<compile_context>
chip_gen: v7x
topology: tpu7x:2x2x1
jax: 0.10.0
libtpu: 0.0.40
codegen_flags: <defaults>
</compile_context>

<pallas_src>
import numpy as np
import jax
import jax.numpy as jnp
from jax.experimental import pallas as pl
from jax.experimental.pallas import tpu as pltpu

HIGHEST = jax.lax.Precision.HIGHEST


# ----------------------------------------------------------------------------
# Pallas kernel: full MFN forward for one (batch, spatial-tile) cell,
# channel-on-sublane / spatial-on-lane layout.
# ----------------------------------------------------------------------------
def gabor_mfn_kernel(xa_ref, coef_ref, lw_ref, lb_ref, ow_ref, ob_ref, o_ref):
    """Refs (block shapes):
      xa_ref   : (1, KP, TN)     augmented coords [x_0..x_{D-1}, x_0^2.., 1, 0-pad]
      coef_ref : (1, F, 2C, KP)  per-filter packed coefficients:
                   rows  0..C-1  : sin argument   [FW      | 0        | FB | 0-pad]
                   rows C..2C-1  : log-Gaussian   [g^2*mu  | -0.5*g^2 | Cc | 0-pad]
      lw_ref   : (1, L, C, C)    hidden linear weights (out, in)
      lb_ref   : (1, L, C, 1)    hidden linear biases
      ow_ref   : (1, O_pad, C)   output linear weight (zero-padded rows)
      ob_ref   : (1, O_pad, 1)   output linear bias   (zero-padded rows)
      o_ref    : (1, O_pad, TN)  output tile, lane-dense
    """
    xa = xa_ref[0]                           # (KP, TN)
    n_filters = coef_ref.shape[1]            # static
    C = lw_ref.shape[3]                      # static

    def gabor(i):
        # Sin argument + log-Gaussian for filter i come out of ONE small MXU
        # matmul against the augmented coordinate slab, keeping the coefficient
        # MAC chain off the (binding) VPU.  HIGHEST keeps full f32 accuracy for
        # the ~30x-scaled sin argument (required, per review).
        z = jnp.dot(coef_ref[0, i], xa,
                    preferred_element_type=jnp.float32,
                    precision=HIGHEST)       # (2C, TN)
        # exp goes to the EUP, sin to the VPU; only one (C, TN) chunk is live
        # at a time (no full n_filters*C slab is ever materialized).
        return jnp.exp(z[C:]) * jnp.sin(z[:C])            # (C, TN)

    # --- MFN recursion on (C, TN) activations -------------------------------
    out = gabor(0)
    for i in range(1, n_filters):            # n_filters is tiny & static -> unrolled
        hid = jnp.dot(lw_ref[0, i - 1], out,
                      preferred_element_type=jnp.float32,
                      precision=HIGHEST) + lb_ref[0, i - 1]            # (C, TN)
        out = gabor(i) * hid

    y = jnp.dot(ow_ref[0], out, preferred_element_type=jnp.float32,
                precision=HIGHEST) + ob_ref[0]                         # (O_pad, TN)
    # final_non_linearity == 'identity'
    o_ref[0] = y.astype(o_ref.dtype)


# ----------------------------------------------------------------------------
# Wrapper: layout glue + pallas_call
# ----------------------------------------------------------------------------
def _pick_tile_n(N, max_tile):
    # largest multiple of 128 that divides N, capped at max_tile
    assert N % 128 == 0, "H*W must be a multiple of 128"
    # TODO(synk): ragged N (not a multiple of 128) would need padding/masking.
    best = 128
    t = 256
    while t <= min(N, max_tile):
        if N % t == 0:
            best = t
        t += 128
    return best


def gabor_model_pallas(x, params, *, tile_n=None):
    B, H, Wsp, D = x.shape
    N = H * Wsp

    fw, fb = params["fw"], params["fb"]           # (B, F, C, D), (B, F, C)
    gamma, mu = params["gamma"], params["mu"]     # (B, F, C, D)
    lw, lb = params["lw"], params["lb"]           # (B, L, C, C), (B, L, C)
    ow, ob = params["ow"], params["ob"]           # (B, O, C), (B, O)

    n_filters = fw.shape[1]
    C = fw.shape[2]
    O = ow.shape[1]
    L = n_filters - 1
    assert L >= 1
    nfC = n_filters * C
    O_pad = max(8, ((O + 7) // 8) * 8)
    KP = max(8, ((2 * D + 1 + 7) // 8) * 8)       # [x(D), x^2(D), 1] padded to 8

    # ---- hardware-aware tiling / VMEM caps (safe fallbacks everywhere) ----
    vmem_cap = 128 * 1024 * 1024
    try:
        vmem_cap = int(getattr(pltpu.get_tpu_info(), "vmem_capacity_bytes", vmem_cap))
    except Exception:
        pass
    big_vmem = vmem_cap > 96 * 1024 * 1024        # v5e/v6e-class
    if tile_n is None:
        tile_n = _pick_tile_n(N, 4096 if big_vmem else 2048)
        # v7x megacore: keep >= 2 "parallel" grid cells so both TCs get work.
        if B * (N // tile_n) < 2 and tile_n % 256 == 0:
            tile_n //= 2
    assert N % tile_n == 0 and tile_n % 128 == 0
    vmem_limit = (64 if big_vmem else 32) * 1024 * 1024

    # ---- layout glue (plain XLA ops, outside the kernel) ----
    # Augmented coordinate slab [x; x^2; 1; 0-pad], spatial on lanes.
    x_t = jnp.swapaxes(x.reshape(B, N, D), 1, 2).astype(jnp.float32)   # (B, D, N)
    xa = jnp.concatenate(
        [x_t, x_t * x_t,
         jnp.ones((B, 1, N), jnp.float32),
         jnp.zeros((B, KP - (2 * D + 1), N), jnp.float32)], axis=1)    # (B, KP, N)

    # Per-filter packed coefficient matrices (fed to one MXU dot per filter).
    g2 = gamma.astype(jnp.float32) ** 2                                # (B, F, C, D)
    FW = fw.astype(jnp.float32)
    FB = fb.astype(jnp.float32)[..., None]                             # (B, F, C, 1)
    A = -0.5 * g2                                                      # x^2 coeffs
    Bc = g2 * mu.astype(jnp.float32)                                   # x coeffs
    Cc = (-0.5 * jnp.sum(g2 * mu * mu, axis=-1))[..., None]            # (B, F, C, 1)
    zpad = jnp.zeros((B, n_filters, C, KP - (2 * D + 1)), jnp.float32)
    sin_coef = jnp.concatenate([FW, jnp.zeros_like(FW), FB, zpad], axis=-1)
    gau_coef = jnp.concatenate([Bc, A, Cc, zpad], axis=-1)
    coef = jnp.concatenate([sin_coef, gau_coef], axis=2)               # (B, F, 2C, KP)

    lb_k = lb[..., None].astype(jnp.float32)                           # (B, L, C, 1)
    ow_p = jnp.zeros((B, O_pad, C), jnp.float32).at[:, :O, :].set(ow)
    ob_p = jnp.zeros((B, O_pad, 1), jnp.float32).at[:, :O, 0].set(ob)

    grid = (B, N // tile_n)

    # Advisory cost estimate: this kernel is transcendental-bound.
    flops = int(2 * B * n_filters * (2 * C) * KP * N
                + 2 * B * L * C * C * N
                + 2 * B * O_pad * C * N
                + 6 * B * nfC * N)
    bytes_accessed = int(4 * (B * KP * N + B * O_pad * N
                              + coef.size + lw.size + lb_k.size
                              + ow_p.size + ob_p.size))
    cost = pl.CostEstimate(flops=flops,
                           transcendentals=int(2 * B * nfC * N),
                           bytes_accessed=bytes_accessed)

    out_pd = pl.pallas_call(
        gabor_mfn_kernel,
        out_shape=jax.ShapeDtypeStruct((B, O_pad, N), jnp.float32),
        grid_spec=pltpu.PrefetchScalarGridSpec(
            num_scalar_prefetch=0,
            grid=grid,
            in_specs=[
                pl.BlockSpec((1, KP, tile_n), lambda b, n: (b, 0, n)),
                pl.BlockSpec((1, n_filters, 2 * C, KP), lambda b, n: (b, 0, 0, 0)),
                pl.BlockSpec((1, L, C, C), lambda b, n: (b, 0, 0, 0)),
                pl.BlockSpec((1, L, C, 1), lambda b, n: (b, 0, 0, 0)),
                pl.BlockSpec((1, O_pad, C), lambda b, n: (b, 0, 0)),
                pl.BlockSpec((1, O_pad, 1), lambda b, n: (b, 0, 0)),
            ],
            out_specs=pl.BlockSpec((1, O_pad, tile_n), lambda b, n: (b, 0, n)),
        ),
        compiler_params=pltpu.CompilerParams(
            dimension_semantics=("parallel", "parallel"),
            vmem_limit_bytes=vmem_limit),
        cost_estimate=cost,
    )(xa, coef, lw.astype(jnp.float32), lb_k, ow_p, ob_p)

    # un-pad + back to channels-last spatial layout
    y = jnp.swapaxes(out_pd[:, :O, :], 1, 2).reshape(B, H, Wsp, O)
    return y


# ----------------------------------------------------------------------------
# Deterministic parameter init mirroring GaborModel.__init__ (anisotropic).
# ----------------------------------------------------------------------------
def init_gabor_params(key, *, B, D, C, O, no_layers,
                      input_scale=30.0, weight_scale=1.0,
                      alpha=6.0, beta=1.0, init_spatial_value=1.0):
    n_filters = no_layers + 1
    layer_scale = input_scale / np.sqrt(n_filters)
    ks = jax.random.split(key, 8)

    gamma = jnp.stack(
        [jax.random.gamma(jax.random.fold_in(ks[0], l), alpha / (l + 1), (B, C, D)) / beta
         for l in range(n_filters)], axis=1).astype(jnp.float32)          # (B, F, C, D)
    mu = init_spatial_value * (
        2.0 * jax.random.uniform(ks[1], (B, n_filters, C, D)) - 1.0)      # (B, F, C, D)
    fw_base = jax.random.uniform(ks[2], (B, n_filters, C, D),
                                 minval=-1.0 / np.sqrt(D), maxval=1.0 / np.sqrt(D))
    fw = fw_base * layer_scale * gamma                                    # weight *= scale * gamma
    fb = jax.random.uniform(ks[3], (B, n_filters, C), minval=-np.pi, maxval=np.pi)

    lw = jax.random.uniform(ks[4], (B, no_layers, C, C),
                            minval=-np.sqrt(weight_scale / C),
                            maxval=np.sqrt(weight_scale / C))
    lb = jax.random.uniform(ks[5], (B, no_layers, C),
                            minval=-1.0 / np.sqrt(C), maxval=1.0 / np.sqrt(C))
    ow = jax.random.uniform(ks[6], (B, O, C),
                            minval=-1.0 / np.sqrt(C), maxval=1.0 / np.sqrt(C))
    ob = jax.random.uniform(ks[7], (B, O),
                            minval=-1.0 / np.sqrt(C), maxval=1.0 / np.sqrt(C))
    return dict(fw=fw.astype(jnp.float32), fb=fb.astype(jnp.float32),
                gamma=gamma, mu=mu.astype(jnp.float32),
                lw=lw.astype(jnp.float32), lb=lb.astype(jnp.float32),
                ow=ow.astype(jnp.float32), ob=ob.astype(jnp.float32))


# ----------------------------------------------------------------------------
# Pure-JAX reference implementing the PyTorch forward verbatim.
# ----------------------------------------------------------------------------
def gabor_model_reference(x, p):
    n_filters = p["fw"].shape[1]

    def filt(l):
        g = p["gamma"][:, l][:, None, None, :, :]          # (B,1,1,C,D)
        m = p["mu"][:, l][:, None, None, :, :]
        gauss = jnp.exp(-0.5 * jnp.sum((g * (x[:, :, :, None, :] - m)) ** 2, axis=-1))
        lin = jnp.einsum("bhwd,bcd->bhwc", x, p["fw"][:, l],
                         precision=HIGHEST) + p["fb"][:, l][:, None, None, :]
        return gauss * jnp.sin(lin)

    out = filt(0)
    for i in range(1, n_filters):
        lin = jnp.einsum("bhwc,bkc->bhwk", out, p["lw"][:, i - 1],
                         precision=HIGHEST) + p["lb"][:, i - 1][:, None, None, :]
        out = filt(i) * lin
    out = jnp.einsum("bhwc,bkc->bhwk", out, p["ow"],
                     precision=HIGHEST) + p["ob"][:, None, None, :]
    return out  # identity non-linearity


if __name__ == "__main__":
    # Small config: dim_linear=2, hidden=32, out=3, no_layers=3, batch=2, 16x16 grid.
    B, H, Wsp, D = 2, 16, 16, 2
    C, O, no_layers = 32, 3, 3

    key = jax.random.PRNGKey(0)
    k_x, k_p = jax.random.split(key)
    x = jax.random.uniform(k_x, (B, H, Wsp, D), minval=-1.0, maxval=1.0,
                           dtype=jnp.float32)
    params = init_gabor_params(k_p, B=B, D=D, C=C, O=O, no_layers=no_layers,
                               input_scale=30.0, weight_scale=1.0,
                               alpha=6.0, beta=1.0, init_spatial_value=1.0)

    y = gabor_model_pallas(x, params)
    y = jax.block_until_ready(y)

    y_ref = jax.block_until_ready(gabor_model_reference(x, params))
    np.testing.assert_allclose(np.asarray(y), np.asarray(y_ref),
                               rtol=1e-3, atol=1e-3)

    print("KERNEL_OK")
</pallas_src>

<mosaic_0001>
module attributes {stable_mosaic.version = 11 : i64} {
  func.func @gabor_mfn_kernel(%arg0: i32, %arg1: i32, %arg2: memref<1x8x256xf32, #tpu.memory_space<vmem>>, %arg3: memref<1x4x64x8xf32, #tpu.memory_space<vmem>>, %arg4: memref<1x3x32x32xf32, #tpu.memory_space<vmem>>, %arg5: memref<1x3x32x1xf32, #tpu.memory_space<vmem>>, %arg6: memref<1x8x32xf32, #tpu.memory_space<vmem>>, %arg7: memref<1x8x1xf32, #tpu.memory_space<vmem>>, %arg8: memref<1x8x256xf32, #tpu.memory_space<vmem>>) attributes {dimension_semantics = [#tpu.dimension_semantics<parallel>, #tpu.dimension_semantics<parallel>], iteration_bounds = array<i64: 2, 1>, scalar_prefetch = 0 : i64, scratch_operands = 0 : i64, tpu.core_type = #tpu.core_type<tc>, window_params = [{transform_indices = @transform_0, window_bounds = array<i64: 1, 8, 256>}, {transform_indices = @transform_1, window_bounds = array<i64: 1, 4, 64, 8>}, {transform_indices = @transform_2, window_bounds = array<i64: 1, 3, 32, 32>}, {transform_indices = @transform_3, window_bounds = array<i64: 1, 3, 32, 1>}, {transform_indices = @transform_4, window_bounds = array<i64: 1, 8, 32>}, {transform_indices = @transform_5, window_bounds = array<i64: 1, 8, 1>}, {transform_indices = @transform_6, window_bounds = array<i64: 1, 8, 256>}]} {
    %c0 = arith.constant 0 : index
    %c0_0 = arith.constant 0 : index
    %c0_1 = arith.constant 0 : index
    %0 = vector.load %arg2[%c0, %c0_0, %c0_1] : memref<1x8x256xf32, #tpu.memory_space<vmem>>, vector<1x8x256xf32>
    %1 = vector.shape_cast %0 : vector<1x8x256xf32> to vector<8x256xf32>
    %c0_2 = arith.constant 0 : index
    %c0_3 = arith.constant 0 : index
    %c0_4 = arith.constant 0 : index
    %c0_5 = arith.constant 0 : index
    %2 = vector.load %arg3[%c0_2, %c0_3, %c0_4, %c0_5] : memref<1x4x64x8xf32, #tpu.memory_space<vmem>>, vector<1x1x64x8xf32>
    %3 = vector.shape_cast %2 : vector<1x1x64x8xf32> to vector<64x8xf32>
    %cst = arith.constant dense<0.000000e+00> : vector<64x256xf32>
    %4 = tpu.matmul %3, %1, %cst {dimension_numbers = #tpu.dot_dimension_numbers<[1], [0], [0], [1], [0, 0, 1, 1], [], []>, precision = #tpu.contract_precision<fp32>} : vector<64x8xf32>, vector<8x256xf32>, vector<64x256xf32> -> vector<64x256xf32>
    %5 = vector.extract_strided_slice %4 {offsets = [32, 0], sizes = [32, 256], strides = [1, 1]} : vector<64x256xf32> to vector<32x256xf32>
    %6 = math.exp %5 : vector<32x256xf32>
    %7 = vector.extract_strided_slice %4 {offsets = [0, 0], sizes = [32, 256], strides = [1, 1]} : vector<64x256xf32> to vector<32x256xf32>
    %8 = math.sin %7 : vector<32x256xf32>
    %9 = arith.mulf %6, %8 : vector<32x256xf32>
    %c0_6 = arith.constant 0 : index
    %c0_7 = arith.constant 0 : index
    %c0_8 = arith.constant 0 : index
    %c0_9 = arith.constant 0 : index
    %10 = vector.load %arg4[%c0_6, %c0_7, %c0_8, %c0_9] : memref<1x3x32x32xf32, #tpu.memory_space<vmem>>, vector<1x1x32x32xf32>
    %11 = vector.shape_cast %10 : vector<1x1x32x32xf32> to vector<32x32xf32>
    %cst_10 = arith.constant dense<0.000000e+00> : vector<32x256xf32>
    %12 = tpu.matmul %11, %9, %cst_10 {dimension_numbers = #tpu.dot_dimension_numbers<[1], [0], [0], [1], [0, 0, 1, 1], [], []>, precision = #tpu.contract_precision<fp32>} : vector<32x32xf32>, vector<32x256xf32>, vector<32x256xf32> -> vector<32x256xf32>
    %c0_11 = arith.constant 0 : index
    %c0_12 = arith.constant 0 : index
    %c0_13 = arith.constant 0 : index
    %c0_14 = arith.constant 0 : index
    %13 = vector.load %arg5[%c0_11, %c0_12, %c0_13, %c0_14] : memref<1x3x32x1xf32, #tpu.memory_space<vmem>>, vector<1x1x32x1xf32>
    %14 = vector.shape_cast %13 : vector<1x1x32x1xf32> to vector<32x1xf32>
    %15 = vector.broadcast %14 : vector<32x1xf32> to vector<32x256xf32>
    %16 = arith.addf %12, %15 : vector<32x256xf32>
    %c0_15 = arith.constant 0 : index
    %c1 = arith.constant 1 : index
    %c0_16 = arith.constant 0 : index
    %c0_17 = arith.constant 0 : index
    %17 = vector.load %arg3[%c0_15, %c1, %c0_16, %c0_17] : memref<1x4x64x8xf32, #tpu.memory_space<vmem>>, vector<1x1x64x8xf32>
    %18 = vector.shape_cast %17 : vector<1x1x64x8xf32> to vector<64x8xf32>
    %cst_18 = arith.constant dense<0.000000e+00> : vector<64x256xf32>
    %19 = tpu.matmul %18, %1, %cst_18 {dimension_numbers = #tpu.dot_dimension_numbers<[1], [0], [0], [1], [0, 0, 1, 1], [], []>, precision = #tpu.contract_precision<fp32>} : vector<64x8xf32>, vector<8x256xf32>, vector<64x256xf32> -> vector<64x256xf32>
    %20 = vector.extract_strided_slice %19 {offsets = [32, 0], sizes = [32, 256], strides = [1, 1]} : vector<64x256xf32> to vector<32x256xf32>
    %21 = math.exp %20 : vector<32x256xf32>
    %22 = vector.extract_strided_slice %19 {offsets = [0, 0], sizes = [32, 256], strides = [1, 1]} : vector<64x256xf32> to vector<32x256xf32>
    %23 = math.sin %22 : vector<32x256xf32>
    %24 = arith.mulf %21, %23 : vector<32x256xf32>
    %25 = arith.mulf %24, %16 : vector<32x256xf32>
    %c0_19 = arith.constant 0 : index
    %c1_20 = arith.constant 1 : index
    %c0_21 = arith.constant 0 : index
    %c0_22 = arith.constant 0 : index
    %26 = vector.load %arg4[%c0_19, %c1_20, %c0_21, %c0_22] : memref<1x3x32x32xf32, #tpu.memory_space<vmem>>, vector<1x1x32x32xf32>
    %27 = vector.shape_cast %26 : vector<1x1x32x32xf32> to vector<32x32xf32>
    %cst_23 = arith.constant dense<0.000000e+00> : vector<32x256xf32>
    %28 = tpu.matmul %27, %25, %cst_23 {dimension_numbers = #tpu.dot_dimension_numbers<[1], [0], [0], [1], [0, 0, 1, 1], [], []>, precision = #tpu.contract_precision<fp32>} : vector<32x32xf32>, vector<32x256xf32>, vector<32x256xf32> -> vector<32x256xf32>
    %c0_24 = arith.constant 0 : index
    %c1_25 = arith.constant 1 : index
    %c0_26 = arith.constant 0 : index
    %c0_27 = arith.constant 0 : index
    %29 = vector.load %arg5[%c0_24, %c1_25, %c0_26, %c0_27] : memref<1x3x32x1xf32, #tpu.memory_space<vmem>>, vector<1x1x32x1xf32>
    %30 = vector.shape_cast %29 : vector<1x1x32x1xf32> to vector<32x1xf32>
    %31 = vector.broadcast %30 : vector<32x1xf32> to vector<32x256xf32>
    %32 = arith.addf %28, %31 : vector<32x256xf32>
    %c0_28 = arith.constant 0 : index
    %c2 = arith.constant 2 : index
    %c0_29 = arith.constant 0 : index
    %c0_30 = arith.constant 0 : index
    %33 = vector.load %arg3[%c0_28, %c2, %c0_29, %c0_30] : memref<1x4x64x8xf32, #tpu.memory_space<vmem>>, vector<1x1x64x8xf32>
    %34 = vector.shape_cast %33 : vector<1x1x64x8xf32> to vector<64x8xf32>
    %cst_31 = arith.constant dense<0.000000e+00> : vector<64x256xf32>
    %35 = tpu.matmul %34, %1, %cst_31 {dimension_numbers = #tpu.dot_dimension_numbers<[1], [0], [0], [1], [0, 0, 1, 1], [], []>, precision = #tpu.contract_precision<fp32>} : vector<64x8xf32>, vector<8x256xf32>, vector<64x256xf32> -> vector<64x256xf32>
    %36 = vector.extract_strided_slice %35 {offsets = [32, 0], sizes = [32, 256], strides = [1, 1]} : vector<64x256xf32> to vector<32x256xf32>
    %37 = math.exp %36 : vector<32x256xf32>
    %38 = vector.extract_strided_slice %35 {offsets = [0, 0], sizes = [32, 256], strides = [1, 1]} : vector<64x256xf32> to vector<32x256xf32>
    %39 = math.sin %38 : vector<32x256xf32>
    %40 = arith.mulf %37, %39 : vector<32x256xf32>
    %41 = arith.mulf %40, %32 : vector<32x256xf32>
    %c0_32 = arith.constant 0 : index
    %c2_33 = arith.constant 2 : index
    %c0_34 = arith.constant 0 : index
    %c0_35 = arith.constant 0 : index
    %42 = vector.load %arg4[%c0_32, %c2_33, %c0_34, %c0_35] : memref<1x3x32x32xf32, #tpu.memory_space<vmem>>, vector<1x1x32x32xf32>
    %43 = vector.shape_cast %42 : vector<1x1x32x32xf32> to vector<32x32xf32>
    %cst_36 = arith.constant dense<0.000000e+00> : vector<32x256xf32>
    %44 = tpu.matmul %43, %41, %cst_36 {dimension_numbers = #tpu.dot_dimension_numbers<[1], [0], [0], [1], [0, 0, 1, 1], [], []>, precision = #tpu.contract_precision<fp32>} : vector<32x32xf32>, vector<32x256xf32>, vector<32x256xf32> -> vector<32x256xf32>
    %c0_37 = arith.constant 0 : index
    %c2_38 = arith.constant 2 : index
    %c0_39 = arith.constant 0 : index
    %c0_40 = arith.constant 0 : index
    %45 = vector.load %arg5[%c0_37, %c2_38, %c0_39, %c0_40] : memref<1x3x32x1xf32, #tpu.memory_space<vmem>>, vector<1x1x32x1xf32>
    %46 = vector.shape_cast %45 : vector<1x1x32x1xf32> to vector<32x1xf32>
    %47 = vector.broadcast %46 : vector<32x1xf32> to vector<32x256xf32>
    %48 = arith.addf %44, %47 : vector<32x256xf32>
    %c0_41 = arith.constant 0 : index
    %c3 = arith.constant 3 : index
    %c0_42 = arith.constant 0 : index
    %c0_43 = arith.constant 0 : index
    %49 = vector.load %arg3[%c0_41, %c3, %c0_42, %c0_43] : memref<1x4x64x8xf32, #tpu.memory_space<vmem>>, vector<1x1x64x8xf32>
    %50 = vector.shape_cast %49 : vector<1x1x64x8xf32> to vector<64x8xf32>
    %cst_44 = arith.constant dense<0.000000e+00> : vector<64x256xf32>
    %51 = tpu.matmul %50, %1, %cst_44 {dimension_numbers = #tpu.dot_dimension_numbers<[1], [0], [0], [1], [0, 0, 1, 1], [], []>, precision = #tpu.contract_precision<fp32>} : vector<64x8xf32>, vector<8x256xf32>, vector<64x256xf32> -> vector<64x256xf32>
    %52 = vector.extract_strided_slice %51 {offsets = [32, 0], sizes = [32, 256], strides = [1, 1]} : vector<64x256xf32> to vector<32x256xf32>
    %53 = math.exp %52 : vector<32x256xf32>
    %54 = vector.extract_strided_slice %51 {offsets = [0, 0], sizes = [32, 256], strides = [1, 1]} : vector<64x256xf32> to vector<32x256xf32>
    %55 = math.sin %54 : vector<32x256xf32>
    %56 = arith.mulf %53, %55 : vector<32x256xf32>
    %57 = arith.mulf %56, %48 : vector<32x256xf32>
    %c0_45 = arith.constant 0 : index
    %c0_46 = arith.constant 0 : index
    %c0_47 = arith.constant 0 : index
    %58 = vector.load %arg6[%c0_45, %c0_46, %c0_47] : memref<1x8x32xf32, #tpu.memory_space<vmem>>, vector<1x8x32xf32>
    %59 = vector.shape_cast %58 : vector<1x8x32xf32> to vector<8x32xf32>
    %cst_48 = arith.constant dense<0.000000e+00> : vector<8x256xf32>
    %60 = tpu.matmul %59, %57, %cst_48 {dimension_numbers = #tpu.dot_dimension_numbers<[1], [0], [0], [1], [0, 0, 1, 1], [], []>, precision = #tpu.contract_precision<fp32>} : vector<8x32xf32>, vector<32x256xf32>, vector<8x256xf32> -> vector<8x256xf32>
    %c0_49 = arith.constant 0 : index
    %c0_50 = arith.constant 0 : index
    %c0_51 = arith.constant 0 : index
    %61 = vector.load %arg7[%c0_49, %c0_50, %c0_51] : memref<1x8x1xf32, #tpu.memory_space<vmem>>, vector<1x8x1xf32>
    %62 = vector.shape_cast %61 : vector<1x8x1xf32> to vector<8x1xf32>
    %63 = vector.broadcast %62 : vector<8x1xf32> to vector<8x256xf32>
    %64 = arith.addf %60, %63 : vector<8x256xf32>
    %c0_52 = arith.constant 0 : index
    %c0_53 = arith.constant 0 : index
    %c0_54 = arith.constant 0 : index
    %65 = vector.load %arg8[%c0_52, %c0_53, %c0_54] : memref<1x8x256xf32, #tpu.memory_space<vmem>>, vector<1x8x256xf32>
    %66 = vector.shape_cast %65 : vector<1x8x256xf32> to vector<8x256xf32>
    %67 = vector.shape_cast %64 : vector<8x256xf32> to vector<1x8x256xf32>
    tpu.vector_store %arg8[%c0_52, %c0_53, %c0_54], %67 {strides = array<i32>} : memref<1x8x256xf32, #tpu.memory_space<vmem>>, vector<1x8x256xf32>,
    return
  }
  func.func @transform_0(%arg0: i32, %arg1: i32) -> (i32, i32, i32) {
    %c0_i32 = arith.constant 0 : i32
    %c0_i32_0 = arith.constant 0 : i32
    return %arg0, %c0_i32, %arg1 : i32, i32, i32
  }
  func.func @transform_1(%arg0: i32, %arg1: i32) -> (i32, i32, i32, i32) {
    %c0_i32 = arith.constant 0 : i32
    %c0_i32_0 = arith.constant 0 : i32
    %c0_i32_1 = arith.constant 0 : i32
    %c0_i32_2 = arith.constant 0 : i32
    return %arg0, %c0_i32, %c0_i32_0, %c0_i32_1 : i32, i32, i32, i32
  }
  func.func @transform_2(%arg0: i32, %arg1: i32) -> (i32, i32, i32, i32) {
    %c0_i32 = arith.constant 0 : i32
    %c0_i32_0 = arith.constant 0 : i32
    %c0_i32_1 = arith.constant 0 : i32
    %c0_i32_2 = arith.constant 0 : i32
    return %arg0, %c0_i32, %c0_i32_0, %c0_i32_1 : i32, i32, i32, i32
  }
  func.func @transform_3(%arg0: i32, %arg1: i32) -> (i32, i32, i32, i32) {
    %c0_i32 = arith.constant 0 : i32
    %c0_i32_0 = arith.constant 0 : i32
    %c0_i32_1 = arith.constant 0 : i32
    %c0_i32_2 = arith.constant 0 : i32
    return %arg0, %c0_i32, %c0_i32_0, %c0_i32_1 : i32, i32, i32, i32
  }
  func.func @transform_4(%arg0: i32, %arg1: i32) -> (i32, i32, i32) {
    %c0_i32 = arith.constant 0 : i32
    %c0_i32_0 = arith.constant 0 : i32
    %c0_i32_1 = arith.constant 0 : i32
    return %arg0, %c0_i32, %c0_i32_0 : i32, i32, i32
  }
  func.func @transform_5(%arg0: i32, %arg1: i32) -> (i32, i32, i32) {
    %c0_i32 = arith.constant 0 : i32
    %c0_i32_0 = arith.constant 0 : i32
    %c0_i32_1 = arith.constant 0 : i32
    return %arg0, %c0_i32, %c0_i32_0 : i32, i32, i32
  }
  func.func @transform_6(%arg0: i32, %arg1: i32) -> (i32, i32, i32) {
    %c0_i32 = arith.constant 0 : i32
    %c0_i32_0 = arith.constant 0 : i32
    return %arg0, %c0_i32, %arg1 : i32, i32, i32
  }
}

</mosaic_0001>

<bundles_post_ra>
// kernel: tpu_custom_call.1
= control target key start
LH: loop header
LB: loop body
LE: loop exit
PB: predicated region body
PF: predicated region fallthrough
CT: control target
= control target key end

     0   :  { %s16772_s0 = inlined_call_operand.hbm [shape: f32[2,8,256], index: 0, kind: input, shape index: {}]   ;;  %s16773_s1 = inlined_call_operand.hbm [shape: f32[2,4,64,8], index: 1, kind: input, shape index: {}]   ;;  %s16774_s2 = inlined_call_operand.hbm [shape: f32[2,3,32,32], index: 2, kind: input, shape index: {}]   ;;  %s16775_s3 = inlined_call_operand.hbm [shape: f32[2,3,32,1], index: 3, kind: input, shape index: {}]   ;;  %s16776_s4 = inlined_call_operand.hbm [shape: f32[2,8,32], index: 4, kind: input, shape index: {}]   ;;  %s16777_s5 = inlined_call_operand.hbm [shape: f32[2,8,1], index: 5, kind: input, shape index: {}]   ;;  %s16778_s6 = inlined_call_operand.hbm [shape: f32[2,8,256], index: 6, kind: output, shape index: {}]  }
   0x1   :  { %16868 = sst [smem:[#allocation51_spill]] %s16773_s1 }
   0x2   :  { %16869 = sst [smem:[#allocation52_spill]] %s16775_s3 }
   0x3   :  { %11 = vsyncpa [#allocation3], 0 }
   0x4   :  { %13 = vsyncpa [#allocation3 + $0x1], 0 }
   0x5   :  { %14 = vsyncpa [#allocation6], 0 }
   0x6   :  { %16 = vsyncpa [#allocation6 + $0x1], 0 }
   0x7   :  { %17 = vsyncpa [#allocation9], 0 }
   0x8   :  { %19 = vsyncpa [#allocation9 + $0x1], 0 }
   0x9   :  { %20 = vsyncpa [#allocation12], 0 }
   0xa   :  { %22 = vsyncpa [#allocation12 + $0x1], 0 }
   0xb   :  { %23 = vsyncpa [#allocation4], 0 }
   0xc   :  { %25 = vsyncpa [#allocation4 + $0x1], 0  ;;  %s11870_s21 = smov 0   ;;  %s11872_s22 = smov 0  }
   0xd   :  { %s11874_s23 = smov 0   ;;  %s11876_s24 = smov 0  }
   0xe   :  { %s11878_s25 = smov 0   ;;  %s11880_s26 = smov 0  }
   0xf LB: > { %16870 = sst [smem:[#allocation19_spill]] %s11796_s21  ;;  %s11901_s27 = sadd.s32 4294967295, %s11816_s26   ;;  %s11816_s26 = sphi %s11880_s26, %s31_s26   ;;  %s11812_s25 = sphi %s11878_s25, %s17117_s25   ;;  %s11808_s24 = sphi %s11876_s24, %s17116_s24   ;;  %s11804_s23 = sphi %s11874_s23, %s17112_s23   ;;  %s11800_s22 = sphi %s11872_s22, %s17115_s22   ;;  %s11796_s21 = sphi %s11870_s21, %s17114_s21  }
  0x10   : > { %16871 = sst [smem:[#allocation20_spill]] %s11804_s23  ;;  %s10251_s28 = sadd.s32 4294967294, %s11816_s26  }
  0x11   : > { %16872 = sst [smem:[#allocation21_spill]] %s11816_s26  ;;  %s43_s29 = sadd.s32 1, %s11812_s25 }
  0x12   : > { %s52_s30 = sadd.s32 1, %s11804_s23  ;;  %p45_p0 = scmp.ge.s32.totalorder %s43_s29, 2 }
  0x13   : > { %p59_p1 = scmp.ne.s32.totalorder %s11804_s23, %s11800_s22  ;;  %p60_p2 = scmp.eq.s32.totalorder %s11816_s26, 0 }
  0x14   : > { %p65_p3 = scmp.ne.s32.totalorder %s11800_s22, %s11796_s21  ;;  %s17119_s29 = smov (%p45_p0, %s43_s29), 0 }
  0x15   : > { %16873 = sst [smem:[#allocation22_spill]] %s17119_s29  ;;  %p11913_p4 = por %p60_p2, %p59_p1 }
  0x16   : > { %p66_p5 = scmp.eq.s32.totalorder %s11901_s27, 0  ;;  %s47_s8 = ssub.s32 %s11812_s25, %s17119_s29 }
  0x17   : > { %p221_p6 = scmp.eq.s32.totalorder %s11901_s27, 1  ;;  %p50_p7 = scmp.eq.s32.totalorder %s47_s8, 0 }
  0x18   : > { %p11921_p8 = por %p66_p5, %p65_p3  ;;  %p227_p10 = scmp.eq.s32.totalorder %s10251_s28, 1 }
  0x19   : > { %p11925_p9 = por %p221_p6, %p59_p1  ;;  %p11288_p13 = scmp.lt.s32.totalorder %s11816_s26, 2 }
  0x1a   : > { %s16875_s9 = scalar_select %p11921_p8, 1, 0 }
  0x1b   : > { %s16876_s10 = scalar_select %p11925_p9, 1, 0 }
  0x1c   : > { %s11930_s11 = scalar_select %p50_p7, %s11804_s23, %s52_s30  }
  0x1d   : > { %p11932_p11 = por %p227_p10, %p65_p3  ;;  %s11939_s13 = sand.u32 1, %s11804_s23  }
  0x1e   : > { %16877 = sst [smem:[#allocation23_spill]] %s11930_s11  ;;  %s16780_s14 = sand.u32 1, %s11816_s26  }
  0x1f   : > { %s16878_s12 = scalar_select %p11932_p11, 1, 0 }
  0x20   : > { %s10257_s15 = sshll.u32 %s11939_s13, 8  ;;  %p11945_p0 = pnand %p11288_p13, %p11913_p4 }
  0x21   : > { %16879 = sst [smem:[#allocation24_spill]] %s16878_s12  ;;  %s10446_s17 = sshll.u32 %s11812_s25, 12 }
  0x22   : > { %s16880_s16 = scalar_select %p11945_p0, 1, 0 }
  0x23   : > { %s16881_s1 = sld [smem:[#allocation51_spill]]  ;;  %s272_s28 = scalar_lea.vmem [#allocation5], %s10257_s15 }
  0x24   : > { %s279_s30 = sshll.u32 %s272_s28, 4  ;;  %s11959_s7 = scalar_lea.sflag [#allocation6], %s16780_s14  ;;  %s11955_s30 = int_to_ptr.vmem [resolvable:$true] %s279_s30 }
  0x25   : > { %p11965_p2 = pneg %p11945_p0 }
  0x29   : > { %s11953_s20 = scalar_lea.hbm %s16881_s1, %s10446_s17  ;;  %s11547_s15 = scalar_lea.hbm %s16881_s1, 8192 }
  0x2a   : > { %s11542_s8 = scalar_lea.hbm %s11953_s20, 4096  ;;  %p11548_p5 = scmp.lt.u32.totalorder %s11953_s20, %s16881_s1 }
  0x2b   : > { %p11543_p1 = scmp.ne.s32.totalorder %s11953_s20, %s11542_s8  ;;  %p11549_p6 = scmp.lt.u32.totalorder %s11547_s15, %s11542_s8 }
  0x2c   : > { %p11551_p10 = scmp.lt.u32.totalorder %s11542_s8, %s11953_s20 }
  0x2d   : > { %p11545_p3 = pnand %p11965_p2, %p11543_p1  ;;  %p11550_p7 = por %p11549_p6, %p11548_p5 }
  0x2f   : > { %p11546_p4 = pneg %p11545_p3  ;;  %p11552_p13 = por %p11551_p10, %p11550_p7 }
  0x31   : > { %p11553_p12 = pnand %p11552_p13, %p11546_p4 }
  0x33   : > { %11556 = shalt.err (!%p11553_p12)
}
  0x34   : > { %s11557_s14 = scalar_lea.vmem %s11955_s30, 4096  ;;  %s11818_s17 = smov [#allocation5]  }
  0x35   : > { %p11558_p1 = scmp.ne.s32.totalorder %s11955_s30, %s11557_s14  ;;  %s11562_s18 = sshll.u32 %s11818_s17, 4  ;;  %s11563_s18 = int_to_ptr.vmem [resolvable:$false] %s11562_s18 }
  0x36   : > { %s11564_s19 = scalar_lea.vmem %s11563_s18, 8192  ;;  %p11565_p9 = scmp.lt.s32.totalorder %s11955_s30, %s11563_s18 }
  0x37   : > { %p11560_p3 = pnand %p11558_p1, %p11965_p2  ;;  %p11566_p8 = scmp.lt.s32.totalorder %s11564_s19, %s11557_s14 }
  0x39   : > { %p11561_p11 = pneg %p11560_p3  ;;  %p11567_p5 = por %p11566_p8, %p11565_p9 }
  0x3b   : > { %p11568_p6 = pnand %p11567_p5, %p11561_p11 }
  0x3d   : > { %11571 = shalt.err (!%p11568_p6)
}
  0x3e   : > { %s16783_s8 = smov 128   ;;  %s16785_s15 = smov 8  }
  0x3f   : > { %11271 = dma.hbm_to_vmem [thread:$0]  (!%p11945_p0), %s11953_s20, 4096, %s11955_s30, %s11959_s7, %s16783_s8, %s16783_s8, %s16785_s15  }
  0x40   : > { %p10266_p8 = scmp.ge.s32.totalorder %s11816_s26, 1  ;;  %p365_p9 = scmp.lt.s32.totalorder %s11816_s26, 3 }
  0x41   : > { %s16790_s14 = smul.u32 96, %s11939_s13  ;;  %s16884_s3 = sld [smem:[#allocation52_spill]] }
  0x42   : > { %p11995_p11 = pnand %p10266_p8, %p365_p9  ;;  %s16787_s17 = smul.u32 1536, %s11812_s25 }
  0x43   : > { %s314_s20 = scalar_lea.vmem [#allocation8], %s16790_s14  ;;  %s16885_s8 = sand.u32 1, %s11816_s26  }
  0x44   : > { %s16883_s28 = scalar_select %p11995_p11, 1, 0 }
  0x45   : > { %s321_s30 = sshll.u32 %s314_s20, 4  ;;  %s12013_s15 = scalar_lea.sflag [#allocation9], %s16885_s8  ;;  %s12009_s30 = int_to_ptr.vmem [resolvable:$true] %s321_s30 }
  0x47   : > { %s12005_s1 = scalar_lea.hbm %s16884_s3, %s16787_s17  ;;  %s11577_s17 = scalar_lea.hbm %s16884_s3, 3072 }
  0x48   : > { %s11572_s11 = scalar_lea.hbm %s12005_s1, 1536  ;;  %p11578_p10 = scmp.lt.u32.totalorder %s12005_s1, %s16884_s3 }
  0x49   : > { %p11573_p12 = scmp.ne.s32.totalorder %s12005_s1, %s11572_s11  ;;  %p11579_p13 = scmp.lt.u32.totalorder %s11577_s17, %s11572_s11 }
  0x4a   : > { %p11581_p3 = scmp.lt.u32.totalorder %s11572_s11, %s12005_s1 }
  0x4b   : > { %p11575_p4 = pnand %p11573_p12, %p11965_p2  ;;  %p11580_p1 = por %p11579_p13, %p11578_p10 }
  0x4d   : > { %p11576_p7 = pneg %p11575_p4  ;;  %p11582_p5 = por %p11581_p3, %p11580_p1 }
  0x4f   : > { %p11583_p6 = pnand %p11582_p5, %p11576_p7 }
  0x51   : > { %11586 = shalt.err (!%p11583_p6)
}
  0x52   : > { %s11587_s8 = scalar_lea.vmem %s12009_s30, 1536  ;;  %s11821_s20 = smov [#allocation8]  }
  0x53   : > { %p11588_p8 = scmp.ne.s32.totalorder %s12009_s30, %s11587_s8  ;;  %s11592_s18 = sshll.u32 %s11821_s20, 4  ;;  %s11593_s18 = int_to_ptr.vmem [resolvable:$false] %s11592_s18 }
  0x54   : > { %s11594_s23 = scalar_lea.vmem %s11593_s18, 3072  ;;  %p11595_p4 = scmp.lt.s32.totalorder %s12009_s30, %s11593_s18 }
  0x55   : > { %p11590_p9 = pnand %p11588_p8, %p11965_p2  ;;  %p11596_p11 = scmp.lt.s32.totalorder %s11594_s23, %s11587_s8 }
  0x57   : > { %p11591_p12 = pneg %p11590_p9  ;;  %p11597_p10 = por %p11596_p11, %p11595_p4 }
  0x59   : > { %p11598_p13 = pnand %p11597_p10, %p11591_p12 }
  0x5b   : > { %11601 = shalt.err (!%p11598_p13)
}
  0x5c   : > { %s16886_s11 = smov 8   ;;  %s16887_s12 = smov 128  }
  0x5d   : > { %11277 = dma.hbm_to_vmem [thread:$0]  (!%p11945_p0), %s12005_s1, 1536, %s12009_s30, %s12013_s15, %s16887_s12, %s16887_s12, %s16886_s11  }
  0x5e   : > { %s10254_s17 = sshll.u32 %s11939_s13, 4  ;;  %s10445_s19 = sshll.u32 %s11812_s25, 8 }
  0x5f   : > { %s12045_s18 = scalar_lea.hbm %s16772_s0, %s10445_s19  ;;  %s251_s23 = scalar_lea.vmem [#allocation2], %s10254_s17 }
  0x60   : > { %s261_s14 = sshll.u32 %s251_s23, 4  ;;  %s248_s3 = scalar_lea.sflag [#allocation3], %s11939_s13  ;;  %s262_s14 = int_to_ptr.vmem [resolvable:$true] %s261_s14 }
  0x61   : > { %s11602_s26 = scalar_lea.hbm %s12045_s18, 256  ;;  %s11607_s21 = scalar_lea.hbm %s16772_s0, 512 }
  0x62   : > { %p11603_p11 = scmp.ne.s32.totalorder %s12045_s18, %s11602_s26  ;;  %p11608_p3 = scmp.lt.u32.totalorder %s12045_s18, %s16772_s0 }
  0x63   : > { %p11609_p5 = scmp.lt.u32.totalorder %s11607_s21, %s11602_s26  ;;  %p11611_p8 = scmp.lt.u32.totalorder %s11602_s26, %s12045_s18 }
  0x64   : > { %p11605_p7 = pnand %p11603_p11, %p11965_p2 }
  0x65   : > { %p11610_p6 = por %p11609_p5, %p11608_p3 }
  0x66   : > { %p11606_p1 = pneg %p11605_p7 }
  0x67   : > { %p11612_p9 = por %p11611_p8, %p11610_p6 }
  0x69   : > { %p11613_p12 = pnand %p11612_p9, %p11606_p1 }
  0x6b   : > { %11616 = shalt.err (!%p11613_p12)
}
  0x6c   : > { %s11617_s17 = scalar_lea.vmem %s262_s14, 256  ;;  %s11822_s8 = smov [#allocation2]  }
  0x6d   : > { %p11618_p4 = scmp.ne.s32.totalorder %s262_s14, %s11617_s17  ;;  %s11622_s23 = sshll.u32 %s11822_s8, 4  ;;  %s11623_s23 = int_to_ptr.vmem [resolvable:$false] %s11622_s23 }
  0x6e   : > { %s11624_s1 = scalar_lea.vmem %s11623_s23, 512  ;;  %p11625_p11 = scmp.lt.s32.totalorder %s262_s14, %s11623_s23 }
  0x6f   : > { %p11620_p10 = pnand %p11618_p4, %p11965_p2  ;;  %p11626_p7 = scmp.lt.s32.totalorder %s11624_s1, %s11617_s17 }
  0x71   : > { %p11621_p13 = pneg %p11620_p10  ;;  %p11627_p0 = por %p11626_p7, %p11625_p11 }
  0x73   : > { %p11628_p3 = pnand %p11627_p0, %p11621_p13 }
  0x75   : > { %11631 = shalt.err (!%p11628_p3)
}
  0x76   : > { %p16888_p5 = scmp.ne.s32.totalorder %s16880_s16, 0  ;;  %s16889_s21 = smul.u32 1536, %s11812_s25 }
  0x77   : > { %s16890_s19 = smul.u32 96, %s11939_s13  ;;  %s10262_s23 = sshll.u32 %s11939_s13, 3 }
  0x78   : > { %11268 = dma.hbm_to_vmem [thread:$0]  (!%p16888_p5), %s12045_s18, 256, %s262_s14, %s248_s3  }
  0x79   : > { %s12070_s20 = scalar_lea.hbm %s16774_s2, %s16889_s21  ;;  %s293_s17 = scalar_lea.vmem [#allocation7], %s16890_s19 }
  0x7a   : > { %s300_s8 = sshll.u32 %s293_s17, 4  ;;  %s11632_s1 = scalar_lea.hbm %s12070_s20, 1536  ;;  %s12074_s8 = int_to_ptr.vmem [resolvable:$true] %s300_s8 }
  0x7b   : > { %p11633_p0 = scmp.ne.s32.totalorder %s12070_s20, %s11632_s1  ;;  %s11637_s18 = scalar_lea.hbm %s16774_s2, 3072 }
  0x7c   : > { %p11638_p8 = scmp.lt.u32.totalorder %s12070_s20, %s16774_s2  ;;  %p11639_p9 = scmp.lt.u32.totalorder %s11637_s18, %s11632_s1 }
  0x7d   : > { %p11635_p1 = pnand %p11633_p0, %p11965_p2  ;;  %p11641_p4 = scmp.lt.u32.totalorder %s11632_s1, %s12070_s20 }
  0x7e   : > { %p11640_p12 = por %p11639_p9, %p11638_p8 }
  0x7f   : > { %p11636_p6 = pneg %p11635_p1 }
  0x80   : > { %p11642_p10 = por %p11641_p4, %p11640_p12 }
  0x82   : > { %p11643_p13 = pnand %p11642_p10, %p11636_p6 }
  0x84   : > { %11646 = shalt.err (!%p11643_p13)
}
  0x85   : > { %s11647_s30 = scalar_lea.vmem %s12074_s8, 1536  ;;  %s11823_s19 = smov [#allocation7]  }
  0x86   : > { %p11648_p11 = scmp.ne.s32.totalorder %s12074_s8, %s11647_s30  ;;  %s11652_s17 = sshll.u32 %s11823_s19, 4  ;;  %s11653_s17 = int_to_ptr.vmem [resolvable:$false] %s11652_s17 }
  0x87   : > { %s11654_s3 = scalar_lea.vmem %s11653_s17, 3072  ;;  %p11655_p0 = scmp.lt.s32.totalorder %s12074_s8, %s11653_s17 }
  0x88   : > { %p11650_p7 = pnand %p11648_p11, %p11965_p2  ;;  %p11656_p1 = scmp.lt.s32.totalorder %s11654_s3, %s11647_s30 }
  0x8a   : > { %p11651_p3 = pneg %p11650_p7  ;;  %p11657_p8 = por %p11656_p1, %p11655_p0 }
  0x8c   : > { %p11658_p9 = pnand %p11657_p8, %p11651_p3 }
  0x8e   : > { %11661 = shalt.err (!%p11658_p9)
}
  0x8f   : > { %11274 = dma.hbm_to_vmem [thread:$0]  (!%p16888_p5), %s12070_s20, 1536, %s12074_s8, %s11959_s7, %s16887_s12, %s16887_s12, %s16886_s11  }
  0x90   : > { %s10263_s1 = sshll.u32 %s11812_s25, 7  ;;  %s335_s26 = scalar_lea.vmem [#allocation10], %s10262_s23 }
  0x91   : > { %s12108_s21 = scalar_lea.hbm %s16776_s4, %s10263_s1  ;;  %s342_s30 = sshll.u32 %s335_s26, 4  ;;  %s343_s30 = int_to_ptr.vmem [resolvable:$true] %s342_s30 }
  0x92   : > { %s11662_s19 = scalar_lea.hbm %s12108_s21, 128  ;;  %s11667_s12 = scalar_lea.hbm %s16776_s4, 256 }
  0x93   : > { %p11663_p6 = scmp.ne.s32.totalorder %s12108_s21, %s11662_s19  ;;  %p11668_p10 = scmp.lt.u32.totalorder %s12108_s21, %s16776_s4 }
  0x94   : > { %p11669_p13 = scmp.lt.u32.totalorder %s11667_s12, %s11662_s19  ;;  %p11671_p7 = scmp.lt.u32.totalorder %s11662_s19, %s12108_s21 }
  0x95   : > { %p11665_p12 = pnand %p11663_p6, %p11965_p2 }
  0x96   : > { %p11670_p11 = por %p11669_p13, %p11668_p10 }
  0x97   : > { %p11666_p4 = pneg %p11665_p12 }
  0x98   : > { %p11672_p3 = por %p11671_p7, %p11670_p11 }
  0x9a   : > { %p11673_p0 = pnand %p11672_p3, %p11666_p4 }
  0x9c   : > { %11676 = shalt.err (!%p11673_p0)
}
  0x9d   : > { %s11677_s17 = scalar_lea.vmem %s343_s30, 128  ;;  %s11824_s3 = smov [#allocation10]  }
  0x9e   : > { %p11678_p1 = scmp.ne.s32.totalorder %s343_s30, %s11677_s17  ;;  %s11682_s14 = sshll.u32 %s11824_s3, 4  ;;  %s11683_s14 = int_to_ptr.vmem [resolvable:$false] %s11682_s14 }
  0x9f   : > { %s11684_s18 = scalar_lea.vmem %s11683_s14, 256  ;;  %p11685_p6 = scmp.lt.s32.totalorder %s343_s30, %s11683_s14 }
  0xa0   : > { %p11680_p8 = pnand %p11678_p1, %p11965_p2  ;;  %p11686_p12 = scmp.lt.s32.totalorder %s11684_s18, %s11677_s17 }
  0xa2   : > { %p11681_p9 = pneg %p11680_p8  ;;  %p11687_p5 = por %p11686_p12, %p11685_p6 }
  0xa4   : > { %p11688_p10 = pnand %p11687_p5, %p11681_p9 }
  0xa6   : > { %11691 = shalt.err (!%p11688_p10)
}
  0xa7   : > { %p16891_p13 = scmp.ne.s32.totalorder %s16880_s16, 0  ;;  %s12135_s7 = scalar_lea.hbm %s16777_s5, %s10263_s1 }
  0xa8   : > { %s353_s11 = scalar_lea.vmem [#allocation11], %s10262_s23  ;;  %s350_s20 = scalar_lea.sflag [#allocation12], %s11939_s13 }
  0xa9   : > { %11280 = dma.hbm_to_vmem [thread:$0]  (!%p16891_p13), %s12108_s21, 128, %s343_s30, %s12013_s15  }
  0xaa   : > { %s360_s12 = sshll.u32 %s353_s11, 4  ;;  %s11692_s8 = scalar_lea.hbm %s12135_s7, 128  ;;  %s361_s12 = int_to_ptr.vmem [resolvable:$true] %s360_s12 }
  0xab   : > { %p11693_p5 = scmp.ne.s32.totalorder %s12135_s7, %s11692_s8  ;;  %s11697_s30 = scalar_lea.hbm %s16777_s5, 256 }
  0xac   : > { %p11698_p7 = scmp.lt.u32.totalorder %s12135_s7, %s16777_s5  ;;  %p11699_p3 = scmp.lt.u32.totalorder %s11697_s30, %s11692_s8 }
  0xad   : > { %p11695_p4 = pnand %p11693_p5, %p11965_p2  ;;  %p11701_p1 = scmp.lt.u32.totalorder %s11692_s8, %s12135_s7 }
  0xae   : > { %p11700_p0 = por %p11699_p3, %p11698_p7 }
  0xaf   : > { %p11696_p11 = pneg %p11695_p4 }
  0xb0   : > { %p11702_p8 = por %p11701_p1, %p11700_p0 }
  0xb2   : > { %p11703_p9 = pnand %p11702_p8, %p11696_p11 }
  0xb4   : > { %11706 = shalt.err (!%p11703_p9)
}
  0xb5   : > { %s11707_s13 = scalar_lea.vmem %s361_s12, 128  ;;  %s11825_s23 = smov [#allocation11]  }
  0xb6   : > { %p11708_p6 = scmp.ne.s32.totalorder %s361_s12, %s11707_s13  ;;  %s11712_s3 = sshll.u32 %s11825_s23, 4  ;;  %s11713_s3 = int_to_ptr.vmem [resolvable:$false] %s11712_s3 }
  0xb7   : > { %s11714_s14 = scalar_lea.vmem %s11713_s3, 256  ;;  %p11715_p5 = scmp.lt.s32.totalorder %s361_s12, %s11713_s3 }
  0xb8   : > { %p11710_p12 = pnand %p11708_p6, %p11965_p2  ;;  %p11716_p4 = scmp.lt.s32.totalorder %s11714_s14, %s11707_s13 }
  0xba   : > { %p11711_p10 = pneg %p11710_p12  ;;  %p11717_p13 = por %p11716_p4, %p11715_p5 }
  0xbc   : > { %p11718_p3 = pnand %p11717_p13, %p11711_p10 }
  0xbe   : > { %11721 = shalt.err (!%p11718_p3)
}
  0xbf   : > { %p16892_p7 = scmp.ne.s32.totalorder %s16880_s16, 0  ;;  %p16893_p11 = scmp.ne.s32.totalorder %s16883_s28, 0 }
  0xc1   : > { %11283 = dma.hbm_to_vmem [thread:$0]  (!%p16892_p7), %s12135_s7, 128, %s361_s12, %s350_s20  }
  0xc2   : > { %369 = sbr.rel (%p16893_p11) target bundleno = 3232 (0xca0), region = 44 }
  0xc9   : > { %s12160_s29 = sand.u32 1, %s11800_s22   ;;  %p16894_p2 = scmp.ne.s32.totalorder %s16875_s9, 0 }
  0xca   : > { %s10267_s18 = sshll.u32 %s12160_s29, 4  ;;  %s372_s26 = scalar_lea.sflag [#allocation3], %s12160_s29 }
  0xcb   : > { %s375_s19 = scalar_lea.vmem [#allocation2], %s10267_s18 }
  0xcc   : > { %11775 = dma.done.wait (%p16894_p2), %s372_s26, 256  }
  0xcd   : > { %11777 = vsyncadd (%p16894_p2), %s372_s26, 4294967040  ;;  %s380_s16 = sand.u32 1, %s11901_s27   ;;  %s10268_s28 = sshll.u32 %s12160_s29, 8 }
  0xce   : > { %s381_s7 = scalar_lea.sflag [#allocation6], %s380_s16  ;;  %s12172_s11 = scalar_lea.vmem [#allocation5], %s10268_s28 }
  0xcf   : > { %11779 = dma.done.wait (%p16894_p2), %s381_s7, 5632  }
  0xd0   : > { %11781 = vsyncadd (%p16894_p2), %s381_s7, 4294961664  ;;  %s11122_s12 = smul.u32 96, %s12160_s29  ;;  %s399_s8 = scalar_lea.sflag [#allocation9], %s380_s16 }
  0xd2   : > { %s12179_s20 = scalar_lea.vmem [#allocation7], %s11122_s12  ;;  %s12181_s15 = scalar_lea.vmem [#allocation8], %s11122_s12 }
  0xd3   : > { %11783 = dma.done.wait (%p16894_p2), %s399_s8, 1664  }
  0xd4   : > { %11785 = vsyncadd (%p16894_p2), %s399_s8, 4294965632  ;;  %s10269_s27 = sshll.u32 %s12160_s29, 3  ;;  %s417_s30 = scalar_lea.sflag [#allocation12], %s12160_s29 }
  0xd5   : > { %s12188_s21 = scalar_lea.vmem [#allocation10], %s10269_s27  ;;  %s12191_s1 = scalar_lea.vmem [#allocation11], %s10269_s27 }
  0xd6   : > { %11787 = dma.done.wait (%p16894_p2), %s417_s30, 128  }
  0xd7   : > { %11789 = vsyncadd (%p16894_p2), %s417_s30, 4294967168  ;;  %v16797_v0 = vmov 0.0   ;;  %vm486_vm0 = vcmask 64512   ;;  %v477_v1 = vld [vmem:[%s375_s19 + $0x8] sm:$0xff]  ;;  %v476_v2 = vld [vmem:[%s375_s19] sm:$0xff]  ;;  %s10447_s9 = sshll.u32 %s11808_s24, 8 }
  0xd8   : > { %577 = vmatprep.mubr.f32.mxu0 %v16797_v0  ;;  %2288 = vmatprep.mubr.f32.mxu1 %v16797_v0  ;;  %v478_v3 = vld [vmem:[%s12172_s11] sm:$0xff]  ;;  %v12200_v4 = vand.u32 4294901760, %v477_v1  ;;  %v12202_v5 = vand.u32 4294901760, %v476_v2  ;;  %v479_v7 = vld [vmem:[%s12172_s11 + $0x8] sm:$0xff]  ;;  %v480_v8 = vld [vmem:[%s12172_s11 + $0x10] sm:$0xff]  ;;  %s473_s17 = scalar_lea.vmem [#allocation13], %s10267_s18  ;;  %s16723_s14 = scalar_lea.hbm %s16778_s6, %s10447_s9 }
  0xd9   : > { %v488_v6 = vsel %vm486_vm0, %v478_v3, 0  ;;  %v481_v9 = vld [vmem:[%s12172_s11 + $0x18] sm:$0xff]  ;;  %v491_v11 = vsel %vm486_vm0, %v479_v7, 0  ;;  %v494_v12 = vsel %vm486_vm0, %v480_v8, 0  ;;  %v482_v14 = vld [vmem:[%s12172_s11 + $0x20] sm:$0xff]  ;;  %v483_v20 = vld [vmem:[%s12172_s11 + $0x28] sm:$0xff] }
  0xda   : > { %16895 = vst [vmem:[#allocation25_spill] sm:$0xff] %v12200_v4  ;;  %16896 = vst [vmem:[#allocation26_spill] sm:$0xff] %v12202_v5  ;;  %v12208_v10 = vand.u32 4294901760, %v488_v6  ;;  %v497_v13 = vsel %vm486_vm0, %v481_v9, 0  ;;  %512 = vmatprep.subr.mxu0 %v12200_v4  ;;  %v12215_v15 = vand.u32 4294901760, %v491_v11  ;;  %v12217_v16 = vand.u32 4294901760, %v494_v12 }
  0xdb   : > { %v12219_v17 = vand.u32 4294901760, %v497_v13  ;;  %514 = vmatpush1.msra.mxu0 %v12202_v5  ;;  %v500_v19 = vsel %vm486_vm0, %v482_v14, 0  ;;  %v12228_v21 = vsub.f32 %v477_v1, %v12200_v4  ;;  %v12241_v26 = vsub.f32 %v476_v2, %v12202_v5  ;;  %v484_v39 = vld [vmem:[%s12172_s11 + $0x30] sm:$0xff]  ;;  %v485_v47 = vld [vmem:[%s12172_s11 + $0x38] sm:$0xff]  ;;  %s10057_s13 = sshll.u32 %s473_s17, 4  ;;  %s10041_s24 = scalar_lea.sflag [#allocation4], %s12160_s29  ;;  %s16725_s13 = int_to_ptr.vmem [resolvable:$true] %s10057_s13 }
  0xdc   : > { %v12223_v18 = vsub.f32 %v488_v6, %v12208_v10  ;;  %v12231_v22 = vsub.f32 %v491_v11, %v12215_v15  ;;  %v12234_v23 = vsub.f32 %v494_v12, %v12217_v16  ;;  %v12247_v29 = vand.u32 4294901760, %v500_v19  ;;  %s11722_s18 = scalar_lea.vmem %s16725_s13, 256  ;;  %p17105_p0 = scmp.ne.s32.totalorder %s16876_s10, 0 }
  0xdd   : > { %16897 = vst [vmem:[#allocation27_spill] sm:$0xff] %v12228_v21  ;;  %v12238_v25 = vand.u32 4294901760, %v12228_v21  ;;  %16899 = vst [vmem:[#allocation29_spill] sm:$0xff] %v12241_v26  ;;  %v12245_v28 = vsub.f32 %v497_v13, %v12219_v17  ;;  %v503_v30 = vsel %vm486_vm0, %v483_v20, 0  ;;  %v12257_v34 = vand.u32 4294901760, %v12241_v26  ;;  %p11723_p13 = scmp.ne.s32.totalorder %s16725_s13, %s11722_s18  ;;  %s11834_s26 = smov [#allocation13]  }
  0xde   : > { %v580_v24 = vand.u32 4294901760, %v12223_v18  ;;  %v591_v27 = vand.u32 4294901760, %v12231_v22  ;;  %v602_v32 = vand.u32 4294901760, %v12234_v23  ;;  %v12268_v40 = vsub.f32 %v500_v19, %v12247_v29  ;;  %s11726_s19 = sshll.u32 %s11834_s26, 4  ;;  %s11727_s19 = int_to_ptr.vmem [resolvable:$false] %s11726_s19 }
  0xdf   : > { %16898 = vst [vmem:[#allocation28_spill] sm:$0xff] %v12238_v25  ;;  %v669_v33 = vsub.f32 %v12228_v21, %v12238_v25  ;;  %16900 = vst [vmem:[#allocation30_spill] sm:$0xff] %v12257_v34  ;;  %v675_v38 = vsub.f32 %v12241_v26, %v12257_v34  ;;  %v12270_v41 = vand.u32 4294901760, %v503_v30  ;;  %v613_v44 = vand.u32 4294901760, %v12245_v28  ;;  %p11724_p1 = pnand %p11723_p13, %p17105_p0  ;;  %s11728_s16 = scalar_lea.vmem %s11727_s19, 512 }
  0xe0   : > { %v581_v31 = vsub.f32 %v12223_v18, %v580_v24  ;;  %v592_v35 = vsub.f32 %v12231_v22, %v591_v27  ;;  %v603_v43 = vsub.f32 %v12234_v23, %v602_v32  ;;  %v506_v46 = vsel %vm486_vm0, %v484_v39, 0  ;;  %p11729_p9 = scmp.lt.s32.totalorder %s16725_s13, %s11727_s19  ;;  %p11730_p6 = scmp.lt.s32.totalorder %s11728_s16, %s11722_s18 }
  0xe1   : > { %v12262_v37 = vand.u32 4294901760, %v669_v33  ;;  %v12277_v45 = vand.u32 4294901760, %v675_v38  ;;  %v12284_v48 = vsub.f32 %v503_v30, %v12270_v41  ;;  %v614_v50 = vsub.f32 %v12245_v28, %v613_v44  ;;  %p11725_p8 = pneg %p11724_p1 }
  0xe2   : > { %v582_v36 = vand.u32 4294901760, %v581_v31  ;;  %v593_v42 = vand.u32 4294901760, %v592_v35  ;;  %v604_v49 = vand.u32 4294901760, %v603_v43  ;;  %v624_v51 = vand.u32 4294901760, %v12268_v40  ;;  %p11731_p12 = por %p11730_p6, %p11729_p9 }
  0xe3   : > { %16901 = vst [vmem:[#allocation31_spill] sm:$0xff] %v12262_v37  ;;  %671 = vmatprep.subr.mxu0 %v12262_v37  ;;  %16902 = vst [vmem:[#allocation32_spill] sm:$0xff] %v12277_v45  ;;  %v12291_v52 = vand.u32 4294901760, %v506_v46  ;;  %v509_v53 = vsel %vm486_vm0, %v485_v47, 0  ;;  %v635_v54 = vand.u32 4294901760, %v12284_v48  ;;  %v615_v55 = vand.u32 4294901760, %v614_v50 }
  0xe4   : > { %583 = vmatmul.mubr.f32.vlgmr.msra.gmra.mrb[0].mxu0 %v582_v36  ;;  %v625_v56 = vsub.f32 %v12268_v40, %v624_v51  ;;  %v12302_v58 = vand.u32 4294901760, %v509_v53  ;;  %p11732_p10 = pnand %p11731_p12, %p11725_p8 }
  0xe5   : > { %588 = vmatprep.mubr.f32.mxu0 %v16797_v0  ;;  %677 = vmatpush1.msra.mxu0 %v12277_v45  ;;  %v12300_v57 = vsub.f32 %v506_v46, %v12291_v52  ;;  %v636_v60 = vsub.f32 %v12284_v48, %v635_v54  ;;  %v16810_v46 = vmov 683565275  }
  0xe6   : > { %799 = vmatprep.subr.mxu0 %v12228_v21  ;;  %v626_v59 = vand.u32 4294901760, %v625_v56  ;;  %v12310_v62 = vsub.f32 %v509_v53, %v12302_v58  ;;  %v16802_v53 = vmov 2131351028  }
  0xe7   : > { %v646_v61 = vand.u32 4294901760, %v12300_v57  ;;  %v637_v63 = vand.u32 4294901760, %v636_v60 }
  0xe8   : > { %594 = vmatmul.mubr.f32.gmra.mrb[2].mxu0 %v593_v42  ;;  %v657_v2 = vand.u32 4294901760, %v12310_v62 }
  0xe9   : > { %599 = vmatprep.mubr.f32.mxu0 %v16797_v0  ;;  %v647_v1 = vsub.f32 %v12300_v57, %v646_v61 }
  0xea   : > { %v658_v6 = vsub.f32 %v12310_v62, %v657_v2 }
  0xeb   : > { %v648_v3 = vand.u32 4294901760, %v647_v1  ;;  %v16806_v1 = vmov 1326507024  }
  0xec   : > { %605 = vmatmul.mubr.f32.gmra.mrb[4].mxu0 %v604_v49  ;;  %v659_v7 = vand.u32 4294901760, %v658_v6 }
  0xed   : > { %610 = vmatprep.mubr.f32.mxu0 %v16797_v0 }
  0xf0   : > { %616 = vmatmul.mubr.f32.gmra.mrb[6].mxu0 %v615_v55  ;;  %v16800_v55 = vmov 2102212464  }
  0xf1   : > { %621 = vmatprep.mubr.f32.mxu0 %v16797_v0 }
  0xf4   : > { %627 = vmatmul.mubr.f32.gmra.mrb[8].mxu0 %v626_v59 }
  0xf5   : > { %632 = vmatprep.mubr.f32.mxu0 %v16797_v0 }
  0xf8   : > { %638 = vmatmul.mubr.f32.gmra.mrb[10].mxu0 %v637_v63 }
  0xf9   : > { %643 = vmatprep.mubr.f32.mxu0 %v16797_v0 }
  0xfc   : > { %649 = vmatmul.mubr.f32.gmra.mrb[12].mxu0 %v648_v3 }
  0xfd   : > { %654 = vmatprep.mubr.f32.mxu0 %v16797_v0 }
 0x100   : > { %660 = vmatmul.mubr.f32.gmra.mrb[14].mxu0 %v659_v7 }
 0x101   : > { %740 = vmatprep.mubr.f32.mxu0 %v16797_v0 }
 0x104   : > { %742 = vmatmul.mubr.f32.vlgmr.msra.gmra.mrb[0].mxu0 %v12208_v10 }
 0x105   : > { %747 = vmatprep.mubr.f32.mxu0 %v16797_v0  ;;  %802 = vmatpush1.msra.mxu0 %v12241_v26 }
 0x106   : > { %931 = vmatprep.subr.mxu0 %v12200_v4 }
 0x108   : > { %749 = vmatmul.mubr.f32.gmra.mrb[2].mxu0 %v12215_v15 }
 0x109   : > { %754 = vmatprep.mubr.f32.mxu0 %v16797_v0 }
 0x10c   : > { %756 = vmatmul.mubr.f32.gmra.mrb[4].mxu0 %v12217_v16 }
 0x10d   : > { %761 = vmatprep.mubr.f32.mxu0 %v16797_v0 }
 0x110   : > { %763 = vmatmul.mubr.f32.gmra.mrb[6].mxu0 %v12219_v17 }
 0x111   : > { %768 = vmatprep.mubr.f32.mxu0 %v16797_v0 }
 0x114   : > { %770 = vmatmul.mubr.f32.gmra.mrb[8].mxu0 %v12247_v29 }
 0x115   : > { %775 = vmatprep.mubr.f32.mxu0 %v16797_v0 }
 0x118   : > { %777 = vmatmul.mubr.f32.gmra.mrb[10].mxu0 %v12270_v41 }
 0x119   : > { %782 = vmatprep.mubr.f32.mxu0 %v16797_v0 }
 0x11c   : > { %784 = vmatmul.mubr.f32.gmra.mrb[12].mxu0 %v12291_v52 }
 0x11d   : > { %789 = vmatprep.mubr.f32.mxu0 %v16797_v0 }
 0x120   : > { %791 = vmatmul.mubr.f32.gmra.mrb[14].mxu0 %v12302_v58 }
 0x121   : > { %865 = vmatprep.mubr.f32.mxu0 %v16797_v0 }
 0x124   : > { %868 = vmatmul.mubr.f32.vlgmr.msra.gmra.mrb[0].mxu0 %v12223_v18 }
 0x125   : > { %873 = vmatprep.mubr.f32.mxu0 %v16797_v0  ;;  %933 = vmatpush1.msra.mxu0 %v12202_v5 }
 0x126   : > { %1072 = vmatprep.subr.mxu0 %v12238_v25  ;;  %v16913_v25 = vmov 1326507024  }
 0x128   : > { %876 = vmatmul.mubr.f32.gmra.mrb[2].mxu0 %v12231_v22 }
 0x129   : > { %881 = vmatprep.mubr.f32.mxu0 %v16797_v0 }
 0x12c   : > { %884 = vmatmul.mubr.f32.gmra.mrb[4].mxu0 %v12234_v23 }
 0x12d   : > { %889 = vmatprep.mubr.f32.mxu0 %v16797_v0 }
 0x130   : > { %892 = vmatmul.mubr.f32.gmra.mrb[6].mxu0 %v12245_v28 }
 0x131   : > { %897 = vmatprep.mubr.f32.mxu0 %v16797_v0 }
 0x134   : > { %900 = vmatmul.mubr.f32.gmra.mrb[8].mxu0 %v12268_v40 }
 0x135   : > { %905 = vmatprep.mubr.f32.mxu0 %v16797_v0 }
 0x138   : > { %908 = vmatmul.mubr.f32.gmra.mrb[10].mxu0 %v12284_v48 }
 0x139   : > { %913 = vmatprep.mubr.f32.mxu0 %v16797_v0 }
 0x13c   : > { %916 = vmatmul.mubr.f32.gmra.mrb[12].mxu0 %v12300_v57  ;;  %v16818_v57 = vmov 920167782  }
 0x13d   : > { %921 = vmatprep.mubr.f32.mxu0 %v16797_v0 }
 0x140   : > { %924 = vmatmul.mubr.f32.gmra.mrb[14].mxu0 %v12310_v62 }
 0x141   : > { %996 = vmatprep.mubr.f32.mxu0 %v16797_v0 }
 0x144   : > { %1000 = vmatmul.mubr.f32.vlgmr.msra.gmra.mrb[0].mxu0 %v580_v24 }
 0x145   : > { %1005 = vmatprep.mubr.f32.mxu0 %v16797_v0  ;;  %1076 = vmatpush1.msra.mxu0 %v12257_v34 }
 0x146   : > { %1197 = vmatprep.subr.mxu0 %v12200_v4 }
 0x148   : > { %1009 = vmatmul.mubr.f32.gmra.mrb[2].mxu0 %v591_v27 }
 0x149   : > { %1014 = vmatprep.mubr.f32.mxu0 %v16797_v0 }
 0x14c   : > { %1018 = vmatmul.mubr.f32.gmra.mrb[4].mxu0 %v602_v32 }
 0x14d   : > { %1023 = vmatprep.mubr.f32.mxu0 %v16797_v0 }
 0x150   : > { %1027 = vmatmul.mubr.f32.gmra.mrb[6].mxu0 %v613_v44 }
 0x151   : > { %1032 = vmatprep.mubr.f32.mxu0 %v16797_v0 }
 0x154   : > { %1036 = vmatmul.mubr.f32.gmra.mrb[8].mxu0 %v624_v51  ;;  %v16804_v51 = vmov 2475754826  }
 0x155   : > { %1041 = vmatprep.mubr.f32.mxu0 %v16797_v0 }
 0x158   : > { %1045 = vmatmul.mubr.f32.gmra.mrb[10].mxu0 %v635_v54 }
 0x159   : > { %1050 = vmatprep.mubr.f32.mxu0 %v16797_v0 }
 0x15c   : > { %1054 = vmatmul.mubr.f32.gmra.mrb[12].mxu0 %v646_v61 }
 0x15d   : > { %1059 = vmatprep.mubr.f32.mxu0 %v16797_v0 }
 0x160   : > { %1063 = vmatmul.mubr.f32.gmra.mrb[14].mxu0 %v657_v2 }
 0x161   : > { %1139 = vmatprep.mubr.f32.mxu0 %v16797_v0 }
 0x164   : > { %1141 = vmatmul.mubr.f32.vlgmr.msra.gmra.mrb[0].mxu0 %v12208_v10 }
 0x165   : > { %1146 = vmatprep.mubr.f32.mxu0 %v16797_v0  ;;  %1199 = vmatpush1.msra.mxu0 %v12202_v5 }
 0x166   : > { %2940 = vmatprep.subr.mxu0 %v12200_v4 }
 0x168   : > { %1148 = vmatmul.mubr.f32.gmra.mrb[2].mxu0 %v12215_v15 }
 0x169   : > { %1153 = vmatprep.mubr.f32.mxu0 %v16797_v0 }
 0x16c   : > { %1155 = vmatmul.mubr.f32.gmra.mrb[4].mxu0 %v12217_v16 }
 0x16d   : > { %1160 = vmatprep.mubr.f32.mxu0 %v16797_v0 }
 0x170   : > { %1162 = vmatmul.mubr.f32.gmra.mrb[6].mxu0 %v12219_v17 }
 0x171   : > { %1167 = vmatprep.mubr.f32.mxu0 %v16797_v0 }
 0x174   : > { %1169 = vmatmul.mubr.f32.gmra.mrb[8].mxu0 %v12247_v29 }
 0x175   : > { %1174 = vmatprep.mubr.f32.mxu0 %v16797_v0 }
 0x178   : > { %1176 = vmatmul.mubr.f32.gmra.mrb[10].mxu0 %v12270_v41 }
 0x179   : > { %1181 = vmatprep.mubr.f32.mxu0 %v16797_v0 }
 0x17c   : > { %1183 = vmatmul.mubr.f32.gmra.mrb[12].mxu0 %v12291_v52 }
 0x17d   : > { %1188 = vmatprep.mubr.f32.mxu0 %v16797_v0 }
 0x180   : > { %1190 = vmatmul.mubr.f32.gmra.mrb[14].mxu0 %v12302_v58 }
 0x181   : > { %1262 = vmatprep.mubr.f32.mxu0 %v16797_v0 }
 0x184   : > { %1264 = vmatmul.mubr.f32.vlgmr.msra.gmra.mrb[0].mxu0 %v12208_v10 }
 0x185   : > { %1269 = vmatprep.mubr.f32.mxu0 %v16797_v0  ;;  %2942 = vmatpush1.msra.mxu0 %v12202_v5 }
 0x188   : > { %1271 = vmatmul.mubr.f32.gmra.mrb[2].mxu0 %v12215_v15 }
 0x189   : > { %1276 = vmatprep.mubr.f32.mxu0 %v16797_v0 }
 0x18c   : > { %1278 = vmatmul.mubr.f32.gmra.mrb[4].mxu0 %v12217_v16 }
 0x18d   : > { %1283 = vmatprep.mubr.f32.mxu0 %v16797_v0 }
 0x190   : > { %1285 = vmatmul.mubr.f32.gmra.mrb[6].mxu0 %v12219_v17 }
 0x191   : > { %1290 = vmatprep.mubr.f32.mxu0 %v16797_v0 }
 0x194   : > { %1292 = vmatmul.mubr.f32.gmra.mrb[8].mxu0 %v12247_v29 }
 0x195   : > { %1297 = vmatprep.mubr.f32.mxu0 %v16797_v0 }
 0x198   : > { %1299 = vmatmul.mubr.f32.gmra.mrb[10].mxu0 %v12270_v41 }
 0x199   : > { %1304 = vmatprep.mubr.f32.mxu0 %v16797_v0 }
 0x19c   : > { %1306 = vmatmul.mubr.f32.gmra.mrb[12].mxu0 %v12291_v52 }
 0x19d   : > { %1311 = vmatprep.mubr.f32.mxu0 %v16797_v0 }
 0x1a0   : > { %1313 = vmatmul.mubr.f32.gmra.mrb[14].mxu0 %v12302_v58 }
 0x1a1   : > { %3005 = vmatprep.mubr.f32.mxu0 %v16797_v0 }
 0x257   : > { %v12417_v8 = vpop.f32.mrb[0].mxu0 }
 0x258   : > { %v1335_v9 = vand.u32 2147483647, %v12417_v8  ;;  %v1338_v10 = vand.u32 2139095040, %v12417_v8  ;;  %v12421_v11 = vpop.f32.mrb[1].mxu0  ;;  %vm1337_vm14 = vcmp.lt.s32.totalorder %v12417_v8, 0 }
 0x259   : > { %v1439_v12 = vand.u32 2147483647, %v12421_v11  ;;  %v1442_v13 = vand.u32 2139095040, %v12421_v11 }
 0x25a   : > { %v1339_v14 = vshrl.u32 %v1338_v10, 23  ;;  %v1342_v15 = vand.u32 8388607, %v1335_v9 }
 0x25b   : > { %v1443_v16 = vshrl.u32 %v1442_v13, 23  ;;  %v1446_v17 = vand.u32 8388607, %v1439_v12  ;;  %v12429_v18 = vpop.f32.mrb[2].mxu0 }
 0x25c   : > { %v10272_v19 = vadd.s32 4294967169, %v1339_v14  ;;  %v12431_v20 = vpop.f32.mrb[3].mxu0  ;;  %v1546_v23 = vand.u32 2139095040, %v12429_v18  ;;  %v1343_v27 = vor.u32 8388608, %v1342_v15 }
 0x25d   : > { %v10276_v22 = vadd.s32 4294967169, %v1443_v16  ;;  %v1447_v28 = vor.u32 8388608, %v1446_v17 }
 0x25e   : > { %v1345_v24 = vadd.s32 1, %v10272_v19  ;;  %v1547_v30 = vshrl.u32 %v1546_v23, 23  ;;  %v12438_v40 = vshll.u32 %v1343_v27, 8 }
 0x25f   : > { %v1449_v29 = vadd.s32 1, %v10276_v22  ;;  %v12434_v31 = vpop.f32.mrb[4].mxu0  ;;  %v12442_v42 = vshll.u32 %v1447_v28, 8 }
 0x260   : > { %vm1346_vm1 = vcmp.gt.s32.totalorder %v1345_v24, 0  ;;  %v12436_v32 = vpop.f32.mrb[5].mxu0  ;;  %v10280_v35 = vadd.s32 4294967169, %v1547_v30 }
 0x261   : > { %v1347_v33 = vsel %vm1346_vm1, %v1345_v24, 0  ;;  %vm1450_vm2 = vcmp.gt.s32.totalorder %v1449_v29, 0 }
 0x262   : > { %v1348_v36 = vshrl.u32 %v1347_v33, 5  ;;  %v1349_v38 = vand.u32 31, %v1347_v33  ;;  %v1451_v39 = vsel %vm1450_vm2, %v1449_v29, 0  ;;  %v12447_v49 = vadd.s32 1, %v10280_v35 }
 0x263   : > { %v12440_v41 = vshrl.u32 %v1451_v39, 5  ;;  %v12444_v43 = vpop.f32.mrb[6].mxu0  ;;  %v1453_v48 = vand.u32 31, %v1451_v39 }
 0x264   : > { %v1350_v44 = vsub.s32 32, %v1349_v38  ;;  %v1352_v47 = vshll.u32 %v16810_v46, %v1349_v38  ;;  %v12449_v50 = vpop.f32.mrb[7].mxu0  ;;  %v1355_v52 = vshll.u32 %v16804_v51, %v1349_v38  ;;  %v1358_v54 = vshll.u32 %v16802_v53, %v1349_v38 }
 0x265   : > { %16903 = vst [vmem:[#allocation33_spill] sm:$0xff] %v12449_v50  ;;  %v1361_v56 = vshll.u32 %v16800_v55, %v1349_v38  ;;  %v1364_v58 = vshll.u32 %v16818_v57, %v1349_v38  ;;  %vm1367_vm3 = vcmp.lt.s32.totalorder %v1348_v36, 1  ;;  %vm1368_vm4 = vcmp.lt.s32.totalorder %v1348_v36, 2 }
 0x266   : > { %v1353_v59 = vshrl.u32 %v16804_v51, %v1350_v44  ;;  %v1356_v60 = vshrl.u32 %v16802_v53, %v1350_v44  ;;  %v1359_v61 = vshrl.u32 %v16800_v55, %v1350_v44  ;;  %v1351_v62 = vshrl.u32 %v16810_v46, %v1350_v44 }
 0x267   : > { %v1362_v63 = vshrl.u32 %v16818_v57, %v1350_v44  ;;  %v1365_v2 = vshrl.u32 %v16806_v1, %v1350_v44  ;;  %v1454_v10 = vsub.s32 32, %v1453_v48  ;;  %vm1369_vm5 = vcmp.lt.s32.totalorder %v1348_v36, 3  ;;  %v12467_v35 = vpop.f32.mrb[8].mxu0 }
 0x268   : > { %v1354_v3 = vor.u32 %v1353_v59, %v1352_v47  ;;  %v1357_v6 = vor.u32 %v1356_v60, %v1355_v52  ;;  %v1360_v7 = vor.u32 %v1359_v61, %v1358_v54  ;;  %vm1370_vm6 = vcmp.lt.s32.totalorder %v1348_v36, 4  ;;  %v12473_v52 = vpop.f32.mrb[9].mxu0 }
 0x269   : > { %v1363_v13 = vor.u32 %v1362_v63, %v1361_v56  ;;  %v1366_v14 = vor.u32 %v1365_v2, %v1364_v58  ;;  %v1456_v27 = vshll.u32 %v16810_v46, %v1453_v48  ;;  %v1457_v30 = vshrl.u32 %v16804_v51, %v1454_v10 }
 0x26a   : > { %v1371_v15 = vsel %vm1367_vm3, %v1351_v62, %v1354_v3  ;;  %v1372_v16 = vsel %vm1370_vm6, %v1360_v7, 2102212464  ;;  %v1375_v17 = vsel %vm1367_vm3, %v1354_v3, %v1357_v6  ;;  %v1379_v19 = vsel %vm1367_vm3, %v1357_v6, %v1360_v7 }
 0x26b   : > { %v1373_v22 = vsel %vm1369_vm5, %v1357_v6, %v1372_v16  ;;  %v1376_v23 = vsel %vm1370_vm6, %v1363_v13, 920167782  ;;  %v1380_v24 = vsel %vm1370_vm6, %v1366_v14, 1326507024  ;;  %v1459_v33 = vshll.u32 %v16804_v51, %v1453_v48 }
 0x26c   : > { %v1377_v28 = vsel %vm1369_vm5, %v1360_v7, %v1376_v23  ;;  %v1381_v29 = vsel %vm1369_vm5, %v1363_v13, %v1380_v24  ;;  %v1374_v38 = vsel %vm1368_vm4, %v1371_v15, %v1373_v22  ;;  %v1460_v47 = vshrl.u32 %v16802_v53, %v1454_v10  ;;  %v12490_v7 = vpop.f32.mrb[10].mxu0 }
 0x26d   : > { %v1378_v39 = vsel %vm1368_vm4, %v1375_v17, %v1377_v28  ;;  %v1382_v44 = vsel %vm1368_vm4, %v1379_v19, %v1381_v29  ;;  %v1458_v60 = vor.u32 %v1457_v30, %v1456_v27  ;;  %v1462_v62 = vshll.u32 %v16802_v53, %v1453_v48  ;;  %v12495_v16 = vpop.f32.mrb[11].mxu0 }
 0x26e   : > { %v12476_v54 = vmul.u32.u64.low %v12438_v40, %v1382_v44  ;;  %v12477_v56 = vmul.u32.u64.high %v12438_v40, %v1382_v44, %v12476_v54  ;;  %v12480_v58 = vmul.u32.u64.low %v12438_v40, %v1378_v39  ;;  %v12481_v59 = vmul.u32.u64.high %v12438_v40, %v1378_v39, %v12480_v58 }
 0x26f   : > { %v1461_v61 = vor.u32 %v1460_v47, %v1459_v33  ;;  %v1463_v36 = vshrl.u32 %v16800_v55, %v1454_v10  ;;  %v1455_v63 = vshrl.u32 %v16810_v46, %v1454_v10  ;;  %v1465_v2 = vshll.u32 %v16800_v55, %v1453_v48 }
 0x270   : > { %v1466_v3 = vshrl.u32 %v16818_v57, %v1454_v10  ;;  %v1469_v6 = vshrl.u32 %v16806_v1, %v1454_v10  ;;  %v1390_v13 = vmul.u32 %v12438_v40, %v1374_v38  ;;  %v1468_v15 = vshll.u32 %v16818_v57, %v1453_v48 }
 0x271   : > { %v1464_v14 = vor.u32 %v1463_v36, %v1462_v62  ;;  %vm1471_vm7 = vcmp.lt.s32.totalorder %v12440_v41, 1  ;;  %vm1392_vm8 = vc.u32 %v12477_v56, %v12480_v58  ;;  %v1393_v17 = vadd.s32 1, %v12481_v59 }
 0x272   : > { %v1467_v19 = vor.u32 %v1466_v3, %v1465_v2  ;;  %vm1472_vm9 = vcmp.lt.s32.totalorder %v12440_v41, 2  ;;  %v1470_v10 = vor.u32 %v1469_v6, %v1468_v15  ;;  %vm1473_vm10 = vcmp.lt.s32.totalorder %v12440_v41, 3  ;;  %v12526_v15 = vpop.f32.mrb[12].mxu0 }
 0x273   : > { %vm1474_vm11 = vcmp.lt.s32.totalorder %v12440_v41, 4  ;;  %v1479_v40 = vsel %vm1471_vm7, %v1458_v60, %v1461_v61  ;;  %v1394_v48 = vsel %vm1392_vm8, %v1393_v17, %v12481_v59  ;;  %v1483_v24 = vsel %vm1471_vm7, %v1461_v61, %v1464_v14 }
 0x274   : > { %v1476_v22 = vsel %vm1474_vm11, %v1464_v14, 2102212464  ;;  %v1480_v23 = vsel %vm1474_vm11, %v1467_v19, 920167782  ;;  %v1395_v27 = vadd.s32 %v1394_v48, %v1390_v13  ;;  %v1475_v28 = vsel %vm1471_vm7, %v1455_v63, %v1458_v60 }
 0x275   : > { %v1481_v29 = vsel %vm1473_vm10, %v1464_v14, %v1480_v23  ;;  %v1484_v30 = vsel %vm1474_vm11, %v1470_v10, 1326507024  ;;  %v1477_v33 = vsel %vm1473_vm10, %v1461_v61, %v1476_v22  ;;  %vm1554_vm12 = vcmp.gt.s32.totalorder %v12447_v49, 0 }
 0x276   : > { %v1482_v38 = vsel %vm1472_vm9, %v1479_v40, %v1481_v29  ;;  %v1485_v39 = vsel %vm1473_vm10, %v1467_v19, %v1484_v30  ;;  %v1396_v44 = vadd.s32 536870912, %v1395_v27  ;;  %v1555_v61 = vsel %vm1554_vm12, %v12447_v49, 0  ;;  %v12531_v49 = vpop.f32.mrb[13].mxu0 }
 0x277   : > { %v1486_v47 = vsel %vm1472_vm9, %v1483_v24, %v1485_v39  ;;  %v12510_v54 = vmul.u32.u64.low %v12442_v42, %v1482_v38  ;;  %v12511_v59 = vmul.u32.u64.high %v12442_v42, %v1482_v38, %v12510_v54  ;;  %v1478_v63 = vsel %vm1472_vm9, %v1475_v28, %v1477_v33  ;;  %v12554_v0 = vpop.f32.mrb[14].mxu0 }
 0x278   : > { %v12515_v60 = vmul.u32.u64.low %v12442_v42, %v1486_v47  ;;  %v12516_v62 = vmul.u32.u64.high %v12442_v42, %v1486_v47, %v12515_v60  ;;  %v12519_v36 = vshrl.u32 %v1396_v44, 30  ;;  %v1557_v2 = vand.u32 31, %v1555_v61  ;;  %16904 = vst [vmem:[#allocation34_spill] sm:$0xff] %v12554_v0 }
 0x279   : > { %v16799_v3 = vand.u32 2147483647, %v12429_v18  ;;  %v1497_v13 = vadd.s32 1, %v12511_v59  ;;  %v1494_v17 = vmul.u32 %v12442_v42, %v1478_v63  ;;  %v16809_v24 = vand.u32 2147483647, %v12431_v20 }
 0x27a   : > { %v1398_v6 = vshll.u32 %v12519_v36, 30  ;;  %v1558_v14 = vsub.s32 32, %v1557_v2  ;;  %vm1496_vm13 = vc.u32 %v12516_v62, %v12510_v54  ;;  %v1650_v28 = vand.u32 2139095040, %v12431_v20 }
 0x27b   : > { %v1498_v41 = vsel %vm1496_vm13, %v1497_v13, %v12511_v59  ;;  %v1550_v40 = vand.u32 8388607, %v16799_v3  ;;  %v1556_v29 = vshrl.u32 %v1555_v61, 5  ;;  %v1560_v30 = vshll.u32 %v16810_v46, %v1557_v2 }
 0x27c   : > { %v12533_v19 = vsub.s32 %v1395_v27, %v1398_v6  ;;  %v1499_v10 = vadd.s32 %v1498_v41, %v1494_v17  ;;  %v1561_v48 = vshrl.u32 %v16804_v51, %v1558_v14  ;;  %v1564_v22 = vshrl.u32 %v16802_v53, %v1558_v14 }
 0x27d   : > { %v1567_v42 = vshrl.u32 %v16800_v55, %v1558_v14  ;;  %v1563_v33 = vshll.u32 %v16804_v51, %v1557_v2  ;;  %v1566_v39 = vshll.u32 %v16802_v53, %v1557_v2  ;;  %v1569_v44 = vshll.u32 %v16800_v55, %v1557_v2  ;;  %v12559_v51 = vpop.f32.mrb[15].mxu0 }
 0x27e   : > { %v1401_v23 = vsub.s32 0, %v12533_v19  ;;  %v1500_v27 = vadd.s32 536870912, %v1499_v10  ;;  %v1570_v47 = vshrl.u32 %v16818_v57, %v1558_v14  ;;  %v1562_v60 = vor.u32 %v1561_v48, %v1560_v30  ;;  %16905 = vst [vmem:[#allocation35_spill] sm:$0xff] %v12559_v51 }
 0x27f   : > { %v1565_v63 = vor.u32 %v1564_v22, %v1563_v33  ;;  %v1573_v61 = vshrl.u32 %v16806_v1, %v1558_v14  ;;  %v1551_v13 = vor.u32 8388608, %v1550_v40  ;;  %v1568_v17 = vor.u32 %v1567_v42, %v1566_v39 }
 0x280   : > { %v10273_v38 = vmin.u32 %v1401_v23, %v12533_v19  ;;  %v12551_v59 = vshrl.u32 %v1500_v27, 30  ;;  %v1571_v41 = vor.u32 %v1570_v47, %v1569_v44  ;;  %v1421_v23 = vsub.s32 4, %v12519_v36 }
 0x281   : > { %v1572_v55 = vshll.u32 %v16818_v57, %v1557_v2  ;;  %v1651_v53 = vshrl.u32 %v1650_v28, 23  ;;  %vm1575_vm15 = vcmp.lt.s32.totalorder %v1556_v29, 1  ;;  %vm1577_vm1 = vcmp.lt.s32.totalorder %v1556_v29, 3 }
 0x282   : > { %v1403_v6 = vclz %v10273_v38  ;;  %v1502_v3 = vshll.u32 %v12551_v59, 30  ;;  %vm1578_vm2 = vcmp.lt.s32.totalorder %v1556_v29, 4  ;;  %v1583_v22 = vsel %vm1575_vm15, %v1562_v60, %v1565_v63 }
 0x283   : > { %v1574_v40 = vor.u32 %v1573_v61, %v1572_v55  ;;  %v1584_v42 = vsel %vm1578_vm2, %v1571_v41, 920167782  ;;  %v1559_v30 = vshrl.u32 %v16810_v46, %v1558_v14  ;;  %v1591_v2 = vshll.u32 %v1551_v13, 8 }
 0x284   : > { %v10274_v27 = vadd.s32 4294967294, %v1403_v6  ;;  %v12561_v48 = vsub.s32 %v1499_v10, %v1502_v3  ;;  %v1585_v33 = vsel %vm1577_vm1, %v1568_v17, %v1584_v42  ;;  %vm1576_vm4 = vcmp.lt.s32.totalorder %v1556_v29, 2 }
 0x285   : > { %v1580_v39 = vsel %vm1578_vm2, %v1568_v17, 2102212464  ;;  %v1586_v3 = vsel %vm1576_vm4, %v1583_v22, %v1585_v33  ;;  %v1587_v55 = vsel %vm1575_vm15, %v1565_v63, %v1568_v17  ;;  %v10284_v10 = vadd.s32 4294967169, %v1651_v53 }
 0x286   : > { %vm10275_vm3 = vcmp.lt.s32.totalorder %v10274_v27, 0  ;;  %v1505_v38 = vsub.s32 0, %v12561_v48  ;;  %v1422_v47 = vsel %vm1337_vm14, %v1421_v23, %v12519_v36  ;;  %v1579_v61 = vsel %vm1575_vm15, %v1559_v30, %v1562_v60 }
 0x287   : > { %v1406_v28 = vsel %vm10275_vm3, 0, %v10274_v27  ;;  %v1588_v6 = vsel %vm1578_vm2, %v1574_v40, 1326507024  ;;  %v1581_v42 = vsel %vm1577_vm1, %v1565_v63, %v1580_v39  ;;  %v1391_v36 = vadd.s32 %v12480_v58, %v12477_v56 }
 0x288   : > { %v1411_v44 = vsub.s32 4294967266, %v1406_v28  ;;  %v10277_v14 = vmin.u32 %v1505_v38, %v12561_v48  ;;  %v1407_v13 = vsub.s32 32, %v1406_v28  ;;  %v1589_v1 = vsel %vm1577_vm1, %v1571_v41, %v1588_v6 }
 0x289   : > { %v1590_v17 = vsel %vm1576_vm4, %v1587_v55, %v1589_v1  ;;  %v12580_v53 = vmul.u32.u64.low %v1591_v2, %v1586_v3  ;;  %v12581_v33 = vmul.u32.u64.high %v1591_v2, %v1586_v3, %v12580_v53  ;;  %vm12590_vm5 = vcmp.le.f32.partialorder %v1335_v9, 0.7853982 }
 0x28a   : > { %v1412_v27 = vadd.s32 127, %v1411_v44  ;;  %v1507_v22 = vclz %v10277_v14  ;;  %v12585_v38 = vmul.u32.u64.low %v1591_v2, %v1590_v17  ;;  %v12586_v60 = vmul.u32.u64.high %v1591_v2, %v1590_v17, %v12585_v38 }
 0x28b   : > { %v1582_v41 = vsel %vm1576_vm4, %v1579_v61, %v1581_v42  ;;  %v1657_v1 = vadd.s32 1, %v10284_v10  ;;  %v1409_v30 = vshrl.u32 %v1391_v36, %v1407_v13  ;;  %v1424_v39 = vsel %vm12590_vm5, 0, %v1422_v47 }
 0x28c   : > { %v1413_v23 = vshll.u32 %v1412_v27, 23  ;;  %v10278_v63 = vadd.s32 4294967294, %v1507_v22  ;;  %v1654_v56 = vand.u32 8388607, %v16809_v24  ;;  %v1525_v58 = vsub.s32 4, %v12551_v59 }
 0x28d   : > { %v1601_v44 = vadd.s32 1, %v12581_v33  ;;  %vm1658_vm7 = vcmp.gt.s32.totalorder %v1657_v1, 0  ;;  %v1408_v9 = vshll.u32 %v12533_v19, %v1406_v28  ;;  %v1598_v55 = vmul.u32 %v1591_v2, %v1582_v41 }
 0x28e   : > { %vm10279_vm6 = vcmp.lt.s32.totalorder %v10278_v63, 0  ;;  %v1414_v3 = vor.u32 4788187, %v1413_v23  ;;  %vm1600_vm8 = vc.u32 %v12586_v60, %v12580_v53  ;;  %v1428_v29 = vadd.s32 3, %v1424_v39 }
 0x28f   : > { %v1602_v10 = vsel %vm1600_vm8, %v1601_v44, %v12581_v33  ;;  %v1410_v14 = vor.u32 %v1409_v30, %v1408_v9  ;;  %v1510_v47 = vsel %vm10279_vm6, 0, %v10278_v63  ;;  %v1659_v6 = vsel %vm1658_vm7, %v1657_v1, 0 }
 0x290   : > { %v1603_v61 = vadd.s32 %v1602_v10, %v1598_v55  ;;  %vm1441_vm9 = vcmp.lt.s32.totalorder %v12421_v11, 0  ;;  %v1655_v13 = vor.u32 8388608, %v1654_v56  ;;  %v1661_v27 = vand.u32 31, %v1659_v6 }
 0x291   : > { %v16808_v42 = vand.u32 2147483647, %v12434_v31  ;;  %v1415_v22 = vand.u32 2147483647, %v1414_v3  ;;  %v12609_v19 = vsel %vm1441_vm9, %v1525_v58, %v12551_v59  ;;  %vm12613_vm10 = vcmp.le.f32.partialorder %v1439_v12, 0.7853982 }
 0x292   : > { %v1604_v2 = vadd.s32 536870912, %v1603_v61  ;;  %v1495_v17 = vadd.s32 %v12510_v54, %v12516_v62  ;;  %v1515_v33 = vsub.s32 4294967266, %v1510_v47  ;;  %v1662_v36 = vsub.s32 32, %v1661_v27 }
 0x293   : > { %v1417_v23 = vcvt.s32.f32 %v1410_v14  ;;  %v12619_v38 = vand.u32 3, %v1428_v29  ;;  %v1754_v59 = vand.u32 2139095040, %v12434_v31  ;;  %v1511_v41 = vsub.s32 32, %v1510_v47 }
 0x294   : > { %v12621_v63 = vshrl.u32 %v1604_v2, 30  ;;  %v12627_v1 = vshll.u32 %v1655_v13, 8  ;;  %v12631_v30 = vand.u32 8388607, %v16808_v42  ;;  %v12636_v62 = vadd.s32 %v12580_v53, %v12586_v60 }
 0x295   : > { %v12633_v54 = vmul.f32 %v1417_v23, %v1415_v22  ;;  %v16910_v56 = vmov 2475754826   ;;  %v1516_v44 = vadd.s32 127, %v1515_v33  ;;  %v1664_v9 = vshll.u32 %v16810_v46, %v1661_v27 }
 0x296   : > { %v1606_v39 = vshll.u32 %v12621_v63, 30  ;;  %v1665_v58 = vshrl.u32 %v16910_v56, %v1662_v36  ;;  %v16911_v3 = vmov 2131351028   ;;  %v16912_v29 = vmov 2102212464  }
 0x297   : > { %v1668_v55 = vshrl.u32 %v16911_v3, %v1662_v36  ;;  %v1671_v10 = vshrl.u32 %v16912_v29, %v1662_v36  ;;  %v1667_v13 = vshll.u32 %v16910_v56, %v1661_v27  ;;  %v1670_v22 = vshll.u32 %v16911_v3, %v1661_v27 }
 0x298   : > { %v12643_v14 = vsub.s32 %v1603_v61, %v1606_v39  ;;  %v1755_v2 = vshrl.u32 %v1754_v59, 23  ;;  %v1513_v53 = vshrl.u32 %v1495_v17, %v1511_v41  ;;  %v1660_v60 = vshrl.u32 %v1659_v6, 5 }
 0x299   : > { %v1666_v23 = vor.u32 %v1665_v58, %v1664_v9  ;;  %v1673_v42 = vshll.u32 %v16912_v29, %v1661_v27  ;;  %v1669_v24 = vor.u32 %v1668_v55, %v1667_v13  ;;  %v1672_v12 = vor.u32 %v1671_v10, %v1670_v22 }
 0x29a   : > { %v1609_v33 = vsub.s32 0, %v12643_v14  ;;  %v1674_v46 = vshrl.u32 %v16818_v57, %v1662_v36  ;;  %v1512_v34 = vshll.u32 %v12561_v48, %v1510_v47  ;;  %v1517_v61 = vshll.u32 %v1516_v44, 23 }
 0x29b   : > { %v1676_v39 = vshll.u32 %v16818_v57, %v1661_v27  ;;  %v1677_v26 = vshrl.u32 %v16913_v25, %v1662_v36  ;;  %v1419_v59 = vxor.u32 2147483648, %v12633_v54  ;;  %v10288_v41 = vadd.s32 4294967169, %v1755_v2 }
 0x29c   : > { %v10281_v6 = vmin.u32 %v1609_v33, %v12643_v14  ;;  %v1675_v17 = vor.u32 %v1674_v46, %v1673_v42  ;;  %v1514_v58 = vor.u32 %v1513_v53, %v1512_v34  ;;  %vm1679_vm11 = vcmp.lt.s32.totalorder %v1660_v60, 1 }
 0x29d   : > { %v1678_v9 = vor.u32 %v1677_v26, %v1676_v39  ;;  %vm1682_vm12 = vcmp.lt.s32.totalorder %v1660_v60, 4  ;;  %v16914_v10 = vmov 683565275   ;;  %v1687_v48 = vsel %vm1679_vm11, %v1666_v23, %v1669_v24 }
 0x29e   : > { %v1611_v55 = vclz %v10281_v6  ;;  %v1663_v13 = vshrl.u32 %v16914_v10, %v1662_v36  ;;  %v1684_v22 = vsel %vm1682_vm12, %v1672_v12, 2102212464  ;;  %v1518_v47 = vor.u32 4788187, %v1517_v61 }
 0x29f   : > { %vm1680_vm13 = vcmp.lt.s32.totalorder %v1660_v60, 2  ;;  %vm1681_vm15 = vcmp.lt.s32.totalorder %v1660_v60, 3  ;;  %v1688_v27 = vsel %vm1682_vm12, %v1675_v17, 920167782  ;;  %v1691_v45 = vsel %vm1679_vm11, %v1669_v24, %v1672_v12 }
 0x2a0   : > { %v10282_v44 = vadd.s32 4294967294, %v1611_v55  ;;  %v1683_v57 = vsel %vm1679_vm11, %v1663_v13, %v1666_v23  ;;  %v1689_v21 = vsel %vm1681_vm15, %v1672_v12, %v1688_v27  ;;  %v1685_v33 = vsel %vm1681_vm15, %v1669_v24, %v1684_v22 }
 0x2a1   : > { %v1690_v46 = vsel %vm1680_vm13, %v1687_v48, %v1689_v21  ;;  %v1692_v34 = vsel %vm1682_vm12, %v1678_v9, 1326507024  ;;  %v1761_v26 = vadd.s32 1, %v10288_v41  ;;  %v1519_v53 = vand.u32 2147483647, %v1518_v47 }
 0x2a2   : > { %vm10283_vm1 = vcmp.lt.s32.totalorder %v10282_v44, 0  ;;  %v1693_v42 = vsel %vm1681_vm15, %v1675_v17, %v1692_v34  ;;  %v12658_v2 = vmul.u32.u64.low %v12627_v1, %v1690_v46  ;;  %v12659_v36 = vmul.u32.u64.high %v12627_v1, %v1690_v46, %v12658_v2 }
 0x2a3   : > { %v1614_v61 = vsel %vm10283_vm1, 0, %v10282_v44  ;;  %v1694_v39 = vsel %vm1680_vm13, %v1691_v45, %v1693_v42  ;;  %vm1762_vm2 = vcmp.gt.s32.totalorder %v1761_v26, 0  ;;  %v1686_v24 = vsel %vm1680_vm13, %v1683_v57, %v1685_v33 }
 0x2a4   : > { %v1615_v23 = vsub.s32 32, %v1614_v61  ;;  %v1619_v6 = vsub.s32 4294967266, %v1614_v61  ;;  %v1763_v12 = vsel %vm1762_vm2, %v1761_v26, 0  ;;  %v1521_v21 = vcvt.s32.f32 %v1514_v58 }
 0x2a5   : > { %v12665_v41 = vmul.u32.u64.low %v12627_v1, %v1694_v39  ;;  %v12666_v9 = vmul.u32.u64.high %v12627_v1, %v1694_v39, %v12665_v41  ;;  %v1765_v17 = vand.u32 31, %v1763_v12  ;;  %v1420_v55 = vsel %vm1337_vm14, %v1419_v59, %v12633_v54 }
 0x2a6   : > { %v1617_v13 = vshrl.u32 %v12636_v62, %v1615_v23  ;;  %v1620_v22 = vadd.s32 127, %v1619_v6  ;;  %v1705_v45 = vadd.s32 1, %v12659_v36  ;;  %v1522_v48 = vmul.f32 %v1521_v21, %v1519_v53 }
 0x2a7   : > { %v1616_v60 = vshll.u32 %v12643_v14, %v1614_v61  ;;  %v1702_v57 = vmul.u32 %v12627_v1, %v1686_v24  ;;  %v1766_v58 = vsub.s32 32, %v1765_v17  ;;  %v12675_v27 = vshrl.u32 %v1763_v12, 5 }
 0x2a8   : > { %v1621_v47 = vshll.u32 %v1620_v22, 23  ;;  %v1768_v44 = vshll.u32 %v16914_v10, %v1765_v17  ;;  %v1771_v33 = vshll.u32 %v16910_v56, %v1765_v17  ;;  %vm1704_vm14 = vc.u32 %v12666_v9, %v12658_v2 }
 0x2a9   : > { %v1618_v46 = vor.u32 %v1617_v13, %v1616_v60  ;;  %v1769_v54 = vshrl.u32 %v16910_v56, %v1766_v58  ;;  %v1774_v62 = vshll.u32 %v16911_v3, %v1765_v17  ;;  %v1706_v14 = vsel %vm1704_vm14, %v1705_v45, %v12659_v36 }
 0x2aa   : > { %v1622_v59 = vor.u32 4788187, %v1621_v47  ;;  %v1772_v1 = vshrl.u32 %v16911_v3, %v1766_v58  ;;  %v1777_v34 = vshll.u32 %v16912_v29, %v1765_v17  ;;  %v1707_v26 = vadd.s32 %v1706_v14, %v1702_v57 }
 0x2ab   : > { %v1775_v42 = vshrl.u32 %v16912_v29, %v1766_v58  ;;  %v16915_v53 = vmov 920167782   ;;  %vm1545_vm3 = vcmp.lt.s32.totalorder %v12429_v18, 0  ;;  %v1770_v6 = vor.u32 %v1769_v54, %v1768_v44 }
 0x2ac   : > { %v1778_v61 = vshrl.u32 %v16915_v53, %v1766_v58  ;;  %v1780_v39 = vshll.u32 %v16915_v53, %v1765_v17  ;;  %v1623_v23 = vand.u32 2147483647, %v1622_v59  ;;  %v1773_v24 = vor.u32 %v1772_v1, %v1771_v33 }
 0x2ad   : > { %v1781_v12 = vshrl.u32 %v16913_v25, %v1766_v58  ;;  %v16916_v36 = vsel %vm12613_vm10, 0, %v12609_v19  ;;  %v1708_v41 = vadd.s32 536870912, %v1707_v26  ;;  %v1776_v13 = vor.u32 %v1775_v42, %v1774_v62 }
 0x2ae   : > { %v1532_v21 = vadd.s32 3, %v16916_v36  ;;  %v1779_v22 = vor.u32 %v1778_v61, %v1777_v34  ;;  %v1423_v45 = vsel %vm12590_vm5, %v12417_v8, %v1420_v55  ;;  %v1625_v17 = vcvt.s32.f32 %v1618_v46 }
 0x2af   : > { %v1759_v60 = vor.u32 8388608, %v12631_v30  ;;  %v1782_v57 = vor.u32 %v1781_v12, %v1780_v39  ;;  %v1523_v47 = vxor.u32 2147483648, %v1522_v48  ;;  %v1709_v44 = vshrl.u32 %v1708_v41, 30 }
 0x2b0   : > { %vm1783_vm4 = vcmp.lt.s32.totalorder %v12675_v27, 1  ;;  %vm1786_vm6 = vcmp.lt.s32.totalorder %v12675_v27, 4  ;;  %v1626_v33 = vmul.f32 %v1625_v17, %v1623_v23  ;;  %vm1785_vm7 = vcmp.lt.s32.totalorder %v12675_v27, 3 }
 0x2b1   : > { %v1791_v19 = vsel %vm1783_vm4, %v1770_v6, %v1773_v24  ;;  %v1792_v54 = vsel %vm1786_vm6, %v1779_v22, 920167782  ;;  %v16917_v40 = vand.u32 2147483647, %v12429_v18  ;;  %v1629_v30 = vsub.s32 4, %v12621_v63 }
 0x2b2   : > { %v1710_v46 = vshll.u32 %v1709_v44, 30  ;;  %v1793_v62 = vsel %vm1785_vm7, %v1776_v13, %v1792_v54  ;;  %v1795_v59 = vsel %vm1783_vm4, %v1773_v24, %v1776_v13  ;;  %11350 = vcosq.f32 %v1423_v45 }
 0x2b3   : > { %vm12706_vm5 = vcmp.le.f32.partialorder %v16917_v40, 0.7853982  ;;  %vm1784_vm8 = vcmp.lt.s32.totalorder %v12675_v27, 2  ;;  %v1788_v14 = vsel %vm1786_vm6, %v1776_v13, 2102212464  ;;  %vm1649_vm11 = vcmp.lt.s32.totalorder %v12431_v20, 0 }
 0x2b4   : > { %v1796_v1 = vsel %vm1786_vm6, %v1782_v57, 1326507024  ;;  %v12717_v34 = vsub.s32 %v1707_v26, %v1710_v46  ;;  %v1767_v42 = vshrl.u32 %v16914_v10, %v1766_v58  ;;  %v1794_v61 = vsel %vm1784_vm8, %v1791_v19, %v1793_v62 }
 0x2b5   : > { %v1797_v39 = vsel %vm1785_vm7, %v1779_v22, %v1796_v1  ;;  %v1524_v23 = vsel %vm1441_vm9, %v1523_v47, %v1522_v48  ;;  %v1627_v12 = vxor.u32 2147483648, %v1626_v33  ;;  %v1799_v41 = vshll.u32 %v1759_v60, 8 }
 0x2b6   : > { %v1798_v36 = vsel %vm1784_vm8, %v1795_v59, %v1797_v39  ;;  %v1630_v26 = vsel %vm1545_vm3, %v1629_v30, %v12621_v63  ;;  %v1713_v58 = vsub.s32 0, %v12717_v34  ;;  %v1787_v13 = vsel %vm1783_vm4, %v1767_v42, %v1770_v6 }
 0x2b7   : > { %v1789_v22 = vsel %vm1785_vm7, %v1773_v24, %v1788_v14  ;;  %v16920_v17 = vand.u32 2147483647, %v12431_v20  ;;  %v12742_v57 = vmul.u32.u64.low %v1799_v41, %v1798_v36  ;;  %v12743_v60 = vmul.u32.u64.high %v1799_v41, %v1798_v36, %v12742_v57 }
 0x2b8   : > { %v12745_v47 = vmul.u32.u64.low %v1799_v41, %v1794_v61  ;;  %v12746_v19 = vmul.u32.u64.high %v1799_v41, %v1794_v61, %v12745_v47  ;;  %v1527_v63 = vsel %vm12613_vm10, %v12421_v11, %v1524_v23  ;;  %v10285_v6 = vmin.u32 %v1713_v58, %v12717_v34 }
 0x2b9   : > { %vm12738_vm9 = vcmp.le.f32.partialorder %v16920_v17, 0.7853982  ;;  %v16825_v24 = vand.u32 2147483647, %v12436_v32  ;;  %v1858_v54 = vand.u32 2139095040, %v12436_v32  ;;  %v1628_v40 = vsel %vm1545_vm3, %v1627_v12, %v1626_v33 }
 0x2ba   : > { %v1733_v30 = vsub.s32 4, %v1709_v44  ;;  %v1790_v46 = vsel %vm1784_vm8, %v1787_v13, %v1789_v22  ;;  %v1962_v62 = vand.u32 2139095040, %v12444_v43  ;;  %11352 = vsinq.f32 %v1423_v45 }
 0x2bb   : > { %v12759_v59 = vand.u32 3, %v1532_v21  ;;  %v1715_v28 = vclz %v10285_v6  ;;  %v1859_v14 = vshrl.u32 %v1858_v54, 23  ;;  %11354 = vcosq.f32 %v1527_v63 }
 0x2bc   : > { %v1632_v1 = vsel %vm12706_vm5, 0, %v1630_v26  ;;  %vm1808_vm10 = vc.u32 %v12743_v60, %v12745_v47  ;;  %v1809_v42 = vadd.s32 1, %v12746_v19  ;;  %v1631_v27 = vsel %vm12706_vm5, %v12429_v18, %v1628_v40  ;;  %v12768_v45 = vpop.eup %11350 }
 0x2bd   : > { %v10286_v33 = vadd.s32 4294967294, %v1715_v28  ;;  %v1806_v61 = vmul.u32 %v1799_v41, %v1790_v46  ;;  %v10292_v39 = vadd.s32 4294967169, %v1859_v14  ;;  %v1734_v21 = vsel %vm1649_vm11, %v1733_v30, %v1709_v44 }
 0x2be   : > { %v1810_v23 = vsel %vm1808_vm10, %v1809_v42, %v12746_v19  ;;  %v1862_v12 = vand.u32 8388607, %v16825_v24  ;;  %v1963_v36 = vshrl.u32 %v1962_v62, 23  ;;  %11356 = vsinq.f32 %v1527_v63 }
 0x2bf   : > { %vm10287_vm12 = vcmp.lt.s32.totalorder %v10286_v33, 0  ;;  %v1811_v26 = vadd.s32 %v1810_v23, %v1806_v61  ;;  %v1865_v58 = vadd.s32 1, %v10292_v39  ;;  %11358 = vcosq.f32 %v1631_v27 }
 0x2c0   : > { %v1636_v55 = vadd.s32 3, %v1632_v1  ;;  %v1703_v41 = vadd.s32 %v12658_v2, %v12666_v9  ;;  %v1718_v13 = vsel %vm10287_vm12, 0, %v10286_v33  ;;  %v1736_v44 = vsel %vm12738_vm9, 0, %v1734_v21 }
 0x2c1   : > { %v1719_v22 = vsub.s32 32, %v1718_v13  ;;  %v1723_v17 = vsub.s32 4294967266, %v1718_v13  ;;  %v1812_v57 = vadd.s32 536870912, %v1811_v26  ;;  %v1863_v19 = vor.u32 8388608, %v1862_v12 }
 0x2c2   : > { %vm1866_vm13 = vcmp.gt.s32.totalorder %v1865_v58, 0  ;;  %v16824_v6 = vand.u32 2147483647, %v12444_v43  ;;  %v10296_v63 = vadd.s32 4294967169, %v1963_v36  ;;  %11360 = vsinq.f32 %v1631_v27 }
 0x2c3   : > { %v1721_v54 = vshrl.u32 %v1703_v41, %v1719_v22  ;;  %v1724_v40 = vadd.s32 127, %v1723_v17  ;;  %v1813_v30 = vshrl.u32 %v1812_v57, 30  ;;  %v1867_v46 = vsel %vm1866_vm13, %v1865_v58, 0 }
 0x2c4   : > { %v12780_v62 = vand.u32 3, %v1636_v55  ;;  %v12782_v2 = vadd.s32 3, %v1736_v44  ;;  %v1869_v9 = vand.u32 31, %v1867_v46  ;;  %v12784_v28 = vpop.eup %11352  ;;  %v1720_v14 = vshll.u32 %v12717_v34, %v1718_v13 }
 0x2c5   : > { %v1725_v1 = vshll.u32 %v1724_v40, 23  ;;  %v12788_v42 = vadd.s32 %v12745_v47, %v12743_v60  ;;  %v1814_v33 = vshll.u32 %v1813_v30, 30  ;;  %v12790_v61 = vpop.eup %11354  ;;  %v12792_v21 = vshll.u32 %v1863_v19, 8 }
 0x2c6   : > { %16923 = vst [vmem:[#allocation36_spill] sm:$0xff] %v12780_v62  ;;  %v1870_v39 = vsub.s32 32, %v1869_v9  ;;  %v12796_v27 = vand.u32 8388607, %v16824_v6  ;;  %v1969_v23 = vadd.s32 1, %v10296_v63  ;;  %v1722_v12 = vor.u32 %v1721_v54, %v1720_v14 }
 0x2c7   : > { %v1726_v36 = vor.u32 4788187, %v1725_v1  ;;  %vm1753_vm15 = vcmp.lt.s32.totalorder %v12434_v31, 0  ;;  %v12799_v34 = vsub.s32 %v1811_v26, %v1814_v33  ;;  %v1868_v58 = vshrl.u32 %v1867_v46, 5 }
 0x2c8   : > { %v1872_v60 = vshll.u32 %v16914_v10, %v1869_v9  ;;  %v1873_v47 = vshrl.u32 %v16910_v56, %v1870_v39  ;;  %v1875_v55 = vshll.u32 %v16910_v56, %v1869_v9  ;;  %v1876_v41 = vshrl.u32 %v16911_v3, %v1870_v39  ;;  %v12805_v13 = vpop.eup %11356 }
 0x2c9   : > { %v1727_v22 = vand.u32 2147483647, %v1726_v36  ;;  %v1817_v17 = vsub.s32 0, %v12799_v34  ;;  %v1878_v44 = vshll.u32 %v16911_v3, %v1869_v9  ;;  %v1879_v57 = vshrl.u32 %v16912_v29, %v1870_v39  ;;  %v12810_v26 = vpop.eup %11358 }
 0x2ca   : > { %16924 = vst [vmem:[#allocation37_spill] sm:$0xff] %v12810_v26  ;;  %v1874_v19 = vor.u32 %v1873_v47, %v1872_v60  ;;  %v1877_v63 = vor.u32 %v1876_v41, %v1875_v55  ;;  %v1881_v54 = vshll.u32 %v16912_v29, %v1869_v9  ;;  %v1882_v40 = vshrl.u32 %v16915_v53, %v1870_v39 }
 0x2cb   : > { %v1729_v46 = vcvt.s32.f32 %v1722_v12  ;;  %v10289_v14 = vmin.u32 %v1817_v17, %v12799_v34  ;;  %v1880_v1 = vor.u32 %v1879_v57, %v1878_v44  ;;  %v1967_v33 = vor.u32 8388608, %v12796_v27 }
 0x2cc   : > { %v1837_v36 = vsub.s32 4, %v1813_v30  ;;  %v1883_v6 = vor.u32 %v1882_v40, %v1881_v54  ;;  %v1884_v24 = vshll.u32 %v16915_v53, %v1869_v9  ;;  %v1885_v37 = vshrl.u32 %v16913_v25, %v1870_v39  ;;  %v12819_v47 = vpop.eup %11360 }
 0x2cd   : > { %v1730_v5 = vmul.f32 %v1729_v46, %v1727_v22  ;;  %v1819_v4 = vclz %v10289_v14  ;;  %vm1887_vm1 = vcmp.lt.s32.totalorder %v1868_v58, 1  ;;  %v2066_v60 = vand.u32 2139095040, %v12449_v50 }
 0x2ce   : > { %v1886_v55 = vor.u32 %v1885_v37, %v1884_v24  ;;  %vm1890_vm2 = vcmp.lt.s32.totalorder %v1868_v58, 4  ;;  %v1895_v12 = vsel %vm1887_vm1, %v1874_v19, %v1877_v63  ;;  %vm1970_vm14 = vcmp.gt.s32.totalorder %v1969_v23, 0 }
 0x2cf   : > { %v16925_v27 = vand.u32 2147483647, %v12434_v31  ;;  %v10290_v9 = vadd.s32 4294967294, %v1819_v4  ;;  %vm1889_vm4 = vcmp.lt.s32.totalorder %v1868_v58, 3  ;;  %v1892_v22 = vsel %vm1890_vm2, %v1880_v1, 2102212464 }
 0x2d0   : > { %v1896_v17 = vsel %vm1890_vm2, %v1883_v6, 920167782  ;;  %v12832_v44 = vsel %vm1753_vm15, %v1837_v36, %v1813_v30  ;;  %v1871_v37 = vshrl.u32 %v16914_v10, %v1870_v39  ;;  %vm1888_vm6 = vcmp.lt.s32.totalorder %v1868_v58, 2 }
 0x2d1   : > { %vm12824_vm3 = vcmp.le.f32.partialorder %v16925_v27, 0.7853982  ;;  %v1897_v24 = vsel %vm1889_vm4, %v1880_v1, %v1896_v17  ;;  %v1731_v57 = vxor.u32 2147483648, %v1730_v5  ;;  %vm10291_vm7 = vcmp.lt.s32.totalorder %v10290_v9, 0 }
 0x2d2   : > { %v1898_v54 = vsel %vm1888_vm6, %v1895_v12, %v1897_v24  ;;  %v1899_v4 = vsel %vm1887_vm1, %v1877_v63, %v1880_v1  ;;  %v1822_v40 = vsel %vm10291_vm7, 0, %v10290_v9  ;;  %v1891_v46 = vsel %vm1887_vm1, %v1871_v37, %v1874_v19 }
 0x2d3   : > { %v1893_v14 = vsel %vm1889_vm4, %v1877_v63, %v1892_v22  ;;  %v1900_v27 = vsel %vm1890_vm2, %v1886_v55, 1326507024  ;;  %v1823_v30 = vsub.s32 32, %v1822_v40  ;;  %v1824_v36 = vshll.u32 %v12799_v34, %v1822_v40 }
 0x2d4   : > { %v1827_v39 = vsub.s32 4294967266, %v1822_v40  ;;  %v1901_v51 = vsel %vm1889_vm4, %v1883_v6, %v1900_v27  ;;  %v12845_v26 = vmul.u32.u64.low %v12792_v21, %v1898_v54  ;;  %v12846_v12 = vmul.u32.u64.high %v12792_v21, %v1898_v54, %v12845_v26 }
 0x2d5   : > { %v1902_v17 = vsel %vm1888_vm6, %v1899_v4, %v1901_v51  ;;  %v1971_v1 = vsel %vm1970_vm14, %v1969_v23, 0  ;;  %v1825_v19 = vshrl.u32 %v12788_v42, %v1823_v30  ;;  %v12856_v34 = vand.u32 3, %v12782_v2 }
 0x2d6   : > { %v1828_v63 = vadd.s32 127, %v1827_v39  ;;  %v12852_v55 = vmul.u32.u64.low %v12792_v21, %v1902_v17  ;;  %v12853_v9 = vmul.u32.u64.high %v12792_v21, %v1902_v17, %v12852_v55  ;;  %v1894_v6 = vsel %vm1888_vm6, %v1891_v46, %v1893_v14 }
 0x2d7   : > { %v1973_v51 = vand.u32 31, %v1971_v1  ;;  %v1826_v37 = vor.u32 %v1825_v19, %v1824_v36  ;;  %v12860_v54 = vshll.u32 %v1967_v33, 8  ;;  %v2067_v23 = vshrl.u32 %v2066_v60, 23 }
 0x2d8   : > { %v1829_v24 = vshll.u32 %v1828_v63, 23  ;;  %v1732_v42 = vsel %vm1649_vm11, %v1731_v57, %v1730_v5  ;;  %v1840_v4 = vsel %vm12824_vm3, 0, %v12832_v44  ;;  %v1913_v2 = vadd.s32 1, %v12846_v12 }
 0x2d9   : > { %v1974_v40 = vsub.s32 32, %v1973_v51  ;;  %v1910_v46 = vmul.u32 %v12792_v21, %v1894_v6  ;;  %vm1912_vm5 = vc.u32 %v12853_v9, %v12845_v26  ;;  %v1976_v33 = vshll.u32 %v16914_v10, %v1973_v51 }
 0x2da   : > { %v1830_v58 = vor.u32 4788187, %v1829_v24  ;;  %v1914_v60 = vsel %vm1912_vm5, %v1913_v2, %v12846_v12  ;;  %v1979_v5 = vshll.u32 %v16910_v56, %v1973_v51  ;;  %v1833_v27 = vcvt.s32.f32 %v1826_v37 }
 0x2db   : > { %v1977_v14 = vshrl.u32 %v16910_v56, %v1974_v40  ;;  %v1980_v57 = vshrl.u32 %v16911_v3, %v1974_v40  ;;  %v1915_v30 = vadd.s32 %v1914_v60, %v1910_v46  ;;  %v1983_v36 = vshrl.u32 %v16912_v29, %v1974_v40 }
 0x2dc   : > { %v1831_v44 = vand.u32 2147483647, %v1830_v58  ;;  %v1972_v39 = vshrl.u32 %v1971_v1, 5  ;;  %v1982_v21 = vshll.u32 %v16911_v3, %v1973_v51  ;;  %v1985_v17 = vshll.u32 %v16912_v29, %v1973_v51 }
 0x2dd   : > { %v1986_v19 = vshrl.u32 %v16915_v53, %v1974_v40  ;;  %vm1857_vm8 = vcmp.lt.s32.totalorder %v12436_v32, 0  ;;  %v1916_v12 = vadd.s32 536870912, %v1915_v30  ;;  %v1978_v55 = vor.u32 %v1977_v14, %v1976_v33 }
 0x2de   : > { %v1834_v63 = vmul.f32 %v1833_v27, %v1831_v44  ;;  %v1981_v6 = vor.u32 %v1980_v57, %v1979_v5  ;;  %v1984_v24 = vor.u32 %v1983_v36, %v1982_v21  ;;  %v1988_v37 = vshll.u32 %v16915_v53, %v1973_v51 }
 0x2df   : > { %v1987_v2 = vor.u32 %v1986_v19, %v1985_v17  ;;  %v1989_v58 = vshrl.u32 %v16913_v25, %v1974_v40  ;;  %v1735_v1 = vsel %vm12738_vm9, %v12431_v20, %v1732_v42  ;;  %v12886_v46 = vadd.s32 3, %v1840_v4 }
 0x2e0   : > { %v1917_v60 = vshrl.u32 %v1916_v12, 30  ;;  %v10300_v22 = vadd.s32 4294967169, %v2067_v23  ;;  %v16928_v44 = vand.u32 2147483647, %v12436_v32  ;;  %v1975_v33 = vshrl.u32 %v16914_v10, %v1974_v40 }
 0x2e1   : > { %v1990_v14 = vor.u32 %v1989_v58, %v1988_v37  ;;  %vm1991_vm10 = vcmp.lt.s32.totalorder %v1972_v39, 1  ;;  %v16931_v51 = vand.u32 2147483647, %v12449_v50  ;;  %v1835_v57 = vxor.u32 2147483648, %v1834_v63 }
 0x2e2   : > { %vm12890_vm11 = vcmp.le.f32.partialorder %v16928_v44, 0.7853982  ;;  %v1918_v48 = vshll.u32 %v1917_v60, 30  ;;  %vm1994_vm9 = vcmp.lt.s32.totalorder %v1972_v39, 4  ;;  %v1999_v42 = vsel %vm1991_vm10, %v1978_v55, %v1981_v6 }
 0x2e3   : > { %v2070_v5 = vand.u32 8388607, %v16931_v51  ;;  %v1941_v4 = vsub.s32 4, %v1917_v60  ;;  %vm1993_vm12 = vcmp.lt.s32.totalorder %v1972_v39, 3  ;;  %v1996_v23 = vsel %vm1994_vm9, %v1984_v24, 2102212464 }
 0x2e4   : > { %v2000_v36 = vsel %vm1994_vm9, %v1987_v2, 920167782  ;;  %v12897_v21 = vsub.s32 %v1915_v30, %v1918_v48  ;;  %vm1992_vm13 = vcmp.lt.s32.totalorder %v1972_v39, 2  ;;  %v2003_v19 = vsel %vm1991_vm10, %v1981_v6, %v1984_v24 }
 0x2e5   : > { %v2001_v17 = vsel %vm1993_vm12, %v1984_v24, %v2000_v36  ;;  %v1995_v12 = vsel %vm1991_vm10, %v1975_v33, %v1978_v55  ;;  %v2004_v37 = vsel %vm1994_vm9, %v1990_v14, 1326507024  ;;  %v2073_v58 = vadd.s32 1, %v10300_v22 }
 0x2e6   : > { %v2002_v40 = vsel %vm1992_vm13, %v1999_v42, %v2001_v17  ;;  %v1836_v44 = vsel %vm1753_vm15, %v1835_v57, %v1834_v63  ;;  %v1921_v51 = vsub.s32 0, %v12897_v21  ;;  %v1997_v50 = vsel %vm1993_vm12, %v1981_v6, %v1996_v23 }
 0x2e7   : > { %v2005_v0 = vsel %vm1993_vm12, %v1987_v2, %v2004_v37  ;;  %v1942_v62 = vsel %vm1857_vm8, %v1941_v4, %v1917_v60  ;;  %v12907_v48 = vmul.u32.u64.low %v12860_v54, %v2002_v40  ;;  %v12908_v24 = vmul.u32.u64.high %v12860_v54, %v2002_v40, %v12907_v48 }
 0x2e8   : > { %v2006_v30 = vsel %vm1992_vm13, %v2003_v19, %v2005_v0  ;;  %11362 = vcosq.f32 %v1735_v1  ;;  %v10293_v22 = vmin.u32 %v1921_v51, %v12897_v21  ;;  %v12919_v6 = vsel %vm12824_vm3, %v12434_v31, %v1836_v44 }
 0x2e9   : > { %v12913_v55 = vmul.u32.u64.low %v12860_v54, %v2006_v30  ;;  %v12914_v63 = vmul.u32.u64.high %v12860_v54, %v2006_v30, %v12913_v55  ;;  %v1998_v2 = vsel %vm1992_vm13, %v1995_v12, %v1997_v50  ;;  %v2071_v0 = vor.u32 8388608, %v2070_v5 }
 0x2ea   : > { %vm2074_vm15 = vcmp.gt.s32.totalorder %v2073_v58, 0  ;;  %11364 = vsinq.f32 %v1735_v1  ;;  %v1923_v60 = vclz %v10293_v22  ;;  %v1944_v33 = vsel %vm12890_vm11, 0, %v1942_v62 }
 0x2eb   : > { %v2075_v14 = vsel %vm2074_vm15, %v2073_v58, 0  ;;  %v1911_v57 = vadd.s32 %v12845_v26, %v12853_v9  ;;  %v2017_v42 = vadd.s32 1, %v12908_v24  ;;  %v12928_v41 = vmul.f32 1.442695, %v12467_v35 }
 0x2ec   : > { %v2077_v4 = vand.u32 31, %v2075_v14  ;;  %11366 = vcosq.f32 %v12919_v6  ;;  %v10294_v50 = vadd.s32 4294967294, %v1923_v60  ;;  %v2014_v39 = vmul.u32 %v12860_v54, %v1998_v2 }
 0x2ed   : > { %vm2016_vm1 = vc.u32 %v12914_v63, %v12907_v48  ;;  %v12934_v1 = vadd.s32 3, %v1944_v33  ;;  %v12937_v26 = vshll.u32 %v2071_v0, 8  ;;  %v12939_v23 = vshrl.u32 %v2075_v14, 5 }
 0x2ee   : > { %v2018_v62 = vsel %vm2016_vm1, %v2017_v42, %v12908_v24  ;;  %v2078_v5 = vsub.s32 32, %v2077_v4  ;;  %vm10295_vm2 = vcmp.lt.s32.totalorder %v10294_v50, 0  ;;  %v1321_v35 = vmul.f32 1.442695, %v12473_v52 }
 0x2ef   : > { %v2019_v9 = vadd.s32 %v2018_v62, %v2014_v39  ;;  %v1926_v36 = vsel %vm10295_vm2, 0, %v10294_v50  ;;  %v2080_v17 = vshll.u32 %v16914_v10, %v2077_v4  ;;  %vm1961_vm14 = vcmp.lt.s32.totalorder %v12444_v43, 0 }
 0x2f0   : > { %v2081_v54 = vshrl.u32 %v16910_v56, %v2078_v5  ;;  %v2084_v19 = vshrl.u32 %v16911_v3, %v2078_v5  ;;  %v1927_v12 = vsub.s32 32, %v1926_v36  ;;  %v1931_v40 = vsub.s32 4294967266, %v1926_v36 }
 0x2f1   : > { %v2020_v37 = vadd.s32 536870912, %v2019_v9  ;;  %v2083_v58 = vshll.u32 %v16910_v56, %v2077_v4  ;;  %v2086_v44 = vshll.u32 %v16911_v3, %v2077_v4  ;;  %v2087_v51 = vshrl.u32 %v16912_v29, %v2078_v5 }
 0x2f2   : > { %v2089_v52 = vshll.u32 %v16912_v29, %v2077_v4  ;;  %v2090_v30 = vshrl.u32 %v16915_v53, %v2078_v5  ;;  %v12951_v24 = vpop.eup %11362  ;;  %v1928_v22 = vshll.u32 %v12897_v21, %v1926_v36  ;;  %v1929_v55 = vshrl.u32 %v1911_v57, %v1927_v12 }
 0x2f3   : > { %v1932_v2 = vadd.s32 127, %v1931_v40  ;;  %v2021_v0 = vshrl.u32 %v2020_v37, 30  ;;  %v16932_v60 = vand.u32 2147483647, %v12444_v43  ;;  %v2082_v14 = vor.u32 %v2081_v54, %v2080_v17 }
 0x2f4   : > { %v2085_v42 = vor.u32 %v2084_v19, %v2083_v58  ;;  %v2092_v50 = vshll.u32 %v16915_v53, %v2077_v4  ;;  %v2093_v39 = vshrl.u32 %v16913_v25, %v2078_v5  ;;  %v12962_v62 = vpop.eup %11364  ;;  %v1930_v29 = vor.u32 %v1929_v55, %v1928_v22 }
 0x2f5   : > { %vm12956_vm3 = vcmp.le.f32.partialorder %v16932_v60, 0.7853982  ;;  %v1933_v3 = vshll.u32 %v1932_v2, 23  ;;  %v2022_v21 = vshll.u32 %v2021_v0, 30  ;;  %v2088_v57 = vor.u32 %v2087_v51, %v2086_v44 }
 0x2f6   : > { %v2045_v36 = vsub.s32 4, %v2021_v0  ;;  %v2091_v12 = vor.u32 %v2090_v30, %v2089_v52  ;;  %v2094_v40 = vor.u32 %v2093_v39, %v2092_v50  ;;  %v1325_v37 = vmul.f32 1.442695, %v12495_v16  ;;  %v12965_v60 = vpop.eup %11366 }
 0x2f7   : > { %v1934_v56 = vor.u32 4788187, %v1933_v3  ;;  %v12967_v17 = vsub.s32 %v2019_v9, %v2022_v21  ;;  %v2079_v4 = vshrl.u32 %v16914_v10, %v2078_v5  ;;  %11368 = vpow2.f32 %v1321_v35 }
 0x2f8   : > { %v1937_v54 = vcvt.s32.f32 %v1930_v29  ;;  %vm2095_vm4 = vcmp.lt.s32.totalorder %v12939_v23, 1  ;;  %vm2097_vm6 = vcmp.lt.s32.totalorder %v12939_v23, 3  ;;  %vm2098_vm7 = vcmp.lt.s32.totalorder %v12939_v23, 4 }
 0x2f9   : > { %v1935_v19 = vand.u32 2147483647, %v1934_v56  ;;  %v2025_v58 = vsub.s32 0, %v12967_v17  ;;  %v2100_v44 = vsel %vm2098_vm7, %v2088_v57, 2102212464  ;;  %v2103_v16 = vsel %vm2095_vm4, %v2082_v14, %v2085_v42 }
 0x2fa   : > { %v2046_v3 = vsel %vm1961_vm14, %v2045_v36, %v2021_v0  ;;  %v2104_v9 = vsel %vm2098_vm7, %v2091_v12, 920167782  ;;  %v2107_v51 = vsel %vm2095_vm4, %v2085_v42, %v2088_v57  ;;  %v2108_v52 = vsel %vm2098_vm7, %v2094_v40, 1326507024 }
 0x2fb   : > { %v1938_v5 = vmul.f32 %v1937_v54, %v1935_v19  ;;  %v10297_v29 = vmin.u32 %v2025_v58, %v12967_v17  ;;  %vm2096_vm5 = vcmp.lt.s32.totalorder %v12939_v23, 2  ;;  %v2105_v35 = vsel %vm2097_vm6, %v2088_v57, %v2104_v9 }
 0x2fc   : > { %v2099_v30 = vsel %vm2095_vm4, %v2079_v4, %v2082_v14  ;;  %v2101_v56 = vsel %vm2097_vm6, %v2085_v42, %v2100_v44  ;;  %v2106_v22 = vsel %vm2096_vm5, %v2103_v16, %v2105_v35  ;;  %v2109_v55 = vsel %vm2097_vm6, %v2091_v12, %v2108_v52 }
 0x2fd   : > { %v1939_v2 = vxor.u32 2147483648, %v1938_v5  ;;  %v2027_v0 = vclz %v10297_v29  ;;  %v2048_v50 = vsel %vm12956_vm3, 0, %v2046_v3  ;;  %v2110_v39 = vsel %vm2096_vm5, %v2107_v51, %v2109_v55 }
 0x2fe   : > { %v12991_v21 = vmul.u32.u64.low %v12937_v26, %v2110_v39  ;;  %v12992_v14 = vmul.u32.u64.high %v12937_v26, %v2110_v39, %v12991_v21  ;;  %v12995_v42 = vmul.u32.u64.low %v12937_v26, %v2106_v22  ;;  %v12996_v57 = vmul.u32.u64.high %v12937_v26, %v2106_v22, %v12995_v42 }
 0x2ff   : > { %vm1531_vm10 = vweird.f32 %v12421_v11  ;;  %11370 = vsinq.f32 %v12919_v6  ;;  %v13002_v36 = vand.u32 3, %v12886_v46  ;;  %v10298_v12 = vadd.s32 4294967294, %v2027_v0 }
 0x300   : > { %v2102_v40 = vsel %vm2096_vm5, %v2099_v30, %v2101_v56  ;;  %v13007_v4 = vand.u32 3, %v12934_v1  ;;  %v2015_v54 = vadd.s32 %v12907_v48, %v12914_v63  ;;  %11372 = vpow2.f32 %v12928_v41 }
 0x301   : > { %v1323_v19 = vmul.f32 1.442695, %v12490_v7  ;;  %v11369_v58 = vpop.eup %11368  ;;  %v1940_v6 = vsel %vm1857_vm8, %v1939_v2, %v1938_v5  ;;  %vm10299_vm9 = vcmp.lt.s32.totalorder %v10298_v12, 0  ;;  %v2052_v46 = vadd.s32 3, %v2048_v50 }
 0x302   : > { %v1536_v44 = vxor.u32 2147483648, %v12805_v13  ;;  %v2030_v23 = vsel %vm10299_vm9, 0, %v10298_v12  ;;  %v2118_v16 = vmul.u32 %v12937_v26, %v2102_v40  ;;  %vm2120_vm12 = vc.u32 %v12992_v14, %v12995_v42 }
 0x303   : > { %11374 = vpow2.f32 %v1325_v37  ;;  %v2031_v48 = vsub.s32 32, %v2030_v23  ;;  %v2035_v63 = vsub.s32 4294967266, %v2030_v23  ;;  %v2121_v41 = vadd.s32 1, %v12996_v57 }
 0x304   : > { %vm1535_vm13 = vcmp.eq.s32.totalorder %v12759_v59, 0  ;;  %vm1739_vm15 = vweird.f32 %v12431_v20  ;;  %v1943_v7 = vsel %vm12890_vm11, %v12436_v32, %v1940_v6  ;;  %v2032_v1 = vshll.u32 %v12967_v17, %v2030_v23 }
 0x305   : > { %v1537_v26 = vsel %vm1535_vm13, %v12790_v61, %v1536_v44  ;;  %v1539_v3 = vxor.u32 2147483648, %v12790_v61  ;;  %v2033_v9 = vshrl.u32 %v2015_v54, %v2031_v48  ;;  %v2036_v37 = vadd.s32 127, %v2035_v63 }
 0x306   : > { %v2122_v51 = vsel %vm2120_vm12, %v2121_v41, %v12996_v57  ;;  %vm1538_vm8 = vcmp.eq.s32.totalorder %v12759_v59, 2  ;;  %v1329_v5 = vmul.f32 1.442695, %v12531_v49  ;;  %vm1534_vm1 = vcmp.lt.s32.totalorder %v12759_v59, 2 }
 0x307   : > { %v2123_v52 = vadd.s32 %v2122_v51, %v2118_v16  ;;  %v1540_v27 = vsel %vm1538_vm8, %v1539_v3, %v12805_v13  ;;  %11376 = vcosq.f32 %v1943_v7  ;;  %v2034_v29 = vor.u32 %v2033_v9, %v2032_v1  ;;  %v16936_v3 = vld [vmem:[#allocation34_spill] sm:$0xff]  ;;  %v16937_v51 = vld [vmem:[#allocation37_spill] sm:$0xff] }
 0x308   : > { %v2037_v17 = vshll.u32 %v2036_v37, 23  ;;  %v1541_v35 = vsel %vm1534_vm1, %v1537_v26, %v1540_v27  ;;  %11378 = vsinq.f32 %v1943_v7  ;;  %v1744_v56 = vxor.u32 2147483648, %v12962_v62 }
 0x309   : > { %v2124_v30 = vadd.s32 536870912, %v2123_v52  ;;  %v1542_v61 = vsel %vm1531_vm10, nan, %v1541_v35  ;;  %v13036_v22 = vpop.eup %11370  ;;  %vm1743_vm11 = vcmp.eq.s32.totalorder %v12856_v34, 0  ;;  %v1747_v49 = vxor.u32 2147483648, %v12951_v24 }
 0x30a   : > { %v2038_v55 = vor.u32 4788187, %v2037_v17  ;;  %v13040_v59 = vmul.f32 %v11369_v58, %v1542_v61  ;;  %v11373_v13 = vpop.eup %11372  ;;  %vm1427_vm2 = vweird.f32 %v12417_v8  ;;  %vm1742_vm4 = vcmp.lt.s32.totalorder %v12856_v34, 2 }
 0x30b   : > { %v13043_v2 = vshrl.u32 %v2124_v30, 30  ;;  %v1745_v11 = vsel %vm1743_vm11, %v12951_v24, %v1744_v56  ;;  %vm1746_vm6 = vcmp.eq.s32.totalorder %v12856_v34, 2  ;;  %v2041_v50 = vcvt.s32.f32 %v2034_v29 }
 0x30c   : > { %v2039_v0 = vand.u32 2147483647, %v2038_v55  ;;  %v1748_v39 = vsel %vm1746_vm6, %v1747_v49, %v12962_v62  ;;  %v1432_v21 = vxor.u32 2147483648, %v12784_v28  ;;  %v13050_v12 = vand.u32 3, %v2052_v46 }
 0x30d   : > { %v11375_v57 = vpop.eup %11374  ;;  %v2126_v40 = vshll.u32 %v13043_v2, 30  ;;  %11380 = vpow2.f32 %v1323_v19  ;;  %v1749_v54 = vsel %vm1742_vm4, %v1745_v11, %v1748_v39  ;;  %v1327_v6 = vmul.f32 1.442695, %v12526_v15 }
 0x30e   : > { %v2042_v58 = vmul.f32 %v2041_v50, %v2039_v0  ;;  %v1750_v24 = vsel %vm1739_vm15, nan, %v1749_v54  ;;  %vm1431_vm7 = vcmp.eq.s32.totalorder %v12619_v38, 0  ;;  %v1435_v46 = vxor.u32 2147483648, %v12768_v45 }
 0x30f   : > { %v13057_v34 = vsub.s32 %v2123_v52, %v2126_v40  ;;  %v2170_v62 = vmul.f32 %v11375_v57, %v1750_v24  ;;  %v1433_v44 = vsel %vm1431_vm7, %v12768_v45, %v1432_v21  ;;  %vm1635_vm5 = vweird.f32 %v12429_v18 }
 0x310   : > { %v2043_v23 = vxor.u32 2147483648, %v2042_v58  ;;  %11382 = vpow2.f32 %v1329_v5  ;;  %vm1430_vm10 = vcmp.lt.s32.totalorder %v12619_v38, 2  ;;  %vm1434_vm9 = vcmp.eq.s32.totalorder %v12619_v38, 2 }
 0x311   : > { %v2129_v20 = vsub.s32 0, %v13057_v34  ;;  %v2216_v15 = vand.u32 4294901760, %v13040_v59  ;;  %v2220_v19 = vand.u32 4294901760, %v2170_v62  ;;  %v1436_v16 = vsel %vm1434_vm9, %v1435_v46, %v12784_v28  ;;  %v11377_v48 = vpop.eup %11376  ;;  %v16935_v28 = vld [vmem:[#allocation36_spill] sm:$0xff] }
 0x312   : > { %vm1947_vm12 = vweird.f32 %v12436_v32  ;;  %v2044_v45 = vsel %vm1961_vm14, %v2043_v23, %v2042_v58  ;;  %11384 = vpow2.f32 %v1327_v6  ;;  %v1437_v63 = vsel %vm1430_vm10, %v1433_v44, %v1436_v16  ;;  %v11379_v7 = vpop.eup %11378 }
 0x313   : > { %v1640_v41 = vxor.u32 2147483648, %v12819_v47  ;;  %v2047_v38 = vsel %vm12956_vm3, %v12444_v43, %v2044_v45  ;;  %v10301_v1 = vmin.u32 %v2129_v20, %v13057_v34  ;;  %v13075_v26 = vpack.c.bf16 %v2220_v19, %v2216_v15 }
 0x314   : > { %vm1639_vm13 = vcmp.eq.s32.totalorder %v16935_v28, 0  ;;  %11386 = vcosq.f32 %v2047_v38  ;;  %v1331_v9 = vmul.f32 1.442695, %v16936_v3  ;;  %v1438_v37 = vsel %vm1427_vm2, nan, %v1437_v63 }
 0x315   : > { %v1641_v52 = vsel %vm1639_vm13, %v16937_v51, %v1640_v41  ;;  %11388 = vsinq.f32 %v2047_v38  ;;  %v2131_v5 = vclz %v10301_v1  ;;  %10449 = vmatprep.subr.bf16.mxu1 %v13075_v26  ;;  %v1643_v33 = vxor.u32 2147483648, %v16937_v51 }
 0x316   : > { %v2167_v27 = vmul.f32 %v11373_v13, %v1438_v37  ;;  %v2119_v29 = vadd.s32 %v12995_v42, %v12992_v14  ;;  %vm1638_vm14 = vcmp.lt.s32.totalorder %v16935_v28, 2  ;;  %vm1642_vm3 = vcmp.eq.s32.totalorder %v16935_v28, 2 }
 0x317   : > { %v1952_v17 = vxor.u32 2147483648, %v11379_v7  ;;  %v11381_v35 = vpop.eup %11380  ;;  %v10302_v8 = vadd.s32 4294967294, %v2131_v5  ;;  %v1644_v30 = vsel %vm1642_vm3, %v1643_v33, %v12819_v47  ;;  %vm1951_vm15 = vcmp.eq.s32.totalorder %v13007_v4, 0 }
 0x318   : > { %v1955_v61 = vxor.u32 2147483648, %v11377_v48  ;;  %11390 = vpow2.f32 %v1331_v9  ;;  %v1645_v56 = vsel %vm1638_vm14, %v1641_v52, %v1644_v30  ;;  %vm1954_vm8 = vcmp.eq.s32.totalorder %v13007_v4, 2 }
 0x319   : > { %v1953_v55 = vsel %vm1951_vm15, %v11377_v48, %v1952_v17  ;;  %vm1843_vm1 = vweird.f32 %v12434_v31  ;;  %vm10303_vm11 = vcmp.lt.s32.totalorder %v10302_v8, 0  ;;  %v1646_v14 = vsel %vm1635_vm5, nan, %v1645_v56 }
 0x31a   : > { %vm1950_vm2 = vcmp.lt.s32.totalorder %v13007_v4, 2  ;;  %v1956_v42 = vsel %vm1954_vm8, %v1955_v61, %v11379_v7  ;;  %v11383_v49 = vpop.eup %11382  ;;  %v2134_v13 = vsel %vm10303_vm11, 0, %v10302_v8  ;;  %v2169_v47 = vmul.f32 %v11381_v35, %v1646_v14 }
 0x31b   : > { %v2218_v11 = vand.u32 4294901760, %v2167_v27  ;;  %v1957_v0 = vsel %vm1950_vm2, %v1953_v55, %v1956_v42  ;;  %v2135_v50 = vsub.s32 32, %v2134_v13  ;;  %v2139_v39 = vsub.s32 4294967266, %v2134_v13 }
 0x31c   : > { %v2149_v21 = vsub.s32 4, %v13043_v2  ;;  %v1958_v57 = vsel %vm1947_vm12, nan, %v1957_v0  ;;  %v11385_v40 = vpop.eup %11384  ;;  %v13099_v54 = vsub.f32 %v13040_v59, %v2216_v15  ;;  %v13101_v18 = vsub.f32 %v2170_v62, %v2220_v19 }
 0x31d   : > { %v2222_v4 = vand.u32 4294901760, %v2169_v47  ;;  %v13103_v58 = vmul.f32 %v11383_v49, %v1958_v57  ;;  %vm2051_vm4 = vweird.f32 %v12444_v43  ;;  %v2136_v6 = vshll.u32 %v13057_v34, %v2134_v13 }
 0x31e   : > { %v2137_v24 = vshrl.u32 %v2119_v29, %v2135_v50  ;;  %v2140_v44 = vadd.s32 127, %v2139_v39  ;;  %v1848_v46 = vxor.u32 2147483648, %v13036_v22  ;;  %v11387_v23 = vpop.eup %11386  ;;  %v13110_v20 = vsub.f32 %v2167_v27, %v2218_v11  ;;  %v16938_v29 = vld [vmem:[#allocation33_spill] sm:$0xff] }
 0x31f   : > { %v13108_v32 = vpack.c.bf16 %v2222_v4, %v2218_v11  ;;  %vm1847_vm6 = vcmp.eq.s32.totalorder %v13002_v36, 0  ;;  %v1851_v59 = vxor.u32 2147483648, %v12965_v60  ;;  %v11389_v62 = vpop.eup %11388  ;;  %vm1850_vm7 = vcmp.eq.s32.totalorder %v13002_v36, 2  ;;  %v2175_v39 = vld [vmem:[%s12179_s20] sm:$0xff] }
 0x320   : > { %v2138_v15 = vor.u32 %v2137_v24, %v2136_v6  ;;  %v2141_v19 = vshll.u32 %v2140_v44, 23  ;;  %v1849_v16 = vsel %vm1847_vm6, %v12965_v60, %v1848_v46  ;;  %v13117_v34 = vsub.f32 %v2169_v47, %v2222_v4  ;;  %v16942_v4 = vld [vmem:[#allocation35_spill] sm:$0xff] }
 0x321   : > { %10451 = vmatpush1.bf16.msra.mxu1 %v13108_v32  ;;  %vm1846_vm5 = vcmp.lt.s32.totalorder %v13002_v36, 2  ;;  %v1852_v48 = vsel %vm1850_vm7, %v1851_v59, %v13036_v22  ;;  %v2056_v45 = vxor.u32 2147483648, %v11389_v62  ;;  %vm2055_vm10 = vcmp.eq.s32.totalorder %v13050_v12, 0 }
 0x322   : > { %v2142_v63 = vor.u32 4788187, %v2141_v19  ;;  %v2145_v41 = vcvt.s32.f32 %v2138_v15  ;;  %v1853_v7 = vsel %vm1846_vm5, %v1849_v16, %v1852_v48  ;;  %v11391_v38 = vpop.eup %11390  ;;  %v2059_v28 = vxor.u32 2147483648, %v11387_v23  ;;  %v2176_v15 = vld [vmem:[%s12179_s20 + $0x8] sm:$0xff] }
 0x323   : > { %v1854_v60 = vsel %vm1843_vm1, nan, %v1853_v7  ;;  %v2057_v1 = vsel %vm2055_vm10, %v11387_v23, %v2056_v45  ;;  %v2335_v3 = vand.u32 4294901760, %v13099_v54  ;;  %vm2058_vm9 = vcmp.eq.s32.totalorder %v13050_v12, 2 }
 0x324   : > { %v2143_v9 = vand.u32 2147483647, %v2142_v63  ;;  %v2171_v36 = vmul.f32 %v11385_v40, %v1854_v60  ;;  %v2347_v22 = vand.u32 4294901760, %v13101_v18  ;;  %vm2054_vm12 = vcmp.lt.s32.totalorder %v13050_v12, 2 }
 0x325   : > { %v2060_v37 = vsel %vm2058_vm9, %v2059_v28, %v11389_v62  ;;  %v2336_v51 = vsub.f32 %v13099_v54, %v2335_v3  ;;  %v2341_v52 = vand.u32 4294901760, %v13110_v20  ;;  %vm2065_vm13 = vcmp.lt.s32.totalorder %v16938_v29, 0 }
 0x326   : > { %v2146_v5 = vmul.f32 %v2145_v41, %v2143_v9  ;;  %v2061_v31 = vsel %vm2054_vm12, %v2057_v1, %v2060_v37  ;;  %v2226_v33 = vand.u32 4294901760, %v2171_v36  ;;  %v2348_v27 = vsub.f32 %v13101_v18, %v2347_v22  ;;  %v2177_v37 = vld [vmem:[%s12179_s20 + $0x10] sm:$0xff] }
 0x327   : > { %v2062_v17 = vsel %vm2051_vm4, nan, %v2061_v31  ;;  %v2337_v30 = vand.u32 4294901760, %v2336_v51  ;;  %v16939_v61 = vand.u32 2147483647, %v16938_v29  ;;  %v2150_v55 = vsel %vm2065_vm13, %v2149_v21, %v13043_v2 }
 0x328   : > { %v2147_v35 = vxor.u32 2147483648, %v2146_v5  ;;  %v2173_v8 = vmul.f32 %v11391_v38, %v2062_v17  ;;  %v2349_v12 = vand.u32 4294901760, %v2348_v27  ;;  %v2342_v14 = vsub.f32 %v13110_v20, %v2341_v52 }
 0x329   : > { %vm13136_vm14 = vcmp.le.f32.partialorder %v16939_v61, 0.7853982  ;;  %v2353_v42 = vand.u32 4294901760, %v13117_v34  ;;  %v13143_v13 = vsub.f32 %v2171_v36, %v2226_v33  ;;  %vm2203_vm3 = vcmask 261120  }
 0x32a   : > { %v2148_v49 = vsel %vm2065_vm13, %v2147_v35, %v2146_v5  ;;  %v2230_v43 = vand.u32 4294901760, %v2173_v8  ;;  %v13145_v47 = vpack.c.bf16 %v2349_v12, %v2337_v30  ;;  %v2152_v21 = vsel %vm13136_vm14, 0, %v2150_v55  ;;  %v2178_v35 = vld [vmem:[%s12179_s20 + $0x18] sm:$0xff] }
 0x32b   : > { %v2151_v11 = vsel %vm13136_vm14, %v16938_v29, %v2148_v49  ;;  %v2354_v0 = vsub.f32 %v13117_v34, %v2353_v42  ;;  %v2343_v57 = vand.u32 4294901760, %v2342_v14  ;;  %v1333_v6 = vmul.f32 1.442695, %v16942_v4 }
 0x32c   : > { %11392 = vcosq.f32 %v2151_v11  ;;  %v13151_v50 = vpack.c.bf16 %v2230_v43, %v2226_v33  ;;  %v13153_v2 = vsub.f32 %v2173_v8, %v2230_v43  ;;  %v2365_v24 = vand.u32 4294901760, %v13143_v13 }
 0x32d   : > { %11394 = vsinq.f32 %v2151_v11  ;;  %v2355_v40 = vand.u32 4294901760, %v2354_v0  ;;  %v10464_v46 = vpack.c.bf16 %v13101_v18, %v13099_v54  ;;  %v2205_v23 = vsel %vm2203_vm3, %v2175_v39, 0  ;;  %v2179_v54 = vld [vmem:[%s12181_s15] sm:$0xff] }
 0x32e   : > { %v2377_v44 = vand.u32 4294901760, %v13153_v2  ;;  %v2156_v62 = vadd.s32 3, %v2152_v21  ;;  %v2366_v19 = vsub.f32 %v13143_v13, %v2365_v24  ;;  %v10466_v48 = vpack.c.bf16 %v13117_v34, %v13110_v20  ;;  %v2180_v20 = vld [vmem:[%s12181_s15 + $0x8] sm:$0xff]  ;;  %v2181_v34 = vld [vmem:[%s12181_s15 + $0x10] sm:$0xff] }
 0x32f   : > { %v13164_v59 = vpack.c.bf16 %v2355_v40, %v2343_v57  ;;  %v10470_v45 = vpack.c.bf16 %v13153_v2, %v13143_v13  ;;  %v13173_v63 = vpack.c.bf16 %v2347_v22, %v2335_v3  ;;  %11396 = vpow2.f32 %v1333_v6  ;;  %v2182_v13 = vld [vmem:[%s12181_s15 + $0x18] sm:$0xff] }
 0x330   : > { %v2378_v16 = vsub.f32 %v13153_v2, %v2377_v44  ;;  %v13175_v41 = vand.u32 4294901760, %v2205_v23  ;;  %v2367_v7 = vand.u32 4294901760, %v2366_v19  ;;  %v2208_v60 = vsel %vm2203_vm3, %v2176_v15, 0  ;;  %v10311_v2 = vld [vmem:[%s12172_s11 + $0x78] sm:$0xff] }
 0x331   : > { %v13178_v1 = vpack.c.bf16 %v2353_v42, %v2341_v52  ;;  %v13180_v28 = vpack.c.bf16 %v2377_v44, %v2365_v24  ;;  %v2157_v9 = vand.u32 3, %v2156_v62  ;;  %v2224_v5 = vand.u32 4294901760, %v13103_v58 }
 0x332   : > { %v2379_v38 = vand.u32 4294901760, %v2378_v16  ;;  %v13185_v3 = vsub.f32 %v2205_v23, %v13175_v41  ;;  %v13187_v22 = vand.u32 4294901760, %v2208_v60  ;;  %v2211_v52 = vsel %vm2203_vm3, %v2177_v37, 0 }
 0x333   : > { %vm2162_vm15 = vcmp.eq.s32.totalorder %v2157_v9, 2  ;;  %vm2158_vm8 = vcmp.lt.s32.totalorder %v2157_v9, 2  ;;  %vm2159_vm1 = vcmp.eq.s32.totalorder %v2157_v9, 0  ;;  %v2358_v30 = vsub.f32 %v13103_v58, %v2224_v5 }
 0x334   : > { %v10462_v36 = vpack.c.bf16 %v2379_v38, %v2367_v7  ;;  %v2291_v12 = vand.u32 4294901760, %v13185_v3  ;;  %v13194_v61 = vsub.f32 %v2208_v60, %v13187_v22  ;;  %vm2155_vm11 = vweird.f32 %v16938_v29 }
 0x335   : > { %v13197_v55 = vand.u32 4294901760, %v2211_v52  ;;  %v2214_v49 = vsel %vm2203_vm3, %v2178_v35, 0  ;;  %v2359_v0 = vand.u32 4294901760, %v2358_v30  ;;  %v11833_v18 = vmov 0  }
 0x336   : > { %v11393_v51 = vpop.eup %11392  ;;  %v2292_v11 = vsub.f32 %v13185_v3, %v2291_v12  ;;  %v2302_v58 = vand.u32 4294901760, %v13194_v61  ;;  %v13207_v29 = vand.u32 4294901760, %v2214_v49  ;;  %11348 = vset.pattern.permute.xlu0 %v11833_v18  ;;  %11349 = vset.pattern.permute.xlu1 %v11833_v18 }
 0x337   : > { %v11395_v31 = vpop.eup %11394  ;;  %v2163_v33 = vxor.u32 2147483648, %v11393_v51  ;;  %v13205_v21 = vsub.f32 %v2211_v52, %v13197_v55  ;;  %v2360_v24 = vsub.f32 %v2358_v30, %v2359_v0  ;;  %2185 = vperm.xlu0 %11348, %v2179_v54   ;;  %2195 = vperm.xlu1 %11349, %v2181_v34   ;;  %v10306_v52 = vld [vmem:[%s12172_s11 + $0x50] sm:$0xff] }
 0x338   : > { %v2160_v27 = vxor.u32 2147483648, %v11395_v31  ;;  %v2293_v4 = vand.u32 4294901760, %v2292_v11  ;;  %v2303_v6 = vsub.f32 %v13194_v61, %v2302_v58  ;;  %v13217_v62 = vsub.f32 %v2214_v49, %v13207_v29 }
 0x339   : > { %v2164_v17 = vsel %vm2162_vm15, %v2163_v33, %v11395_v31  ;;  %v11397_v14 = vpop.eup %11396  ;;  %v2313_v23 = vand.u32 4294901760, %v13205_v21  ;;  %v2361_v7 = vand.u32 4294901760, %v2360_v24  ;;  %v10309_v24 = vld [vmem:[%s12172_s11 + $0x68] sm:$0xff] }
 0x33a   : > { %v2161_v8 = vsel %vm2159_vm1, %v11393_v51, %v2160_v27  ;;  %v2304_v38 = vand.u32 4294901760, %v2303_v6  ;;  %v2324_v37 = vand.u32 4294901760, %v13217_v62  ;;  %v16943_v51 = vmov 0.0  }
 0x33b   : > { %v2165_v56 = vsel %vm2158_vm8, %v2161_v8, %v2164_v17  ;;  %v2314_v9 = vsub.f32 %v13205_v21, %v2313_v23  ;;  %2190 = vperm.xlu0 %11348, %v2180_v20   ;;  %2200 = vperm.xlu1 %11349, %v2182_v13   ;;  %v2922_v8 = vsel %vm486_vm0, %v10306_v52, 0  ;;  %v10397_v52 = vld [vmem:[%s12181_s15 + $0x48] sm:$0xff] }
 0x33c   : > { %v2166_v42 = vsel %vm2155_vm11, nan, %v2165_v56  ;;  %v2325_v31 = vsub.f32 %v13217_v62, %v2324_v37  ;;  %v16947_v56 = vld [vmem:[#allocation32_spill] sm:$0xff] }
 0x33d   : > { %v2174_v43 = vmul.f32 %v11397_v14, %v2166_v42  ;;  %v16948_v14 = vld [vmem:[#allocation27_spill] sm:$0xff] }
 0x33e   : > { %v2326_v33 = vand.u32 4294901760, %v2325_v31 }
 0x33f   : > { %v2228_v39 = vand.u32 4294901760, %v2174_v43 }
 0x341   : > { %v13209_v57 = vpack.c.bf16 %v2228_v39, %v2224_v5  ;;  %v2370_v40 = vsub.f32 %v2174_v43, %v2228_v39  ;;  %v16949_v39 = vld [vmem:[#allocation29_spill] sm:$0xff] }
 0x343   : > { %10453 = vmatprep.subr.bf16.mxu1 %v13209_v57  ;;  %v2371_v44 = vand.u32 4294901760, %v2370_v40  ;;  %v10468_v15 = vpack.c.bf16 %v2370_v40, %v2358_v30  ;;  %v10307_v30 = vld [vmem:[%s12172_s11 + $0x58] sm:$0xff] }
 0x344   : > { %10455 = vmatpush1.bf16.msra.mxu1 %v13151_v50  ;;  %v2925_v43 = vsel %vm486_vm0, %v10307_v30, 0  ;;  %v9486_v30 = vld [vmem:[%s12191_s1] sm:$0xff] }
 0x345   : > { %10457 = vmatprep.subr.bf16.mxu1 %v13145_v47  ;;  %v2372_v19 = vsub.f32 %v2370_v40, %v2371_v44  ;;  %v10484_v16 = vpack.c.bf16 %v2371_v44, %v2359_v0  ;;  %v2315_v47 = vand.u32 4294901760, %v2314_v9  ;;  %v10308_v0 = vld [vmem:[%s12172_s11 + $0x60] sm:$0xff] }
 0x346   : > { %v2928_v40 = vsel %vm486_vm0, %v10308_v0, 0 }
 0x347   : > { %2294 = vmatmul.mubr.f32.vlgmr.msra.gmra.mrb[0].mxu1 %v2293_v4  ;;  %v2373_v60 = vand.u32 4294901760, %v2372_v19 }
 0x348   : > { %10459 = vmatpush1.bf16.msra.mxu1 %v13164_v59  ;;  %2299 = vmatprep.mubr.f32.mxu1 %v16943_v51  ;;  %v16945_v59 = vld [vmem:[#allocation26_spill] sm:$0xff] }
 0x349   : > { %v10460_v5 = vpack.c.bf16 %v2373_v60, %v2361_v7 }
 0x34b   : > { %2305 = vmatmul.mubr.f32.gmra.mrb[2].mxu1 %v2304_v38  ;;  %10461 = vmatprep.subr.bf16.mxu1 %v10460_v5 }
 0x34c   : > { %10463 = vmatpush1.bf16.msra.mxu1 %v10462_v36  ;;  %2310 = vmatprep.mubr.f32.mxu1 %v16943_v51 }
 0x34d   : > { %10465 = vmatprep.subr.bf16.mxu1 %v10464_v46 }
 0x34f   : > { %2316 = vmatmul.mubr.f32.gmra.mrb[4].mxu1 %v2315_v47 }
 0x350   : > { %2321 = vmatprep.mubr.f32.mxu1 %v16943_v51 }
 0x353   : > { %2327 = vmatmul.mubr.f32.gmra.mrb[6].mxu1 %v2326_v33 }
 0x354   : > { %2437 = vmatprep.mubr.f32.mxu1 %v16943_v51 }
 0x357   : > { %2439 = vmatmul.mubr.f32.vlgmr.msra.gmra.mrb[0].mxu1 %v13175_v41 }
 0x358   : > { %10467 = vmatpush1.bf16.msra.mxu1 %v10466_v48  ;;  %2444 = vmatprep.mubr.f32.mxu1 %v16943_v51  ;;  %v16946_v48 = vld [vmem:[#allocation31_spill] sm:$0xff] }
 0x359   : > { %10469 = vmatprep.subr.bf16.mxu1 %v10468_v15  ;;  %v2931_v15 = vsel %vm486_vm0, %v10309_v24, 0 }
 0x35a   : > { %v13379_v60 = vand.u32 4294901760, %v2931_v15 }
 0x35b   : > { %2446 = vmatmul.mubr.f32.gmra.mrb[2].mxu1 %v13187_v22 }
 0x35c   : > { %10471 = vmatpush1.bf16.msra.mxu1 %v10470_v45  ;;  %2451 = vmatprep.mubr.f32.mxu1 %v16943_v51  ;;  %v13386_v5 = vsub.f32 %v2931_v15, %v13379_v60 }
 0x35d   : > { %10473 = vmatprep.subr.bf16.mxu1 %v13075_v26 }
 0x35e   : > { %v3063_v33 = vand.u32 4294901760, %v13386_v5 }
 0x35f   : > { %2453 = vmatmul.mubr.f32.gmra.mrb[4].mxu1 %v13197_v55 }
 0x360   : > { %2458 = vmatprep.mubr.f32.mxu1 %v16943_v51  ;;  %v3064_v20 = vsub.f32 %v13386_v5, %v3063_v33 }
 0x362   : > { %v3065_v13 = vand.u32 4294901760, %v3064_v20 }
 0x363   : > { %2460 = vmatmul.mubr.f32.gmra.mrb[6].mxu1 %v13207_v29 }
 0x364   : > { %2546 = vmatprep.mubr.f32.mxu1 %v16943_v51 }
 0x367   : > { %2549 = vmatmul.mubr.f32.vlgmr.msra.gmra.mrb[0].mxu1 %v13185_v3 }
 0x368   : > { %10475 = vmatpush1.bf16.msra.mxu1 %v13108_v32  ;;  %2554 = vmatprep.mubr.f32.mxu1 %v16943_v51 }
 0x369   : > { %10477 = vmatprep.subr.bf16.mxu1 %v13209_v57 }
 0x36b   : > { %2557 = vmatmul.mubr.f32.gmra.mrb[2].mxu1 %v13194_v61 }
 0x36c   : > { %10479 = vmatpush1.bf16.msra.mxu1 %v13151_v50  ;;  %2562 = vmatprep.mubr.f32.mxu1 %v16943_v51 }
 0x36d   : > { %10481 = vmatprep.subr.bf16.mxu1 %v13173_v63  ;;  %v10304_v63 = vld [vmem:[%s12172_s11 + $0x40] sm:$0xff] }
 0x36f   : > { %2565 = vmatmul.mubr.f32.gmra.mrb[4].mxu1 %v13205_v21  ;;  %v13349_v21 = vand.u32 4294901760, %v2925_v43 }
 0x370   : > { %2570 = vmatprep.mubr.f32.mxu1 %v16943_v51 }
 0x371   : > { %v13357_v4 = vsub.f32 %v2925_v43, %v13349_v21 }
 0x373   : > { %2573 = vmatmul.mubr.f32.gmra.mrb[6].mxu1 %v13217_v62  ;;  %v3041_v44 = vand.u32 4294901760, %v13357_v4  ;;  %v13366_v62 = vand.u32 4294901760, %v2928_v40 }
 0x374   : > { %2651 = vmatprep.mubr.f32.mxu1 %v16943_v51 }
 0x375   : > { %v3042_v19 = vsub.f32 %v13357_v4, %v3041_v44  ;;  %v13376_v7 = vsub.f32 %v2928_v40, %v13366_v62 }
 0x377   : > { %2655 = vmatmul.mubr.f32.vlgmr.msra.gmra.mrb[0].mxu1 %v2291_v12  ;;  %v3043_v38 = vand.u32 4294901760, %v3042_v19  ;;  %v3052_v9 = vand.u32 4294901760, %v13376_v7 }
 0x378   : > { %10483 = vmatpush1.bf16.msra.mxu1 %v13178_v1  ;;  %2660 = vmatprep.mubr.f32.mxu1 %v16943_v51  ;;  %v2916_v1 = vsel %vm486_vm0, %v10304_v63, 0  ;;  %v16950_v63 = vld [vmem:[#allocation28_spill] sm:$0xff] }
 0x379   : > { %10485 = vmatprep.subr.bf16.mxu1 %v10484_v16  ;;  %v13312_v36 = vand.u32 4294901760, %v2916_v1  ;;  %v10310_v16 = vld [vmem:[%s12172_s11 + $0x70] sm:$0xff]  ;;  %v3053_v47 = vsub.f32 %v13376_v7, %v3052_v9 }
 0x37b   : > { %2664 = vmatmul.mubr.f32.gmra.mrb[2].mxu1 %v2302_v58  ;;  %v13317_v27 = vsub.f32 %v2916_v1, %v13312_v36  ;;  %v3054_v54 = vand.u32 4294901760, %v3053_v47  ;;  %v16951_v1 = vld [vmem:[#allocation30_spill] sm:$0xff] }
 0x37c   : > { %10487 = vmatpush1.bf16.msra.mxu1 %v13180_v28  ;;  %2669 = vmatprep.mubr.f32.mxu1 %v16943_v51  ;;  %v10305_v28 = vld [vmem:[%s12172_s11 + $0x48] sm:$0xff] }
 0x37d   : > { %10489 = vmatprep.subr.bf16.mxu1 %v13075_v26  ;;  %v16944_v26 = vld [vmem:[#allocation25_spill] sm:$0xff]  ;;  %v2919_v3 = vsel %vm486_vm0, %v10305_v28, 0  ;;  %v3008_v35 = vand.u32 4294901760, %v13317_v27  ;;  %v10349_v28 = vld [vmem:[%s12181_s15 + $0x28] sm:$0xff] }
 0x37e   : > { %v13321_v17 = vand.u32 4294901760, %v2919_v3  ;;  %4628 = vperm.xlu1 %11349, %v10349_v28  }
 0x37f   : > { %2673 = vmatmul.mubr.f32.gmra.mrb[4].mxu1 %v2313_v23  ;;  %v3009_v61 = vsub.f32 %v13317_v27, %v3008_v35 }
 0x380   : > { %2678 = vmatprep.mubr.f32.mxu1 %v16943_v51  ;;  %v13327_v12 = vsub.f32 %v2919_v3, %v13321_v17  ;;  %v10350_v3 = vld [vmem:[%s12181_s15 + $0x30] sm:$0xff] }
 0x381   : > { %v3010_v49 = vand.u32 4294901760, %v3009_v61 }
 0x382   : > { %v3019_v42 = vand.u32 4294901760, %v13327_v12 }
 0x383   : > { %2682 = vmatmul.mubr.f32.gmra.mrb[6].mxu1 %v2324_v37  ;;  %3011 = vmatmul.mubr.f32.vlgmr.msra.gmra.mrb[16].mxu0 %v3010_v49  ;;  %v2934_v37 = vsel %vm486_vm0, %v10310_v16, 0 }
 0x384   : > { %2776 = vmatprep.mubr.f32.mxu1 %v16943_v51  ;;  %v3020_v58 = vsub.f32 %v13327_v12, %v3019_v42  ;;  %3016 = vmatprep.mubr.f32.mxu0 %v16943_v51  ;;  %v13392_v31 = vand.u32 4294901760, %v2934_v37 }
 0x386   : > { %v13398_v18 = vsub.f32 %v2934_v37, %v13392_v31 }
 0x387   : > { %2778 = vmatmul.mubr.f32.vlgmr.msra.gmra.mrb[0].mxu1 %v13175_v41 }
 0x388   : > { %10491 = vmatpush1.bf16.msra.mxu1 %v13108_v32  ;;  %2783 = vmatprep.mubr.f32.mxu1 %v16943_v51  ;;  %v2937_v32 = vsel %vm486_vm0, %v10311_v2, 0  ;;  %v3074_v34 = vand.u32 4294901760, %v13398_v18 }
 0x389   : > { %10493 = vmatprep.subr.bf16.mxu1 %v13209_v57  ;;  %v13291_v46 = vand.u32 4294901760, %v2937_v32  ;;  %v3021_v57 = vand.u32 4294901760, %v3020_v58 }
 0x38a   : > { %v3075_v2 = vsub.f32 %v13398_v18, %v3074_v34 }
 0x38b   : > { %2785 = vmatmul.mubr.f32.gmra.mrb[2].mxu1 %v13187_v22  ;;  %3022 = vmatmul.mubr.f32.gmra.mrb[18].mxu0 %v3021_v57 }
 0x38c   : > { %10495 = vmatpush1.bf16.msra.mxu1 %v13151_v50  ;;  %2790 = vmatprep.mubr.f32.mxu1 %v16943_v51  ;;  %v13296_v50 = vsub.f32 %v2937_v32, %v13291_v46  ;;  %v3076_v32 = vand.u32 4294901760, %v3075_v2 }
 0x38d   : > { %10640 = vmatprep.subr.mxu1 %v16944_v26  ;;  %3027 = vmatprep.mubr.f32.mxu0 %v16943_v51 }
 0x38e   : > { %v3085_v45 = vand.u32 4294901760, %v13296_v50 }
 0x38f   : > { %2792 = vmatmul.mubr.f32.gmra.mrb[4].mxu1 %v13197_v55 }
 0x390   : > { %2797 = vmatprep.mubr.f32.mxu1 %v16943_v51 }
 0x393   : > { %2799 = vmatmul.mubr.f32.gmra.mrb[6].mxu1 %v13207_v29 }
 0x394   : > { %2877 = vmatprep.mubr.f32.mxu1 %v16943_v51 }
 0x397   : > { %2879 = vmatmul.mubr.f32.vlgmr.msra.gmra.mrb[0].mxu1 %v13175_v41  ;;  %v3086_v41 = vsub.f32 %v13296_v50, %v3085_v45 }
 0x398   : > { %2884 = vmatprep.mubr.f32.mxu1 %v16943_v51  ;;  %10641 = vmatpush1.msra.mxu1 %v16945_v59 }
 0x399   : > { %3099 = vmatprep.subr.mxu1 %v16946_v48 }
 0x39b   : > { %2886 = vmatmul.mubr.f32.gmra.mrb[2].mxu1 %v13187_v22  ;;  %v3087_v22 = vand.u32 4294901760, %v3086_v41  ;;  %v10348_v41 = vld [vmem:[%s12181_s15 + $0x20] sm:$0xff] }
 0x39c   : > { %2891 = vmatprep.mubr.f32.mxu1 %v16943_v51  ;;  %4623 = vperm.xlu0 %11348, %v10348_v41  }
 0x39f   : > { %2893 = vmatmul.mubr.f32.gmra.mrb[4].mxu1 %v13197_v55  ;;  %v13334_v55 = vand.u32 4294901760, %v2922_v8 }
 0x3a0   : > { %2898 = vmatprep.mubr.f32.mxu1 %v16943_v51  ;;  %4633 = vperm.xlu0 %11348, %v10350_v3  }
 0x3a1   : > { %v13341_v11 = vsub.f32 %v2922_v8, %v13334_v55  ;;  %v10399_v8 = vld [vmem:[%s12181_s15 + $0x58] sm:$0xff] }
 0x3a3   : > { %2900 = vmatmul.mubr.f32.gmra.mrb[6].mxu1 %v13207_v29  ;;  %v3030_v29 = vand.u32 4294901760, %v13341_v11 }
 0x3a4   : > { %3082 = vmatprep.mubr.f32.mxu1 %v16943_v51 }
 0x3a5   : > { %v3031_v6 = vsub.f32 %v13341_v11, %v3030_v29 }
 0x3a7   : > { %3088 = vmatmul.mubr.f32.vlgmr.msra.gmra.mrb[8].mxu1 %v3087_v22  ;;  %v3032_v23 = vand.u32 4294901760, %v3031_v6  ;;  %v10351_v22 = vld [vmem:[%s12181_s15 + $0x38] sm:$0xff] }
 0x3a8   : > { %3105 = vmatpush1.msra.mxu1 %v16947_v56  ;;  %3168 = vmatprep.mubr.f32.mxu1 %v16943_v51 }
 0x3a9   : > { %3227 = vmatprep.subr.mxu1 %v16948_v14  ;;  %3033 = vmatmul.mubr.f32.gmra.mrb[20].mxu0 %v3032_v23 }
 0x3aa   : > { %3038 = vmatprep.mubr.f32.mxu0 %v16943_v51  ;;  %4638 = vperm.xlu1 %11349, %v10351_v22  }
 0x3ab   : > { %3170 = vmatmul.mubr.f32.vlgmr.msra.gmra.mrb[10].mxu1 %v13312_v36 }
 0x3ac   : > { %3175 = vmatprep.mubr.f32.mxu1 %v16943_v51  ;;  %3230 = vmatpush1.msra.mxu1 %v16949_v39 }
 0x3ad   : > { %3359 = vmatprep.subr.mxu1 %v16944_v26  ;;  %3044 = vmatmul.mubr.f32.gmra.mrb[22].mxu0 %v3043_v38 }
 0x3ae   : > { %3049 = vmatprep.mubr.f32.mxu0 %v16943_v51  ;;  %7065 = vperm.xlu1 %11349, %v10397_v52  }
 0x3af   : > { %3177 = vmatmul.mubr.f32.gmra.mrb[12].mxu1 %v13321_v17 }
 0x3b0   : > { %3182 = vmatprep.mubr.f32.mxu1 %v16943_v51 }
 0x3b1   : > { %3055 = vmatmul.mubr.f32.gmra.mrb[24].mxu0 %v3054_v54 }
 0x3b2   : > { %3060 = vmatprep.mubr.f32.mxu0 %v16943_v51  ;;  %7075 = vperm.xlu1 %11349, %v10399_v8  }
 0x3b3   : > { %3184 = vmatmul.mubr.f32.gmra.mrb[14].mxu1 %v13334_v55 }
 0x3b4   : > { %3189 = vmatprep.mubr.f32.mxu1 %v16943_v51 }
 0x3b5   : > { %3066 = vmatmul.mubr.f32.gmra.mrb[26].mxu0 %v3065_v13 }
 0x3b6   : > { %3071 = vmatprep.mubr.f32.mxu0 %v16943_v51 }
 0x3b7   : > { %3191 = vmatmul.mubr.f32.gmra.mrb[16].mxu1 %v13349_v21 }
 0x3b8   : > { %3196 = vmatprep.mubr.f32.mxu1 %v16943_v51 }
 0x3b9   : > { %3077 = vmatmul.mubr.f32.gmra.mrb[28].mxu0 %v3076_v32 }
 0x3ba   : > { %4725 = vmatprep.mubr.f32.mxu0 %v16943_v51 }
 0x3bb   : > { %3198 = vmatmul.mubr.f32.gmra.mrb[18].mxu1 %v13366_v62 }
 0x3bc   : > { %3203 = vmatprep.mubr.f32.mxu1 %v16943_v51 }
 0x3bf   : > { %3205 = vmatmul.mubr.f32.gmra.mrb[20].mxu1 %v13379_v60 }
 0x3c0   : > { %3210 = vmatprep.mubr.f32.mxu1 %v16943_v51 }
 0x3c3   : > { %3212 = vmatmul.mubr.f32.gmra.mrb[22].mxu1 %v13392_v31 }
 0x3c4   : > { %3217 = vmatprep.mubr.f32.mxu1 %v16943_v51 }
 0x3c7   : > { %3219 = vmatmul.mubr.f32.gmra.mrb[8].mxu1 %v13291_v46 }
 0x3c8   : > { %3293 = vmatprep.mubr.f32.mxu1 %v16943_v51 }
 0x3cb   : > { %3296 = vmatmul.mubr.f32.vlgmr.msra.gmra.mrb[10].mxu1 %v13317_v27  ;;  %v10396_v27 = vld [vmem:[%s12181_s15 + $0x40] sm:$0xff] }
 0x3cc   : > { %3301 = vmatprep.mubr.f32.mxu1 %v16943_v51  ;;  %3361 = vmatpush1.msra.mxu1 %v16945_v59 }
 0x3cd   : > { %3500 = vmatprep.subr.mxu1 %v16950_v63  ;;  %7060 = vperm.xlu0 %11348, %v10396_v27  }
 0x3cf   : > { %3304 = vmatmul.mubr.f32.gmra.mrb[12].mxu1 %v13327_v12 }
 0x3d0   : > { %3309 = vmatprep.mubr.f32.mxu1 %v16943_v51 }
 0x3d3   : > { %3312 = vmatmul.mubr.f32.gmra.mrb[14].mxu1 %v13341_v11 }
 0x3d4   : > { %3317 = vmatprep.mubr.f32.mxu1 %v16943_v51 }
 0x3d7   : > { %3320 = vmatmul.mubr.f32.gmra.mrb[16].mxu1 %v13357_v4 }
 0x3d8   : > { %3325 = vmatprep.mubr.f32.mxu1 %v16943_v51 }
 0x3db   : > { %3328 = vmatmul.mubr.f32.gmra.mrb[18].mxu1 %v13376_v7 }
 0x3dc   : > { %3333 = vmatprep.mubr.f32.mxu1 %v16943_v51 }
 0x3df   : > { %3336 = vmatmul.mubr.f32.gmra.mrb[20].mxu1 %v13386_v5 }
 0x3e0   : > { %3341 = vmatprep.mubr.f32.mxu1 %v16943_v51 }
 0x3e3   : > { %3344 = vmatmul.mubr.f32.gmra.mrb[22].mxu1 %v13398_v18 }
 0x3e4   : > { %3349 = vmatprep.mubr.f32.mxu1 %v16943_v51 }
 0x3e7   : > { %3352 = vmatmul.mubr.f32.gmra.mrb[8].mxu1 %v13296_v50 }
 0x3e8   : > { %3424 = vmatprep.mubr.f32.mxu1 %v16943_v51 }
 0x3eb   : > { %3428 = vmatmul.mubr.f32.vlgmr.msra.gmra.mrb[10].mxu1 %v3008_v35  ;;  %v10398_v35 = vld [vmem:[%s12181_s15 + $0x50] sm:$0xff] }
 0x3ec   : > { %3433 = vmatprep.mubr.f32.mxu1 %v16943_v51  ;;  %3504 = vmatpush1.msra.mxu1 %v16951_v1 }
 0x3ed   : > { %3625 = vmatprep.subr.mxu1 %v16944_v26  ;;  %7070 = vperm.xlu0 %11348, %v10398_v35  }
 0x3ef   : > { %3437 = vmatmul.mubr.f32.gmra.mrb[12].mxu1 %v3019_v42 }
 0x3f0   : > { %3442 = vmatprep.mubr.f32.mxu1 %v16943_v51 }
 0x3f1   : > { %9489 = vperm.xlu0 %11348, %v9486_v30  }
 0x3f3   : > { %3446 = vmatmul.mubr.f32.gmra.mrb[14].mxu1 %v3030_v29 }
 0x3f4   : > { %3451 = vmatprep.mubr.f32.mxu1 %v16943_v51 }
 0x3f7   : > { %3455 = vmatmul.mubr.f32.gmra.mrb[16].mxu1 %v3041_v44 }
 0x3f8   : > { %3460 = vmatprep.mubr.f32.mxu1 %v16943_v51 }
 0x3fb   : > { %3464 = vmatmul.mubr.f32.gmra.mrb[18].mxu1 %v3052_v9 }
 0x3fc   : > { %3469 = vmatprep.mubr.f32.mxu1 %v16943_v51 }
 0x3ff   : > { %3473 = vmatmul.mubr.f32.gmra.mrb[20].mxu1 %v3063_v33 }
 0x400   : > { %3478 = vmatprep.mubr.f32.mxu1 %v16943_v51 }
 0x403   : > { %3482 = vmatmul.mubr.f32.gmra.mrb[22].mxu1 %v3074_v34 }
 0x404   : > { %3487 = vmatprep.mubr.f32.mxu1 %v16943_v51 }
 0x407   : > { %3491 = vmatmul.mubr.f32.gmra.mrb[8].mxu1 %v3085_v45 }
 0x408   : > { %3567 = vmatprep.mubr.f32.mxu1 %v16943_v51 }
 0x40b   : > { %3569 = vmatmul.mubr.f32.vlgmr.msra.gmra.mrb[10].mxu1 %v13312_v36 }
 0x40c   : > { %3574 = vmatprep.mubr.f32.mxu1 %v16943_v51  ;;  %3627 = vmatpush1.msra.mxu1 %v16945_v59 }
 0x40f   : > { %3576 = vmatmul.mubr.f32.gmra.mrb[12].mxu1 %v13321_v17 }
 0x410   : > { %3581 = vmatprep.mubr.f32.mxu1 %v16943_v51 }
 0x413   : > { %3583 = vmatmul.mubr.f32.gmra.mrb[14].mxu1 %v13334_v55 }
 0x414   : > { %3588 = vmatprep.mubr.f32.mxu1 %v16943_v51 }
 0x417   : > { %3590 = vmatmul.mubr.f32.gmra.mrb[16].mxu1 %v13349_v21 }
 0x418   : > { %3595 = vmatprep.mubr.f32.mxu1 %v16943_v51 }
 0x41b   : > { %3597 = vmatmul.mubr.f32.gmra.mrb[18].mxu1 %v13366_v62 }
 0x41c   : > { %3602 = vmatprep.mubr.f32.mxu1 %v16943_v51 }
 0x41f   : > { %3604 = vmatmul.mubr.f32.gmra.mrb[20].mxu1 %v13379_v60 }
 0x420   : > { %3609 = vmatprep.mubr.f32.mxu1 %v16943_v51 }
 0x423   : > { %3611 = vmatmul.mubr.f32.gmra.mrb[22].mxu1 %v13392_v31 }
 0x424   : > { %3616 = vmatprep.mubr.f32.mxu1 %v16943_v51 }
 0x427   : > { %3618 = vmatmul.mubr.f32.gmra.mrb[8].mxu1 %v13291_v46 }
 0x428   : > { %3690 = vmatprep.mubr.f32.mxu1 %v16943_v51 }
 0x42b   : > { %3692 = vmatmul.mubr.f32.vlgmr.msra.gmra.mrb[10].mxu1 %v13312_v36 }
 0x42c   : > { %3697 = vmatprep.mubr.f32.mxu1 %v16943_v51 }
 0x42f   : > { %3699 = vmatmul.mubr.f32.gmra.mrb[12].mxu1 %v13321_v17 }
 0x430   : > { %3704 = vmatprep.mubr.f32.mxu1 %v16943_v51 }
 0x433   : > { %3706 = vmatmul.mubr.f32.gmra.mrb[14].mxu1 %v13334_v55 }
 0x434   : > { %3711 = vmatprep.mubr.f32.mxu1 %v16943_v51 }
 0x437   : > { %3713 = vmatmul.mubr.f32.gmra.mrb[16].mxu1 %v13349_v21 }
 0x438   : > { %3718 = vmatprep.mubr.f32.mxu1 %v16943_v51 }
 0x43b   : > { %3720 = vmatmul.mubr.f32.gmra.mrb[18].mxu1 %v13366_v62 }
 0x43c   : > { %3725 = vmatprep.mubr.f32.mxu1 %v16943_v51 }
 0x43f   : > { %3727 = vmatmul.mubr.f32.gmra.mrb[20].mxu1 %v13379_v60 }
 0x440   : > { %3732 = vmatprep.mubr.f32.mxu1 %v16943_v51 }
 0x443   : > { %3734 = vmatmul.mubr.f32.gmra.mrb[22].mxu1 %v13392_v31 }
 0x444   : > { %3739 = vmatprep.mubr.f32.mxu1 %v16943_v51 }
 0x447   : > { %3741 = vmatmul.mubr.f32.gmra.mrb[8].mxu1 %v13291_v46 }
 0x448   : > { %7162 = vmatprep.mubr.f32.mxu1 %v16943_v51 }
 0x456   : > { %v3012_v49 = vpop.f32.mrb[16].mxu0 }
 0x457   : > { %v3014_v46 = vpop.f32.mrb[17].mxu0 }
 0x45e   : > { %v3023_v43 = vpop.f32.mrb[18].mxu0 }
 0x45f   : > { %v3025_v11 = vpop.f32.mrb[19].mxu0 }
 0x46a   : > { %v13494_v50 = vpop.f32.mrb[0].mxu1 }
 0x46b   : > { %v13496_v45 = vpop.f32.mrb[1].mxu1 }
 0x46e   : > { %v13498_v36 = vpop.f32.mrb[2].mxu1 }
 0x46f   : > { %v13500_v17 = vpop.f32.mrb[3].mxu1 }
 0x472   : > { %v13502_v12 = vpop.f32.mrb[4].mxu1 }
 0x473   : > { %v13504_v61 = vpop.f32.mrb[5].mxu1 }
 0x476   : > { %v13506_v55 = vpop.f32.mrb[6].mxu1 }
 0x477   : > { %v13508_v42 = vpop.f32.mrb[7].mxu1 }
 0x478   : > { %16952 = vst [vmem:[#allocation36_spill] sm:$0xff] %v13508_v42 }
 0x47c   : > { %v13510_v58 = vpop.f32.mrb[20].mxu0 }
 0x47d   : > { %v13512_v0 = vpop.f32.mrb[21].mxu0 }
 0x480   : > { %v13514_v21 = vpop.f32.mrb[22].mxu0 }
 0x481   : > { %v13516_v29 = vpop.f32.mrb[23].mxu0 }
 0x4fe   : > { %v3693_v57 = vpop.f32.mrb[10].mxu1 }
 0x4ff   : > { %v13518_v40 = vadd.f32 %v3693_v57, %v3012_v49  ;;  %v3695_v4 = vpop.f32.mrb[11].mxu1  ;;  %v16954_v57 = vmov 2475754826  }
 0x500   : > { %v13520_v6 = vadd.f32 %v3695_v4, %v3014_v46 }
 0x501   : > { %v16840_v24 = vand.u32 2147483647, %v13518_v40  ;;  %v3766_v44 = vand.u32 2139095040, %v13518_v40  ;;  %vm3765_vm11 = vcmp.lt.s32.totalorder %v13518_v40, 0 }
 0x502   : > { %16953 = vst [vmem:[#allocation34_spill] sm:$0xff] %v13520_v6  ;;  %v16839_v23 = vand.u32 2147483647, %v13520_v6  ;;  %v3870_v62 = vand.u32 2139095040, %v13520_v6  ;;  %v3700_v15 = vpop.f32.mrb[12].mxu1 }
 0x503   : > { %v3767_v19 = vshrl.u32 %v3766_v44, 23  ;;  %v13526_v16 = vadd.f32 %v3700_v15, %v3023_v43  ;;  %v3702_v7 = vpop.f32.mrb[13].mxu1  ;;  %v3770_v38 = vand.u32 8388607, %v16840_v24  ;;  %v16955_v44 = vmov 2131351028  }
 0x504   : > { %v3871_v60 = vshrl.u32 %v3870_v62, 23  ;;  %v3874_v9 = vand.u32 8388607, %v16839_v23  ;;  %v13532_v37 = vadd.f32 %v3702_v7, %v3025_v11  ;;  %v16956_v15 = vmov 2102212464  }
 0x505   : > { %v10312_v5 = vadd.s32 4294967169, %v3767_v19  ;;  %v3974_v31 = vand.u32 2139095040, %v13526_v16  ;;  %v3771_v18 = vor.u32 8388608, %v3770_v38 }
 0x506   : > { %v10316_v47 = vadd.s32 4294967169, %v3871_v60  ;;  %v13535_v33 = vpop.f32.mrb[14].mxu1  ;;  %v3875_v20 = vor.u32 8388608, %v3874_v9 }
 0x507   : > { %v3773_v54 = vadd.s32 1, %v10312_v5  ;;  %v3975_v13 = vshrl.u32 %v3974_v31, 23  ;;  %v13537_v2 = vpop.f32.mrb[15].mxu1  ;;  %v13543_v35 = vshll.u32 %v3771_v18, 8 }
 0x508   : > { %v3877_v34 = vadd.s32 1, %v10316_v47  ;;  %v13547_v30 = vshll.u32 %v3875_v20, 8 }
 0x509   : > { %vm3774_vm2 = vcmp.gt.s32.totalorder %v3773_v54, 0  ;;  %v10320_v41 = vadd.s32 4294967169, %v3975_v13 }
 0x50a   : > { %v3775_v32 = vsel %vm3774_vm2, %v3773_v54, 0  ;;  %vm3878_vm4 = vcmp.gt.s32.totalorder %v3877_v34, 0  ;;  %v13539_v28 = vpop.f32.mrb[16].mxu1 }
 0x50b   : > { %v3776_v3 = vshrl.u32 %v3775_v32, 5  ;;  %v3777_v22 = vand.u32 31, %v3775_v32  ;;  %v3879_v27 = vsel %vm3878_vm4, %v3877_v34, 0  ;;  %v13541_v52 = vpop.f32.mrb[17].mxu1  ;;  %v13550_v11 = vadd.s32 1, %v10320_v41 }
 0x50c   : > { %v13545_v8 = vshrl.u32 %v3879_v27, 5  ;;  %v3881_v43 = vand.u32 31, %v3879_v27 }
 0x50d   : > { %v3778_v49 = vsub.s32 32, %v3777_v22  ;;  %v3780_v46 = vshll.u32 %v16914_v10, %v3777_v22  ;;  %v3783_v4 = vshll.u32 %v16954_v57, %v3777_v22  ;;  %v3786_v62 = vshll.u32 %v16955_v44, %v3777_v22 }
 0x50e   : > { %v3789_v19 = vshll.u32 %v16956_v15, %v3777_v22  ;;  %v3792_v7 = vshll.u32 %v16915_v53, %v3777_v22  ;;  %vm3795_vm6 = vcmp.lt.s32.totalorder %v3776_v3, 1  ;;  %vm3796_vm7 = vcmp.lt.s32.totalorder %v3776_v3, 2 }
 0x50f   : > { %v3781_v38 = vshrl.u32 %v16954_v57, %v3778_v49  ;;  %v3784_v60 = vshrl.u32 %v16955_v44, %v3778_v49  ;;  %v3787_v9 = vshrl.u32 %v16956_v15, %v3778_v49  ;;  %v3779_v5 = vshrl.u32 %v16914_v10, %v3778_v49 }
 0x510   : > { %v3790_v47 = vshrl.u32 %v16915_v53, %v3778_v49  ;;  %v3793_v31 = vshrl.u32 %v16913_v25, %v3778_v49  ;;  %v3882_v34 = vsub.s32 32, %v3881_v43  ;;  %vm3797_vm5 = vcmp.lt.s32.totalorder %v3776_v3, 3 }
 0x511   : > { %v3782_v54 = vor.u32 %v3781_v38, %v3780_v46  ;;  %v3785_v18 = vor.u32 %v3784_v60, %v3783_v4  ;;  %v3788_v20 = vor.u32 %v3787_v9, %v3786_v62  ;;  %vm3798_vm10 = vcmp.lt.s32.totalorder %v3776_v3, 4 }
 0x512   : > { %v3791_v13 = vor.u32 %v3790_v47, %v3789_v19  ;;  %v3794_v32 = vor.u32 %v3793_v31, %v3792_v7  ;;  %v3884_v49 = vshll.u32 %v16914_v10, %v3881_v43  ;;  %v3885_v62 = vshrl.u32 %v16954_v57, %v3882_v34 }
 0x513   : > { %v3799_v41 = vsel %vm3795_vm6, %v3779_v5, %v3782_v54  ;;  %v3800_v22 = vsel %vm3798_vm10, %v3788_v20, 2102212464  ;;  %v3803_v27 = vsel %vm3795_vm6, %v3782_v54, %v3785_v18  ;;  %v3807_v23 = vsel %vm3795_vm6, %v3785_v18, %v3788_v20 }
 0x514   : > { %v3801_v24 = vsel %vm3797_vm5, %v3785_v18, %v3800_v22  ;;  %v3804_v1 = vsel %vm3798_vm10, %v3791_v13, 920167782  ;;  %v3808_v63 = vsel %vm3798_vm10, %v3794_v32, 1326507024  ;;  %v3887_v19 = vshll.u32 %v16954_v57, %v3881_v43  ;;  %v13587_v32 = vpop.f32.mrb[24].mxu0 }
 0x515   : > { %v3805_v46 = vsel %vm3797_vm5, %v3788_v20, %v3804_v1  ;;  %v3809_v4 = vsel %vm3797_vm5, %v3791_v13, %v3808_v63  ;;  %v3802_v7 = vsel %vm3796_vm7, %v3799_v41, %v3801_v24  ;;  %v3888_v9 = vshrl.u32 %v16955_v44, %v3882_v34  ;;  %v13589_v41 = vpop.f32.mrb[18].mxu1 }
 0x516   : > { %v3806_v38 = vsel %vm3796_vm7, %v3803_v27, %v3805_v46  ;;  %v3810_v60 = vsel %vm3796_vm7, %v3807_v23, %v3809_v4  ;;  %v3886_v63 = vor.u32 %v3885_v62, %v3884_v49  ;;  %v3890_v18 = vshll.u32 %v16955_v44, %v3881_v43  ;;  %v13594_v46 = vpop.f32.mrb[25].mxu0  ;;  %v13596_v4 = vpop.f32.mrb[19].mxu1 }
 0x517   : > { %v13573_v5 = vmul.u32.u64.low %v13543_v35, %v3810_v60  ;;  %v13574_v47 = vmul.u32.u64.high %v13543_v35, %v3810_v60, %v13573_v5  ;;  %v13577_v31 = vmul.u32.u64.low %v13543_v35, %v3806_v38  ;;  %v13578_v1 = vmul.u32.u64.high %v13543_v35, %v3806_v38, %v13577_v31 }
 0x518   : > { %v3889_v54 = vor.u32 %v3888_v9, %v3887_v19  ;;  %v3891_v24 = vshrl.u32 %v16956_v15, %v3882_v34  ;;  %v3883_v3 = vshrl.u32 %v16914_v10, %v3882_v34  ;;  %v3893_v23 = vshll.u32 %v16956_v15, %v3881_v43  ;;  %v13609_v9 = vpop.f32.mrb[26].mxu0  ;;  %v13611_v5 = vpop.f32.mrb[20].mxu1 }
 0x519   : > { %v3894_v20 = vshrl.u32 %v16915_v53, %v3882_v34  ;;  %v3897_v13 = vshrl.u32 %v16913_v25, %v3882_v34  ;;  %v3818_v22 = vmul.u32 %v13543_v35, %v3802_v7  ;;  %v3896_v49 = vshll.u32 %v16915_v53, %v3881_v43 }
 0x51a   : > { %v3892_v27 = vor.u32 %v3891_v24, %v3890_v18  ;;  %vm3899_vm9 = vcmp.lt.s32.totalorder %v13545_v8, 1  ;;  %vm3820_vm12 = vc.u32 %v13574_v47, %v13577_v31  ;;  %v3821_v34 = vadd.s32 1, %v13578_v1 }
 0x51b   : > { %v3895_v62 = vor.u32 %v3894_v20, %v3893_v23  ;;  %vm3900_vm13 = vcmp.lt.s32.totalorder %v13545_v8, 2  ;;  %v3898_v19 = vor.u32 %v3897_v13, %v3896_v49  ;;  %vm3901_vm14 = vcmp.lt.s32.totalorder %v13545_v8, 3  ;;  %v13617_v13 = vpop.f32.mrb[27].mxu0 }
 0x51c   : > { %vm3902_vm15 = vcmp.lt.s32.totalorder %v13545_v8, 4  ;;  %v3907_v35 = vsel %vm3899_vm9, %v3886_v63, %v3889_v54  ;;  %v3822_v43 = vsel %vm3820_vm12, %v3821_v34, %v13578_v1  ;;  %v3911_v60 = vsel %vm3899_vm9, %v3889_v54, %v3892_v27  ;;  %v13619_v1 = vpop.f32.mrb[21].mxu1 }
 0x51d   : > { %v3904_v7 = vsel %vm3902_vm15, %v3892_v27, 2102212464  ;;  %v3908_v38 = vsel %vm3902_vm15, %v3895_v62, 920167782  ;;  %v3823_v18 = vadd.s32 %v3822_v43, %v3818_v22  ;;  %v3903_v24 = vsel %vm3899_vm9, %v3883_v3, %v3886_v63 }
 0x51e   : > { %v3909_v23 = vsel %vm3901_vm14, %v3892_v27, %v3908_v38  ;;  %v3912_v20 = vsel %vm3902_vm15, %v3898_v19, 1326507024  ;;  %v3905_v49 = vsel %vm3901_vm14, %v3889_v54, %v3904_v7  ;;  %vm3982_vm8 = vcmp.gt.s32.totalorder %v13550_v11, 0 }
 0x51f   : > { %v3910_v34 = vsel %vm3900_vm13, %v3907_v35, %v3909_v23  ;;  %v3913_v22 = vsel %vm3901_vm14, %v3895_v62, %v3912_v20  ;;  %v3824_v63 = vadd.s32 536870912, %v3823_v18  ;;  %v3983_v35 = vsel %vm3982_vm8, %v13550_v11, 0  ;;  %v2186_v23 = vpop.permute.xlu0 %2185 }
 0x520   : > { %v3914_v3 = vsel %vm3900_vm13, %v3911_v60, %v3913_v22  ;;  %v13631_v27 = vmul.u32.u64.low %v13547_v30, %v3910_v34  ;;  %v13632_v19 = vmul.u32.u64.high %v13547_v30, %v3910_v34, %v13631_v27  ;;  %v3906_v62 = vsel %vm3900_vm13, %v3903_v24, %v3905_v49 }
 0x521   : > { %v13636_v43 = vmul.u32.u64.low %v13547_v30, %v3914_v3  ;;  %v13637_v54 = vmul.u32.u64.high %v13547_v30, %v3914_v3, %v13636_v43  ;;  %v13640_v7 = vshrl.u32 %v3824_v63, 30  ;;  %v3985_v38 = vand.u32 31, %v3983_v35 }
 0x522   : > { %v13646_v60 = vadd.f32 %v13535_v33, %v13510_v58  ;;  %v13650_v20 = vadd.f32 %v13537_v2, %v13512_v0  ;;  %v13654_v34 = vadd.f32 %v13539_v28, %v13514_v21  ;;  %v3925_v22 = vadd.s32 1, %v13632_v19 }
 0x523   : > { %v3826_v11 = vshll.u32 %v13640_v7, 30  ;;  %v16841_v8 = vand.u32 2147483647, %v13526_v16  ;;  %v3986_v24 = vsub.s32 32, %v3985_v38  ;;  %v3922_v49 = vmul.u32 %v13547_v30, %v3906_v62 }
 0x524   : > { %vm3924_vm1 = vc.u32 %v13637_v54, %v13631_v27  ;;  %v13663_v58 = vadd.f32 %v13494_v50, %v2186_v23  ;;  %v13669_v33 = vadd.f32 %v13496_v45, %v2186_v23  ;;  %v13678_v62 = vshrl.u32 %v3983_v35, 5 }
 0x525   : > { %v13665_v0 = vsub.s32 %v3823_v18, %v3826_v11  ;;  %v3926_v21 = vsel %vm3924_vm1, %v3925_v22, %v13632_v19  ;;  %v3989_v28 = vshrl.u32 %v16954_v57, %v3986_v24  ;;  %v3992_v63 = vshrl.u32 %v16955_v44, %v3986_v24 }
 0x526   : > { %16957 = vst [vmem:[#allocation37_spill] sm:$0xff] %v13663_v58  ;;  %16958 = vst [vmem:[#allocation33_spill] sm:$0xff] %v13669_v33  ;;  %v3927_v2 = vadd.s32 %v3926_v21, %v3922_v49  ;;  %v3978_v3 = vand.u32 8388607, %v16841_v8  ;;  %v3995_v50 = vshrl.u32 %v16956_v15, %v3986_v24  ;;  %v4078_v18 = vand.u32 2139095040, %v13532_v37 }
 0x527   : > { %v3829_v30 = vsub.s32 0, %v13665_v0  ;;  %v3988_v45 = vshll.u32 %v16914_v10, %v3985_v38  ;;  %v3991_v19 = vshll.u32 %v16954_v57, %v3985_v38  ;;  %v3994_v11 = vshll.u32 %v16955_v44, %v3985_v38 }
 0x528   : > { %v3928_v43 = vadd.s32 536870912, %v3927_v2  ;;  %v3997_v22 = vshll.u32 %v16956_v15, %v3985_v38  ;;  %v3998_v49 = vshrl.u32 %v16915_v53, %v3986_v24  ;;  %v4001_v14 = vshrl.u32 %v16913_v25, %v3986_v24 }
 0x529   : > { %v10313_v23 = vmin.u32 %v3829_v30, %v13665_v0  ;;  %v3990_v8 = vor.u32 %v3989_v28, %v3988_v45  ;;  %v3993_v39 = vor.u32 %v3992_v63, %v3991_v19  ;;  %v3979_v56 = vor.u32 8388608, %v3978_v3  ;;  %v13711_v19 = vpop.f32.mrb[22].mxu1 }
 0x52a   : > { %v13686_v21 = vshrl.u32 %v3928_v43, 30  ;;  %v3996_v48 = vor.u32 %v3995_v50, %v3994_v11  ;;  %v3999_v59 = vor.u32 %v3998_v49, %v3997_v22  ;;  %v4000_v26 = vshll.u32 %v16915_v53, %v3985_v38  ;;  %16959 = vst [vmem:[#allocation35_spill] sm:$0xff] %v13711_v19  ;;  %v13720_v49 = vpop.f32.mrb[23].mxu1 }
 0x52b   : > { %v3831_v35 = vclz %v10313_v23  ;;  %v4079_v42 = vshrl.u32 %v4078_v18, 23  ;;  %vm4003_vm2 = vcmp.lt.s32.totalorder %v13678_v62, 1  ;;  %vm4005_vm4 = vcmp.lt.s32.totalorder %v13678_v62, 3  ;;  %16961 = vst [vmem:[#allocation39_spill] sm:$0xff] %v13720_v49 }
 0x52c   : > { %v3930_v30 = vshll.u32 %v13686_v21, 30  ;;  %vm4006_vm6 = vcmp.lt.s32.totalorder %v13678_v62, 4  ;;  %v4002_v63 = vor.u32 %v4001_v14, %v4000_v26  ;;  %v4011_v3 = vsel %vm4003_vm2, %v3990_v8, %v3993_v39  ;;  %v13709_v14 = vpop.f32.mrb[28].mxu0 }
 0x52d   : > { %v10314_v33 = vadd.s32 4294967294, %v3831_v35  ;;  %v4012_v50 = vsel %vm4006_vm6, %v3999_v59, 920167782  ;;  %vm4004_vm5 = vcmp.lt.s32.totalorder %v13678_v62, 2  ;;  %v4019_v18 = vshll.u32 %v3979_v56, 8 }
 0x52e   : > { %v13696_v28 = vsub.s32 %v3927_v2, %v3930_v30  ;;  %v4013_v38 = vsel %vm4005_vm4, %v3996_v48, %v4012_v50  ;;  %v3987_v2 = vshrl.u32 %v16914_v10, %v3986_v24  ;;  %v4008_v26 = vsel %vm4006_vm6, %v3996_v48, 2102212464 }
 0x52f   : > { %vm10315_vm7 = vcmp.lt.s32.totalorder %v10314_v33, 0  ;;  %v3849_v11 = vsub.s32 4, %v13640_v7  ;;  %v4014_v22 = vsel %vm4004_vm5, %v4011_v3, %v4013_v38  ;;  %v4015_v56 = vsel %vm4003_vm2, %v3993_v39, %v3996_v48  ;;  %v2191_v38 = vpop.permute.xlu0 %2190 }
 0x530   : > { %v3834_v43 = vsel %vm10315_vm7, 0, %v10314_v33  ;;  %v3933_v45 = vsub.s32 0, %v13696_v28  ;;  %v13718_v33 = vpop.f32.mrb[29].mxu0  ;;  %v4007_v35 = vsel %vm4003_vm2, %v3987_v2, %v3990_v8  ;;  %v4016_v30 = vsel %vm4006_vm6, %v4002_v63, 1326507024 }
 0x531   : > { %v3839_v23 = vsub.s32 4294967266, %v3834_v43  ;;  %16960 = vst [vmem:[#allocation38_spill] sm:$0xff] %v13718_v33  ;;  %v10324_v50 = vadd.s32 4294967169, %v4079_v42  ;;  %v3835_v51 = vsub.s32 32, %v3834_v43  ;;  %v4009_v3 = vsel %vm4005_vm4, %v3993_v39, %v4008_v26 }
 0x532   : > { %v10317_v24 = vmin.u32 %v3933_v45, %v13696_v28  ;;  %v4017_v48 = vsel %vm4005_vm4, %v3999_v59, %v4016_v30  ;;  %v13733_v49 = vmul.u32.u64.low %v4019_v18, %v4014_v22  ;;  %v13734_v19 = vmul.u32.u64.high %v4019_v18, %v4014_v22, %v13733_v49  ;;  %v2196_v59 = vpop.permute.xlu1 %2195  ;;  %v13747_v22 = vpop.f32.mrb[8].mxu1 }
 0x533   : > { %v3840_v58 = vadd.s32 127, %v3839_v23  ;;  %v4018_v45 = vsel %vm4004_vm5, %v4015_v56, %v4017_v48  ;;  %v3819_v42 = vadd.s32 %v13577_v31, %v13574_v47  ;;  %v3850_v8 = vsel %vm3765_vm11, %v3849_v11, %v13640_v7  ;;  %16962 = vst [vmem:[#allocation40_spill] sm:$0xff] %v13747_v22  ;;  %v13763_v62 = vpop.f32.mrb[9].mxu1 }
 0x534   : > { %v3935_v33 = vclz %v10317_v24  ;;  %v13742_v39 = vmul.u32.u64.low %v4019_v18, %v4018_v45  ;;  %v13743_v63 = vmul.u32.u64.high %v4019_v18, %v4018_v45, %v13742_v39  ;;  %v4010_v23 = vsel %vm4004_vm5, %v4007_v35, %v4009_v3  ;;  %16969 = vst [vmem:[#allocation43_spill] sm:$0xff] %v13763_v62 }
 0x535   : > { %v3841_v2 = vshll.u32 %v3840_v58, 23  ;;  %v4085_v56 = vadd.s32 1, %v10324_v50  ;;  %v13750_v24 = vadd.f32 %v13498_v36, %v2191_v38  ;;  %v13753_v47 = vadd.f32 %v13500_v17, %v2191_v38 }
 0x536   : > { %v10318_v26 = vadd.s32 4294967294, %v3935_v33  ;;  %v16965_v31 = vand.u32 2147483647, %v13518_v40  ;;  %v16968_v58 = vand.u32 2147483647, %v13532_v37  ;;  %v3837_v33 = vshrl.u32 %v3819_v42, %v3835_v51 }
 0x537   : > { %16963 = vst [vmem:[#allocation41_spill] sm:$0xff] %v13750_v24  ;;  %16964 = vst [vmem:[#allocation42_spill] sm:$0xff] %v13753_v47  ;;  %v4029_v35 = vadd.s32 1, %v13734_v19  ;;  %vm4086_vm12 = vcmp.gt.s32.totalorder %v4085_v56, 0  ;;  %v4026_v30 = vmul.u32 %v4019_v18, %v4010_v23  ;;  %vm4028_vm13 = vc.u32 %v13743_v63, %v13733_v49 }
 0x538   : > { %vm13757_vm10 = vcmp.le.f32.partialorder %v16965_v31, 0.7853982  ;;  %v4082_v11 = vand.u32 8388607, %v16968_v58  ;;  %vm10319_vm9 = vcmp.lt.s32.totalorder %v10318_v26, 0  ;;  %v3836_v50 = vshll.u32 %v13665_v0, %v3834_v43  ;;  %v13773_v31 = vpop.permute.xlu1 %2200 }
 0x539   : > { %v3852_v36 = vsel %vm13757_vm10, 0, %v3850_v8  ;;  %v3938_v17 = vsel %vm10319_vm9, 0, %v10318_v26  ;;  %v3842_v3 = vor.u32 4788187, %v3841_v2  ;;  %v4030_v38 = vsel %vm4028_vm13, %v4029_v35, %v13734_v19  ;;  %16970 = vst [vmem:[#allocation44_spill] sm:$0xff] %v13773_v31 }
 0x53a   : > { %v3943_v48 = vsub.s32 4294967266, %v3938_v17  ;;  %v3953_v51 = vsub.s32 4, %v13686_v21  ;;  %v4031_v45 = vadd.s32 %v4030_v38, %v4026_v30  ;;  %v4083_v42 = vor.u32 8388608, %v4082_v11 }
 0x53b   : > { %v4087_v39 = vsel %vm4086_vm12, %v4085_v56, 0  ;;  %v3838_v58 = vor.u32 %v3837_v33, %v3836_v50  ;;  %v3939_v8 = vsub.s32 32, %v3938_v17  ;;  %v13776_v23 = vadd.f32 %v13502_v12, %v2196_v59 }
 0x53c   : > { %v3944_v26 = vadd.s32 127, %v3943_v48  ;;  %v4089_v18 = vand.u32 31, %v4087_v39  ;;  %v13779_v0 = vadd.f32 %v13504_v61, %v2196_v59  ;;  %vm3869_vm14 = vcmp.lt.s32.totalorder %v13520_v6, 0 }
 0x53d   : > { %16971 = vst [vmem:[#allocation45_spill] sm:$0xff] %v13776_v23  ;;  %v4032_v43 = vadd.s32 536870912, %v4031_v45  ;;  %v3843_v19 = vand.u32 2147483647, %v3842_v3  ;;  %v3923_v2 = vadd.s32 %v13631_v27, %v13637_v54  ;;  %v4182_v11 = vand.u32 2139095040, %v13646_v60 }
 0x53e   : > { %16972 = vst [vmem:[#allocation46_spill] sm:$0xff] %v13779_v0  ;;  %v4090_v56 = vsub.s32 32, %v4089_v18  ;;  %v13787_v33 = vadd.f32 %v13506_v55, %v13773_v31  ;;  %v13789_v35 = vadd.s32 3, %v3852_v36  ;;  %v13794_v12 = vsel %vm3869_vm14, %v3953_v51, %v13686_v21 }
 0x53f   : > { %v13796_v61 = vshrl.u32 %v4032_v43, 30  ;;  %v3845_v59 = vcvt.s32.f32 %v3838_v58  ;;  %v3941_v30 = vshrl.u32 %v3923_v2, %v3939_v8  ;;  %v3945_v50 = vshll.u32 %v3944_v26, 23 }
 0x540   : > { %16973 = vst [vmem:[#allocation47_spill] sm:$0xff] %v13787_v33  ;;  %v13798_v27 = vshll.u32 %v4083_v42, 8  ;;  %v3940_v54 = vshll.u32 %v13696_v28, %v3938_v17  ;;  %v4093_v55 = vshrl.u32 %v16954_v57, %v4090_v56  ;;  %v4092_v38 = vshll.u32 %v16914_v10, %v4089_v18 }
 0x541   : > { %v4034_v3 = vshll.u32 %v13796_v61, 30  ;;  %v3846_v48 = vmul.f32 %v3845_v59, %v3843_v19  ;;  %v4096_v21 = vshrl.u32 %v16955_v44, %v4090_v56  ;;  %v4183_v51 = vshrl.u32 %v4182_v11, 23 }
 0x542   : > { %v4088_v58 = vshrl.u32 %v4087_v39, 5  ;;  %v4095_v42 = vshll.u32 %v16954_v57, %v4089_v18  ;;  %v4099_v8 = vshrl.u32 %v16956_v15, %v4090_v56  ;;  %v3942_v28 = vor.u32 %v3941_v30, %v3940_v54 }
 0x543   : > { %v13806_v43 = vsub.s32 %v4031_v45, %v4034_v3  ;;  %v3946_v17 = vor.u32 4788187, %v3945_v50  ;;  %v4094_v26 = vor.u32 %v4093_v55, %v4092_v38  ;;  %v4098_v2 = vshll.u32 %v16955_v44, %v4089_v18 }
 0x544   : > { %v4097_v19 = vor.u32 %v4096_v21, %v4095_v42  ;;  %v4101_v59 = vshll.u32 %v16956_v15, %v4089_v18  ;;  %v4102_v31 = vshrl.u32 %v16915_v53, %v4090_v56  ;;  %v3847_v11 = vxor.u32 2147483648, %v3846_v48 }
 0x545   : > { %v4037_v36 = vsub.s32 0, %v13806_v43  ;;  %v4027_v45 = vadd.s32 %v13733_v49, %v13743_v63  ;;  %v4104_v39 = vshll.u32 %v16915_v53, %v4089_v18  ;;  %v4105_v3 = vshrl.u32 %v16913_v25, %v4090_v56 }
 0x546   : > { %v4100_v50 = vor.u32 %v4099_v8, %v4098_v2  ;;  %v4103_v54 = vor.u32 %v4102_v31, %v4101_v59  ;;  %v10328_v55 = vadd.s32 4294967169, %v4183_v51  ;;  %v3947_v38 = vand.u32 2147483647, %v3946_v17 }
 0x547   : > { %v10321_v30 = vmin.u32 %v4037_v36, %v13806_v43  ;;  %v4106_v62 = vor.u32 %v4105_v3, %v4104_v39  ;;  %vm4107_vm15 = vcmp.lt.s32.totalorder %v4088_v58, 1  ;;  %v16974_v21 = vand.u32 2147483647, %v13646_v60 }
 0x548   : > { %v3949_v0 = vcvt.s32.f32 %v3942_v28  ;;  %vm4110_vm8 = vcmp.lt.s32.totalorder %v4088_v58, 4  ;;  %v4115_v49 = vsel %vm4107_vm15, %v4094_v26, %v4097_v19  ;;  %v16975_v63 = vand.u32 2147483647, %v13520_v6 }
 0x549   : > { %v13821_v42 = vand.u32 8388607, %v16974_v21  ;;  %v4039_v33 = vclz %v10321_v30  ;;  %vm3973_vm2 = vcmp.lt.s32.totalorder %v13526_v16, 0  ;;  %v4091_v31 = vshrl.u32 %v16914_v10, %v4090_v56 }
 0x54a   : > { %vm13826_vm1 = vcmp.le.f32.partialorder %v16975_v63, 0.7853982  ;;  %vm4108_vm4 = vcmp.lt.s32.totalorder %v4088_v58, 2  ;;  %vm4109_vm6 = vcmp.lt.s32.totalorder %v4088_v58, 3  ;;  %v4116_v36 = vsel %vm4110_vm8, %v4103_v54, 920167782 }
 0x54b   : > { %v10322_v51 = vadd.s32 4294967294, %v4039_v33  ;;  %v4112_v8 = vsel %vm4110_vm8, %v4100_v50, 2102212464  ;;  %v4117_v28 = vsel %vm4109_vm6, %v4100_v50, %v4116_v36  ;;  %v4119_v17 = vsel %vm4107_vm15, %v4097_v19, %v4100_v50 }
 0x54c   : > { %v3950_v2 = vmul.f32 %v3949_v0, %v3947_v38  ;;  %v4111_v59 = vsel %vm4107_vm15, %v4091_v31, %v4094_v26  ;;  %v4118_v39 = vsel %vm4108_vm4, %v4115_v49, %v4117_v28  ;;  %v4120_v3 = vsel %vm4110_vm8, %v4106_v62, 1326507024 }
 0x54d   : > { %vm10323_vm7 = vcmp.lt.s32.totalorder %v10322_v51, 0  ;;  %v4121_v30 = vsel %vm4109_vm6, %v4103_v54, %v4120_v3  ;;  %v13836_v21 = vmul.u32.u64.low %v13798_v27, %v4118_v39  ;;  %v13837_v63 = vmul.u32.u64.high %v13798_v27, %v4118_v39, %v13836_v21 }
 0x54e   : > { %v4042_v56 = vsel %vm10323_vm7, 0, %v10322_v51  ;;  %v4113_v23 = vsel %vm4109_vm6, %v4097_v19, %v4112_v8  ;;  %v4122_v33 = vsel %vm4108_vm4, %v4119_v17, %v4121_v30  ;;  %v4189_v36 = vadd.s32 1, %v10328_v55 }
 0x54f   : > { %v3848_v0 = vsel %vm3765_vm11, %v3847_v11, %v3846_v48  ;;  %v4043_v50 = vsub.s32 32, %v4042_v56  ;;  %v4047_v26 = vsub.s32 4294967266, %v4042_v56  ;;  %v4057_v38 = vsub.s32 4, %v13796_v61 }
 0x550   : > { %v3951_v62 = vxor.u32 2147483648, %v3950_v2  ;;  %v13845_v54 = vmul.u32.u64.low %v13798_v27, %v4122_v33  ;;  %v13846_v49 = vmul.u32.u64.high %v13798_v27, %v4122_v33, %v13845_v54  ;;  %vm4190_vm5 = vcmp.gt.s32.totalorder %v4189_v36, 0 }
 0x551   : > { %v4048_v31 = vadd.s32 127, %v4047_v26  ;;  %v4114_v51 = vsel %vm4108_vm4, %v4111_v59, %v4113_v23  ;;  %v4133_v19 = vadd.s32 1, %v13837_v63  ;;  %v4191_v8 = vsel %vm4190_vm5, %v4189_v36, 0 }
 0x552   : > { %v13851_v55 = vand.u32 3, %v13789_v35  ;;  %v16978_v48 = vand.u32 2147483647, %v13526_v16  ;;  %v4045_v28 = vshrl.u32 %v4027_v45, %v4043_v50  ;;  %v4193_v17 = vand.u32 31, %v4191_v8 }
 0x553   : > { %v13862_v39 = vsel %vm13757_vm10, %v13518_v40, %v3848_v0  ;;  %v3956_v23 = vsel %vm13826_vm1, 0, %v13794_v12  ;;  %v4049_v58 = vshll.u32 %v4048_v31, 23  ;;  %v4058_v35 = vsel %vm3973_vm2, %v4057_v38, %v13796_v61 }
 0x554   : > { %vm13855_vm11 = vcmp.le.f32.partialorder %v16978_v48, 0.7853982  ;;  %v4044_v59 = vshll.u32 %v13806_v43, %v4042_v56  ;;  %v4130_v3 = vmul.u32 %v13798_v27, %v4114_v51  ;;  %vm4132_vm9 = vc.u32 %v13846_v49, %v13836_v21 }
 0x555   : > { %v4194_v45 = vsub.s32 32, %v4193_v17  ;;  %v3952_v7 = vsel %vm3869_vm14, %v3951_v62, %v3950_v2  ;;  %v4050_v30 = vor.u32 4788187, %v4049_v58  ;;  %v4134_v33 = vsel %vm4132_vm9, %v4133_v19, %v13837_v63 }
 0x556   : > { %v4187_v12 = vor.u32 8388608, %v13821_v42  ;;  %v4046_v36 = vor.u32 %v4045_v28, %v4044_v59  ;;  %v4135_v0 = vadd.s32 %v4134_v33, %v4130_v3  ;;  %v4192_v56 = vshrl.u32 %v4191_v8, 5 }
 0x557   : > { %v4197_v61 = vshrl.u32 %v16954_v57, %v4194_v45  ;;  %v4200_v43 = vshrl.u32 %v16955_v44, %v4194_v45  ;;  %v4196_v27 = vshll.u32 %v16914_v10, %v4193_v17  ;;  %v4199_v50 = vshll.u32 %v16954_v57, %v4193_v17 }
 0x558   : > { %v4203_v26 = vshrl.u32 %v16956_v15, %v4194_v45  ;;  %v4051_v38 = vand.u32 2147483647, %v4050_v30  ;;  %v4136_v2 = vadd.s32 536870912, %v4135_v0  ;;  %v4205_v62 = vshll.u32 %v16956_v15, %v4193_v17 }
 0x559   : > { %v4206_v63 = vshrl.u32 %v16915_v53, %v4194_v45  ;;  %v4198_v42 = vor.u32 %v4197_v61, %v4196_v27  ;;  %v4201_v54 = vor.u32 %v4200_v43, %v4199_v50  ;;  %v4202_v31 = vshll.u32 %v16955_v44, %v4193_v17 }
 0x55a   : > { %v4209_v51 = vshrl.u32 %v16913_v25, %v4194_v45  ;;  %11398 = vcosq.f32 %v13862_v39  ;;  %v4053_v19 = vcvt.s32.f32 %v4046_v36  ;;  %v13888_v8 = vshrl.u32 %v4136_v2, 30 }
 0x55b   : > { %v4207_v48 = vor.u32 %v4206_v63, %v4205_v62  ;;  %v13893_v28 = vsel %vm13826_vm1, %v13520_v6, %v3952_v7  ;;  %v4060_v58 = vsel %vm13855_vm11, 0, %v4058_v35  ;;  %v4204_v59 = vor.u32 %v4203_v26, %v4202_v31 }
 0x55c   : > { %v4208_v3 = vshll.u32 %v16915_v53, %v4193_v17  ;;  %v4054_v30 = vmul.f32 %v4053_v19, %v4051_v38  ;;  %v4138_v33 = vshll.u32 %v13888_v8, 30  ;;  %vm4211_vm10 = vcmp.lt.s32.totalorder %v4192_v56, 1 }
 0x55d   : > { %vm4214_vm12 = vcmp.lt.s32.totalorder %v4192_v56, 4  ;;  %v4219_v61 = vsel %vm4211_vm10, %v4198_v42, %v4201_v54  ;;  %v4227_v27 = vshll.u32 %v4187_v12, 8  ;;  %vm4213_vm13 = vcmp.lt.s32.totalorder %v4192_v56, 3 }
 0x55e   : > { %v4210_v36 = vor.u32 %v4209_v51, %v4208_v3  ;;  %v4220_v43 = vsel %vm4214_vm12, %v4207_v48, 920167782  ;;  %v13901_v18 = vsub.s32 %v4135_v0, %v4138_v33  ;;  %v16846_v7 = vand.u32 2147483647, %v13650_v20 }
 0x55f   : > { %v4286_v35 = vand.u32 2139095040, %v13650_v20  ;;  %v4195_v17 = vshrl.u32 %v16914_v10, %v4194_v45  ;;  %vm4212_vm14 = vcmp.lt.s32.totalorder %v4192_v56, 2  ;;  %v4216_v50 = vsel %vm4214_vm12, %v4204_v59, 2102212464 }
 0x560   : > { %v4221_v26 = vsel %vm4213_vm13, %v4204_v59, %v4220_v43  ;;  %v4055_v38 = vxor.u32 2147483648, %v4054_v30  ;;  %v4141_v2 = vsub.s32 0, %v13901_v18  ;;  %v4223_v12 = vsel %vm4211_vm10, %v4201_v54, %v4204_v59 }
 0x561   : > { %v4222_v62 = vsel %vm4212_vm14, %v4219_v61, %v4221_v26  ;;  %v4215_v0 = vsel %vm4211_vm10, %v4195_v17, %v4198_v42  ;;  %v4224_v63 = vsel %vm4214_vm12, %v4210_v36, 1326507024  ;;  %v4217_v19 = vsel %vm4213_vm13, %v4201_v54, %v4216_v50 }
 0x562   : > { %v13913_v31 = vmul.u32.u64.low %v4227_v27, %v4222_v62  ;;  %v13914_v51 = vmul.u32.u64.high %v4227_v27, %v4222_v62, %v13913_v31  ;;  %v10325_v45 = vmin.u32 %v4141_v2, %v13901_v18  ;;  %v4225_v3 = vsel %vm4213_vm13, %v4207_v48, %v4224_v63 }
 0x563   : > { %v4287_v33 = vshrl.u32 %v4286_v35, 23  ;;  %11400 = vsinq.f32 %v13862_v39  ;;  %v3960_v61 = vadd.s32 3, %v3956_v23  ;;  %v4064_v43 = vadd.s32 3, %v4060_v58 }
 0x564   : > { %vm4077_vm15 = vcmp.lt.s32.totalorder %v13532_v37, 0  ;;  %v4226_v42 = vsel %vm4212_vm14, %v4223_v12, %v4225_v3  ;;  %v13923_v59 = vpop.eup %11398  ;;  %v4143_v36 = vclz %v10325_v45  ;;  %11402 = vcosq.f32 %v13893_v28 }
 0x565   : > { %v13925_v17 = vmul.u32.u64.low %v4227_v27, %v4226_v42  ;;  %v13926_v26 = vmul.u32.u64.high %v4227_v27, %v4226_v42, %v13925_v17  ;;  %v10332_v2 = vadd.s32 4294967169, %v4287_v33  ;;  %v4218_v54 = vsel %vm4212_vm14, %v4215_v0, %v4217_v19 }
 0x566   : > { %v4237_v48 = vadd.s32 1, %v13914_v51  ;;  %v4290_v39 = vand.u32 8388607, %v16846_v7  ;;  %v4056_v23 = vsel %vm3973_vm2, %v4055_v38, %v4054_v30  ;;  %v10326_v58 = vadd.s32 4294967294, %v4143_v36 }
 0x567   : > { %v4293_v35 = vadd.s32 1, %v10332_v2  ;;  %v4390_v50 = vand.u32 2139095040, %v13654_v34  ;;  %v4131_v62 = vadd.s32 %v13836_v21, %v13846_v49  ;;  %v4161_v12 = vsub.s32 4, %v13888_v8 }
 0x568   : > { %v13941_v56 = vadd.f32 %v13541_v52, %v13516_v29  ;;  %v13945_v0 = vadd.f32 %v13589_v41, %v13587_v32  ;;  %vm10327_vm8 = vcmp.lt.s32.totalorder %v10326_v58, 0  ;;  %v4234_v63 = vmul.u32 %v4227_v27, %v4218_v54 }
 0x569   : > { %vm4236_vm1 = vc.u32 %v13926_v26, %v13913_v31  ;;  %vm4294_vm2 = vcmp.gt.s32.totalorder %v4293_v35, 0  ;;  %v13952_v21 = vsel %vm13855_vm11, %v13526_v16, %v4056_v23  ;;  %v4146_v49 = vsel %vm10327_vm8, 0, %v10326_v58 }
 0x56a   : > { %v4238_v30 = vsel %vm4236_vm1, %v4237_v48, %v13914_v51  ;;  %v4295_v29 = vsel %vm4294_vm2, %v4293_v35, 0  ;;  %v4147_v52 = vsub.s32 32, %v4146_v49  ;;  %v4151_v38 = vsub.s32 4294967266, %v4146_v49 }
 0x56b   : > { %v4239_v45 = vadd.s32 %v4238_v30, %v4234_v63  ;;  %v4391_v32 = vshrl.u32 %v4390_v50, 23  ;;  %11404 = vsinq.f32 %v13893_v28  ;;  %v13956_v41 = vand.u32 3, %v3960_v61 }
 0x56c   : > { %v13958_v27 = vand.u32 3, %v4064_v43  ;;  %v4297_v19 = vand.u32 31, %v4295_v29  ;;  %v4149_v3 = vshrl.u32 %v4131_v62, %v4147_v52  ;;  %v4152_v33 = vadd.s32 127, %v4151_v38 }
 0x56d   : > { %16981 = vst [vmem:[#allocation48_spill] sm:$0xff] %v13956_v41  ;;  %v13963_v11 = vsel %vm4077_vm15, %v4161_v12, %v13888_v8  ;;  %v4240_v51 = vadd.s32 536870912, %v4239_v45  ;;  %v13965_v42 = vpop.eup %11400  ;;  %11406 = vcosq.f32 %v13952_v21  ;;  %v4291_v36 = vor.u32 8388608, %v4290_v39 }
 0x56e   : > { %v4298_v17 = vsub.s32 32, %v4297_v19  ;;  %v4148_v61 = vshll.u32 %v13901_v18, %v4146_v49  ;;  %v4153_v43 = vshll.u32 %v4152_v33, 23  ;;  %v10336_v54 = vadd.s32 4294967169, %v4391_v32  ;;  %v13970_v48 = vpop.eup %11402 }
 0x56f   : > { %v4241_v2 = vshrl.u32 %v4240_v51, 30  ;;  %16982 = vst [vmem:[#allocation49_spill] sm:$0xff] %v13970_v48  ;;  %v4296_v23 = vshrl.u32 %v4295_v29, 5  ;;  %vm4181_vm4 = vcmp.lt.s32.totalorder %v13646_v60, 0  ;;  %v4300_v62 = vshll.u32 %v16914_v10, %v4297_v19 }
 0x570   : > { %v4301_v8 = vshrl.u32 %v16954_v57, %v4298_v17  ;;  %v4304_v58 = vshrl.u32 %v16955_v44, %v4298_v17  ;;  %v4307_v35 = vshrl.u32 %v16956_v15, %v4298_v17  ;;  %v4150_v50 = vor.u32 %v4149_v3, %v4148_v61 }
 0x571   : > { %v4242_v39 = vshll.u32 %v4241_v2, 30  ;;  %v4306_v18 = vshll.u32 %v16955_v44, %v4297_v19  ;;  %v4154_v12 = vor.u32 4788187, %v4153_v43  ;;  %v4303_v63 = vshll.u32 %v16954_v57, %v4297_v19 }
 0x572   : > { %v4309_v49 = vshll.u32 %v16956_v15, %v4297_v19  ;;  %v4310_v30 = vshrl.u32 %v16915_v53, %v4298_v17  ;;  %v4302_v52 = vor.u32 %v4301_v8, %v4300_v62  ;;  %v13983_v32 = vshll.u32 %v4291_v36, 8 }
 0x573   : > { %v13981_v29 = vsub.s32 %v4239_v45, %v4242_v39  ;;  %v4308_v38 = vor.u32 %v4307_v35, %v4306_v18  ;;  %v4305_v3 = vor.u32 %v4304_v58, %v4303_v63  ;;  %v4312_v51 = vshll.u32 %v16915_v53, %v4297_v19 }
 0x574   : > { %v4311_v33 = vor.u32 %v4310_v30, %v4309_v49  ;;  %v4313_v61 = vshrl.u32 %v16913_v25, %v4298_v17  ;;  %v16983_v43 = vand.u32 2147483647, %v13532_v37  ;;  %v4157_v28 = vcvt.s32.f32 %v4150_v50 }
 0x575   : > { %v4245_v45 = vsub.s32 0, %v13981_v29  ;;  %v4299_v8 = vshrl.u32 %v16914_v10, %v4298_v17  ;;  %v4397_v35 = vadd.s32 1, %v10336_v54  ;;  %v13995_v36 = vpop.eup %11404  ;;  %v4155_v58 = vand.u32 2147483647, %v4154_v12 }
 0x576   : > { %vm13989_vm6 = vcmp.le.f32.partialorder %v16983_v43, 0.7853982  ;;  %16986 = vst [vmem:[#allocation50_spill] sm:$0xff] %v13995_v36  ;;  %v16987_v39 = vand.u32 2147483647, %v13646_v60  ;;  %v4265_v62 = vsub.s32 4, %v4241_v2  ;;  %v4314_v18 = vor.u32 %v4313_v61, %v4312_v51 }
 0x577   : > { %vm4318_vm5 = vcmp.lt.s32.totalorder %v4296_v23, 4  ;;  %v10329_v63 = vmin.u32 %v4245_v45, %v13981_v29  ;;  %vm4315_vm11 = vcmp.lt.s32.totalorder %v4296_v23, 1  ;;  %vm4316_vm9 = vcmp.lt.s32.totalorder %v4296_v23, 2  ;;  %v14005_v17 = vpop.eup %11406 }
 0x578   : > { %vm13999_vm7 = vcmp.le.f32.partialorder %v16987_v39, 0.7853982  ;;  %v4320_v50 = vsel %vm4318_vm5, %v4308_v38, 2102212464  ;;  %vm4317_vm10 = vcmp.lt.s32.totalorder %v4296_v23, 3  ;;  %v4319_v54 = vsel %vm4315_vm11, %v4299_v8, %v4302_v52 }
 0x579   : > { %v4323_v12 = vsel %vm4315_vm11, %v4302_v52, %v4305_v3  ;;  %v4324_v49 = vsel %vm4318_vm5, %v4311_v33, 920167782  ;;  %v4247_v30 = vclz %v10329_v63  ;;  %v4321_v43 = vsel %vm4317_vm10, %v4305_v3, %v4320_v50 }
 0x57a   : > { %v4325_v39 = vsel %vm4317_vm10, %v4308_v38, %v4324_v49  ;;  %v4327_v47 = vsel %vm4315_vm11, %v4305_v3, %v4308_v38  ;;  %v4266_v51 = vsel %vm4181_vm4, %v4265_v62, %v4241_v2  ;;  %v4328_v45 = vsel %vm4318_vm5, %v4314_v18, 1326507024 }
 0x57b   : > { %v4326_v61 = vsel %vm4316_vm9, %v4323_v12, %v4325_v39  ;;  %v16990_v24 = vand.u32 2147483647, %v13654_v34  ;;  %v4158_v6 = vmul.f32 %v4157_v28, %v4155_v58  ;;  %v10330_v8 = vadd.s32 4294967294, %v4247_v30 }
 0x57c   : > { %v4329_v52 = vsel %vm4317_vm10, %v4311_v33, %v4328_v45  ;;  %vm4398_vm12 = vcmp.gt.s32.totalorder %v4397_v35, 0  ;;  %v4322_v63 = vsel %vm4316_vm9, %v4319_v54, %v4321_v43  ;;  %v4164_v28 = vsel %vm13989_vm6, 0, %v13963_v11 }
 0x57d   : > { %v14014_v48 = vand.u32 8388607, %v16990_v24  ;;  %v4330_v50 = vsel %vm4316_vm9, %v4327_v47, %v4329_v52  ;;  %v14019_v38 = vmul.u32.u64.low %v13983_v32, %v4326_v61  ;;  %v14020_v3 = vmul.u32.u64.high %v13983_v32, %v4326_v61, %v14019_v38 }
 0x57e   : > { %vm10331_vm13 = vcmp.lt.s32.totalorder %v10330_v8, 0  ;;  %v14024_v2 = vmul.u32.u64.low %v13983_v32, %v4330_v50  ;;  %v14025_v62 = vmul.u32.u64.high %v13983_v32, %v4330_v50, %v14024_v2  ;;  %v4399_v24 = vsel %vm4398_vm12, %v4397_v35, 0 }
 0x57f   : > { %v4235_v33 = vadd.s32 %v13913_v31, %v13926_v26  ;;  %v4250_v23 = vsel %vm10331_vm13, 0, %v10330_v8  ;;  %v4401_v47 = vand.u32 31, %v4399_v24  ;;  %v4268_v54 = vsel %vm13999_vm7, 0, %v4266_v51 }
 0x580   : > { %v4251_v58 = vsub.s32 32, %v4250_v23  ;;  %v4255_v18 = vsub.s32 4294967266, %v4250_v23  ;;  %v4395_v12 = vor.u32 8388608, %v14014_v48  ;;  %v4159_v49 = vxor.u32 2147483648, %v4158_v6 }
 0x581   : > { %v4338_v30 = vmul.u32 %v13983_v32, %v4322_v63  ;;  %v4341_v35 = vadd.s32 1, %v14020_v3  ;;  %v4402_v43 = vsub.s32 32, %v4401_v47  ;;  %v4252_v11 = vshll.u32 %v13981_v29, %v4250_v23 }
 0x582   : > { %v4253_v39 = vshrl.u32 %v4235_v33, %v4251_v58  ;;  %v4256_v61 = vadd.s32 127, %v4255_v18  ;;  %vm4340_vm14 = vc.u32 %v14025_v62, %v14019_v38  ;;  %v4404_v26 = vshll.u32 %v16914_v10, %v4401_v47 }
 0x583   : > { %v4342_v31 = vsel %vm4340_vm14, %v4341_v35, %v14020_v3  ;;  %v4405_v51 = vshrl.u32 %v16954_v57, %v4402_v43  ;;  %v4408_v48 = vshrl.u32 %v16955_v44, %v4402_v43  ;;  %v4400_v52 = vshrl.u32 %v4399_v24, 5 }
 0x584   : > { %v4254_v45 = vor.u32 %v4253_v39, %v4252_v11  ;;  %v4257_v32 = vshll.u32 %v4256_v61, 23  ;;  %v4343_v8 = vadd.s32 %v4342_v31, %v4338_v30  ;;  %v4407_v29 = vshll.u32 %v16954_v57, %v4401_v47 }
 0x585   : > { %v4406_v63 = vor.u32 %v4405_v51, %v4404_v26  ;;  %v4410_v50 = vshll.u32 %v16955_v44, %v4401_v47  ;;  %v4411_v2 = vshrl.u32 %v16956_v15, %v4402_v43  ;;  %v4413_v3 = vshll.u32 %v16956_v15, %v4401_v47 }
 0x586   : > { %v4258_v33 = vor.u32 4788187, %v4257_v32  ;;  %v4344_v23 = vadd.s32 536870912, %v4343_v8  ;;  %v4414_v58 = vshrl.u32 %v16915_v53, %v4402_v43  ;;  %v4261_v18 = vcvt.s32.f32 %v4254_v45 }
 0x587   : > { %v4409_v35 = vor.u32 %v4408_v48, %v4407_v29  ;;  %v4416_v11 = vshll.u32 %v16915_v53, %v4401_v47  ;;  %v4417_v30 = vshrl.u32 %v16913_v25, %v4402_v43  ;;  %v4412_v61 = vor.u32 %v4411_v2, %v4410_v50 }
 0x588   : > { %v4259_v24 = vand.u32 2147483647, %v4258_v33  ;;  %v4345_v39 = vshrl.u32 %v4344_v23, 30  ;;  %v4415_v31 = vor.u32 %v4414_v58, %v4413_v3  ;;  %v4160_v26 = vsel %vm4077_vm15, %v4159_v49, %v4158_v6 }
 0x589   : > { %v4168_v51 = vadd.s32 3, %v4164_v28  ;;  %v4272_v32 = vadd.s32 3, %v4268_v54  ;;  %v4418_v41 = vor.u32 %v4417_v30, %v4416_v11  ;;  %vm4419_vm8 = vcmp.lt.s32.totalorder %v4400_v52, 1 }
 0x58a   : > { %v4262_v36 = vmul.f32 %v4261_v18, %v4259_v24  ;;  %v4346_v22 = vshll.u32 %v4345_v39, 30  ;;  %vm4422_vm1 = vcmp.lt.s32.totalorder %v4400_v52, 4  ;;  %v4403_v48 = vshrl.u32 %v16914_v10, %v4402_v43 }
 0x58b   : > { %v4427_v47 = vsel %vm4419_vm8, %v4406_v63, %v4409_v35  ;;  %v4428_v45 = vsel %vm4422_vm1, %v4415_v31, 920167782  ;;  %v4435_v29 = vshll.u32 %v4395_v12, 8  ;;  %vm4285_vm2 = vcmp.lt.s32.totalorder %v13650_v20, 0 }
 0x58c   : > { %v4263_v33 = vxor.u32 2147483648, %v4262_v36  ;;  %v14056_v50 = vsub.s32 %v4343_v8, %v4346_v22  ;;  %vm4421_vm5 = vcmp.lt.s32.totalorder %v4400_v52, 3  ;;  %v4424_v6 = vsel %vm4422_vm1, %v4412_v61, 2102212464 }
 0x58d   : > { %vm4420_vm15 = vcmp.lt.s32.totalorder %v4400_v52, 2  ;;  %v4429_v28 = vsel %vm4421_vm5, %v4412_v61, %v4428_v45  ;;  %v4431_v54 = vsel %vm4419_vm8, %v4409_v35, %v4412_v61  ;;  %v4432_v49 = vsel %vm4422_vm1, %v4418_v41, 1326507024 }
 0x58e   : > { %v4264_v2 = vsel %vm4181_vm4, %v4263_v33, %v4262_v36  ;;  %v4349_v43 = vsub.s32 0, %v14056_v50  ;;  %v4423_v23 = vsel %vm4419_vm8, %v4403_v48, %v4406_v63  ;;  %v4430_v12 = vsel %vm4420_vm15, %v4427_v47, %v4429_v28  ;;  %v16999_v47 = vld [vmem:[#allocation39_spill] sm:$0xff] }
 0x58f   : > { %v4425_v3 = vsel %vm4421_vm5, %v4409_v35, %v4424_v6  ;;  %v4433_v58 = vsel %vm4421_vm5, %v4415_v31, %v4432_v49  ;;  %v14064_v22 = vmul.u32.u64.low %v4435_v29, %v4430_v12  ;;  %v14065_v8 = vmul.u32.u64.high %v4435_v29, %v4430_v12, %v14064_v22 }
 0x590   : > { %11408 = vsinq.f32 %v13952_v21  ;;  %v14071_v41 = vsel %vm13989_vm6, %v13532_v37, %v4160_v26  ;;  %v10333_v36 = vmin.u32 %v4349_v43, %v14056_v50  ;;  %v4434_v18 = vsel %vm4420_vm15, %v4431_v54, %v4433_v58 }
 0x591   : > { %v4267_v63 = vsel %vm13999_vm7, %v13646_v60, %v4264_v2  ;;  %v4369_v35 = vsub.s32 4, %v4345_v39  ;;  %v14078_v11 = vmul.u32.u64.low %v4435_v29, %v4434_v18  ;;  %v14079_v30 = vmul.u32.u64.high %v4435_v29, %v4434_v18, %v14078_v11 }
 0x592   : > { %v4351_v24 = vclz %v10333_v36  ;;  %v4426_v21 = vsel %vm4420_vm15, %v4423_v23, %v4425_v3  ;;  %v4491_v61 = vand.u32 2147483647, %v13941_v56  ;;  %v4494_v7 = vand.u32 2139095040, %v13941_v56 }
 0x593   : > { %11410 = vcosq.f32 %v14071_v41  ;;  %v14085_v31 = vand.u32 3, %v4168_v51  ;;  %v14087_v26 = vand.u32 3, %v4272_v32  ;;  %v4445_v19 = vadd.s32 1, %v14065_v8 }
 0x594   : > { %11412 = vcosq.f32 %v4267_v63  ;;  %v16991_v48 = vand.u32 2147483647, %v13650_v20  ;;  %v4339_v52 = vadd.s32 %v14019_v38, %v14025_v62  ;;  %v10334_v45 = vadd.s32 4294967294, %v4351_v24 }
 0x595   : > { %v4495_v33 = vshrl.u32 %v4494_v7, 23  ;;  %11414 = vsinq.f32 %v4267_v63  ;;  %v14100_v51 = vsel %vm4285_vm2, %v4369_v35, %v4345_v39  ;;  %v4442_v32 = vmul.u32 %v4435_v29, %v4426_v21 }
 0x596   : > { %vm14092_vm4 = vcmp.le.f32.partialorder %v16991_v48, 0.7853982  ;;  %vm4444_vm6 = vc.u32 %v14079_v30, %v14064_v22  ;;  %vm10335_vm7 = vcmp.lt.s32.totalorder %v10334_v45, 0  ;;  %v4498_v54 = vand.u32 8388607, %v4491_v61 }
 0x597   : > { %v4446_v6 = vsel %vm4444_vm6, %v4445_v19, %v14065_v8  ;;  %v10340_v28 = vadd.s32 4294967169, %v4495_v33  ;;  %vm3858_vm11 = vcmp.lt.s32.totalorder %v13851_v55, 2  ;;  %v4354_v38 = vsel %vm10335_vm7, 0, %v10334_v45 }
 0x598   : > { %v4447_v62 = vadd.s32 %v4446_v6, %v4442_v32  ;;  %v3860_v49 = vxor.u32 2147483648, %v13965_v42  ;;  %v10659_v39 = vadd.f32 %v13596_v4, %v13594_v46  ;;  %v4355_v2 = vsub.s32 32, %v4354_v38 }
 0x599   : > { %v4359_v29 = vsub.s32 4294967266, %v4354_v38  ;;  %v4501_v43 = vadd.s32 1, %v10340_v28  ;;  %v3863_v23 = vxor.u32 2147483648, %v13923_v59  ;;  %v3747_v3 = vmul.f32 1.442695, %v13945_v0 }
 0x59a   : > { %v4448_v12 = vadd.s32 536870912, %v4447_v62  ;;  %vm3859_vm9 = vcmp.eq.s32.totalorder %v13851_v55, 0  ;;  %v10660_v58 = vadd.f32 %v13611_v5, %v13609_v9  ;;  %v14115_v8 = vpop.eup %11408  ;;  %v4357_v36 = vshrl.u32 %v4339_v52, %v4355_v2 }
 0x59b   : > { %v4360_v18 = vadd.s32 127, %v4359_v29  ;;  %v4499_v63 = vor.u32 8388608, %v4498_v54  ;;  %vm4502_vm10 = vcmp.gt.s32.totalorder %v4501_v43, 0  ;;  %v3861_v35 = vsel %vm3859_vm9, %v13923_v59, %v3860_v49 }
 0x59c   : > { %v14117_v46 = vshrl.u32 %v4448_v12, 30  ;;  %v4503_v4 = vsel %vm4502_vm10, %v4501_v43, 0  ;;  %vm3862_vm12 = vcmp.eq.s32.totalorder %v13851_v55, 2  ;;  %vm3855_vm13 = vweird.f32 %v13518_v40 }
 0x59d   : > { %v4356_v0 = vshll.u32 %v14056_v50, %v4354_v38  ;;  %v4361_v11 = vshll.u32 %v4360_v18, 23  ;;  %v4505_v24 = vand.u32 31, %v4503_v4  ;;  %v3864_v9 = vsel %vm3862_vm12, %v3863_v23, %v13965_v42  ;;  %v14124_v5 = vpop.eup %11410 }
 0x59e   : > { %v4372_v21 = vsel %vm14092_vm4, 0, %v14100_v51  ;;  %v14130_v7 = vadd.s32 %v14064_v22, %v14079_v30  ;;  %v4450_v59 = vshll.u32 %v14117_v46, 30  ;;  %11416 = vpow2.f32 %v3747_v3  ;;  %v14133_v19 = vpop.eup %11412 }
 0x59f   : > { %v4358_v48 = vor.u32 %v4357_v36, %v4356_v0  ;;  %v4362_v50 = vor.u32 4788187, %v4361_v11  ;;  %v4506_v52 = vsub.s32 32, %v4505_v24  ;;  %v14135_v45 = vshll.u32 %v4499_v63, 8  ;;  %v14137_v42 = vpop.eup %11414 }
 0x5a0   : > { %v14139_v33 = vsub.s32 %v4447_v62, %v4450_v59  ;;  %v3865_v32 = vsel %vm3858_vm11, %v3861_v35, %v3864_v9  ;;  %v14143_v6 = vmul.f32 1.442695, %v10659_v39  ;;  %v3751_v22 = vmul.f32 1.442695, %v10660_v58 }
 0x5a1   : > { %v4363_v30 = vand.u32 2147483647, %v4362_v50  ;;  %v4508_v28 = vshll.u32 %v16914_v10, %v4505_v24  ;;  %v4509_v54 = vshrl.u32 %v16954_v57, %v4506_v52  ;;  %v4511_v38 = vshll.u32 %v16954_v57, %v4505_v24 }
 0x5a2   : > { %v4453_v49 = vsub.s32 0, %v14139_v33  ;;  %v4512_v2 = vshrl.u32 %v16955_v44, %v4506_v52  ;;  %v4514_v62 = vshll.u32 %v16955_v44, %v4505_v24  ;;  %v4515_v29 = vshrl.u32 %v16956_v15, %v4506_v52 }
 0x5a3   : > { %v4365_v55 = vcvt.s32.f32 %v4358_v48  ;;  %v4504_v43 = vshrl.u32 %v4503_v4, 5  ;;  %v4517_v39 = vshll.u32 %v16956_v15, %v4505_v24  ;;  %v4518_v23 = vshrl.u32 %v16915_v53, %v4506_v52 }
 0x5a4   : > { %v10337_v12 = vmin.u32 %v4453_v49, %v14139_v33  ;;  %v4510_v3 = vor.u32 %v4509_v54, %v4508_v28  ;;  %v4513_v58 = vor.u32 %v4512_v2, %v4511_v38  ;;  %v4516_v36 = vor.u32 %v4515_v29, %v4514_v62 }
 0x5a5   : > { %v4366_v18 = vmul.f32 %v4365_v55, %v4363_v30  ;;  %v4519_v63 = vor.u32 %v4518_v23, %v4517_v39  ;;  %v4520_v35 = vshll.u32 %v16915_v53, %v4505_v24  ;;  %v4521_v0 = vshrl.u32 %v16913_v25, %v4506_v52 }
 0x5a6   : > { %vm4389_vm14 = vcmp.lt.s32.totalorder %v13654_v34, 0  ;;  %v4455_v11 = vclz %v10337_v12  ;;  %v4473_v4 = vsub.s32 4, %v14117_v46  ;;  %v4507_v9 = vshrl.u32 %v16914_v10, %v4506_v52 }
 0x5a7   : > { %v3866_v59 = vsel %vm3855_vm13, nan, %v3865_v32  ;;  %v4522_v48 = vor.u32 %v4521_v0, %v4520_v35  ;;  %vm4523_vm8 = vcmp.lt.s32.totalorder %v4504_v43, 1  ;;  %vm4525_vm1 = vcmp.lt.s32.totalorder %v4504_v43, 3 }
 0x5a8   : > { %vm4526_vm5 = vcmp.lt.s32.totalorder %v4504_v43, 4  ;;  %v11417_v50 = vpop.eup %11416  ;;  %v10338_v30 = vadd.s32 4294967294, %v4455_v11  ;;  %v4527_v24 = vsel %vm4523_vm8, %v4507_v9, %v4510_v3  ;;  %v4531_v54 = vsel %vm4523_vm8, %v4510_v3, %v4513_v58 }
 0x5a9   : > { %v4528_v28 = vsel %vm4526_vm5, %v4516_v36, 2102212464  ;;  %v4367_v38 = vxor.u32 2147483648, %v4366_v18  ;;  %v4532_v52 = vsel %vm4526_vm5, %v4519_v63, 920167782  ;;  %11418 = vpow2.f32 %v3751_v22 }
 0x5aa   : > { %v4529_v49 = vsel %vm4525_vm1, %v4513_v58, %v4528_v28  ;;  %v16994_v40 = vand.u32 2147483647, %v13654_v34  ;;  %vm10339_vm6 = vcmp.lt.s32.totalorder %v10338_v30, 0  ;;  %vm4524_vm7 = vcmp.lt.s32.totalorder %v4504_v43, 2 }
 0x5ab   : > { %v4533_v2 = vsel %vm4525_vm1, %v4516_v36, %v4532_v52  ;;  %v4535_v62 = vsel %vm4523_vm8, %v4513_v58, %v4516_v36  ;;  %v4458_v29 = vsel %vm10339_vm6, 0, %v10338_v30  ;;  %v4530_v55 = vsel %vm4524_vm7, %v4527_v24, %v4529_v49 }
 0x5ac   : > { %vm14169_vm15 = vcmp.le.f32.partialorder %v16994_v40, 0.7853982  ;;  %v4534_v39 = vsel %vm4524_vm7, %v4531_v54, %v4533_v2  ;;  %v4536_v23 = vsel %vm4526_vm5, %v4522_v48, 1326507024  ;;  %v4459_v12 = vsub.s32 32, %v4458_v29  ;;  %v16997_v54 = vld [vmem:[#allocation35_spill] sm:$0xff] }
 0x5ad   : > { %v4460_v22 = vshll.u32 %v14139_v33, %v4458_v29  ;;  %v4463_v3 = vsub.s32 4294967266, %v4458_v29  ;;  %v4537_v35 = vsel %vm4525_vm1, %v4519_v63, %v4536_v23  ;;  %v14183_v28 = vmul.f32 %v11417_v50, %v3866_v59 }
 0x5ae   : > { %v4538_v0 = vsel %vm4524_vm7, %v4535_v62, %v4537_v35  ;;  %v14179_v11 = vmul.u32.u64.low %v14135_v45, %v4534_v39  ;;  %v14180_v9 = vmul.u32.u64.high %v14135_v45, %v4534_v39, %v14179_v11  ;;  %v4461_v58 = vshrl.u32 %v14130_v7, %v4459_v12 }
 0x5af   : > { %v4464_v36 = vadd.s32 127, %v4463_v3  ;;  %v14187_v30 = vmul.u32.u64.low %v14135_v45, %v4538_v0  ;;  %v14188_v48 = vmul.u32.u64.high %v14135_v45, %v4538_v0, %v14187_v30  ;;  %v4368_v33 = vsel %vm4285_vm2, %v4367_v38, %v4366_v18 }
 0x5b0   : > { %v4474_v43 = vsel %vm4389_vm14, %v4473_v4, %v14117_v46  ;;  %v4068_v63 = vxor.u32 2147483648, %v14115_v8  ;;  %v4071_v24 = vxor.u32 2147483648, %v14005_v17  ;;  %vm4063_vm11 = vweird.f32 %v13526_v16 }
 0x5b1   : > { %v4462_v59 = vor.u32 %v4461_v58, %v4460_v22  ;;  %v4465_v7 = vshll.u32 %v4464_v36, 23  ;;  %v10661_v50 = vadd.f32 %v13619_v1, %v13617_v13  ;;  %v10662_v49 = vadd.f32 %v16997_v54, %v13709_v14  ;;  %v16998_v22 = vld [vmem:[#allocation38_spill] sm:$0xff]  ;;  %v17000_v36 = vld [vmem:[#allocation40_spill] sm:$0xff] }
 0x5b2   : > { %v4546_v18 = vmul.u32 %v14135_v45, %v4530_v55  ;;  %v4549_v38 = vadd.s32 1, %v14180_v9  ;;  %vm4067_vm2 = vcmp.eq.s32.totalorder %v13958_v27, 0  ;;  %vm4070_vm9 = vcmp.eq.s32.totalorder %v13958_v27, 2 }
 0x5b3   : > { %v4466_v46 = vor.u32 4788187, %v4465_v7  ;;  %vm4548_vm10 = vc.u32 %v14188_v48, %v14179_v11  ;;  %v4069_v4 = vsel %vm4067_vm2, %v14005_v17, %v4068_v63  ;;  %v4072_v52 = vsel %vm4070_vm9, %v4071_v24, %v14115_v8  ;;  %v11419_v13 = vpop.eup %11418  ;;  %v17001_v7 = vld [vmem:[#allocation50_spill] sm:$0xff] }
 0x5b4   : > { %11420 = vsinq.f32 %v14071_v41  ;;  %v4476_v1 = vsel %vm14169_vm15, 0, %v4474_v43  ;;  %v4550_v14 = vsel %vm4548_vm10, %v4549_v38, %v14180_v9  ;;  %vm4066_vm12 = vcmp.lt.s32.totalorder %v13958_v27, 2  ;;  %v17003_v38 = vld [vmem:[#allocation34_spill] sm:$0xff] }
 0x5b5   : > { %v4371_v45 = vsel %vm14092_vm4, %v13650_v20, %v4368_v33  ;;  %v4467_v40 = vand.u32 2147483647, %v4466_v46  ;;  %v4469_v2 = vcvt.s32.f32 %v4462_v59  ;;  %v4551_v62 = vadd.s32 %v4550_v14, %v4546_v18  ;;  %v17004_v46 = vld [vmem:[#allocation49_spill] sm:$0xff] }
 0x5b6   : > { %v4376_v17 = vadd.s32 3, %v4372_v21  ;;  %11422 = vpow2.f32 %v14143_v6  ;;  %v4073_v41 = vsel %vm4066_vm12, %v4069_v4, %v4072_v52  ;;  %v4276_v8 = vxor.u32 2147483648, %v14137_v42 }
 0x5b7   : > { %vm4271_vm13 = vweird.f32 %v13646_v60  ;;  %v4470_v27 = vmul.f32 %v4469_v2, %v4467_v40  ;;  %v4552_v29 = vadd.s32 536870912, %v4551_v62  ;;  %v3753_v55 = vmul.f32 1.442695, %v10661_v50  ;;  %v17005_v2 = vld [vmem:[#allocation37_spill] sm:$0xff] }
 0x5b8   : > { %v4279_v39 = vxor.u32 2147483648, %v14133_v19  ;;  %11424 = vcosq.f32 %v4371_v45  ;;  %v4480_v23 = vadd.s32 3, %v4476_v1  ;;  %v3755_v12 = vmul.f32 1.442695, %v10662_v49 }
 0x5b9   : > { %v10663_v3 = vadd.f32 %v16999_v47, %v16998_v22  ;;  %v4471_v51 = vxor.u32 2147483648, %v4470_v27  ;;  %v14228_v21 = vshrl.u32 %v4552_v29, 30  ;;  %vm4275_vm4 = vcmp.eq.s32.totalorder %v14087_v26, 0 }
 0x5ba   : > { %vm4278_vm8 = vcmp.eq.s32.totalorder %v14087_v26, 2  ;;  %11426 = vsinq.f32 %v4371_v45  ;;  %v4074_v6 = vsel %vm4063_vm11, nan, %v4073_v41  ;;  %v4277_v35 = vsel %vm4275_vm4, %v14133_v19, %v4276_v8 }
 0x5bb   : > { %v4280_v0 = vsel %vm4278_vm8, %v4279_v39, %v14137_v42  ;;  %v4472_v9 = vsel %vm4389_vm14, %v4471_v51, %v4470_v27  ;;  %v4554_v58 = vshll.u32 %v14228_v21, 30  ;;  %11428 = vpow2.f32 %v3753_v55  ;;  %v17006_v27 = vld [vmem:[#allocation41_spill] sm:$0xff] }
 0x5bc   : > { %v3759_v30 = vmul.f32 1.442695, %v17000_v36  ;;  %v14240_v33 = vand.u32 3, %v4376_v17  ;;  %v4475_v43 = vsel %vm14169_vm15, %v13654_v34, %v4472_v9  ;;  %11430 = vpow2.f32 %v3755_v12  ;;  %v17007_v51 = vld [vmem:[#allocation33_spill] sm:$0xff] }
 0x5bd   : > { %vm4274_vm1 = vcmp.lt.s32.totalorder %v14087_v26, 2  ;;  %11432 = vcosq.f32 %v4475_v43  ;;  %v14246_v16 = vand.u32 3, %v4480_v23  ;;  %v14248_v19 = vsub.s32 %v4551_v62, %v4554_v58  ;;  %v17002_v26 = vld [vmem:[#allocation48_spill] sm:$0xff] }
 0x5be   : > { %v4281_v42 = vsel %vm4274_vm1, %v4277_v35, %v4280_v0  ;;  %v11421_v63 = vpop.eup %11420  ;;  %11434 = vsinq.f32 %v4475_v43  ;;  %v14252_v24 = vadd.s32 %v14179_v11, %v14188_v48  ;;  %v4597_v59 = vmul.f32 %v11419_v13, %v4074_v6 }
 0x5bf   : > { %v3964_v50 = vxor.u32 2147483648, %v17001_v7  ;;  %v4557_v32 = vsub.s32 0, %v14248_v19  ;;  %v3757_v54 = vmul.f32 1.442695, %v10663_v3  ;;  %11436 = vpow2.f32 %v3759_v30 }
 0x5c0   : > { %vm3963_vm14 = vcmp.eq.s32.totalorder %v17002_v26, 0  ;;  %v11423_v49 = vpop.eup %11422  ;;  %v4282_v18 = vsel %vm4271_vm13, nan, %v4281_v42  ;;  %vm3959_vm5 = vweird.f32 %v17003_v38  ;;  %v3967_v11 = vxor.u32 2147483648, %v17004_v46 }
 0x5c1   : > { %v3965_v4 = vsel %vm3963_vm14, %v17004_v46, %v3964_v50  ;;  %v10341_v48 = vmin.u32 %v4557_v32, %v14248_v19  ;;  %vm3962_vm15 = vcmp.lt.s32.totalorder %v17002_v26, 2  ;;  %vm3966_vm6 = vcmp.eq.s32.totalorder %v17002_v26, 2 }
 0x5c2   : > { %v4172_v52 = vxor.u32 2147483648, %v11421_v63  ;;  %v14265_v13 = vpop.eup %11424  ;;  %vm4483_vm7 = vcmp.eq.s32.totalorder %v14246_v16, 0  ;;  %v3968_v60 = vsel %vm3966_vm6, %v3967_v11, %v17001_v7  ;;  %vm4171_vm11 = vcmp.eq.s32.totalorder %v14085_v31, 0 }
 0x5c3   : > { %vm4174_vm2 = vcmp.eq.s32.totalorder %v14085_v31, 2  ;;  %v4175_v1 = vxor.u32 2147483648, %v14124_v5  ;;  %v4559_v14 = vclz %v10341_v48  ;;  %vm4482_vm9 = vcmp.lt.s32.totalorder %v14246_v16, 2 }
 0x5c4   : > { %v3969_v45 = vsel %vm3962_vm15, %v3965_v4, %v3968_v60  ;;  %v4173_v40 = vsel %vm4171_vm11, %v14124_v5, %v4172_v52  ;;  %v4603_v62 = vmul.f32 %v17005_v2, %v14183_v28  ;;  %v11427_v17 = vpop.eup %11426  ;;  %vm4479_vm10 = vweird.f32 %v13654_v34 }
 0x5c5   : > { %v3970_v41 = vsel %vm3959_vm5, nan, %v3969_v45  ;;  %vm4170_vm12 = vcmp.lt.s32.totalorder %v14085_v31, 2  ;;  %v4176_v8 = vsel %vm4174_vm2, %v4175_v1, %v11421_v63  ;;  %v14281_v29 = vmul.f32 %v17006_v27, %v4597_v59  ;;  %v11429_v55 = vpop.eup %11428  ;;  %v17008_v59 = vld [vmem:[#allocation42_spill] sm:$0xff] }
 0x5c6   : > { %v10342_v39 = vadd.s32 4294967294, %v4559_v14  ;;  %vm4167_vm13 = vweird.f32 %v13532_v37  ;;  %v4177_v5 = vsel %vm4170_vm12, %v4173_v40, %v4176_v8  ;;  %v4596_v23 = vmul.f32 %v11423_v49, %v3970_v41  ;;  %v11431_v12 = vpop.eup %11430 }
 0x5c7   : > { %vm4486_vm4 = vcmp.eq.s32.totalorder %v14246_v16, 2  ;;  %v4178_v28 = vsel %vm4167_vm13, nan, %v4177_v5  ;;  %v4655_v22 = vand.u32 4294901760, %v4603_v62  ;;  %v4659_v47 = vand.u32 4294901760, %v14281_v29  ;;  %v11433_v3 = vpop.eup %11432 }
 0x5c8   : > { %vm10343_vm8 = vcmp.lt.s32.totalorder %v10342_v39, 0  ;;  %11438 = vpow2.f32 %v3757_v54  ;;  %v4598_v31 = vmul.f32 %v11429_v55, %v4178_v28  ;;  %v4604_v6 = vmul.f32 %v17007_v51, %v4596_v23  ;;  %v11435_v35 = vpop.eup %11434 }
 0x5c9   : > { %v4562_v0 = vsel %vm10343_vm8, 0, %v10342_v39  ;;  %v4599_v9 = vmul.f32 %v11431_v12, %v4282_v18  ;;  %v4487_v58 = vxor.u32 2147483648, %v11433_v3  ;;  %v14287_v37 = vpack.c.bf16 %v4659_v47, %v4655_v22  ;;  %v11437_v36 = vpop.eup %11436  ;;  %v17010_v39 = vld [vmem:[#allocation47_spill] sm:$0xff] }
 0x5ca   : > { %v4563_v30 = vsub.s32 32, %v4562_v0  ;;  %v4567_v43 = vsub.s32 4294967266, %v4562_v0  ;;  %v4484_v42 = vxor.u32 2147483648, %v11435_v35  ;;  %vm4379_vm1 = vcmp.eq.s32.totalorder %v14240_v33, 0 }
 0x5cb   : > { %v4488_v63 = vsel %vm4486_vm4, %v4487_v58, %v11435_v35  ;;  %v4606_v7 = vmul.f32 %v17008_v59, %v4598_v31  ;;  %v4653_v50 = vand.u32 4294901760, %v4604_v6  ;;  %v4380_v32 = vxor.u32 2147483648, %v11427_v17  ;;  %v17011_v31 = vld [vmem:[#allocation46_spill] sm:$0xff] }
 0x5cc   : > { %v4564_v54 = vshll.u32 %v14248_v19, %v4562_v0  ;;  %v4565_v26 = vshrl.u32 %v14252_v24, %v4563_v30  ;;  %v4568_v49 = vadd.s32 127, %v4567_v43  ;;  %v4485_v18 = vsel %vm4483_vm7, %v11433_v3, %v4484_v42 }
 0x5cd   : > { %v4489_v38 = vsel %vm4482_vm9, %v4485_v18, %v4488_v63  ;;  %v4657_v46 = vand.u32 4294901760, %v4606_v7  ;;  %v14299_v4 = vsub.f32 %v4604_v6, %v4653_v50  ;;  %v4381_v11 = vsel %vm4379_vm1, %v14265_v13, %v4380_v32  ;;  %v10344_v18 = vld [vmem:[%s12179_s20 + $0x20] sm:$0xff] }
 0x5ce   : > { %v4566_v48 = vor.u32 %v4565_v26, %v4564_v54  ;;  %v4569_v52 = vshll.u32 %v4568_v49, 23  ;;  %v4490_v60 = vsel %vm4479_vm10, nan, %v4489_v38  ;;  %v4383_v19 = vxor.u32 2147483648, %v14265_v13  ;;  %v17009_v13 = vld [vmem:[#allocation45_spill] sm:$0xff]  ;;  %v17014_v54 = vld [vmem:[#allocation43_spill] sm:$0xff] }
 0x5cf   : > { %v4601_v24 = vmul.f32 %v11437_v36, %v4490_v60  ;;  %v14305_v1 = vpack.c.bf16 %v4657_v46, %v4653_v50  ;;  %v14307_v14 = vsub.f32 %v4606_v7, %v4657_v46  ;;  %vm4382_vm14 = vcmp.eq.s32.totalorder %v14240_v33, 2 }
 0x5d0   : > { %v4570_v16 = vor.u32 4788187, %v4569_v52  ;;  %vm4375_vm5 = vweird.f32 %v13650_v20  ;;  %vm4378_vm15 = vcmp.lt.s32.totalorder %v14240_v33, 2  ;;  %v4384_v45 = vsel %vm4382_vm14, %v4383_v19, %v11427_v17 }
 0x5d1   : > { %v4573_v40 = vcvt.s32.f32 %v4566_v48  ;;  %10497 = vmatprep.subr.bf16.mxu0 %v14305_v1  ;;  %v14313_v34 = vsub.f32 %v4603_v62, %v4655_v22  ;;  %v4385_v2 = vsel %vm4378_vm15, %v4381_v11, %v4384_v45  ;;  %v4607_v41 = vmul.f32 %v17009_v13, %v4599_v9 }
 0x5d2   : > { %v11439_v8 = vpop.eup %11438  ;;  %v4571_v27 = vand.u32 2147483647, %v4570_v16  ;;  %10499 = vmatpush1.bf16.msra.mxu0 %v14287_v37  ;;  %v4386_v55 = vsel %vm4375_vm5, nan, %v4385_v2  ;;  %v4609_v5 = vmul.f32 %v17010_v39, %v4601_v24  ;;  %v4772_v20 = vand.u32 4294901760, %v14299_v4 }
 0x5d3   : > { %v4577_v33 = vsub.s32 4, %v14228_v21  ;;  %v4600_v17 = vmul.f32 %v11439_v8, %v4386_v55  ;;  %v4663_v23 = vand.u32 4294901760, %v4607_v41  ;;  %v4784_v12 = vand.u32 4294901760, %v14307_v14 }
 0x5d4   : > { %v4574_v62 = vmul.f32 %v4573_v40, %v4571_v27  ;;  %v14322_v28 = vsub.f32 %v14281_v29, %v4659_v47  ;;  %v4667_v22 = vand.u32 4294901760, %v4609_v5  ;;  %v4773_v3 = vsub.f32 %v14299_v4, %v4772_v20  ;;  %v10345_v40 = vld [vmem:[%s12179_s20 + $0x28] sm:$0xff] }
 0x5d5   : > { %v14326_v51 = vmul.f32 %v17011_v31, %v4600_v17  ;;  %v14328_v6 = vsub.f32 %v4607_v41, %v4663_v23  ;;  %v4785_v35 = vsub.f32 %v14307_v14, %v4784_v12  ;;  %v4778_v0 = vand.u32 4294901760, %v14313_v34 }
 0x5d6   : > { %vm14334_vm6 = vcmp.le.f32.partialorder %v4491_v61, 0.7853982  ;;  %vm4493_vm7 = vcmp.lt.s32.totalorder %v13941_v56, 0  ;;  %v4575_v29 = vxor.u32 2147483648, %v4574_v62  ;;  %v14339_v47 = vpack.c.bf16 %v4667_v22, %v4663_v23 }
 0x5d7   : > { %v4578_v58 = vsel %vm4493_vm7, %v4577_v33, %v14228_v21  ;;  %v4774_v36 = vand.u32 4294901760, %v4773_v3  ;;  %v4786_v30 = vand.u32 4294901760, %v4785_v35  ;;  %v4779_v43 = vsub.f32 %v14313_v34, %v4778_v0 }
 0x5d8   : > { %v4576_v42 = vsel %vm4493_vm7, %v4575_v29, %v4574_v62  ;;  %v14343_v63 = vsub.f32 %v4609_v5, %v4667_v22  ;;  %v4790_v61 = vand.u32 4294901760, %v14322_v28  ;;  %v4802_v59 = vand.u32 4294901760, %v14328_v6  ;;  %v10346_v22 = vld [vmem:[%s12179_s20 + $0x30] sm:$0xff] }
 0x5d9   : > { %v4579_v7 = vsel %vm14334_vm6, %v13941_v56, %v4576_v42  ;;  %v14350_v50 = vpack.c.bf16 %v4786_v30, %v4774_v36  ;;  %v4580_v21 = vsel %vm14334_vm6, 0, %v4578_v58  ;;  %v3761_v26 = vmul.f32 1.442695, %v17014_v54  ;;  %v10347_v58 = vld [vmem:[%s12179_s20 + $0x38] sm:$0xff] }
 0x5da   : > { %11440 = vcosq.f32 %v4579_v7  ;;  %v4791_v32 = vsub.f32 %v14322_v28, %v4790_v61  ;;  %v4780_v49 = vand.u32 4294901760, %v4779_v43  ;;  %v4803_v46 = vsub.f32 %v14328_v6, %v4802_v59 }
 0x5db   : > { %11442 = vsinq.f32 %v4579_v7  ;;  %v4814_v11 = vand.u32 4294901760, %v14343_v63  ;;  %v10512_v48 = vpack.c.bf16 %v14307_v14, %v14299_v4  ;;  %v4584_v52 = vadd.s32 3, %v4580_v21  ;;  %v17016_v7 = vld [vmem:[#allocation36_spill] sm:$0xff]  ;;  %v17018_v4 = vld [vmem:[#allocation25_spill] sm:$0xff]  ;;  %v10353_v14 = vld [vmem:[%s12172_s11 + $0x88] sm:$0xff] }
 0x5dc   : > { %v4792_v38 = vand.u32 4294901760, %v4791_v32  ;;  %v4642_v24 = vsel %vm2203_vm3, %v10344_v18, 0  ;;  %v10514_v16 = vpack.c.bf16 %v14322_v28, %v14313_v34  ;;  %v10518_v45 = vpack.c.bf16 %v14343_v63, %v14328_v6  ;;  %v10354_v6 = vld [vmem:[%s12172_s11 + $0x90] sm:$0xff] }
 0x5dd   : > { %v4815_v19 = vsub.f32 %v14343_v63, %v4814_v11  ;;  %11444 = vpow2.f32 %v3761_v26  ;;  %v4804_v2 = vand.u32 4294901760, %v4803_v46  ;;  %v4585_v41 = vand.u32 3, %v4584_v52 }
 0x5de   : > { %v14361_v60 = vpack.c.bf16 %v4792_v38, %v4780_v49  ;;  %v14370_v8 = vpack.c.bf16 %v4784_v12, %v4772_v20  ;;  %v14372_v27 = vpack.c.bf16 %v4790_v61, %v4778_v0  ;;  %v14374_v55 = vpack.c.bf16 %v4814_v11, %v4802_v59  ;;  %v17015_v59 = vld [vmem:[#allocation44_spill] sm:$0xff] }
 0x5df   : > { %v4816_v13 = vand.u32 4294901760, %v4815_v19  ;;  %v14376_v39 = vand.u32 4294901760, %v4642_v24  ;;  %v4645_v33 = vsel %vm2203_vm3, %v10345_v40, 0  ;;  %vm4590_vm11 = vcmp.eq.s32.totalorder %v4585_v41, 2 }
 0x5e0   : > { %v4661_v31 = vand.u32 4294901760, %v14326_v51  ;;  %v14384_v12 = vand.u32 4294901760, %v4645_v33  ;;  %vm4587_vm2 = vcmp.eq.s32.totalorder %v4585_v41, 0  ;;  %vm4586_vm9 = vcmp.lt.s32.totalorder %v4585_v41, 2 }
 0x5e1   : > { %v10510_v5 = vpack.c.bf16 %v4816_v13, %v4804_v2  ;;  %v14382_v20 = vsub.f32 %v4642_v24, %v14376_v39  ;;  %v4648_v9 = vsel %vm2203_vm3, %v10346_v22, 0  ;;  %vm4583_vm10 = vweird.f32 %v13941_v56 }
 0x5e2   : > { %v4795_v43 = vsub.f32 %v14326_v51, %v4661_v31  ;;  %v14392_v61 = vsub.f32 %v4645_v33, %v14384_v12  ;;  %v10649_v21 = vadd.f32 %v17016_v7, %v17015_v59  ;;  %v14396_v54 = vand.u32 4294901760, %v4648_v9 }
 0x5e3   : > { %v4728_v42 = vand.u32 4294901760, %v14382_v20  ;;  %v4651_v26 = vsel %vm2203_vm3, %v10347_v58, 0  ;;  %v5356_v28 = vsel %vm486_vm0, %v10353_v14, 0 }
 0x5e4   : > { %v11441_v17 = vpop.eup %11440  ;;  %v4739_v51 = vand.u32 4294901760, %v14392_v61  ;;  %v4796_v18 = vand.u32 4294901760, %v4795_v43  ;;  %v14404_v46 = vsub.f32 %v4648_v9, %v14396_v54  ;;  %v14406_v11 = vand.u32 4294901760, %v4651_v26 }
 0x5e5   : > { %v11443_v23 = vpop.eup %11442  ;;  %v4591_v62 = vxor.u32 2147483648, %v11441_v17  ;;  %v4729_v49 = vsub.f32 %v14382_v20, %v4728_v42  ;;  %v17017_v9 = vmov 0.0   ;;  %v14487_v63 = vand.u32 4294901760, %v5356_v28 }
 0x5e6   : > { %v4588_v3 = vxor.u32 2147483648, %v11443_v23  ;;  %v4740_v40 = vsub.f32 %v14392_v61, %v4739_v51  ;;  %v4797_v2 = vsub.f32 %v4795_v43, %v4796_v18  ;;  %v4750_v41 = vand.u32 4294901760, %v14404_v46 }
 0x5e7   : > { %v4592_v35 = vsel %vm4590_vm11, %v4591_v62, %v11443_v23  ;;  %v11445_v36 = vpop.eup %11444  ;;  %v4730_v24 = vand.u32 4294901760, %v4729_v49  ;;  %v4760_v33 = vsub.f32 %v4651_v26, %v14406_v11 }
 0x5e8   : > { %v4589_v0 = vsel %vm4587_vm2, %v11441_v17, %v4588_v3  ;;  %v4798_v22 = vand.u32 4294901760, %v4797_v2  ;;  %v4741_v3 = vand.u32 4294901760, %v4740_v40 }
 0x5e9   : > { %v4593_v29 = vsel %vm4586_vm9, %v4589_v0, %v4592_v35  ;;  %v4751_v35 = vsub.f32 %v14404_v46, %v4750_v41  ;;  %v4761_v0 = vand.u32 4294901760, %v4760_v33 }
 0x5ea   : > { %v4594_v30 = vsel %vm4583_vm10, nan, %v4593_v29 }
 0x5eb   : > { %v4602_v32 = vmul.f32 %v11445_v36, %v4594_v30  ;;  %v4752_v58 = vand.u32 4294901760, %v4751_v35  ;;  %v4762_v36 = vsub.f32 %v4760_v33, %v4761_v0 }
 0x5ed   : > { %v4610_v56 = vmul.f32 %v10649_v21, %v4602_v32 }
 0x5ef   : > { %v4665_v38 = vand.u32 4294901760, %v4610_v56 }
 0x5f1   : > { %v14408_v52 = vpack.c.bf16 %v4665_v38, %v4661_v31  ;;  %v4807_v19 = vsub.f32 %v4610_v56, %v4665_v38  ;;  %v10358_v56 = vld [vmem:[%s12172_s11 + $0xb0] sm:$0xff] }
 0x5f3   : > { %10501 = vmatprep.subr.bf16.mxu0 %v14408_v52  ;;  %v4808_v13 = vand.u32 4294901760, %v4807_v19  ;;  %v10516_v17 = vpack.c.bf16 %v4807_v19, %v4795_v43 }
 0x5f4   : > { %10503 = vmatpush1.bf16.msra.mxu0 %v14339_v47 }
 0x5f5   : > { %10505 = vmatprep.subr.bf16.mxu0 %v14350_v50  ;;  %v4809_v23 = vsub.f32 %v4807_v19, %v4808_v13  ;;  %v10532_v62 = vpack.c.bf16 %v4808_v13, %v4796_v18  ;;  %v4763_v50 = vand.u32 4294901760, %v4762_v36  ;;  %v10359_v19 = vld [vmem:[%s12172_s11 + $0xb8] sm:$0xff] }
 0x5f7   : > { %4731 = vmatmul.mubr.f32.vlgmr.msra.gmra.mrb[30].mxu0 %v4730_v24  ;;  %v4810_v31 = vand.u32 4294901760, %v4809_v23  ;;  %v17022_v24 = vld [vmem:[#allocation27_spill] sm:$0xff] }
 0x5f8   : > { %10507 = vmatpush1.bf16.msra.mxu0 %v14361_v60  ;;  %4736 = vmatprep.mubr.f32.mxu0 %v17017_v9  ;;  %v5359_v60 = vsel %vm486_vm0, %v10354_v6, 0  ;;  %v17023_v6 = vld [vmem:[#allocation29_spill] sm:$0xff] }
 0x5f9   : > { %v10508_v29 = vpack.c.bf16 %v4810_v31, %v4798_v22 }
 0x5fb   : > { %4742 = vmatmul.mubr.f32.gmra.mrb[32].mxu0 %v4741_v3  ;;  %10509 = vmatprep.subr.bf16.mxu0 %v10508_v29 }
 0x5fc   : > { %10511 = vmatpush1.bf16.msra.mxu0 %v10510_v5  ;;  %4747 = vmatprep.mubr.f32.mxu0 %v17017_v9  ;;  %v10356_v5 = vld [vmem:[%s12172_s11 + $0xa0] sm:$0xff] }
 0x5fd   : > { %10513 = vmatprep.subr.bf16.mxu0 %v10512_v48  ;;  %v17019_v48 = vld [vmem:[#allocation26_spill] sm:$0xff] }
 0x5ff   : > { %4753 = vmatmul.mubr.f32.gmra.mrb[34].mxu0 %v4752_v58 }
 0x600   : > { %4758 = vmatprep.mubr.f32.mxu0 %v17017_v9 }
 0x603   : > { %4764 = vmatmul.mubr.f32.gmra.mrb[36].mxu0 %v4763_v50 }
 0x604   : > { %4874 = vmatprep.mubr.f32.mxu0 %v17017_v9 }
 0x607   : > { %4876 = vmatmul.mubr.f32.vlgmr.msra.gmra.mrb[30].mxu0 %v14376_v39 }
 0x608   : > { %10515 = vmatpush1.bf16.msra.mxu0 %v10514_v16  ;;  %4881 = vmatprep.mubr.f32.mxu0 %v17017_v9  ;;  %v10355_v16 = vld [vmem:[%s12172_s11 + $0x98] sm:$0xff] }
 0x609   : > { %10517 = vmatprep.subr.bf16.mxu0 %v10516_v17  ;;  %v5374_v17 = vsel %vm486_vm0, %v10359_v19, 0 }
 0x60a   : > { %v14562_v31 = vand.u32 4294901760, %v5374_v17 }
 0x60b   : > { %4883 = vmatmul.mubr.f32.gmra.mrb[32].mxu0 %v14384_v12 }
 0x60c   : > { %10519 = vmatpush1.bf16.msra.mxu0 %v10518_v45  ;;  %4888 = vmatprep.mubr.f32.mxu0 %v17017_v9  ;;  %v17020_v45 = vld [vmem:[#allocation31_spill] sm:$0xff]  ;;  %v14570_v58 = vsub.f32 %v5374_v17, %v14562_v31 }
 0x60d   : > { %10521 = vmatprep.subr.bf16.mxu0 %v14305_v1 }
 0x60f   : > { %4890 = vmatmul.mubr.f32.gmra.mrb[34].mxu0 %v14396_v54 }
 0x610   : > { %4895 = vmatprep.mubr.f32.mxu0 %v17017_v9 }
 0x613   : > { %4897 = vmatmul.mubr.f32.gmra.mrb[36].mxu0 %v14406_v11 }
 0x614   : > { %4983 = vmatprep.mubr.f32.mxu0 %v17017_v9 }
 0x617   : > { %4986 = vmatmul.mubr.f32.vlgmr.msra.gmra.mrb[30].mxu0 %v14382_v20 }
 0x618   : > { %10523 = vmatpush1.bf16.msra.mxu0 %v14287_v37  ;;  %4991 = vmatprep.mubr.f32.mxu0 %v17017_v9 }
 0x619   : > { %10525 = vmatprep.subr.bf16.mxu0 %v14408_v52 }
 0x61b   : > { %4994 = vmatmul.mubr.f32.gmra.mrb[32].mxu0 %v14392_v61  ;;  %v10357_v61 = vld [vmem:[%s12172_s11 + $0xa8] sm:$0xff] }
 0x61c   : > { %10527 = vmatpush1.bf16.msra.mxu0 %v14339_v47  ;;  %4999 = vmatprep.mubr.f32.mxu0 %v17017_v9  ;;  %v5368_v26 = vsel %vm486_vm0, %v10357_v61, 0 }
 0x61d   : > { %10529 = vmatprep.subr.bf16.mxu0 %v14370_v8 }
 0x61f   : > { %5002 = vmatmul.mubr.f32.gmra.mrb[34].mxu0 %v14404_v46  ;;  %v14537_v46 = vand.u32 4294901760, %v5368_v26 }
 0x620   : > { %5007 = vmatprep.mubr.f32.mxu0 %v17017_v9 }
 0x623   : > { %5010 = vmatmul.mubr.f32.gmra.mrb[36].mxu0 %v4760_v33 }
 0x624   : > { %5088 = vmatprep.mubr.f32.mxu0 %v17017_v9 }
 0x627   : > { %5092 = vmatmul.mubr.f32.vlgmr.msra.gmra.mrb[30].mxu0 %v4728_v42  ;;  %v5365_v42 = vsel %vm486_vm0, %v10356_v5, 0 }
 0x628   : > { %10531 = vmatpush1.bf16.msra.mxu0 %v14372_v27  ;;  %5097 = vmatprep.mubr.f32.mxu0 %v17017_v9  ;;  %v14497_v27 = vsub.f32 %v5356_v28, %v14487_v63 }
 0x629   : > { %10533 = vmatprep.subr.bf16.mxu0 %v10532_v62 }
 0x62a   : > { %v5456_v30 = vand.u32 4294901760, %v14497_v27 }
 0x62b   : > { %5101 = vmatmul.mubr.f32.gmra.mrb[32].mxu0 %v4739_v51 }
 0x62c   : > { %10535 = vmatpush1.bf16.msra.mxu0 %v14374_v55  ;;  %5106 = vmatprep.mubr.f32.mxu0 %v17017_v9  ;;  %v14499_v55 = vand.u32 4294901760, %v5359_v60  ;;  %v5457_v21 = vsub.f32 %v14497_v27, %v5456_v30 }
 0x62d   : > { %10537 = vmatprep.subr.bf16.mxu0 %v14305_v1  ;;  %v10352_v1 = vld [vmem:[%s12172_s11 + $0x80] sm:$0xff] }
 0x62e   : > { %v14512_v43 = vsub.f32 %v5359_v60, %v14499_v55  ;;  %v5458_v51 = vand.u32 4294901760, %v5457_v21  ;;  %v17024_v60 = vld [vmem:[#allocation28_spill] sm:$0xff] }
 0x62f   : > { %5110 = vmatmul.mubr.f32.gmra.mrb[34].mxu0 %v4750_v41  ;;  %v14549_v41 = vsub.f32 %v5368_v26, %v14537_v46 }
 0x630   : > { %5115 = vmatprep.mubr.f32.mxu0 %v17017_v9  ;;  %v5467_v32 = vand.u32 4294901760, %v14512_v43 }
 0x631   : > { %v5500_v22 = vand.u32 4294901760, %v14549_v41 }
 0x632   : > { %v5468_v18 = vsub.f32 %v14512_v43, %v5467_v32 }
 0x633   : > { %5119 = vmatmul.mubr.f32.gmra.mrb[36].mxu0 %v4761_v0  ;;  %v5501_v0 = vsub.f32 %v14549_v41, %v5500_v22 }
 0x634   : > { %5213 = vmatprep.mubr.f32.mxu0 %v17017_v9  ;;  %v5469_v2 = vand.u32 4294901760, %v5468_v18 }
 0x635   : > { %v5502_v36 = vand.u32 4294901760, %v5501_v0 }
 0x637   : > { %5215 = vmatmul.mubr.f32.vlgmr.msra.gmra.mrb[30].mxu0 %v14376_v39 }
 0x638   : > { %10539 = vmatpush1.bf16.msra.mxu0 %v14287_v37  ;;  %5220 = vmatprep.mubr.f32.mxu0 %v17017_v9  ;;  %v5353_v37 = vsel %vm486_vm0, %v10352_v1, 0  ;;  %v5522_v1 = vand.u32 4294901760, %v14570_v58 }
 0x639   : > { %10541 = vmatprep.subr.bf16.mxu0 %v14408_v52  ;;  %v14478_v34 = vand.u32 4294901760, %v5353_v37  ;;  %v5371_v52 = vsel %vm486_vm0, %v10358_v56, 0 }
 0x63a   : > { %v14551_v33 = vand.u32 4294901760, %v5371_v52  ;;  %v5523_v14 = vsub.f32 %v14570_v58, %v5522_v1 }
 0x63b   : > { %5222 = vmatmul.mubr.f32.gmra.mrb[32].mxu0 %v14384_v12 }
 0x63c   : > { %10543 = vmatpush1.bf16.msra.mxu0 %v14339_v47  ;;  %5227 = vmatprep.mubr.f32.mxu0 %v17017_v9  ;;  %v14485_v47 = vsub.f32 %v5353_v37, %v14478_v34  ;;  %v14560_v3 = vsub.f32 %v5371_v52, %v14551_v33  ;;  %v5524_v28 = vand.u32 4294901760, %v5523_v14 }
 0x63d   : > { %5377 = vmatprep.subr.mxu0 %v17018_v4 }
 0x63e   : > { %v5445_v8 = vand.u32 4294901760, %v14485_v47  ;;  %v5511_v29 = vand.u32 4294901760, %v14560_v3 }
 0x63f   : > { %5229 = vmatmul.mubr.f32.gmra.mrb[34].mxu0 %v14396_v54 }
 0x640   : > { %5234 = vmatprep.mubr.f32.mxu0 %v17017_v9  ;;  %v5512_v50 = vsub.f32 %v14560_v3, %v5511_v29 }
 0x642   : > { %v5513_v37 = vand.u32 4294901760, %v5512_v50 }
 0x643   : > { %5236 = vmatmul.mubr.f32.gmra.mrb[36].mxu0 %v14406_v11 }
 0x644   : > { %5314 = vmatprep.mubr.f32.mxu0 %v17017_v9 }
 0x647   : > { %5316 = vmatmul.mubr.f32.vlgmr.msra.gmra.mrb[30].mxu0 %v14376_v39  ;;  %v5362_v39 = vsel %vm486_vm0, %v10355_v16, 0  ;;  %v17025_v16 = vld [vmem:[#allocation30_spill] sm:$0xff] }
 0x648   : > { %5321 = vmatprep.mubr.f32.mxu0 %v17017_v9  ;;  %5379 = vmatpush1.msra.mxu0 %v17019_v48  ;;  %v14504_v20 = vand.u32 4294901760, %v5362_v39 }
 0x649   : > { %5536 = vmatprep.subr.mxu0 %v17020_v45 }
 0x64a   : > { %v14518_v59 = vsub.f32 %v5362_v39, %v14504_v20 }
 0x64b   : > { %5323 = vmatmul.mubr.f32.gmra.mrb[32].mxu0 %v14384_v12  ;;  %v5446_v12 = vsub.f32 %v14485_v47, %v5445_v8 }
 0x64c   : > { %5328 = vmatprep.mubr.f32.mxu0 %v17017_v9  ;;  %v5478_v49 = vand.u32 4294901760, %v14518_v59 }
 0x64d   : > { %v5447_v7 = vand.u32 4294901760, %v5446_v12 }
 0x64e   : > { %v5479_v40 = vsub.f32 %v14518_v59, %v5478_v49 }
 0x64f   : > { %5330 = vmatmul.mubr.f32.gmra.mrb[34].mxu0 %v14396_v54  ;;  %v14525_v54 = vand.u32 4294901760, %v5365_v42 }
 0x650   : > { %5335 = vmatprep.mubr.f32.mxu0 %v17017_v9  ;;  %v5480_v23 = vand.u32 4294901760, %v5479_v40 }
 0x651   : > { %v14535_v38 = vsub.f32 %v5365_v42, %v14525_v54 }
 0x653   : > { %5337 = vmatmul.mubr.f32.gmra.mrb[36].mxu0 %v14406_v11  ;;  %v17021_v11 = vld [vmem:[#allocation32_spill] sm:$0xff]  ;;  %v5489_v13 = vand.u32 4294901760, %v14535_v38 }
 0x654   : > { %5442 = vmatprep.mubr.f32.mxu0 %v17017_v9 }
 0x655   : > { %v5490_v62 = vsub.f32 %v14535_v38, %v5489_v13 }
 0x657   : > { %5448 = vmatmul.mubr.f32.vlgmr.msra.gmra.mrb[38].mxu0 %v5447_v7  ;;  %v5491_v35 = vand.u32 4294901760, %v5490_v62 }
 0x658   : > { %5453 = vmatprep.mubr.f32.mxu0 %v17017_v9  ;;  %5542 = vmatpush1.msra.mxu0 %v17021_v11 }
 0x659   : > { %5664 = vmatprep.subr.mxu0 %v17022_v24 }
 0x65b   : > { %5459 = vmatmul.mubr.f32.gmra.mrb[40].mxu0 %v5458_v51 }
 0x65c   : > { %5464 = vmatprep.mubr.f32.mxu0 %v17017_v9 }
 0x65f   : > { %5470 = vmatmul.mubr.f32.gmra.mrb[42].mxu0 %v5469_v2 }
 0x660   : > { %5475 = vmatprep.mubr.f32.mxu0 %v17017_v9 }
 0x663   : > { %5481 = vmatmul.mubr.f32.gmra.mrb[44].mxu0 %v5480_v23 }
 0x664   : > { %5486 = vmatprep.mubr.f32.mxu0 %v17017_v9 }
 0x667   : > { %5492 = vmatmul.mubr.f32.gmra.mrb[46].mxu0 %v5491_v35 }
 0x668   : > { %5497 = vmatprep.mubr.f32.mxu0 %v17017_v9 }
 0x66b   : > { %5503 = vmatmul.mubr.f32.gmra.mrb[48].mxu0 %v5502_v36 }
 0x66c   : > { %5508 = vmatprep.mubr.f32.mxu0 %v17017_v9 }
 0x66f   : > { %5514 = vmatmul.mubr.f32.gmra.mrb[50].mxu0 %v5513_v37 }
 0x670   : > { %5519 = vmatprep.mubr.f32.mxu0 %v17017_v9 }
 0x673   : > { %5525 = vmatmul.mubr.f32.gmra.mrb[52].mxu0 %v5524_v28 }
 0x674   : > { %5605 = vmatprep.mubr.f32.mxu0 %v17017_v9 }
 0x677   : > { %5607 = vmatmul.mubr.f32.vlgmr.msra.gmra.mrb[38].mxu0 %v14478_v34 }
 0x678   : > { %5612 = vmatprep.mubr.f32.mxu0 %v17017_v9  ;;  %5667 = vmatpush1.msra.mxu0 %v17023_v6 }
 0x679   : > { %5796 = vmatprep.subr.mxu0 %v17018_v4 }
 0x67b   : > { %5614 = vmatmul.mubr.f32.gmra.mrb[40].mxu0 %v14487_v63 }
 0x67c   : > { %5619 = vmatprep.mubr.f32.mxu0 %v17017_v9 }
 0x67f   : > { %5621 = vmatmul.mubr.f32.gmra.mrb[42].mxu0 %v14499_v55 }
 0x680   : > { %5626 = vmatprep.mubr.f32.mxu0 %v17017_v9 }
 0x683   : > { %5628 = vmatmul.mubr.f32.gmra.mrb[44].mxu0 %v14504_v20 }
 0x684   : > { %5633 = vmatprep.mubr.f32.mxu0 %v17017_v9 }
 0x687   : > { %5635 = vmatmul.mubr.f32.gmra.mrb[46].mxu0 %v14525_v54 }
 0x688   : > { %5640 = vmatprep.mubr.f32.mxu0 %v17017_v9 }
 0x68b   : > { %5642 = vmatmul.mubr.f32.gmra.mrb[48].mxu0 %v14537_v46 }
 0x68c   : > { %5647 = vmatprep.mubr.f32.mxu0 %v17017_v9 }
 0x68f   : > { %5649 = vmatmul.mubr.f32.gmra.mrb[50].mxu0 %v14551_v33 }
 0x690   : > { %5654 = vmatprep.mubr.f32.mxu0 %v17017_v9 }
 0x693   : > { %5656 = vmatmul.mubr.f32.gmra.mrb[52].mxu0 %v14562_v31 }
 0x694   : > { %5730 = vmatprep.mubr.f32.mxu0 %v17017_v9 }
 0x697   : > { %5733 = vmatmul.mubr.f32.vlgmr.msra.gmra.mrb[38].mxu0 %v14485_v47 }
 0x698   : > { %5738 = vmatprep.mubr.f32.mxu0 %v17017_v9  ;;  %5798 = vmatpush1.msra.mxu0 %v17019_v48 }
 0x699   : > { %5937 = vmatprep.subr.mxu0 %v17024_v60 }
 0x69b   : > { %5741 = vmatmul.mubr.f32.gmra.mrb[40].mxu0 %v14497_v27 }
 0x69c   : > { %5746 = vmatprep.mubr.f32.mxu0 %v17017_v9 }
 0x69f   : > { %5749 = vmatmul.mubr.f32.gmra.mrb[42].mxu0 %v14512_v43 }
 0x6a0   : > { %5754 = vmatprep.mubr.f32.mxu0 %v17017_v9 }
 0x6a3   : > { %5757 = vmatmul.mubr.f32.gmra.mrb[44].mxu0 %v14518_v59 }
 0x6a4   : > { %5762 = vmatprep.mubr.f32.mxu0 %v17017_v9 }
 0x6a7   : > { %5765 = vmatmul.mubr.f32.gmra.mrb[46].mxu0 %v14535_v38 }
 0x6a8   : > { %5770 = vmatprep.mubr.f32.mxu0 %v17017_v9 }
 0x6ab   : > { %5773 = vmatmul.mubr.f32.gmra.mrb[48].mxu0 %v14549_v41 }
 0x6ac   : > { %5778 = vmatprep.mubr.f32.mxu0 %v17017_v9 }
 0x6af   : > { %5781 = vmatmul.mubr.f32.gmra.mrb[50].mxu0 %v14560_v3 }
 0x6b0   : > { %5786 = vmatprep.mubr.f32.mxu0 %v17017_v9 }
 0x6b3   : > { %5789 = vmatmul.mubr.f32.gmra.mrb[52].mxu0 %v14570_v58 }
 0x6b4   : > { %5861 = vmatprep.mubr.f32.mxu0 %v17017_v9 }
 0x6b7   : > { %5865 = vmatmul.mubr.f32.vlgmr.msra.gmra.mrb[38].mxu0 %v5445_v8 }
 0x6b8   : > { %5870 = vmatprep.mubr.f32.mxu0 %v17017_v9  ;;  %5941 = vmatpush1.msra.mxu0 %v17025_v16 }
 0x6b9   : > { %6062 = vmatprep.subr.mxu0 %v17018_v4 }
 0x6bb   : > { %5874 = vmatmul.mubr.f32.gmra.mrb[40].mxu0 %v5456_v30 }
 0x6bc   : > { %5879 = vmatprep.mubr.f32.mxu0 %v17017_v9 }
 0x6bf   : > { %5883 = vmatmul.mubr.f32.gmra.mrb[42].mxu0 %v5467_v32 }
 0x6c0   : > { %5888 = vmatprep.mubr.f32.mxu0 %v17017_v9 }
 0x6c3   : > { %5892 = vmatmul.mubr.f32.gmra.mrb[44].mxu0 %v5478_v49 }
 0x6c4   : > { %5897 = vmatprep.mubr.f32.mxu0 %v17017_v9 }
 0x6c7   : > { %5901 = vmatmul.mubr.f32.gmra.mrb[46].mxu0 %v5489_v13 }
 0x6c8   : > { %5906 = vmatprep.mubr.f32.mxu0 %v17017_v9 }
 0x6cb   : > { %5910 = vmatmul.mubr.f32.gmra.mrb[48].mxu0 %v5500_v22 }
 0x6cc   : > { %5915 = vmatprep.mubr.f32.mxu0 %v17017_v9 }
 0x6cf   : > { %5919 = vmatmul.mubr.f32.gmra.mrb[50].mxu0 %v5511_v29 }
 0x6d0   : > { %5924 = vmatprep.mubr.f32.mxu0 %v17017_v9 }
 0x6d3   : > { %5928 = vmatmul.mubr.f32.gmra.mrb[52].mxu0 %v5522_v1 }
 0x6d4   : > { %6004 = vmatprep.mubr.f32.mxu0 %v17017_v9 }
 0x6d7   : > { %6006 = vmatmul.mubr.f32.vlgmr.msra.gmra.mrb[38].mxu0 %v14478_v34 }
 0x6d8   : > { %6011 = vmatprep.mubr.f32.mxu0 %v17017_v9  ;;  %6064 = vmatpush1.msra.mxu0 %v17019_v48 }
 0x6db   : > { %6013 = vmatmul.mubr.f32.gmra.mrb[40].mxu0 %v14487_v63 }
 0x6dc   : > { %6018 = vmatprep.mubr.f32.mxu0 %v17017_v9 }
 0x6df   : > { %6020 = vmatmul.mubr.f32.gmra.mrb[42].mxu0 %v14499_v55 }
 0x6e0   : > { %6025 = vmatprep.mubr.f32.mxu0 %v17017_v9 }
 0x6e3   : > { %6027 = vmatmul.mubr.f32.gmra.mrb[44].mxu0 %v14504_v20 }
 0x6e4   : > { %6032 = vmatprep.mubr.f32.mxu0 %v17017_v9 }
 0x6e7   : > { %6034 = vmatmul.mubr.f32.gmra.mrb[46].mxu0 %v14525_v54 }
 0x6e8   : > { %6039 = vmatprep.mubr.f32.mxu0 %v17017_v9 }
 0x6eb   : > { %6041 = vmatmul.mubr.f32.gmra.mrb[48].mxu0 %v14537_v46 }
 0x6ec   : > { %6046 = vmatprep.mubr.f32.mxu0 %v17017_v9 }
 0x6ef   : > { %6048 = vmatmul.mubr.f32.gmra.mrb[50].mxu0 %v14551_v33 }
 0x6f0   : > { %6053 = vmatprep.mubr.f32.mxu0 %v17017_v9 }
 0x6f3   : > { %6055 = vmatmul.mubr.f32.gmra.mrb[52].mxu0 %v14562_v31 }
 0x6f4   : > { %6127 = vmatprep.mubr.f32.mxu0 %v17017_v9 }
 0x6f7   : > { %6129 = vmatmul.mubr.f32.vlgmr.msra.gmra.mrb[38].mxu0 %v14478_v34 }
 0x6f8   : > { %6134 = vmatprep.mubr.f32.mxu0 %v17017_v9 }
 0x6fb   : > { %6136 = vmatmul.mubr.f32.gmra.mrb[40].mxu0 %v14487_v63 }
 0x6fc   : > { %6141 = vmatprep.mubr.f32.mxu0 %v17017_v9 }
 0x6ff   : > { %6143 = vmatmul.mubr.f32.gmra.mrb[42].mxu0 %v14499_v55 }
 0x700   : > { %6148 = vmatprep.mubr.f32.mxu0 %v17017_v9 }
 0x703   : > { %6150 = vmatmul.mubr.f32.gmra.mrb[44].mxu0 %v14504_v20 }
 0x704   : > { %6155 = vmatprep.mubr.f32.mxu0 %v17017_v9 }
 0x707   : > { %6157 = vmatmul.mubr.f32.gmra.mrb[46].mxu0 %v14525_v54 }
 0x708   : > { %6162 = vmatprep.mubr.f32.mxu0 %v17017_v9 }
 0x70b   : > { %6164 = vmatmul.mubr.f32.gmra.mrb[48].mxu0 %v14537_v46 }
 0x70c   : > { %6169 = vmatprep.mubr.f32.mxu0 %v17017_v9 }
 0x70f   : > { %6171 = vmatmul.mubr.f32.gmra.mrb[50].mxu0 %v14551_v33 }
 0x710   : > { %6176 = vmatprep.mubr.f32.mxu0 %v17017_v9 }
 0x713   : > { %6178 = vmatmul.mubr.f32.gmra.mrb[52].mxu0 %v14562_v31 }
 0x714   : > { %9567 = vmatprep.mubr.f32.mxu0 %v17017_v9 }
 0x71a   : > { %v14675_v34 = vpop.f32.mrb[30].mxu0 }
 0x71b   : > { %v14677_v47 = vpop.f32.mrb[31].mxu0 }
 0x71e   : > { %v14679_v63 = vpop.f32.mrb[32].mxu0 }
 0x71f   : > { %v14681_v8 = vpop.f32.mrb[33].mxu0 }
 0x722   : > { %v14683_v27 = vpop.f32.mrb[34].mxu0 }
 0x723   : > { %v14685_v55 = vpop.f32.mrb[35].mxu0 }
 0x726   : > { %v14687_v39 = vpop.f32.mrb[36].mxu0 }
 0x727   : > { %17026 = vst [vmem:[#allocation35_spill] sm:$0xff] %v14687_v39  ;;  %v14689_v5 = vpop.f32.mrb[37].mxu0 }
 0x728   : > { %17027 = vst [vmem:[#allocation38_spill] sm:$0xff] %v14689_v5 }
 0x7ca   : > { %v14691_v20 = vpop.f32.mrb[38].mxu0 }
 0x7cb   : > { %v16854_v12 = vand.u32 2147483647, %v14691_v20  ;;  %v6203_v30 = vand.u32 2139095040, %v14691_v20  ;;  %v14695_v43 = vpop.f32.mrb[39].mxu0 }
 0x7cc   : > { %v16853_v42 = vand.u32 2147483647, %v14695_v43  ;;  %v6307_v61 = vand.u32 2139095040, %v14695_v43 }
 0x7cd   : > { %v6204_v59 = vshrl.u32 %v6203_v30, 23  ;;  %v6207_v7 = vand.u32 8388607, %v16854_v12 }
 0x7ce   : > { %v6308_v21 = vshrl.u32 %v6307_v61, 23  ;;  %v6311_v32 = vand.u32 8388607, %v16853_v42  ;;  %v14703_v54 = vpop.f32.mrb[40].mxu0 }
 0x7cf   : > { %v10360_v26 = vadd.s32 4294967169, %v6204_v59  ;;  %v14705_v56 = vpop.f32.mrb[41].mxu0  ;;  %v6411_v51 = vand.u32 2139095040, %v14703_v54  ;;  %v6208_v38 = vor.u32 8388608, %v6207_v7 }
 0x7d0   : > { %v10364_v49 = vadd.s32 4294967169, %v6308_v21  ;;  %v6312_v46 = vor.u32 8388608, %v6311_v32 }
 0x7d1   : > { %v6210_v18 = vadd.s32 1, %v10360_v26  ;;  %v6412_v19 = vshrl.u32 %v6411_v51, 23  ;;  %v14712_v62 = vshll.u32 %v6208_v38, 8 }
 0x7d2   : > { %v6314_v52 = vadd.s32 1, %v10364_v49  ;;  %v14708_v40 = vpop.f32.mrb[42].mxu0  ;;  %v14716_v3 = vshll.u32 %v6312_v46, 8 }
 0x7d3   : > { %vm6211_vm12 = vcmp.gt.s32.totalorder %v6210_v18, 0  ;;  %v14710_v2 = vpop.f32.mrb[43].mxu0  ;;  %v10368_v41 = vadd.s32 4294967169, %v6412_v19 }
 0x7d4   : > { %v6212_v13 = vsel %vm6211_vm12, %v6210_v18, 0  ;;  %vm6315_vm13 = vcmp.gt.s32.totalorder %v6314_v52, 0 }
 0x7d5   : > { %v6213_v33 = vshrl.u32 %v6212_v13, 5  ;;  %v6214_v17 = vand.u32 31, %v6212_v13  ;;  %v6316_v23 = vsel %vm6315_vm13, %v6314_v52, 0  ;;  %v14721_v58 = vadd.s32 1, %v10368_v41 }
 0x7d6   : > { %v14714_v22 = vshrl.u32 %v6316_v23, 5  ;;  %v14718_v31 = vpop.f32.mrb[44].mxu0  ;;  %v6318_v29 = vand.u32 31, %v6316_v23 }
 0x7d7   : > { %v6215_v35 = vsub.s32 32, %v6214_v17  ;;  %v6217_v0 = vshll.u32 %v16914_v10, %v6214_v17  ;;  %v14723_v36 = vpop.f32.mrb[45].mxu0  ;;  %v6220_v50 = vshll.u32 %v16954_v57, %v6214_v17  ;;  %v6223_v1 = vshll.u32 %v16955_v44, %v6214_v17 }
 0x7d8   : > { %v6226_v37 = vshll.u32 %v16956_v15, %v6214_v17  ;;  %v6229_v14 = vshll.u32 %v16915_v53, %v6214_v17  ;;  %vm6232_vm4 = vcmp.lt.s32.totalorder %v6213_v33, 1  ;;  %vm6233_vm8 = vcmp.lt.s32.totalorder %v6213_v33, 2 }
 0x7d9   : > { %v6218_v28 = vshrl.u32 %v16954_v57, %v6215_v35  ;;  %v6221_v30 = vshrl.u32 %v16955_v44, %v6215_v35  ;;  %v6224_v61 = vshrl.u32 %v16956_v15, %v6215_v35  ;;  %v6216_v59 = vshrl.u32 %v16914_v10, %v6215_v35 }
 0x7da   : > { %v6227_v7 = vshrl.u32 %v16915_v53, %v6215_v35  ;;  %v6230_v21 = vshrl.u32 %v16913_v25, %v6215_v35  ;;  %v6319_v51 = vsub.s32 32, %v6318_v29  ;;  %vm6234_vm1 = vcmp.lt.s32.totalorder %v6213_v33, 3 }
 0x7db   : > { %v6219_v32 = vor.u32 %v6218_v28, %v6217_v0  ;;  %v6222_v26 = vor.u32 %v6221_v30, %v6220_v50  ;;  %v6225_v49 = vor.u32 %v6224_v61, %v6223_v1  ;;  %vm6235_vm14 = vcmp.lt.s32.totalorder %v6213_v33, 4 }
 0x7dc   : > { %v6228_v18 = vor.u32 %v6227_v7, %v6226_v37  ;;  %v6231_v38 = vor.u32 %v6230_v21, %v6229_v14  ;;  %v6321_v35 = vshll.u32 %v16914_v10, %v6318_v29  ;;  %v6322_v1 = vshrl.u32 %v16954_v57, %v6319_v51 }
 0x7dd   : > { %v6236_v46 = vsel %vm6232_vm4, %v6216_v59, %v6219_v32  ;;  %v6237_v52 = vsel %vm6235_vm14, %v6225_v49, 2102212464  ;;  %v6240_v19 = vsel %vm6232_vm4, %v6219_v32, %v6222_v26  ;;  %v6244_v13 = vsel %vm6232_vm4, %v6222_v26, %v6225_v49 }
 0x7de   : > { %v6238_v41 = vsel %vm6234_vm1, %v6222_v26, %v6237_v52  ;;  %v6241_v17 = vsel %vm6235_vm14, %v6228_v18, 920167782  ;;  %v6245_v23 = vsel %vm6235_vm14, %v6231_v38, 1326507024  ;;  %v6324_v37 = vshll.u32 %v16954_v57, %v6318_v29 }
 0x7df   : > { %v6242_v0 = vsel %vm6234_vm1, %v6225_v49, %v6241_v17  ;;  %v6246_v50 = vsel %vm6234_vm1, %v6228_v18, %v6245_v23  ;;  %v6239_v14 = vsel %vm6233_vm8, %v6236_v46, %v6238_v41  ;;  %v6325_v61 = vshrl.u32 %v16955_v44, %v6319_v51 }
 0x7e0   : > { %v6243_v28 = vsel %vm6233_vm8, %v6240_v19, %v6242_v0  ;;  %v6247_v30 = vsel %vm6233_vm8, %v6244_v13, %v6246_v50  ;;  %v6323_v26 = vor.u32 %v6322_v1, %v6321_v35  ;;  %v6327_v18 = vshll.u32 %v16955_v44, %v6318_v29 }
 0x7e1   : > { %v14746_v59 = vmul.u32.u64.low %v14712_v62, %v6247_v30  ;;  %v14747_v7 = vmul.u32.u64.high %v14712_v62, %v6247_v30, %v14746_v59  ;;  %v14750_v21 = vmul.u32.u64.low %v14712_v62, %v6243_v28  ;;  %v14751_v32 = vmul.u32.u64.high %v14712_v62, %v6243_v28, %v14750_v21 }
 0x7e2   : > { %v6326_v49 = vor.u32 %v6325_v61, %v6324_v37  ;;  %v6328_v38 = vshrl.u32 %v16956_v15, %v6319_v51  ;;  %v6320_v33 = vshrl.u32 %v16914_v10, %v6319_v51  ;;  %v6330_v46 = vshll.u32 %v16956_v15, %v6318_v29 }
 0x7e3   : > { %v6331_v52 = vshrl.u32 %v16915_v53, %v6319_v51  ;;  %v6334_v19 = vshrl.u32 %v16913_v25, %v6319_v51  ;;  %v6255_v13 = vmul.u32 %v14712_v62, %v6239_v14  ;;  %v6333_v17 = vshll.u32 %v16915_v53, %v6318_v29 }
 0x7e4   : > { %v6329_v41 = vor.u32 %v6328_v38, %v6327_v18  ;;  %vm6336_vm5 = vcmp.lt.s32.totalorder %v14714_v22, 1  ;;  %vm6257_vm15 = vc.u32 %v14747_v7, %v14750_v21  ;;  %v6258_v23 = vadd.s32 1, %v14751_v32 }
 0x7e5   : > { %v6332_v35 = vor.u32 %v6331_v52, %v6330_v46  ;;  %vm6337_vm6 = vcmp.lt.s32.totalorder %v14714_v22, 2  ;;  %v6335_v0 = vor.u32 %v6334_v19, %v6333_v17  ;;  %vm6338_vm7 = vcmp.lt.s32.totalorder %v14714_v22, 3  ;;  %v14785_v19 = vpop.f32.mrb[46].mxu0 }
 0x7e6   : > { %vm6339_vm11 = vcmp.lt.s32.totalorder %v14714_v22, 4  ;;  %v6344_v51 = vsel %vm6336_vm5, %v6323_v26, %v6326_v49  ;;  %v6259_v62 = vsel %vm6257_vm15, %v6258_v23, %v14751_v32  ;;  %v6348_v1 = vsel %vm6336_vm5, %v6326_v49, %v6329_v41 }
 0x7e7   : > { %v6341_v50 = vsel %vm6339_vm11, %v6329_v41, 2102212464  ;;  %v6345_v29 = vsel %vm6339_vm11, %v6332_v35, 920167782  ;;  %v6260_v37 = vadd.s32 %v6259_v62, %v6255_v13  ;;  %v6340_v14 = vsel %vm6336_vm5, %v6320_v33, %v6323_v26 }
 0x7e8   : > { %v6346_v28 = vsel %vm6338_vm7, %v6329_v41, %v6345_v29  ;;  %v6349_v30 = vsel %vm6339_vm11, %v6335_v0, 1326507024  ;;  %v6342_v61 = vsel %vm6338_vm7, %v6326_v49, %v6341_v50  ;;  %vm6419_vm2 = vcmp.gt.s32.totalorder %v14721_v58, 0 }
 0x7e9   : > { %v6347_v59 = vsel %vm6337_vm6, %v6344_v51, %v6346_v28  ;;  %v6350_v18 = vsel %vm6338_vm7, %v6332_v35, %v6349_v30  ;;  %v6261_v38 = vadd.s32 536870912, %v6260_v37  ;;  %v6420_v49 = vsel %vm6419_vm2, %v14721_v58, 0 }
 0x7ea   : > { %v6351_v46 = vsel %vm6337_vm6, %v6348_v1, %v6350_v18  ;;  %v14776_v32 = vmul.u32.u64.low %v14716_v3, %v6347_v59  ;;  %v14777_v52 = vmul.u32.u64.high %v14716_v3, %v6347_v59, %v14776_v32  ;;  %v6343_v41 = vsel %vm6337_vm6, %v6340_v14, %v6342_v61 }
 0x7eb   : > { %v14781_v26 = vmul.u32.u64.low %v14716_v3, %v6351_v46  ;;  %v14782_v33 = vmul.u32.u64.high %v14716_v3, %v6351_v46, %v14781_v26  ;;  %v14787_v13 = vshrl.u32 %v6261_v38, 30  ;;  %v6422_v17 = vand.u32 31, %v6420_v49 }
 0x7ec   : > { %v6362_v35 = vadd.s32 1, %v14777_v52  ;;  %v6359_v0 = vmul.u32 %v14716_v3, %v6343_v41  ;;  %v16852_v50 = vand.u32 2147483647, %v14703_v54  ;;  %v6515_v61 = vand.u32 2139095040, %v14705_v56 }
 0x7ed   : > { %v6263_v23 = vshll.u32 %v14787_v13, 30  ;;  %vm6361_vm9 = vc.u32 %v14782_v33, %v14776_v32  ;;  %v6423_v51 = vsub.s32 32, %v6422_v17  ;;  %v6425_v18 = vshll.u32 %v16914_v10, %v6422_v17 }
 0x7ee   : > { %v6363_v58 = vsel %vm6361_vm9, %v6362_v35, %v14777_v52  ;;  %v6415_v30 = vand.u32 8388607, %v16852_v50  ;;  %v6428_v38 = vshll.u32 %v16954_v57, %v6422_v17  ;;  %v6421_v26 = vshrl.u32 %v6420_v49, 5 }
 0x7ef   : > { %v14796_v62 = vsub.s32 %v6260_v37, %v6263_v23  ;;  %v6364_v29 = vadd.s32 %v6363_v58, %v6359_v0  ;;  %v6426_v14 = vshrl.u32 %v16954_v57, %v6423_v51  ;;  %v6429_v28 = vshrl.u32 %v16955_v44, %v6423_v51 }
 0x7f0   : > { %v6435_v37 = vshrl.u32 %v16915_v53, %v6423_v51  ;;  %v6432_v46 = vshrl.u32 %v16956_v15, %v6423_v51  ;;  %v6434_v41 = vshll.u32 %v16956_v15, %v6422_v17  ;;  %v6438_v23 = vshrl.u32 %v16913_v25, %v6423_v51 }
 0x7f1   : > { %v6266_v22 = vsub.s32 0, %v14796_v62  ;;  %v6365_v1 = vadd.s32 536870912, %v6364_v29  ;;  %v6427_v0 = vor.u32 %v6426_v14, %v6425_v18  ;;  %v6430_v58 = vor.u32 %v6429_v28, %v6428_v38 }
 0x7f2   : > { %v6436_v50 = vor.u32 %v6435_v37, %v6434_v41  ;;  %v6437_v42 = vshll.u32 %v16915_v53, %v6422_v17  ;;  %v6416_v16 = vor.u32 8388608, %v6415_v30  ;;  %vm6440_vm12 = vcmp.lt.s32.totalorder %v6421_v26, 1 }
 0x7f3   : > { %v10361_v3 = vmin.u32 %v6266_v22, %v14796_v62  ;;  %v14808_v59 = vshrl.u32 %v6365_v1, 30  ;;  %v6431_v22 = vshll.u32 %v16955_v44, %v6422_v17  ;;  %v6516_v6 = vshrl.u32 %v6515_v61, 23 }
 0x7f4   : > { %v6439_v49 = vor.u32 %v6438_v23, %v6437_v42  ;;  %vm6443_vm13 = vcmp.lt.s32.totalorder %v6421_v26, 4  ;;  %v6448_v28 = vsel %vm6440_vm12, %v6427_v0, %v6430_v58  ;;  %v6424_v37 = vshrl.u32 %v16914_v10, %v6423_v51 }
 0x7f5   : > { %v6268_v52 = vclz %v10361_v3  ;;  %v6367_v35 = vshll.u32 %v14808_v59, 30  ;;  %v6433_v60 = vor.u32 %v6432_v46, %v6431_v22  ;;  %v14820_v3 = vpop.f32.mrb[47].mxu0  ;;  %vm6442_vm4 = vcmp.lt.s32.totalorder %v6421_v26, 3 }
 0x7f6   : > { %v6449_v17 = vsel %vm6443_vm13, %v6436_v50, 920167782  ;;  %vm6441_vm8 = vcmp.lt.s32.totalorder %v6421_v26, 2  ;;  %v14827_v42 = vpop.f32.mrb[48].mxu0  ;;  %v6444_v51 = vsel %vm6440_vm12, %v6424_v37, %v6427_v0  ;;  %v10372_v22 = vadd.s32 4294967169, %v6516_v6 }
 0x7f7   : > { %v10362_v1 = vadd.s32 4294967294, %v6268_v52  ;;  %v14818_v12 = vsub.s32 %v6364_v29, %v6367_v35  ;;  %v6445_v30 = vsel %vm6443_vm13, %v6433_v60, 2102212464  ;;  %v6450_v38 = vsel %vm6442_vm4, %v6433_v60, %v6449_v17  ;;  %v14831_v41 = vpop.f32.mrb[49].mxu0 }
 0x7f8   : > { %v6451_v61 = vsel %vm6441_vm8, %v6448_v28, %v6450_v38  ;;  %v6452_v46 = vsel %vm6440_vm12, %v6430_v58, %v6433_v60  ;;  %v6453_v52 = vsel %vm6443_vm13, %v6439_v49, 1326507024  ;;  %v6456_v35 = vshll.u32 %v6416_v16, 8  ;;  %v14841_v60 = vpop.f32.mrb[50].mxu0 }
 0x7f9   : > { %vm10363_vm10 = vcmp.lt.s32.totalorder %v10362_v1, 0  ;;  %v6370_v14 = vsub.s32 0, %v14818_v12  ;;  %v6446_v11 = vsel %vm6442_vm4, %v6430_v58, %v6445_v30  ;;  %v6454_v17 = vsel %vm6442_vm4, %v6436_v50, %v6453_v52  ;;  %v14846_v16 = vpop.f32.mrb[51].mxu0 }
 0x7fa   : > { %v6271_v24 = vsel %vm10363_vm10, 0, %v10362_v1  ;;  %v6455_v48 = vsel %vm6441_vm8, %v6452_v46, %v6454_v17  ;;  %v14837_v28 = vmul.u32.u64.low %v6456_v35, %v6451_v61  ;;  %v14838_v38 = vmul.u32.u64.high %v6456_v35, %v6451_v61, %v14837_v28  ;;  %v14855_v46 = vpop.f32.mrb[52].mxu0 }
 0x7fb   : > { %v6276_v18 = vsub.s32 4294967266, %v6271_v24  ;;  %v10365_v29 = vmin.u32 %v6370_v14, %v14818_v12  ;;  %v6272_v1 = vsub.s32 32, %v6271_v24  ;;  %v6256_v6 = vadd.s32 %v14750_v21, %v14747_v7  ;;  %17028 = vst [vmem:[#allocation39_spill] sm:$0xff] %v14855_v46  ;;  %v14860_v7 = vpop.f32.mrb[53].mxu0 }
 0x7fc   : > { %v6447_v50 = vsel %vm6441_vm8, %v6444_v51, %v6446_v11  ;;  %v6522_v0 = vadd.s32 1, %v10372_v22  ;;  %v6286_v30 = vsub.s32 4, %v14787_v13  ;;  %v6466_v61 = vadd.s32 1, %v14838_v38  ;;  %17029 = vst [vmem:[#allocation40_spill] sm:$0xff] %v14860_v7 }
 0x7fd   : > { %v6372_v23 = vclz %v10365_v29  ;;  %v6277_v14 = vadd.s32 127, %v6276_v18  ;;  %v14843_v49 = vmul.u32.u64.low %v6456_v35, %v6455_v48  ;;  %v14844_v29 = vmul.u32.u64.high %v6456_v35, %v6455_v48, %v14843_v49 }
 0x7fe   : > { %v6274_v18 = vshrl.u32 %v6256_v6, %v6272_v1  ;;  %v6463_v52 = vmul.u32 %v6456_v35, %v6447_v50  ;;  %vm6523_vm5 = vcmp.gt.s32.totalorder %v6522_v0, 0  ;;  %vm6202_vm15 = vcmp.lt.s32.totalorder %v14691_v20, 0  ;;  %v4624_v1 = vpop.permute.xlu0 %4623 }
 0x7ff   : > { %v10366_v45 = vadd.s32 4294967294, %v6372_v23  ;;  %v6278_v37 = vshll.u32 %v6277_v14, 23  ;;  %vm6465_vm14 = vc.u32 %v14844_v29, %v14837_v28  ;;  %v6524_v21 = vsel %vm6523_vm5, %v6522_v0, 0  ;;  %v4629_v14 = vpop.permute.xlu1 %4628 }
 0x800   : > { %v6467_v11 = vsel %vm6465_vm14, %v6466_v61, %v14838_v38  ;;  %v6526_v23 = vand.u32 31, %v6524_v21  ;;  %v6287_v35 = vsel %vm6202_vm15, %v6286_v30, %v14787_v13  ;;  %v16856_v22 = vand.u32 2147483647, %v14705_v56 }
 0x801   : > { %vm10367_vm1 = vcmp.lt.s32.totalorder %v10366_v45, 0  ;;  %v6468_v26 = vadd.s32 %v6467_v11, %v6463_v52  ;;  %v6279_v17 = vor.u32 4788187, %v6278_v37  ;;  %v14873_v38 = vadd.f32 %v14677_v47, %v4624_v1 }
 0x802   : > { %v14851_v58 = vsel %vm10367_vm1, 0, %v10366_v45  ;;  %v6273_v45 = vshll.u32 %v14796_v62, %v6271_v24  ;;  %v6527_v24 = vsub.s32 32, %v6526_v23  ;;  %v14870_v62 = vadd.f32 %v14675_v34, %v4624_v1  ;;  %v14915_v7 = vpop.permute.xlu0 %4633 }
 0x803   : > { %v6380_v48 = vsub.s32 4294967266, %v14851_v58  ;;  %v6469_v6 = vadd.s32 536870912, %v6468_v26  ;;  %v14876_v50 = vadd.f32 %v14679_v63, %v4629_v14  ;;  %v14879_v0 = vadd.f32 %v14681_v8, %v4629_v14 }
 0x804   : > { %v6275_v51 = vor.u32 %v6274_v18, %v6273_v45  ;;  %v17030_v13 = vand.u32 2147483647, %v14691_v20  ;;  %v6376_v37 = vsub.s32 32, %v14851_v58  ;;  %v6360_v63 = vadd.s32 %v14776_v32, %v14782_v33 }
 0x805   : > { %v6381_v49 = vadd.s32 127, %v6380_v48  ;;  %v14888_v30 = vshrl.u32 %v6469_v6, 30  ;;  %v6519_v8 = vand.u32 8388607, %v16856_v22  ;;  %v6280_v61 = vand.u32 2147483647, %v6279_v17 }
 0x806   : > { %vm14883_vm6 = vcmp.le.f32.partialorder %v17030_v13, 0.7853982  ;;  %v6282_v34 = vcvt.s32.f32 %v6275_v51  ;;  %v6530_v45 = vshrl.u32 %v16954_v57, %v6527_v24  ;;  %v6533_v11 = vshrl.u32 %v16955_v44, %v6527_v24 }
 0x807   : > { %v6289_v47 = vsel %vm14883_vm6, 0, %v6287_v35  ;;  %v6382_v48 = vshll.u32 %v6381_v49, 23  ;;  %v6471_v52 = vshll.u32 %v14888_v30, 30  ;;  %v6536_v1 = vshrl.u32 %v16956_v15, %v6527_v24 }
 0x808   : > { %v6538_v51 = vshll.u32 %v16956_v15, %v6526_v23  ;;  %v6539_v35 = vshrl.u32 %v16915_v53, %v6527_v24  ;;  %v6378_v14 = vshrl.u32 %v6360_v63, %v6376_v37  ;;  %v14904_v32 = vshrl.u32 %v6524_v21, 5 }
 0x809   : > { %v14902_v6 = vsub.s32 %v6468_v26, %v6471_v52  ;;  %v6529_v33 = vshll.u32 %v16914_v10, %v6526_v23  ;;  %v6532_v17 = vshll.u32 %v16954_v57, %v6526_v23  ;;  %v6535_v49 = vshll.u32 %v16955_v44, %v6526_v23 }
 0x80a   : > { %v6540_v13 = vor.u32 %v6539_v35, %v6538_v51  ;;  %v6542_v22 = vshrl.u32 %v16913_v25, %v6527_v24  ;;  %v6377_v4 = vshll.u32 %v14818_v12, %v14851_v58  ;;  %v6383_v9 = vor.u32 4788187, %v6382_v48 }
 0x80b   : > { %v6474_v5 = vsub.s32 0, %v14902_v6  ;;  %v6619_v26 = vand.u32 2139095040, %v14708_v40  ;;  %v6531_v37 = vor.u32 %v6530_v45, %v6529_v33  ;;  %v6534_v21 = vor.u32 %v6533_v11, %v6532_v17 }
 0x80c   : > { %v6537_v63 = vor.u32 %v6536_v1, %v6535_v49  ;;  %v6541_v52 = vshll.u32 %v16915_v53, %v6526_v23  ;;  %v6283_v39 = vmul.f32 %v6282_v34, %v6280_v61  ;;  %v6379_v46 = vor.u32 %v6378_v14, %v6377_v4 }
 0x80d   : > { %v10369_v51 = vmin.u32 %v6474_v5, %v14902_v6  ;;  %vm6547_vm7 = vcmp.lt.s32.totalorder %v14904_v32, 4  ;;  %v14921_v12 = vadd.f32 %v14683_v27, %v14915_v7  ;;  %v6293_v58 = vadd.s32 3, %v6289_v47 }
 0x80e   : > { %v6543_v48 = vor.u32 %v6542_v22, %v6541_v52  ;;  %v6553_v45 = vsel %vm6547_vm7, %v6540_v13, 920167782  ;;  %vm6544_vm11 = vcmp.lt.s32.totalorder %v14904_v32, 1  ;;  %vm6546_vm2 = vcmp.lt.s32.totalorder %v14904_v32, 3 }
 0x80f   : > { %17033 = vst [vmem:[#allocation50_spill] sm:$0xff] %v14921_v12  ;;  %v6476_v11 = vclz %v10369_v51  ;;  %v6620_v23 = vshrl.u32 %v6619_v26, 23  ;;  %vm6306_vm9 = vcmp.lt.s32.totalorder %v14695_v43, 0  ;;  %v6384_v4 = vand.u32 2147483647, %v6383_v9 }
 0x810   : > { %v6520_v5 = vor.u32 8388608, %v6519_v8  ;;  %v6552_v34 = vsel %vm6544_vm11, %v6531_v37, %v6534_v21  ;;  %v6554_v27 = vsel %vm6546_vm2, %v6537_v63, %v6553_v45  ;;  %v6284_v22 = vxor.u32 2147483648, %v6283_v39 }
 0x811   : > { %v6386_v47 = vcvt.s32.f32 %v6379_v46  ;;  %v10370_v61 = vadd.s32 4294967294, %v6476_v11  ;;  %v6528_v1 = vshrl.u32 %v16914_v10, %v6527_v24  ;;  %vm6545_vm10 = vcmp.lt.s32.totalorder %v14904_v32, 2 }
 0x812   : > { %v6549_v35 = vsel %vm6547_vm7, %v6537_v63, 2102212464  ;;  %v6556_v9 = vsel %vm6544_vm11, %v6534_v21, %v6537_v63  ;;  %v6557_v8 = vsel %vm6547_vm7, %v6543_v48, 1326507024  ;;  %v6555_v14 = vsel %vm6545_vm10, %v6552_v34, %v6554_v27 }
 0x813   : > { %vm10371_vm12 = vcmp.lt.s32.totalorder %v10370_v61, 0  ;;  %v6558_v46 = vsel %vm6546_vm2, %v6540_v13, %v6557_v8  ;;  %v10376_v33 = vadd.s32 4294967169, %v6620_v23  ;;  %v17034_v24 = vand.u32 2147483647, %v14695_v43 }
 0x814   : > { %v6387_v49 = vmul.f32 %v6386_v47, %v6384_v4  ;;  %v6479_v26 = vsel %vm10371_vm12, 0, %v10370_v61  ;;  %v6559_v63 = vsel %vm6545_vm10, %v6556_v9, %v6558_v46  ;;  %v6560_v52 = vshll.u32 %v6520_v5, 8 }
 0x815   : > { %vm14946_vm13 = vcmp.le.f32.partialorder %v17034_v24, 0.7853982  ;;  %v6390_v51 = vsub.s32 4, %v14808_v59  ;;  %v6484_v48 = vsub.s32 4294967266, %v6479_v26  ;;  %v6548_v45 = vsel %vm6544_vm11, %v6528_v1, %v6531_v37 }
 0x816   : > { %v6550_v13 = vsel %vm6546_vm2, %v6534_v21, %v6549_v35  ;;  %v14957_v11 = vmul.u32.u64.low %v6560_v52, %v6559_v63  ;;  %v14958_v23 = vmul.u32.u64.high %v6560_v52, %v6559_v63, %v14957_v11  ;;  %v6285_v4 = vsel %vm6202_vm15, %v6284_v22, %v6283_v39 }
 0x817   : > { %v14960_v34 = vmul.u32.u64.low %v6560_v52, %v6555_v14  ;;  %v14961_v27 = vmul.u32.u64.high %v6560_v52, %v6555_v14, %v14960_v34  ;;  %v6480_v5 = vsub.s32 32, %v6479_v26  ;;  %v6485_v47 = vadd.s32 127, %v6484_v48 }
 0x818   : > { %v6626_v61 = vadd.s32 1, %v10376_v33  ;;  %v6388_v9 = vxor.u32 2147483648, %v6387_v49  ;;  %vm6410_vm4 = vcmp.lt.s32.totalorder %v14703_v54, 0  ;;  %v6551_v37 = vsel %vm6545_vm10, %v6548_v45, %v6550_v13 }
 0x819   : > { %v16859_v21 = vand.u32 2147483647, %v14708_v40  ;;  %v6391_v1 = vsel %vm6306_vm9, %v6390_v51, %v14808_v59  ;;  %v6464_v35 = vadd.s32 %v14837_v28, %v14844_v29  ;;  %v6486_v8 = vshll.u32 %v6485_v47, 23 }
 0x81a   : > { %vm6627_vm8 = vcmp.gt.s32.totalorder %v6626_v61, 0  ;;  %v6288_v39 = vsel %vm14883_vm6, %v14691_v20, %v6285_v4  ;;  %v6494_v22 = vsub.s32 4, %v14888_v30  ;;  %vm6569_vm1 = vc.u32 %v14958_v23, %v14960_v34 }
 0x81b   : > { %v6570_v32 = vadd.s32 1, %v14961_v27  ;;  %v14982_v14 = vand.u32 3, %v6293_v58  ;;  %v6482_v46 = vshrl.u32 %v6464_v35, %v6480_v5  ;;  %v6567_v59 = vmul.u32 %v6560_v52, %v6551_v37 }
 0x81c   : > { %v6628_v33 = vsel %vm6627_vm8, %v6626_v61, 0  ;;  %v6389_v28 = vsel %vm6306_vm9, %v6388_v9, %v6387_v49  ;;  %v17037_v29 = vand.u32 2147483647, %v14703_v54  ;;  %v6487_v24 = vor.u32 4788187, %v6486_v8 }
 0x81d   : > { %v6571_v63 = vsel %vm6569_vm1, %v6570_v32, %v14961_v27  ;;  %v6630_v51 = vand.u32 31, %v6628_v33  ;;  %11446 = vcosq.f32 %v6288_v39  ;;  %v6393_v58 = vsel %vm14946_vm13, 0, %v6391_v1 }
 0x81e   : > { %vm14988_vm14 = vcmp.le.f32.partialorder %v17037_v29, 0.7853982  ;;  %v6481_v52 = vshll.u32 %v14902_v6, %v6479_v26  ;;  %v6572_v48 = vadd.s32 %v6571_v63, %v6567_v59  ;;  %11448 = vsinq.f32 %v6288_v39 }
 0x81f   : > { %v14999_v49 = vsel %vm6410_vm4, %v6494_v22, %v14888_v30  ;;  %v6623_v45 = vand.u32 8388607, %v16859_v21  ;;  %v6631_v13 = vsub.s32 32, %v6630_v51  ;;  %v6392_v11 = vsel %vm14946_vm13, %v14695_v43, %v6389_v28 }
 0x820   : > { %v6483_v27 = vor.u32 %v6482_v46, %v6481_v52  ;;  %v6573_v4 = vadd.s32 536870912, %v6572_v48  ;;  %v15006_v5 = vshrl.u32 %v6628_v33, 5  ;;  %v6488_v6 = vand.u32 2147483647, %v6487_v24 }
 0x821   : > { %v6634_v26 = vshrl.u32 %v16954_v57, %v6631_v13  ;;  %v6637_v47 = vshrl.u32 %v16955_v44, %v6631_v13  ;;  %v6640_v30 = vshrl.u32 %v16956_v15, %v6631_v13  ;;  %v6633_v9 = vshll.u32 %v16914_v10, %v6630_v51 }
 0x822   : > { %v15011_v61 = vshrl.u32 %v6573_v4, 30  ;;  %v6636_v37 = vshll.u32 %v16954_v57, %v6630_v51  ;;  %v6643_v17 = vshrl.u32 %v16915_v53, %v6631_v13  ;;  %v6639_v1 = vshll.u32 %v16955_v44, %v6630_v51 }
 0x823   : > { %v6642_v35 = vshll.u32 %v16956_v15, %v6630_v51  ;;  %v6645_v8 = vshll.u32 %v16915_v53, %v6630_v51  ;;  %v6646_v39 = vshrl.u32 %v16913_v25, %v6631_v13  ;;  %11450 = vcosq.f32 %v6392_v11 }
 0x824   : > { %v6575_v22 = vshll.u32 %v15011_v61, 30  ;;  %v6635_v32 = vor.u32 %v6634_v26, %v6633_v9  ;;  %v6638_v46 = vor.u32 %v6637_v47, %v6636_v37  ;;  %v6490_v59 = vcvt.s32.f32 %v6483_v27 }
 0x825   : > { %v6641_v33 = vor.u32 %v6640_v30, %v6639_v1  ;;  %v6644_v28 = vor.u32 %v6643_v17, %v6642_v35  ;;  %v6647_v29 = vor.u32 %v6646_v39, %v6645_v8  ;;  %11452 = vsinq.f32 %v6392_v11 }
 0x826   : > { %v6397_v24 = vadd.s32 3, %v6393_v58  ;;  %v6497_v63 = vsel %vm14988_vm14, 0, %v14999_v49  ;;  %v15024_v52 = vsub.s32 %v6572_v48, %v6575_v22  ;;  %v6491_v51 = vmul.f32 %v6490_v59, %v6488_v6 }
 0x827   : > { %v6624_v4 = vor.u32 8388608, %v6623_v45  ;;  %vm6648_vm5 = vcmp.lt.s32.totalorder %v15006_v5, 1  ;;  %v6723_v21 = vand.u32 2139095040, %v14710_v2  ;;  %v11447_v26 = vpop.eup %11446  ;;  %vm6650_vm15 = vcmp.lt.s32.totalorder %v15006_v5, 3 }
 0x828   : > { %v6578_v27 = vsub.s32 0, %v15024_v52  ;;  %vm6651_vm6 = vcmp.lt.s32.totalorder %v15006_v5, 4  ;;  %v6656_v58 = vsel %vm6648_vm5, %v6635_v32, %v6638_v46  ;;  %v11449_v11 = vpop.eup %11448  ;;  %v6632_v48 = vshrl.u32 %v16914_v10, %v6631_v13 }
 0x829   : > { %v6653_v49 = vsel %vm6651_vm6, %v6641_v33, 2102212464  ;;  %v6657_v6 = vsel %vm6651_vm6, %v6644_v28, 920167782  ;;  %v6661_v45 = vsel %vm6651_vm6, %v6647_v29, 1326507024  ;;  %v6660_v9 = vsel %vm6648_vm5, %v6638_v46, %v6641_v33 }
 0x82a   : > { %v10373_v47 = vmin.u32 %v6578_v27, %v15024_v52  ;;  %vm6649_vm7 = vcmp.lt.s32.totalorder %v15006_v5, 2  ;;  %v6658_v30 = vsel %vm6650_vm15, %v6641_v33, %v6657_v6  ;;  %v6662_v17 = vsel %vm6650_vm15, %v6644_v28, %v6661_v45 }
 0x82b   : > { %v6659_v37 = vsel %vm6649_vm7, %v6656_v58, %v6658_v30  ;;  %v6664_v13 = vshll.u32 %v6624_v4, 8  ;;  %v6724_v1 = vshrl.u32 %v6723_v21, 23  ;;  %v6300_v35 = vxor.u32 2147483648, %v11447_v26 }
 0x82c   : > { %v6580_v8 = vclz %v10373_v47  ;;  %v6652_v39 = vsel %vm6648_vm5, %v6632_v48, %v6635_v32  ;;  %v6654_v22 = vsel %vm6650_vm15, %v6638_v46, %v6653_v49  ;;  %v6663_v59 = vsel %vm6649_vm7, %v6660_v9, %v6662_v17 }
 0x82d   : > { %v15050_v33 = vmul.u32.u64.low %v6664_v13, %v6659_v37  ;;  %v15051_v29 = vmul.u32.u64.high %v6664_v13, %v6659_v37, %v15050_v33  ;;  %v10380_v27 = vadd.s32 4294967169, %v6724_v1  ;;  %v15054_v58 = vpop.eup %11450  ;;  %v6492_v28 = vxor.u32 2147483648, %v6491_v51 }
 0x82e   : > { %v10374_v21 = vadd.s32 4294967294, %v6580_v8  ;;  %v15056_v4 = vmul.u32.u64.low %v6664_v13, %v6663_v59  ;;  %v15057_v6 = vmul.u32.u64.high %v6664_v13, %v6663_v59, %v15056_v4  ;;  %v15061_v32 = vadd.f32 %v14685_v55, %v14915_v7 }
 0x82f   : > { %vm6295_vm11 = vcmp.lt.s32.totalorder %v14982_v14, 2  ;;  %v6297_v46 = vxor.u32 2147483648, %v11449_v11  ;;  %v6730_v48 = vadd.s32 1, %v10380_v27  ;;  %v15064_v49 = vpop.eup %11452  ;;  %vm6299_vm2 = vcmp.eq.s32.totalorder %v14982_v14, 2 }
 0x830   : > { %17040 = vst [vmem:[#allocation48_spill] sm:$0xff] %v15061_v32  ;;  %v15067_v45 = vand.u32 3, %v6397_v24  ;;  %vm10375_vm9 = vcmp.lt.s32.totalorder %v10374_v21, 0  ;;  %v6655_v47 = vsel %vm6649_vm7, %v6652_v39, %v6654_v22  ;;  %v6501_v30 = vadd.s32 3, %v6497_v63 }
 0x831   : > { %v6583_v9 = vsel %vm10375_vm9, 0, %v10374_v21  ;;  %v6674_v37 = vadd.s32 1, %v15051_v29  ;;  %vm6731_vm10 = vcmp.gt.s32.totalorder %v6730_v48, 0  ;;  %vm6296_vm12 = vcmp.eq.s32.totalorder %v14982_v14, 0 }
 0x832   : > { %v6301_v55 = vsel %vm6299_vm2, %v6300_v35, %v11449_v11  ;;  %v6493_v7 = vsel %vm6410_vm4, %v6492_v28, %v6491_v51  ;;  %v6588_v17 = vsub.s32 4294967266, %v6583_v9  ;;  %v6298_v1 = vsel %vm6296_vm12, %v11447_v26, %v6297_v46 }
 0x833   : > { %v6671_v8 = vmul.u32 %v6664_v13, %v6655_v47  ;;  %vm6673_vm13 = vc.u32 %v15057_v6, %v15050_v33  ;;  %v6732_v24 = vsel %vm6731_vm10, %v6730_v48, 0  ;;  %v6584_v5 = vsub.s32 32, %v6583_v9 }
 0x834   : > { %v6589_v39 = vadd.s32 127, %v6588_v17  ;;  %v6675_v63 = vsel %vm6673_vm13, %v6674_v37, %v15051_v29  ;;  %v16860_v22 = vand.u32 2147483647, %v14710_v2  ;;  %vm6400_vm8 = vcmp.eq.s32.totalorder %v15067_v45, 0 }
 0x835   : > { %vm6403_vm1 = vcmp.eq.s32.totalorder %v15067_v45, 2  ;;  %v6496_v51 = vsel %vm14988_vm14, %v14703_v54, %v6493_v7  ;;  %v15084_v26 = vand.u32 3, %v6501_v30  ;;  %v6676_v11 = vadd.s32 %v6675_v63, %v6671_v8 }
 0x836   : > { %v6734_v13 = vand.u32 31, %v6732_v24  ;;  %v15088_v35 = vsel %vm6295_vm11, %v6298_v1, %v6301_v55  ;;  %v6401_v59 = vxor.u32 2147483648, %v15064_v49  ;;  %v6404_v29 = vxor.u32 2147483648, %v15054_v58 }
 0x837   : > { %vm6514_vm4 = vcmp.lt.s32.totalorder %v14705_v56, 0  ;;  %v6568_v27 = vadd.s32 %v14960_v34, %v14958_v23  ;;  %v6590_v28 = vshll.u32 %v6589_v39, 23  ;;  %v6598_v18 = vsub.s32 4, %v15011_v61 }
 0x838   : > { %v6677_v21 = vadd.s32 536870912, %v6676_v11  ;;  %v6735_v4 = vsub.s32 32, %v6734_v13  ;;  %11454 = vcosq.f32 %v6496_v51  ;;  %v6585_v46 = vshll.u32 %v15024_v52, %v6583_v9 }
 0x839   : > { %v6586_v14 = vshrl.u32 %v6568_v27, %v6584_v5  ;;  %v6727_v48 = vand.u32 8388607, %v16860_v22  ;;  %v15101_v30 = vshrl.u32 %v6732_v24, 5  ;;  %v6737_v34 = vshll.u32 %v16914_v10, %v6734_v13 }
 0x83a   : > { %v15099_v47 = vshrl.u32 %v6677_v21, 30  ;;  %v6738_v37 = vshrl.u32 %v16954_v57, %v6735_v4  ;;  %v6741_v23 = vshrl.u32 %v16955_v44, %v6735_v4  ;;  %v6744_v55 = vshrl.u32 %v16956_v15, %v6735_v4 }
 0x83b   : > { %v6746_v7 = vshll.u32 %v16956_v15, %v6734_v13  ;;  %v6747_v52 = vshrl.u32 %v16915_v53, %v6735_v4  ;;  %v6591_v9 = vor.u32 4788187, %v6590_v28  ;;  %v6740_v1 = vshll.u32 %v16954_v57, %v6734_v13 }
 0x83c   : > { %v6679_v17 = vshll.u32 %v15099_v47, 30  ;;  %v6743_v8 = vshll.u32 %v16955_v44, %v6734_v13  ;;  %11456 = vsinq.f32 %v6496_v51  ;;  %v6587_v24 = vor.u32 %v6586_v14, %v6585_v46 }
 0x83d   : > { %v6748_v5 = vor.u32 %v6747_v52, %v6746_v7  ;;  %v6750_v39 = vshrl.u32 %v16913_v25, %v6735_v4  ;;  %v17041_v63 = vand.u32 2147483647, %v14705_v56  ;;  %v6739_v28 = vor.u32 %v6738_v37, %v6737_v34 }
 0x83e   : > { %v15119_v21 = vsub.s32 %v6676_v11, %v6679_v17  ;;  %v6742_v22 = vor.u32 %v6741_v23, %v6740_v1  ;;  %v6745_v32 = vor.u32 %v6744_v55, %v6743_v8  ;;  %v15124_v12 = vsel %vm6400_vm8, %v15054_v58, %v6401_v59 }
 0x83f   : > { %vm15115_vm14 = vcmp.le.f32.partialorder %v17041_v63, 0.7853982  ;;  %v15129_v51 = vsel %vm6403_vm1, %v6404_v29, %v15064_v49  ;;  %v6728_v46 = vor.u32 8388608, %v6727_v48  ;;  %v6749_v14 = vshll.u32 %v16915_v53, %v6734_v13 }
 0x840   : > { %v6592_v7 = vand.u32 2147483647, %v6591_v9  ;;  %v15135_v11 = vsel %vm6514_vm4, %v6598_v18, %v15011_v61  ;;  %v6682_v37 = vsub.s32 0, %v15119_v21  ;;  %vm6755_vm5 = vcmp.lt.s32.totalorder %v15101_v30, 4 }
 0x841   : > { %v6594_v58 = vcvt.s32.f32 %v6587_v24  ;;  %v6751_v59 = vor.u32 %v6750_v39, %v6749_v14  ;;  %vm6752_vm15 = vcmp.lt.s32.totalorder %v15101_v30, 1  ;;  %v6761_v49 = vsel %vm6755_vm5, %v6748_v5, 920167782 }
 0x842   : > { %v10377_v29 = vmin.u32 %v6682_v37, %v15119_v21  ;;  %vm6754_vm6 = vcmp.lt.s32.totalorder %v15101_v30, 3  ;;  %v6757_v13 = vsel %vm6755_vm5, %v6745_v32, 2102212464  ;;  %v6760_v61 = vsel %vm6752_vm15, %v6739_v28, %v6742_v22  ;;  %v15148_v18 = vpop.eup %11454 }
 0x843   : > { %v6736_v48 = vshrl.u32 %v16914_v10, %v6735_v4  ;;  %v6762_v23 = vsel %vm6754_vm6, %v6745_v32, %v6761_v49  ;;  %v6768_v34 = vshll.u32 %v6728_v46, 8  ;;  %v6827_v55 = vand.u32 2139095040, %v14718_v31 }
 0x844   : > { %v6595_v52 = vmul.f32 %v6594_v58, %v6592_v7  ;;  %vm6618_vm7 = vcmp.lt.s32.totalorder %v14708_v40, 0  ;;  %v6684_v9 = vclz %v10377_v29  ;;  %vm6753_vm11 = vcmp.lt.s32.totalorder %v15101_v30, 2 }
 0x845   : > { %v6764_v17 = vsel %vm6752_vm15, %v6742_v22, %v6745_v32  ;;  %v6756_v1 = vsel %vm6752_vm15, %v6736_v48, %v6739_v28  ;;  %v6758_v4 = vsel %vm6754_vm6, %v6742_v22, %v6757_v13  ;;  %v6763_v8 = vsel %vm6753_vm11, %v6760_v61, %v6762_v23 }
 0x846   : > { %v6765_v24 = vsel %vm6755_vm5, %v6751_v59, 1326507024  ;;  %vm6292_vm2 = vweird.f32 %v14691_v20  ;;  %vm6399_vm9 = vcmp.lt.s32.totalorder %v15067_v45, 2  ;;  %v10378_v39 = vadd.s32 4294967294, %v6684_v9  ;;  %v11457_v28 = vpop.eup %11456 }
 0x847   : > { %v6766_v32 = vsel %vm6754_vm6, %v6748_v5, %v6765_v24  ;;  %v15170_v63 = vmul.u32.u64.low %v6768_v34, %v6763_v8  ;;  %v15171_v46 = vmul.u32.u64.high %v6768_v34, %v6763_v8, %v15170_v63  ;;  %vm6504_vm10 = vcmp.eq.s32.totalorder %v15084_v26, 0 }
 0x848   : > { %vm6507_vm12 = vcmp.eq.s32.totalorder %v15084_v26, 2  ;;  %v6601_v22 = vsel %vm15115_vm14, 0, %v15135_v11  ;;  %v6767_v14 = vsel %vm6753_vm11, %v6764_v17, %v6766_v32  ;;  %v6824_v7 = vand.u32 2147483647, %v14718_v31 }
 0x849   : > { %v6828_v37 = vshrl.u32 %v6827_v55, 23  ;;  %v17044_v5 = vand.u32 2147483647, %v14708_v40  ;;  %vm10379_vm8 = vcmp.lt.s32.totalorder %v10378_v39, 0  ;;  %v6759_v59 = vsel %vm6753_vm11, %v6756_v1, %v6758_v4 }
 0x84a   : > { %v15190_v49 = vmul.u32.u64.low %v6768_v34, %v6767_v14  ;;  %v15191_v29 = vmul.u32.u64.high %v6768_v34, %v6767_v14, %v15190_v49  ;;  %v6596_v11 = vxor.u32 2147483648, %v6595_v52  ;;  %v6687_v13 = vsel %vm10379_vm8, 0, %v10378_v39 }
 0x84b   : > { %vm15184_vm13 = vcmp.le.f32.partialorder %v17044_v5, 0.7853982  ;;  %v6702_v61 = vsub.s32 4, %v15099_v47  ;;  %v10384_v48 = vadd.s32 4294967169, %v6828_v37  ;;  %vm6396_vm1 = vweird.f32 %v14695_v43 }
 0x84c   : > { %vm6503_vm5 = vcmp.lt.s32.totalorder %v15084_v26, 2  ;;  %v6672_v23 = vadd.s32 %v15050_v33, %v15057_v6  ;;  %v6688_v55 = vsub.s32 32, %v6687_v13  ;;  %v6692_v9 = vsub.s32 4294967266, %v6687_v13 }
 0x84d   : > { %v6778_v30 = vadd.s32 1, %v15171_v46  ;;  %v6505_v17 = vxor.u32 2147483648, %v11457_v28  ;;  %v6508_v1 = vxor.u32 2147483648, %v15148_v18  ;;  %v6775_v4 = vmul.u32 %v6768_v34, %v6759_v59 }
 0x84e   : > { %v6834_v8 = vadd.s32 1, %v10384_v48  ;;  %v6689_v24 = vshll.u32 %v15119_v21, %v6687_v13  ;;  %v6690_v39 = vshrl.u32 %v6672_v23, %v6688_v55  ;;  %v6693_v32 = vadd.s32 127, %v6692_v9 }
 0x84f   : > { %vm6777_vm15 = vc.u32 %v15191_v29, %v15170_v63  ;;  %v6597_v14 = vsel %vm6514_vm4, %v6596_v11, %v6595_v52  ;;  %v6703_v33 = vsel %vm6618_vm7, %v6702_v61, %v15099_v47  ;;  %v6931_v21 = vand.u32 2139095040, %v14723_v36 }
 0x850   : > { %v6779_v6 = vsel %vm6777_vm15, %v6778_v30, %v15171_v46  ;;  %vm6835_vm6 = vcmp.gt.s32.totalorder %v6834_v8, 0  ;;  %v6691_v37 = vor.u32 %v6690_v39, %v6689_v24  ;;  %v6694_v34 = vshll.u32 %v6693_v32, 23 }
 0x851   : > { %v6780_v5 = vadd.s32 %v6779_v6, %v6775_v4  ;;  %v15213_v59 = vsel %vm6292_vm2, nan, %v15088_v35  ;;  %v6406_v52 = vsel %vm6399_vm9, %v15124_v12, %v15129_v51  ;;  %v6605_v49 = vadd.s32 3, %v6601_v22 }
 0x852   : > { %v6836_v47 = vsel %vm6835_vm6, %v6834_v8, 0  ;;  %v6506_v46 = vsel %vm6504_vm10, %v15148_v18, %v6505_v17  ;;  %v6509_v11 = vsel %vm6507_vm12, %v6508_v1, %v11457_v28  ;;  %v6695_v13 = vor.u32 4788187, %v6694_v34 }
 0x853   : > { %v6781_v61 = vadd.s32 536870912, %v6780_v5  ;;  %v6600_v20 = vsel %vm15115_vm14, %v14705_v56, %v6597_v14  ;;  %v6705_v35 = vsel %vm15184_vm13, 0, %v6703_v33  ;;  %v6831_v12 = vand.u32 8388607, %v6824_v7 }
 0x854   : > { %v6838_v45 = vand.u32 31, %v6836_v47  ;;  %v6696_v51 = vand.u32 2147483647, %v6695_v13  ;;  %v6698_v22 = vcvt.s32.f32 %v6691_v37  ;;  %v6932_v18 = vshrl.u32 %v6931_v21, 23 }
 0x855   : > { %v15231_v48 = vshrl.u32 %v6781_v61, 30  ;;  %v15235_v28 = vsel %vm6396_vm1, nan, %v6406_v52  ;;  %v15239_v27 = vsel %vm6503_vm5, %v6506_v46, %v6509_v11  ;;  %v15241_v23 = vand.u32 3, %v6605_v49 }
 0x856   : > { %v6839_v55 = vsub.s32 32, %v6838_v45  ;;  %11458 = vcosq.f32 %v6600_v20  ;;  %v6699_v9 = vmul.f32 %v6698_v22, %v6696_v51  ;;  %v15243_v30 = vadd.s32 3, %v6705_v35 }
 0x857   : > { %v6783_v17 = vshll.u32 %v15231_v48, 30  ;;  %11460 = vsinq.f32 %v6600_v20  ;;  %v6832_v26 = vor.u32 8388608, %v6831_v12  ;;  %v6841_v24 = vshll.u32 %v16914_v10, %v6838_v45 }
 0x858   : > { %v6842_v1 = vshrl.u32 %v16954_v57, %v6839_v55  ;;  %v6845_v43 = vshrl.u32 %v16955_v44, %v6839_v55  ;;  %v6848_v4 = vshrl.u32 %v16956_v15, %v6839_v55  ;;  %v10388_v39 = vadd.s32 4294967169, %v6932_v18 }
 0x859   : > { %v15249_v8 = vsub.s32 %v6780_v5, %v6783_v17  ;;  %v6700_v32 = vxor.u32 2147483648, %v6699_v9  ;;  %v6837_v14 = vshrl.u32 %v6836_v47, 5  ;;  %v6844_v33 = vshll.u32 %v16954_v57, %v6838_v45 }
 0x85a   : > { %v6847_v6 = vshll.u32 %v16955_v44, %v6838_v45  ;;  %v6843_v34 = vor.u32 %v6842_v1, %v6841_v24  ;;  %v6850_v21 = vshll.u32 %v16956_v15, %v6838_v45  ;;  %v6851_v52 = vshrl.u32 %v16915_v53, %v6839_v55 }
 0x85b   : > { %v6786_v37 = vsub.s32 0, %v15249_v8  ;;  %v6846_v49 = vor.u32 %v6845_v43, %v6844_v33  ;;  %v6853_v46 = vshll.u32 %v16915_v53, %v6838_v45  ;;  %v6854_v11 = vshrl.u32 %v16913_v25, %v6839_v55 }
 0x85c   : > { %v6849_v5 = vor.u32 %v6848_v4, %v6847_v6  ;;  %v6852_v47 = vor.u32 %v6851_v52, %v6850_v21  ;;  %v6928_v61 = vand.u32 2147483647, %v14723_v36  ;;  %v6938_v20 = vadd.s32 1, %v10388_v39 }
 0x85d   : > { %v10381_v13 = vmin.u32 %v6786_v37, %v15249_v8  ;;  %v6776_v35 = vadd.s32 %v15170_v63, %v15191_v29  ;;  %v6840_v12 = vshrl.u32 %v16914_v10, %v6839_v55  ;;  %v6855_v51 = vor.u32 %v6854_v11, %v6853_v46 }
 0x85e   : > { %v6872_v22 = vshll.u32 %v6832_v26, 8  ;;  %vm6500_vm4 = vweird.f32 %v14703_v54  ;;  %v6701_v45 = vsel %vm6618_vm7, %v6700_v32, %v6699_v9  ;;  %vm6856_vm14 = vcmp.lt.s32.totalorder %v6837_v14, 1 }
 0x85f   : > { %v6788_v18 = vclz %v10381_v13  ;;  %vm6857_vm11 = vcmp.lt.s32.totalorder %v6837_v14, 2  ;;  %vm6858_vm2 = vcmp.lt.s32.totalorder %v6837_v14, 3  ;;  %vm6859_vm9 = vcmp.lt.s32.totalorder %v6837_v14, 4 }
 0x860   : > { %v6864_v17 = vsel %vm6856_vm14, %v6843_v34, %v6846_v49  ;;  %v6868_v1 = vsel %vm6856_vm14, %v6846_v49, %v6849_v5  ;;  %v15267_v43 = vpop.eup %11458  ;;  %v6861_v63 = vsel %vm6859_vm9, %v6849_v5, 2102212464  ;;  %v6865_v29 = vsel %vm6859_vm9, %v6852_v47, 920167782 }
 0x861   : > { %v10382_v4 = vadd.s32 4294967294, %v6788_v18  ;;  %vm6939_vm10 = vcmp.gt.s32.totalorder %v6938_v20, 0  ;;  %v15269_v55 = vpop.eup %11460  ;;  %vm6722_vm12 = vcmp.lt.s32.totalorder %v14710_v2, 0  ;;  %v6860_v26 = vsel %vm6856_vm14, %v6840_v12, %v6843_v34 }
 0x862   : > { %v6862_v9 = vsel %vm6858_vm2, %v6846_v49, %v6861_v63  ;;  %v6866_v24 = vsel %vm6858_vm2, %v6849_v5, %v6865_v29  ;;  %v6869_v39 = vsel %vm6859_vm9, %v6855_v51, 1326507024  ;;  %v6940_v6 = vsel %vm6939_vm10, %v6938_v20, 0 }
 0x863   : > { %vm10383_vm7 = vcmp.lt.s32.totalorder %v10382_v4, 0  ;;  %v6867_v32 = vsel %vm6857_vm11, %v6864_v17, %v6866_v24  ;;  %v6870_v33 = vsel %vm6858_vm2, %v6852_v47, %v6869_v39  ;;  %v6806_v49 = vsub.s32 4, %v15231_v48 }
 0x864   : > { %v6791_v37 = vsel %vm10383_vm7, 0, %v10382_v4  ;;  %v6871_v21 = vsel %vm6857_vm11, %v6868_v1, %v6870_v33  ;;  %v15277_v52 = vmul.u32.u64.low %v6872_v22, %v6867_v32  ;;  %v15278_v46 = vmul.u32.u64.high %v6872_v22, %v6867_v32, %v15277_v52 }
 0x865   : > { %v6792_v11 = vsub.s32 32, %v6791_v37  ;;  %v6796_v34 = vsub.s32 4294967266, %v6791_v37  ;;  %v6935_v5 = vand.u32 8388607, %v6928_v61  ;;  %v6704_v13 = vsel %vm15184_vm13, %v14708_v40, %v6701_v45 }
 0x866   : > { %v15287_v47 = vmul.u32.u64.low %v6872_v22, %v6871_v21  ;;  %v15288_v20 = vmul.u32.u64.high %v6872_v22, %v6871_v21, %v15287_v47  ;;  %v6942_v12 = vand.u32 31, %v6940_v6  ;;  %vm6611_vm8 = vcmp.eq.s32.totalorder %v15241_v23, 2 }
 0x867   : > { %v17047_v51 = vand.u32 2147483647, %v14710_v2  ;;  %v6793_v17 = vshll.u32 %v15249_v8, %v6791_v37  ;;  %v6794_v1 = vshrl.u32 %v6776_v35, %v6792_v11  ;;  %v6797_v4 = vadd.s32 127, %v6796_v34 }
 0x868   : > { %v6863_v63 = vsel %vm6857_vm11, %v6860_v26, %v6862_v9  ;;  %v15302_v58 = vsel %vm6500_vm4, nan, %v15239_v27  ;;  %v15305_v45 = vand.u32 3, %v15243_v30  ;;  %v6882_v29 = vadd.s32 1, %v15278_v46 }
 0x869   : > { %vm15293_vm1 = vcmp.le.f32.partialorder %v17047_v51, 0.7853982  ;;  %v15308_v24 = vsub.s32 32, %v6942_v12  ;;  %v6609_v39 = vxor.u32 2147483648, %v15269_v55  ;;  %v6612_v8 = vxor.u32 2147483648, %v15267_v43 }
 0x86a   : > { %v6795_v35 = vor.u32 %v6794_v1, %v6793_v17  ;;  %v6798_v32 = vshll.u32 %v6797_v4, 23  ;;  %11462 = vcosq.f32 %v6704_v13  ;;  %v6879_v14 = vmul.u32 %v6872_v22, %v6863_v63 }
 0x86b   : > { %vm6881_vm13 = vc.u32 %v15288_v20, %v15277_v52  ;;  %v6936_v54 = vor.u32 8388608, %v6935_v5  ;;  %11464 = vsinq.f32 %v6704_v13  ;;  %v6807_v30 = vsel %vm6722_vm12, %v6806_v49, %v15231_v48 }
 0x86c   : > { %v6799_v27 = vor.u32 4788187, %v6798_v32  ;;  %v6883_v26 = vsel %vm6881_vm13, %v6882_v29, %v15278_v46  ;;  %v6945_v33 = vshll.u32 %v16914_v10, %v6942_v12  ;;  %v6946_v37 = vshrl.u32 %v16954_v57, %v15308_v24 }
 0x86d   : > { %v6884_v9 = vadd.s32 %v6883_v26, %v6879_v14  ;;  %v6949_v22 = vshrl.u32 %v16955_v44, %v15308_v24  ;;  %v6802_v11 = vcvt.s32.f32 %v6795_v35  ;;  %v6948_v34 = vshll.u32 %v16954_v57, %v6942_v12 }
 0x86e   : > { %v6800_v21 = vand.u32 2147483647, %v6799_v27  ;;  %v6952_v5 = vshrl.u32 %v16956_v15, %v15308_v24  ;;  %v15326_v48 = vshrl.u32 %v6940_v6, 5  ;;  %v6947_v46 = vor.u32 %v6946_v37, %v6945_v33 }
 0x86f   : > { %v6885_v13 = vadd.s32 536870912, %v6884_v9  ;;  %v6951_v49 = vshll.u32 %v16955_v44, %v6942_v12  ;;  %v6950_v51 = vor.u32 %v6949_v22, %v6948_v34  ;;  %v6954_v17 = vshll.u32 %v16956_v15, %v6942_v12 }
 0x870   : > { %v6803_v47 = vmul.f32 %v6802_v11, %v6800_v21  ;;  %v6955_v1 = vshrl.u32 %v16915_v53, %v15308_v24  ;;  %v15335_v4 = vsel %vm6611_vm8, %v6612_v8, %v15269_v55  ;;  %v6809_v63 = vsel %vm15293_vm1, 0, %v6807_v30 }
 0x871   : > { %v15339_v6 = vshrl.u32 %v6885_v13, 30  ;;  %v6958_v29 = vshrl.u32 %v16913_v25, %v15308_v24  ;;  %v6953_v32 = vor.u32 %v6952_v5, %v6951_v49  ;;  %v6957_v27 = vshll.u32 %v16915_v53, %v6942_v12 }
 0x872   : > { %v6804_v35 = vxor.u32 2147483648, %v6803_v47  ;;  %v6956_v14 = vor.u32 %v6955_v1, %v6954_v17  ;;  %vm6608_vm5 = vcmp.eq.s32.totalorder %v15241_v23, 0  ;;  %vm6960_vm15 = vcmp.lt.s32.totalorder %v15326_v48, 1 }
 0x873   : > { %v6887_v26 = vshll.u32 %v15339_v6, 30  ;;  %vm6963_vm6 = vcmp.lt.s32.totalorder %v15326_v48, 4  ;;  %v15348_v8 = vshll.u32 %v6936_v54, 8  ;;  %v6959_v33 = vor.u32 %v6958_v29, %v6957_v27 }
 0x874   : > { %v6805_v30 = vsel %vm6722_vm12, %v6804_v35, %v6803_v47  ;;  %v6968_v37 = vsel %vm6960_vm15, %v6947_v46, %v6950_v51  ;;  %v6969_v12 = vsel %vm6963_vm6, %v6956_v14, 920167782  ;;  %v11463_v22 = vpop.eup %11462  ;;  %vm6715_vm4 = vcmp.eq.s32.totalorder %v15305_v45, 2 }
 0x875   : > { %v6808_v21 = vsel %vm15293_vm1, %v14710_v2, %v6805_v30  ;;  %v6813_v11 = vadd.s32 3, %v6809_v63  ;;  %v15360_v54 = vsub.s32 %v6884_v9, %v6887_v26  ;;  %vm6962_vm14 = vcmp.lt.s32.totalorder %v15326_v48, 3  ;;  %v11465_v34 = vpop.eup %11464 }
 0x876   : > { %vm6712_vm11 = vcmp.eq.s32.totalorder %v15305_v45, 0  ;;  %11466 = vcosq.f32 %v6808_v21  ;;  %vm6961_vm2 = vcmp.lt.s32.totalorder %v15326_v48, 2  ;;  %v6970_v5 = vsel %vm6962_vm14, %v6953_v32, %v6969_v12 }
 0x877   : > { %v6184_v13 = vmul.f32 1.442695, %v14785_v19  ;;  %11468 = vsinq.f32 %v6808_v21  ;;  %v6890_v18 = vsub.s32 0, %v15360_v54  ;;  %v6965_v9 = vsel %vm6963_vm6, %v6953_v32, 2102212464 }
 0x878   : > { %v6971_v49 = vsel %vm6961_vm2, %v6968_v37, %v6970_v5  ;;  %v6972_v47 = vsel %vm6960_vm15, %v6950_v51, %v6953_v32  ;;  %v6973_v17 = vsel %vm6963_vm6, %v6959_v33, 1326507024  ;;  %vm6607_vm9 = vcmp.lt.s32.totalorder %v15241_v23, 2 }
 0x879   : > { %v15378_v1 = vmul.u32.u64.low %v15348_v8, %v6971_v49  ;;  %v15379_v63 = vmul.u32.u64.high %v15348_v8, %v6971_v49, %v15378_v1  ;;  %v6716_v19 = vxor.u32 2147483648, %v11463_v22  ;;  %v10385_v29 = vmin.u32 %v6890_v18, %v15360_v54 }
 0x87a   : > { %v6944_v35 = vshrl.u32 %v16914_v10, %v15308_v24  ;;  %v6974_v27 = vsel %vm6962_vm14, %v6956_v14, %v6973_v17  ;;  %v6713_v32 = vxor.u32 2147483648, %v11465_v34  ;;  %v6186_v30 = vmul.f32 1.442695, %v14820_v3 }
 0x87b   : > { %v6975_v26 = vsel %vm6961_vm2, %v6972_v47, %v6974_v27  ;;  %v6188_v33 = vmul.f32 1.442695, %v14827_v42  ;;  %vm6711_vm10 = vcmp.lt.s32.totalorder %v15305_v45, 2  ;;  %v6892_v37 = vclz %v10385_v29 }
 0x87c   : > { %v6964_v12 = vsel %vm6960_vm15, %v6944_v35, %v6947_v46  ;;  %v6966_v24 = vsel %vm6962_vm14, %v6950_v51, %v6965_v9  ;;  %11470 = vpow2.f32 %v6184_v13  ;;  %v6610_v14 = vsel %vm6608_vm5, %v15267_v43, %v6609_v39 }
 0x87d   : > { %v15403_v3 = vmul.u32.u64.low %v15348_v8, %v6975_v26  ;;  %v15404_v21 = vmul.u32.u64.high %v15348_v8, %v6975_v26, %v15403_v3  ;;  %11472 = vpow2.f32 %v6186_v30  ;;  %vm6604_vm12 = vweird.f32 %v14705_v56 }
 0x87e   : > { %v10386_v42 = vadd.s32 4294967294, %v6892_v37  ;;  %11474 = vpow2.f32 %v6188_v33  ;;  %v6190_v46 = vmul.f32 1.442695, %v14831_v41  ;;  %v6192_v51 = vmul.f32 1.442695, %v14841_v60 }
 0x87f   : > { %v6717_v55 = vsel %vm6715_vm4, %v6716_v19, %v11465_v34  ;;  %v6814_v5 = vand.u32 3, %v6813_v11  ;;  %v6967_v43 = vsel %vm6961_vm2, %v6964_v12, %v6966_v24  ;;  %v6986_v39 = vadd.s32 1, %v15379_v63 }
 0x880   : > { %v6714_v13 = vsel %vm6712_vm11, %v11463_v22, %v6713_v32  ;;  %v6880_v18 = vadd.s32 %v15277_v52, %v15288_v20  ;;  %vm10387_vm7 = vcmp.lt.s32.totalorder %v10386_v42, 0  ;;  %11476 = vpow2.f32 %v6190_v46  ;;  %v11467_v41 = vpop.eup %11466 }
 0x881   : > { %v6895_v9 = vsel %vm10387_vm7, 0, %v10386_v42  ;;  %vm6985_vm8 = vc.u32 %v15404_v21, %v15378_v1  ;;  %11478 = vpow2.f32 %v6192_v51  ;;  %v6194_v60 = vmul.f32 1.442695, %v14846_v16  ;;  %v11469_v48 = vpop.eup %11468 }
 0x882   : > { %v6820_v11 = vxor.u32 2147483648, %v11467_v41  ;;  %v6896_v34 = vsub.s32 32, %v6895_v9  ;;  %v6900_v49 = vsub.s32 4294967266, %v6895_v9  ;;  %v6983_v47 = vmul.u32 %v15348_v8, %v6967_v43 }
 0x883   : > { %v6614_v52 = vsel %vm6607_vm9, %v6610_v14, %v15335_v4  ;;  %v6817_v20 = vxor.u32 2147483648, %v11469_v48  ;;  %vm6819_vm1 = vcmp.eq.s32.totalorder %v6814_v5, 2  ;;  %v6987_v22 = vsel %vm6985_vm8, %v6986_v39, %v15379_v63 }
 0x884   : > { %v6897_v17 = vshll.u32 %v15360_v54, %v6895_v9  ;;  %v6898_v19 = vshrl.u32 %v6880_v18, %v6896_v34  ;;  %v6901_v29 = vadd.s32 127, %v6900_v49  ;;  %v6988_v35 = vadd.s32 %v6987_v22, %v6983_v47 }
 0x885   : > { %v6718_v16 = vsel %vm6711_vm10, %v6714_v13, %v6717_v55  ;;  %vm6816_vm13 = vcmp.eq.s32.totalorder %v6814_v5, 0  ;;  %v6821_v27 = vsel %vm6819_vm1, %v6820_v11, %v11469_v48  ;;  %11480 = vpow2.f32 %v6194_v60 }
 0x886   : > { %v11471_v8 = vpop.eup %11470  ;;  %v6818_v32 = vsel %vm6816_vm13, %v11467_v41, %v6817_v20  ;;  %v6899_v26 = vor.u32 %v6898_v19, %v6897_v17  ;;  %v6902_v23 = vshll.u32 %v6901_v29, 23  ;;  %v6989_v4 = vadd.s32 536870912, %v6988_v35  ;;  %v17052_v29 = vld [vmem:[#allocation50_spill] sm:$0xff] }
 0x887   : > { %v11473_v30 = vpop.eup %11472  ;;  %v6615_v63 = vsel %vm6604_vm12, nan, %v6614_v52  ;;  %vm6708_vm5 = vweird.f32 %v14708_v40  ;;  %vm6815_vm15 = vcmp.lt.s32.totalorder %v6814_v5, 2  ;;  %v7032_v54 = vmul.f32 %v11471_v8, %v15213_v59  ;;  %v17053_v8 = vld [vmem:[#allocation39_spill] sm:$0xff] }
 0x888   : > { %v11475_v33 = vpop.eup %11474  ;;  %v6719_v45 = vsel %vm6708_vm5, nan, %v6718_v16  ;;  %v6903_v37 = vor.u32 4788187, %v6902_v23  ;;  %v15433_v12 = vshrl.u32 %v6989_v4, 30  ;;  %v7033_v24 = vmul.f32 %v11473_v30, %v15235_v28 }
 0x889   : > { %v6822_v14 = vsel %vm6815_vm15, %v6818_v32, %v6821_v27  ;;  %v6910_v3 = vsub.s32 4, %v15339_v6  ;;  %v7034_v42 = vmul.f32 %v11475_v33, %v15302_v58  ;;  %v7040_v56 = vmul.f32 %v14870_v62, %v7032_v54 }
 0x88a   : > { %v11477_v46 = vpop.eup %11476  ;;  %v6904_v51 = vand.u32 2147483647, %v6903_v37  ;;  %v6906_v40 = vcvt.s32.f32 %v6899_v26  ;;  %v6991_v55 = vshll.u32 %v15433_v12, 30  ;;  %v7041_v59 = vmul.f32 %v14873_v38, %v7033_v24  ;;  %v17054_v26 = vld [vmem:[#allocation48_spill] sm:$0xff] }
 0x88b   : > { %v11479_v5 = vpop.eup %11478  ;;  %vm6812_vm6 = vweird.f32 %v14710_v2  ;;  %v7035_v43 = vmul.f32 %v11477_v46, %v6615_v63  ;;  %v7042_v28 = vmul.f32 %v14876_v50, %v7034_v42  ;;  %v7092_v39 = vand.u32 4294901760, %v7040_v56 }
 0x88c   : > { %vm6826_vm4 = vcmp.lt.s32.totalorder %v14718_v31, 0  ;;  %v6907_v13 = vmul.f32 %v6906_v40, %v6904_v51  ;;  %v6992_v58 = vsub.s32 %v6988_v35, %v6991_v55  ;;  %v7036_v18 = vmul.f32 %v11479_v5, %v6719_v45 }
 0x88d   : > { %v6823_v62 = vsel %vm6812_vm6, nan, %v6822_v14  ;;  %v7043_v41 = vmul.f32 %v14879_v0, %v7035_v43  ;;  %v7090_v9 = vand.u32 4294901760, %v7041_v59  ;;  %v7096_v60 = vand.u32 4294901760, %v7042_v28 }
 0x88e   : > { %vm15447_vm14 = vcmp.le.f32.partialorder %v6824_v7, 0.7853982  ;;  %v6908_v2 = vxor.u32 2147483648, %v6907_v13  ;;  %v6911_v50 = vsel %vm6826_vm4, %v6910_v3, %v15339_v6  ;;  %v6994_v48 = vsub.s32 0, %v6992_v58 }
 0x88f   : > { %v11481_v11 = vpop.eup %11480  ;;  %v7094_v34 = vand.u32 4294901760, %v7043_v41  ;;  %v15454_v49 = vsub.f32 %v7041_v59, %v7090_v9  ;;  %v15456_v47 = vpack.c.bf16 %v7096_v60, %v7092_v39  ;;  %v15458_v0 = vsub.f32 %v7040_v56, %v7092_v39 }
 0x890   : > { %v6909_v7 = vsel %vm6826_vm4, %v6908_v2, %v6907_v13  ;;  %v10389_v52 = vmin.u32 %v6994_v48, %v6992_v58  ;;  %v15462_v20 = vsub.f32 %v7042_v28, %v7096_v60  ;;  %v7037_v22 = vmul.f32 %v11481_v11, %v6823_v62 }
 0x891   : > { %v6912_v6 = vsel %vm15447_vm14, %v14718_v31, %v6909_v7  ;;  %v15467_v17 = vpack.c.bf16 %v7094_v34, %v7090_v9  ;;  %v15469_v19 = vsub.f32 %v7043_v41, %v7094_v34  ;;  %v15472_v35 = vmul.f32 %v17052_v29, %v7036_v18 }
 0x892   : > { %v6913_v16 = vsel %vm15447_vm14, 0, %v6911_v50  ;;  %11482 = vcosq.f32 %v6912_v6  ;;  %v6996_v27 = vclz %v10389_v52  ;;  %v6196_v32 = vmul.f32 1.442695, %v17053_v8 }
 0x893   : > { %11484 = vsinq.f32 %v6912_v6  ;;  %10545 = vmatprep.subr.bf16.mxu1 %v15467_v17  ;;  %v15479_v23 = vmul.f32 %v17054_v26, %v7037_v22  ;;  %v7209_v30 = vand.u32 4294901760, %v15454_v49  ;;  %v7221_v63 = vand.u32 4294901760, %v15469_v19 }
 0x894   : > { %v10390_v4 = vadd.s32 4294967294, %v6996_v27  ;;  %10547 = vmatpush1.bf16.msra.mxu1 %v15456_v47  ;;  %v7215_v54 = vand.u32 4294901760, %v15458_v0  ;;  %v6917_v33 = vadd.s32 3, %v6913_v16  ;;  %v7227_v45 = vand.u32 4294901760, %v15462_v20  ;;  %v4639_v27 = vpop.permute.xlu1 %4638 }
 0x895   : > { %v7210_v37 = vsub.f32 %v15454_v49, %v7209_v30  ;;  %v7222_v24 = vsub.f32 %v15469_v19, %v7221_v63  ;;  %v6984_v56 = vadd.s32 %v15378_v1, %v15404_v21  ;;  %11486 = vpow2.f32 %v6196_v32 }
 0x896   : > { %vm10391_vm11 = vcmp.lt.s32.totalorder %v10390_v4, 0  ;;  %v7216_v14 = vsub.f32 %v15458_v0, %v7215_v54  ;;  %v7228_v42 = vsub.f32 %v15462_v20, %v7227_v45  ;;  %v6918_v43 = vand.u32 3, %v6917_v33 }
 0x897   : > { %v6999_v3 = vsel %vm10391_vm11, 0, %v10390_v4  ;;  %v7211_v40 = vand.u32 4294901760, %v7210_v37  ;;  %v7223_v55 = vand.u32 4294901760, %v7222_v24  ;;  %v10560_v41 = vpack.c.bf16 %v15469_v19, %v15454_v49  ;;  %v17055_v4 = vld [vmem:[#allocation35_spill] sm:$0xff]  ;;  %v17061_v49 = vld [vmem:[#allocation25_spill] sm:$0xff] }
 0x898   : > { %v7000_v46 = vsub.s32 32, %v6999_v3  ;;  %v7004_v51 = vsub.s32 4294967266, %v6999_v3  ;;  %v7217_v59 = vand.u32 4294901760, %v7216_v14  ;;  %v7229_v5 = vand.u32 4294901760, %v7228_v42 }
 0x899   : > { %v7001_v28 = vshll.u32 %v6992_v58, %v6999_v3  ;;  %v15492_v18 = vpack.c.bf16 %v7223_v55, %v7211_v40  ;;  %v10562_v2 = vpack.c.bf16 %v15462_v20, %v15458_v0  ;;  %vm6919_vm2 = vcmp.lt.s32.totalorder %v6918_v43, 2  ;;  %v10400_v0 = vld [vmem:[%s12172_s11 + $0xc0] sm:$0xff]  ;;  %v10401_v20 = vld [vmem:[%s12172_s11 + $0xc8] sm:$0xff] }
 0x89a   : > { %v7002_v39 = vshrl.u32 %v6984_v56, %v7000_v46  ;;  %v7005_v13 = vadd.s32 127, %v7004_v51  ;;  %v15494_v62 = vpack.c.bf16 %v7229_v5, %v7217_v59  ;;  %vm6923_vm9 = vcmp.eq.s32.totalorder %v6918_v43, 2  ;;  %v10392_v46 = vld [vmem:[%s12179_s20 + $0x40] sm:$0xff]  ;;  %v17058_v51 = vld [vmem:[#allocation40_spill] sm:$0xff] }
 0x89b   : > { %vm6920_vm10 = vcmp.eq.s32.totalorder %v6918_v43, 0  ;;  %v7100_v34 = vand.u32 4294901760, %v15472_v35  ;;  %v15501_v22 = vpack.c.bf16 %v7221_v63, %v7209_v30  ;;  %v15503_v6 = vpack.c.bf16 %v7227_v45, %v7215_v54 }
 0x89c   : > { %v11483_v9 = vpop.eup %11482  ;;  %v7003_v1 = vor.u32 %v7002_v39, %v7001_v28  ;;  %v7006_v21 = vshll.u32 %v7005_v13, 23  ;;  %vm6916_vm12 = vweird.f32 %v14718_v31  ;;  %v7014_v26 = vsub.s32 4, %v15433_v12  ;;  %v10393_v13 = vld [vmem:[%s12179_s20 + $0x48] sm:$0xff] }
 0x89d   : > { %v11485_v60 = vpop.eup %11484  ;;  %v6924_v38 = vxor.u32 2147483648, %v11483_v9  ;;  %v10670_v33 = vadd.f32 %v17055_v4, %v4639_v27  ;;  %v15509_v24 = vsub.f32 %v15472_v35, %v7100_v34  ;;  %vm6930_vm7 = vcmp.lt.s32.totalorder %v14723_v36, 0 }
 0x89e   : > { %v6921_v50 = vxor.u32 2147483648, %v11485_v60  ;;  %v7007_v58 = vor.u32 4788187, %v7006_v21  ;;  %v7010_v11 = vcvt.s32.f32 %v7003_v1  ;;  %vm15514_vm8 = vcmp.le.f32.partialorder %v6928_v61, 0.7853982 }
 0x89f   : > { %v6925_v48 = vsel %vm6923_vm9, %v6924_v38, %v11485_v60  ;;  %v11487_v16 = vpop.eup %11486  ;;  %v7015_v45 = vsel %vm6930_vm7, %v7014_v26, %v15433_v12  ;;  %v7239_v35 = vand.u32 4294901760, %v15509_v24  ;;  %v6198_v12 = vmul.f32 1.442695, %v17058_v51 }
 0x8a0   : > { %v6922_v7 = vsel %vm6920_vm10, %v11483_v9, %v6921_v50  ;;  %v7008_v52 = vand.u32 2147483647, %v7007_v58  ;;  %v7017_v42 = vsel %vm15514_vm8, 0, %v7015_v45  ;;  %v7079_v43 = vsel %vm2203_vm3, %v10392_v46, 0  ;;  %v17059_v45 = vld [vmem:[#allocation38_spill] sm:$0xff] }
 0x8a1   : > { %v6926_v29 = vsel %vm6919_vm2, %v6922_v7, %v6925_v48  ;;  %v7240_v40 = vsub.f32 %v15509_v24, %v7239_v35  ;;  %v7021_v5 = vadd.s32 3, %v7017_v42  ;;  %v15540_v9 = vand.u32 4294901760, %v7079_v43  ;;  %v10394_v7 = vld [vmem:[%s12179_s20 + $0x50] sm:$0xff] }
 0x8a2   : > { %v6927_v8 = vsel %vm6916_vm12, nan, %v6926_v29  ;;  %v7011_v32 = vmul.f32 %v7010_v11, %v7008_v52  ;;  %v7082_v38 = vsel %vm2203_vm3, %v10393_v13, 0  ;;  %v7098_v29 = vand.u32 4294901760, %v15479_v23 }
 0x8a3   : > { %v7038_v37 = vmul.f32 %v11487_v16, %v6927_v8  ;;  %v7241_v1 = vand.u32 4294901760, %v7240_v40  ;;  %v7022_v60 = vand.u32 3, %v7021_v5  ;;  %v15548_v16 = vand.u32 4294901760, %v7082_v38 }
 0x8a4   : > { %v7012_v30 = vxor.u32 2147483648, %v7011_v32  ;;  %v7085_v26 = vsel %vm2203_vm3, %v10394_v7, 0  ;;  %vm7020_vm15 = vweird.f32 %v14723_v36  ;;  %v7793_v19 = vsel %vm486_vm0, %v10401_v20, 0 }
 0x8a5   : > { %v7046_v63 = vmul.f32 %v10670_v33, %v7038_v37  ;;  %vm7027_vm1 = vcmp.eq.s32.totalorder %v7022_v60, 2  ;;  %vm7024_vm13 = vcmp.eq.s32.totalorder %v7022_v60, 0  ;;  %vm7023_vm5 = vcmp.lt.s32.totalorder %v7022_v60, 2  ;;  %v10395_v33 = vld [vmem:[%s12179_s20 + $0x58] sm:$0xff] }
 0x8a6   : > { %v7013_v54 = vsel %vm6930_vm7, %v7012_v30, %v7011_v32  ;;  %v7088_v42 = vsel %vm2203_vm3, %v10395_v33, 0 }
 0x8a7   : > { %v7016_v14 = vsel %vm15514_vm8, %v14723_v36, %v7013_v54  ;;  %v7104_v3 = vand.u32 4294901760, %v7046_v63  ;;  %v15556_v54 = vsub.f32 %v7082_v38, %v15548_v16 }
 0x8a8   : > { %11488 = vcosq.f32 %v7016_v14 }
 0x8a9   : > { %11490 = vsinq.f32 %v7016_v14  ;;  %v15525_v61 = vpack.c.bf16 %v7104_v3, %v7100_v34  ;;  %v15527_v56 = vsub.f32 %v7046_v63, %v7104_v3  ;;  %v15544_v34 = vsub.f32 %v7079_v43, %v15540_v9 }
 0x8aa   : > { %11492 = vpow2.f32 %v6198_v12  ;;  %v7232_v63 = vsub.f32 %v15479_v23, %v7098_v29  ;;  %v10671_v14 = vadd.f32 %v17059_v45, %v4639_v27  ;;  %v7176_v51 = vand.u32 4294901760, %v15556_v54 }
 0x8ab   : > { %v7251_v55 = vand.u32 4294901760, %v15527_v56  ;;  %v10566_v59 = vpack.c.bf16 %v15527_v56, %v15509_v24  ;;  %v7165_v31 = vand.u32 4294901760, %v15544_v34  ;;  %v10403_v24 = vld [vmem:[%s12172_s11 + $0xd8] sm:$0xff] }
 0x8ac   : > { %v7233_v23 = vand.u32 4294901760, %v7232_v63 }
 0x8ad   : > { %v7252_v28 = vsub.f32 %v15527_v56, %v7251_v55  ;;  %v15537_v39 = vpack.c.bf16 %v7251_v55, %v7239_v35  ;;  %v15559_v35 = vand.u32 4294901760, %v7085_v26  ;;  %v7166_v36 = vsub.f32 %v15544_v34, %v7165_v31 }
 0x8ae   : > { %v15569_v55 = vand.u32 4294901760, %v7088_v42  ;;  %v7234_v13 = vsub.f32 %v7232_v63, %v7233_v23 }
 0x8af   : > { %v7253_v21 = vand.u32 4294901760, %v7252_v28  ;;  %v15567_v40 = vsub.f32 %v7085_v26, %v15559_v35  ;;  %v7167_v43 = vand.u32 4294901760, %v7166_v36  ;;  %v7177_v28 = vsub.f32 %v15556_v54, %v7176_v51 }
 0x8b0   : > { %v7197_v60 = vsub.f32 %v7088_v42, %v15569_v55  ;;  %v7235_v7 = vand.u32 4294901760, %v7234_v13 }
 0x8b1   : > { %v10558_v50 = vpack.c.bf16 %v7253_v21, %v7241_v1  ;;  %v7187_v21 = vand.u32 4294901760, %v15567_v40 }
 0x8b2   : > { %v11489_v58 = vpop.eup %11488 }
 0x8b3   : > { %v11491_v48 = vpop.eup %11490  ;;  %v7028_v11 = vxor.u32 2147483648, %v11489_v58 }
 0x8b4   : > { %v7025_v52 = vxor.u32 2147483648, %v11491_v48  ;;  %v11493_v37 = vpop.eup %11492 }
 0x8b5   : > { %v7029_v8 = vsel %vm7027_vm1, %v7028_v11, %v11491_v48  ;;  %v7178_v11 = vand.u32 4294901760, %v7177_v28 }
 0x8b6   : > { %v7026_v32 = vsel %vm7024_vm13, %v11489_v58, %v7025_v52 }
 0x8b7   : > { %v7030_v4 = vsel %vm7023_vm5, %v7026_v32, %v7029_v8  ;;  %v7198_v8 = vand.u32 4294901760, %v7197_v60  ;;  %v17060_v32 = vmov 0.0  }
 0x8b8   : > { %v7031_v30 = vsel %vm7020_vm15, nan, %v7030_v4 }
 0x8b9   : > { %v7039_v3 = vmul.f32 %v11493_v37, %v7031_v30  ;;  %v7199_v33 = vsub.f32 %v7197_v60, %v7198_v8 }
 0x8bb   : > { %v7047_v46 = vmul.f32 %v10671_v14, %v7039_v3 }
 0x8bd   : > { %v7102_v12 = vand.u32 4294901760, %v7047_v46 }
 0x8bf   : > { %v15571_v27 = vpack.c.bf16 %v7102_v12, %v7098_v29  ;;  %v7244_v5 = vsub.f32 %v7047_v46, %v7102_v12  ;;  %v7188_v29 = vsub.f32 %v15567_v40, %v7187_v21  ;;  %v10406_v46 = vld [vmem:[%s12172_s11 + $0xf0] sm:$0xff] }
 0x8c1   : > { %10549 = vmatprep.subr.bf16.mxu1 %v15571_v27  ;;  %v7245_v1 = vand.u32 4294901760, %v7244_v5  ;;  %v10564_v38 = vpack.c.bf16 %v7244_v5, %v7232_v63  ;;  %v7189_v4 = vand.u32 4294901760, %v7188_v29 }
 0x8c2   : > { %10551 = vmatpush1.bf16.msra.mxu1 %v15525_v61 }
 0x8c3   : > { %10553 = vmatprep.subr.bf16.mxu1 %v15492_v18  ;;  %v7246_v58 = vsub.f32 %v7244_v5, %v7245_v1  ;;  %v10580_v48 = vpack.c.bf16 %v7245_v1, %v7233_v23  ;;  %v7200_v18 = vand.u32 4294901760, %v7199_v33  ;;  %v10407_v5 = vld [vmem:[%s12172_s11 + $0xf8] sm:$0xff] }
 0x8c5   : > { %7168 = vmatmul.mubr.f32.vlgmr.msra.gmra.mrb[24].mxu1 %v7167_v43  ;;  %v7247_v52 = vand.u32 4294901760, %v7246_v58  ;;  %v17065_v43 = vld [vmem:[#allocation27_spill] sm:$0xff] }
 0x8c6   : > { %10555 = vmatpush1.bf16.msra.mxu1 %v15494_v62  ;;  %7173 = vmatprep.mubr.f32.mxu1 %v17060_v32  ;;  %v10402_v62 = vld [vmem:[%s12172_s11 + $0xd0] sm:$0xff] }
 0x8c7   : > { %v10556_v26 = vpack.c.bf16 %v7247_v52, %v7235_v7 }
 0x8c9   : > { %7179 = vmatmul.mubr.f32.gmra.mrb[26].mxu1 %v7178_v11  ;;  %10557 = vmatprep.subr.bf16.mxu1 %v10556_v26 }
 0x8ca   : > { %10559 = vmatpush1.bf16.msra.mxu1 %v10558_v50  ;;  %7184 = vmatprep.mubr.f32.mxu1 %v17060_v32  ;;  %v10404_v50 = vld [vmem:[%s12172_s11 + $0xe0] sm:$0xff] }
 0x8cb   : > { %10561 = vmatprep.subr.bf16.mxu1 %v10560_v41  ;;  %v7802_v63 = vsel %vm486_vm0, %v10404_v50, 0 }
 0x8cd   : > { %7190 = vmatmul.mubr.f32.gmra.mrb[28].mxu1 %v7189_v4 }
 0x8ce   : > { %7195 = vmatprep.mubr.f32.mxu1 %v17060_v32 }
 0x8d1   : > { %7201 = vmatmul.mubr.f32.gmra.mrb[30].mxu1 %v7200_v18 }
 0x8d2   : > { %7311 = vmatprep.mubr.f32.mxu1 %v17060_v32 }
 0x8d5   : > { %7313 = vmatmul.mubr.f32.vlgmr.msra.gmra.mrb[24].mxu1 %v15540_v9 }
 0x8d6   : > { %10563 = vmatpush1.bf16.msra.mxu1 %v10562_v2  ;;  %7318 = vmatprep.mubr.f32.mxu1 %v17060_v32  ;;  %v15650_v2 = vand.u32 4294901760, %v7793_v19 }
 0x8d7   : > { %10565 = vmatprep.subr.bf16.mxu1 %v10564_v38  ;;  %v7811_v38 = vsel %vm486_vm0, %v10407_v5, 0 }
 0x8d8   : > { %v15725_v52 = vand.u32 4294901760, %v7811_v38 }
 0x8d9   : > { %7320 = vmatmul.mubr.f32.gmra.mrb[26].mxu1 %v15548_v16 }
 0x8da   : > { %10567 = vmatpush1.bf16.msra.mxu1 %v10566_v59  ;;  %7325 = vmatprep.mubr.f32.mxu1 %v17060_v32  ;;  %v15660_v59 = vsub.f32 %v7793_v19, %v15650_v2  ;;  %v15733_v4 = vsub.f32 %v7811_v38, %v15725_v52 }
 0x8db   : > { %10569 = vmatprep.subr.bf16.mxu1 %v15467_v17 }
 0x8dc   : > { %v7893_v37 = vand.u32 4294901760, %v15660_v59 }
 0x8dd   : > { %7327 = vmatmul.mubr.f32.gmra.mrb[28].mxu1 %v15559_v35 }
 0x8de   : > { %7332 = vmatprep.mubr.f32.mxu1 %v17060_v32  ;;  %v7894_v14 = vsub.f32 %v15660_v59, %v7893_v37 }
 0x8e1   : > { %7334 = vmatmul.mubr.f32.gmra.mrb[30].mxu1 %v15569_v55 }
 0x8e2   : > { %7420 = vmatprep.mubr.f32.mxu1 %v17060_v32 }
 0x8e5   : > { %7423 = vmatmul.mubr.f32.vlgmr.msra.gmra.mrb[24].mxu1 %v15544_v34 }
 0x8e6   : > { %10571 = vmatpush1.bf16.msra.mxu1 %v15456_v47  ;;  %7428 = vmatprep.mubr.f32.mxu1 %v17060_v32 }
 0x8e7   : > { %10573 = vmatprep.subr.bf16.mxu1 %v15571_v27 }
 0x8e9   : > { %7431 = vmatmul.mubr.f32.gmra.mrb[26].mxu1 %v15556_v54 }
 0x8ea   : > { %10575 = vmatpush1.bf16.msra.mxu1 %v15525_v61  ;;  %7436 = vmatprep.mubr.f32.mxu1 %v17060_v32 }
 0x8eb   : > { %10577 = vmatprep.subr.bf16.mxu1 %v15501_v22  ;;  %v17062_v22 = vld [vmem:[#allocation26_spill] sm:$0xff] }
 0x8ed   : > { %7439 = vmatmul.mubr.f32.gmra.mrb[28].mxu1 %v15567_v40 }
 0x8ee   : > { %7444 = vmatprep.mubr.f32.mxu1 %v17060_v32 }
 0x8f1   : > { %7447 = vmatmul.mubr.f32.gmra.mrb[30].mxu1 %v7197_v60 }
 0x8f2   : > { %7525 = vmatprep.mubr.f32.mxu1 %v17060_v32 }
 0x8f5   : > { %7529 = vmatmul.mubr.f32.vlgmr.msra.gmra.mrb[24].mxu1 %v7165_v31  ;;  %v10405_v31 = vld [vmem:[%s12172_s11 + $0xe8] sm:$0xff] }
 0x8f6   : > { %10579 = vmatpush1.bf16.msra.mxu1 %v15503_v6  ;;  %7534 = vmatprep.mubr.f32.mxu1 %v17060_v32  ;;  %v7796_v6 = vsel %vm486_vm0, %v10402_v62, 0  ;;  %v7805_v42 = vsel %vm486_vm0, %v10405_v31, 0  ;;  %v17066_v62 = vld [vmem:[#allocation29_spill] sm:$0xff] }
 0x8f7   : > { %10581 = vmatprep.subr.bf16.mxu1 %v10580_v48  ;;  %v15700_v40 = vand.u32 4294901760, %v7805_v42 }
 0x8f9   : > { %7538 = vmatmul.mubr.f32.gmra.mrb[26].mxu1 %v7176_v51  ;;  %v7895_v51 = vand.u32 4294901760, %v7894_v14 }
 0x8fa   : > { %10583 = vmatpush1.bf16.msra.mxu1 %v15537_v39  ;;  %7543 = vmatprep.mubr.f32.mxu1 %v17060_v32  ;;  %v15662_v39 = vand.u32 4294901760, %v7796_v6 }
 0x8fb   : > { %10585 = vmatprep.subr.bf16.mxu1 %v15467_v17 }
 0x8fc   : > { %v15675_v30 = vsub.f32 %v7796_v6, %v15662_v39  ;;  %v17067_v6 = vld [vmem:[#allocation28_spill] sm:$0xff] }
 0x8fd   : > { %7547 = vmatmul.mubr.f32.gmra.mrb[28].mxu1 %v7187_v21  ;;  %v15712_v21 = vsub.f32 %v7805_v42, %v15700_v40 }
 0x8fe   : > { %7552 = vmatprep.mubr.f32.mxu1 %v17060_v32  ;;  %v7904_v3 = vand.u32 4294901760, %v15675_v30 }
 0x8ff   : > { %v7937_v11 = vand.u32 4294901760, %v15712_v21 }
 0x900   : > { %v7905_v23 = vsub.f32 %v15675_v30, %v7904_v3 }
 0x901   : > { %7556 = vmatmul.mubr.f32.gmra.mrb[30].mxu1 %v7198_v8  ;;  %v7938_v8 = vsub.f32 %v15712_v21, %v7937_v11 }
 0x902   : > { %7650 = vmatprep.mubr.f32.mxu1 %v17060_v32  ;;  %v7906_v13 = vand.u32 4294901760, %v7905_v23 }
 0x903   : > { %v7939_v33 = vand.u32 4294901760, %v7938_v8 }
 0x905   : > { %7652 = vmatmul.mubr.f32.vlgmr.msra.gmra.mrb[24].mxu1 %v15540_v9 }
 0x906   : > { %10587 = vmatpush1.bf16.msra.mxu1 %v15456_v47  ;;  %7657 = vmatprep.mubr.f32.mxu1 %v17060_v32  ;;  %v7790_v47 = vsel %vm486_vm0, %v10400_v0, 0  ;;  %v7959_v0 = vand.u32 4294901760, %v15733_v4 }
 0x907   : > { %10589 = vmatprep.subr.bf16.mxu1 %v15571_v27  ;;  %v15641_v17 = vand.u32 4294901760, %v7790_v47  ;;  %v7808_v27 = vsel %vm486_vm0, %v10406_v46, 0 }
 0x908   : > { %v15714_v60 = vand.u32 4294901760, %v7808_v27  ;;  %v7960_v20 = vsub.f32 %v15733_v4, %v7959_v0 }
 0x909   : > { %7659 = vmatmul.mubr.f32.gmra.mrb[26].mxu1 %v15548_v16  ;;  %v15648_v41 = vsub.f32 %v7790_v47, %v15641_v17 }
 0x90a   : > { %10591 = vmatpush1.bf16.msra.mxu1 %v15525_v61  ;;  %7664 = vmatprep.mubr.f32.mxu1 %v17060_v32  ;;  %v17063_v61 = vld [vmem:[#allocation31_spill] sm:$0xff]  ;;  %v15723_v7 = vsub.f32 %v7808_v27, %v15714_v60  ;;  %v7961_v19 = vand.u32 4294901760, %v7960_v20 }
 0x90b   : > { %7814 = vmatprep.subr.mxu1 %v17061_v49  ;;  %v7882_v56 = vand.u32 4294901760, %v15648_v41 }
 0x90c   : > { %v7948_v26 = vand.u32 4294901760, %v15723_v7 }
 0x90d   : > { %7666 = vmatmul.mubr.f32.gmra.mrb[28].mxu1 %v15559_v35 }
 0x90e   : > { %7671 = vmatprep.mubr.f32.mxu1 %v17060_v32  ;;  %v7949_v18 = vsub.f32 %v15723_v7, %v7948_v26 }
 0x910   : > { %v7950_v47 = vand.u32 4294901760, %v7949_v18 }
 0x911   : > { %7673 = vmatmul.mubr.f32.gmra.mrb[30].mxu1 %v15569_v55 }
 0x912   : > { %7751 = vmatprep.mubr.f32.mxu1 %v17060_v32 }
 0x915   : > { %7753 = vmatmul.mubr.f32.vlgmr.msra.gmra.mrb[24].mxu1 %v15540_v9  ;;  %v7799_v9 = vsel %vm486_vm0, %v10403_v24, 0  ;;  %v17068_v24 = vld [vmem:[#allocation30_spill] sm:$0xff] }
 0x916   : > { %7758 = vmatprep.mubr.f32.mxu1 %v17060_v32  ;;  %7816 = vmatpush1.msra.mxu1 %v17062_v22  ;;  %v15667_v34 = vand.u32 4294901760, %v7799_v9 }
 0x917   : > { %7973 = vmatprep.subr.mxu1 %v17063_v61 }
 0x918   : > { %v15681_v54 = vsub.f32 %v7799_v9, %v15667_v34 }
 0x919   : > { %7760 = vmatmul.mubr.f32.gmra.mrb[26].mxu1 %v15548_v16  ;;  %v7883_v16 = vsub.f32 %v15648_v41, %v7882_v56 }
 0x91a   : > { %7765 = vmatprep.mubr.f32.mxu1 %v17060_v32  ;;  %v7915_v36 = vand.u32 4294901760, %v15681_v54 }
 0x91b   : > { %v7884_v45 = vand.u32 4294901760, %v7883_v16 }
 0x91c   : > { %v7916_v28 = vsub.f32 %v15681_v54, %v7915_v36 }
 0x91d   : > { %7767 = vmatmul.mubr.f32.gmra.mrb[28].mxu1 %v15559_v35  ;;  %v15688_v35 = vand.u32 4294901760, %v7802_v63 }
 0x91e   : > { %7772 = vmatprep.mubr.f32.mxu1 %v17060_v32  ;;  %v7917_v58 = vand.u32 4294901760, %v7916_v28 }
 0x91f   : > { %v15698_v12 = vsub.f32 %v7802_v63, %v15688_v35 }
 0x921   : > { %7774 = vmatmul.mubr.f32.gmra.mrb[30].mxu1 %v15569_v55  ;;  %v17064_v55 = vld [vmem:[#allocation32_spill] sm:$0xff]  ;;  %v7926_v1 = vand.u32 4294901760, %v15698_v12 }
 0x922   : > { %7879 = vmatprep.mubr.f32.mxu1 %v17060_v32 }
 0x923   : > { %v7927_v48 = vsub.f32 %v15698_v12, %v7926_v1 }
 0x925   : > { %7885 = vmatmul.mubr.f32.vlgmr.msra.gmra.mrb[32].mxu1 %v7884_v45  ;;  %v7928_v29 = vand.u32 4294901760, %v7927_v48 }
 0x926   : > { %7890 = vmatprep.mubr.f32.mxu1 %v17060_v32  ;;  %7979 = vmatpush1.msra.mxu1 %v17064_v55 }
 0x927   : > { %8101 = vmatprep.subr.mxu1 %v17065_v43 }
 0x929   : > { %7896 = vmatmul.mubr.f32.gmra.mrb[34].mxu1 %v7895_v51 }
 0x92a   : > { %7901 = vmatprep.mubr.f32.mxu1 %v17060_v32 }
 0x92d   : > { %7907 = vmatmul.mubr.f32.gmra.mrb[36].mxu1 %v7906_v13 }
 0x92e   : > { %7912 = vmatprep.mubr.f32.mxu1 %v17060_v32 }
 0x931   : > { %7918 = vmatmul.mubr.f32.gmra.mrb[38].mxu1 %v7917_v58 }
 0x932   : > { %7923 = vmatprep.mubr.f32.mxu1 %v17060_v32 }
 0x935   : > { %7929 = vmatmul.mubr.f32.gmra.mrb[40].mxu1 %v7928_v29 }
 0x936   : > { %7934 = vmatprep.mubr.f32.mxu1 %v17060_v32 }
 0x939   : > { %7940 = vmatmul.mubr.f32.gmra.mrb[42].mxu1 %v7939_v33 }
 0x93a   : > { %7945 = vmatprep.mubr.f32.mxu1 %v17060_v32 }
 0x93d   : > { %7951 = vmatmul.mubr.f32.gmra.mrb[44].mxu1 %v7950_v47 }
 0x93e   : > { %7956 = vmatprep.mubr.f32.mxu1 %v17060_v32 }
 0x941   : > { %7962 = vmatmul.mubr.f32.gmra.mrb[46].mxu1 %v7961_v19 }
 0x942   : > { %8042 = vmatprep.mubr.f32.mxu1 %v17060_v32 }
 0x945   : > { %8044 = vmatmul.mubr.f32.vlgmr.msra.gmra.mrb[32].mxu1 %v15641_v17 }
 0x946   : > { %8049 = vmatprep.mubr.f32.mxu1 %v17060_v32  ;;  %8104 = vmatpush1.msra.mxu1 %v17066_v62 }
 0x947   : > { %8233 = vmatprep.subr.mxu1 %v17061_v49 }
 0x949   : > { %8051 = vmatmul.mubr.f32.gmra.mrb[34].mxu1 %v15650_v2 }
 0x94a   : > { %8056 = vmatprep.mubr.f32.mxu1 %v17060_v32 }
 0x94d   : > { %8058 = vmatmul.mubr.f32.gmra.mrb[36].mxu1 %v15662_v39 }
 0x94e   : > { %8063 = vmatprep.mubr.f32.mxu1 %v17060_v32 }
 0x951   : > { %8065 = vmatmul.mubr.f32.gmra.mrb[38].mxu1 %v15667_v34 }
 0x952   : > { %8070 = vmatprep.mubr.f32.mxu1 %v17060_v32 }
 0x955   : > { %8072 = vmatmul.mubr.f32.gmra.mrb[40].mxu1 %v15688_v35 }
 0x956   : > { %8077 = vmatprep.mubr.f32.mxu1 %v17060_v32 }
 0x959   : > { %8079 = vmatmul.mubr.f32.gmra.mrb[42].mxu1 %v15700_v40 }
 0x95a   : > { %8084 = vmatprep.mubr.f32.mxu1 %v17060_v32 }
 0x95d   : > { %8086 = vmatmul.mubr.f32.gmra.mrb[44].mxu1 %v15714_v60 }
 0x95e   : > { %8091 = vmatprep.mubr.f32.mxu1 %v17060_v32 }
 0x961   : > { %8093 = vmatmul.mubr.f32.gmra.mrb[46].mxu1 %v15725_v52 }
 0x962   : > { %8167 = vmatprep.mubr.f32.mxu1 %v17060_v32 }
 0x965   : > { %8170 = vmatmul.mubr.f32.vlgmr.msra.gmra.mrb[32].mxu1 %v15648_v41 }
 0x966   : > { %8175 = vmatprep.mubr.f32.mxu1 %v17060_v32  ;;  %8235 = vmatpush1.msra.mxu1 %v17062_v22 }
 0x967   : > { %8374 = vmatprep.subr.mxu1 %v17067_v6 }
 0x969   : > { %8178 = vmatmul.mubr.f32.gmra.mrb[34].mxu1 %v15660_v59 }
 0x96a   : > { %8183 = vmatprep.mubr.f32.mxu1 %v17060_v32 }
 0x96d   : > { %8186 = vmatmul.mubr.f32.gmra.mrb[36].mxu1 %v15675_v30 }
 0x96e   : > { %8191 = vmatprep.mubr.f32.mxu1 %v17060_v32 }
 0x971   : > { %8194 = vmatmul.mubr.f32.gmra.mrb[38].mxu1 %v15681_v54 }
 0x972   : > { %8199 = vmatprep.mubr.f32.mxu1 %v17060_v32 }
 0x975   : > { %8202 = vmatmul.mubr.f32.gmra.mrb[40].mxu1 %v15698_v12 }
 0x976   : > { %8207 = vmatprep.mubr.f32.mxu1 %v17060_v32 }
 0x979   : > { %8210 = vmatmul.mubr.f32.gmra.mrb[42].mxu1 %v15712_v21 }
 0x97a   : > { %8215 = vmatprep.mubr.f32.mxu1 %v17060_v32 }
 0x97d   : > { %8218 = vmatmul.mubr.f32.gmra.mrb[44].mxu1 %v15723_v7 }
 0x97e   : > { %8223 = vmatprep.mubr.f32.mxu1 %v17060_v32 }
 0x981   : > { %8226 = vmatmul.mubr.f32.gmra.mrb[46].mxu1 %v15733_v4 }
 0x982   : > { %8298 = vmatprep.mubr.f32.mxu1 %v17060_v32 }
 0x985   : > { %8302 = vmatmul.mubr.f32.vlgmr.msra.gmra.mrb[32].mxu1 %v7882_v56 }
 0x986   : > { %8307 = vmatprep.mubr.f32.mxu1 %v17060_v32  ;;  %8378 = vmatpush1.msra.mxu1 %v17068_v24 }
 0x987   : > { %8499 = vmatprep.subr.mxu1 %v17061_v49 }
 0x989   : > { %8311 = vmatmul.mubr.f32.gmra.mrb[34].mxu1 %v7893_v37 }
 0x98a   : > { %8316 = vmatprep.mubr.f32.mxu1 %v17060_v32 }
 0x98d   : > { %8320 = vmatmul.mubr.f32.gmra.mrb[36].mxu1 %v7904_v3 }
 0x98e   : > { %8325 = vmatprep.mubr.f32.mxu1 %v17060_v32 }
 0x991   : > { %8329 = vmatmul.mubr.f32.gmra.mrb[38].mxu1 %v7915_v36 }
 0x992   : > { %8334 = vmatprep.mubr.f32.mxu1 %v17060_v32 }
 0x995   : > { %8338 = vmatmul.mubr.f32.gmra.mrb[40].mxu1 %v7926_v1 }
 0x996   : > { %8343 = vmatprep.mubr.f32.mxu1 %v17060_v32 }
 0x999   : > { %8347 = vmatmul.mubr.f32.gmra.mrb[42].mxu1 %v7937_v11 }
 0x99a   : > { %8352 = vmatprep.mubr.f32.mxu1 %v17060_v32 }
 0x99d   : > { %8356 = vmatmul.mubr.f32.gmra.mrb[44].mxu1 %v7948_v26 }
 0x99e   : > { %8361 = vmatprep.mubr.f32.mxu1 %v17060_v32 }
 0x9a1   : > { %8365 = vmatmul.mubr.f32.gmra.mrb[46].mxu1 %v7959_v0 }
 0x9a2   : > { %8441 = vmatprep.mubr.f32.mxu1 %v17060_v32 }
 0x9a5   : > { %8443 = vmatmul.mubr.f32.vlgmr.msra.gmra.mrb[32].mxu1 %v15641_v17 }
 0x9a6   : > { %8448 = vmatprep.mubr.f32.mxu1 %v17060_v32  ;;  %8501 = vmatpush1.msra.mxu1 %v17062_v22 }
 0x9a9   : > { %8450 = vmatmul.mubr.f32.gmra.mrb[34].mxu1 %v15650_v2 }
 0x9aa   : > { %8455 = vmatprep.mubr.f32.mxu1 %v17060_v32 }
 0x9ad   : > { %8457 = vmatmul.mubr.f32.gmra.mrb[36].mxu1 %v15662_v39 }
 0x9ae   : > { %8462 = vmatprep.mubr.f32.mxu1 %v17060_v32 }
 0x9b1   : > { %8464 = vmatmul.mubr.f32.gmra.mrb[38].mxu1 %v15667_v34 }
 0x9b2   : > { %8469 = vmatprep.mubr.f32.mxu1 %v17060_v32 }
 0x9b5   : > { %8471 = vmatmul.mubr.f32.gmra.mrb[40].mxu1 %v15688_v35 }
 0x9b6   : > { %8476 = vmatprep.mubr.f32.mxu1 %v17060_v32 }
 0x9b9   : > { %8478 = vmatmul.mubr.f32.gmra.mrb[42].mxu1 %v15700_v40 }
 0x9ba   : > { %8483 = vmatprep.mubr.f32.mxu1 %v17060_v32 }
 0x9bd   : > { %8485 = vmatmul.mubr.f32.gmra.mrb[44].mxu1 %v15714_v60 }
 0x9be   : > { %8490 = vmatprep.mubr.f32.mxu1 %v17060_v32 }
 0x9c1   : > { %8492 = vmatmul.mubr.f32.gmra.mrb[46].mxu1 %v15725_v52 }
 0x9c2   : > { %8564 = vmatprep.mubr.f32.mxu1 %v17060_v32 }
 0x9c5   : > { %8566 = vmatmul.mubr.f32.vlgmr.msra.gmra.mrb[32].mxu1 %v15641_v17 }
 0x9c6   : > { %8571 = vmatprep.mubr.f32.mxu1 %v17060_v32 }
 0x9c9   : > { %8573 = vmatmul.mubr.f32.gmra.mrb[34].mxu1 %v15650_v2 }
 0x9ca   : > { %8578 = vmatprep.mubr.f32.mxu1 %v17060_v32 }
 0x9cd   : > { %8580 = vmatmul.mubr.f32.gmra.mrb[36].mxu1 %v15662_v39 }
 0x9ce   : > { %8585 = vmatprep.mubr.f32.mxu1 %v17060_v32 }
 0x9d1   : > { %8587 = vmatmul.mubr.f32.gmra.mrb[38].mxu1 %v15667_v34 }
 0x9d2   : > { %8592 = vmatprep.mubr.f32.mxu1 %v17060_v32 }
 0x9d5   : > { %8594 = vmatmul.mubr.f32.gmra.mrb[40].mxu1 %v15688_v35 }
 0x9d6   : > { %8599 = vmatprep.mubr.f32.mxu1 %v17060_v32 }
 0x9d9   : > { %8601 = vmatmul.mubr.f32.gmra.mrb[42].mxu1 %v15700_v40 }
 0x9da   : > { %8606 = vmatprep.mubr.f32.mxu1 %v17060_v32 }
 0x9dd   : > { %8608 = vmatmul.mubr.f32.gmra.mrb[44].mxu1 %v15714_v60 }
 0x9de   : > { %8613 = vmatprep.mubr.f32.mxu1 %v17060_v32 }
 0x9e1   : > { %8615 = vmatmul.mubr.f32.gmra.mrb[46].mxu1 %v15725_v52 }
 0x9e8   : > { %v15837_v49 = vpop.f32.mrb[24].mxu1 }
 0x9e9   : > { %v15839_v17 = vpop.f32.mrb[25].mxu1 }
 0x9ec   : > { %v15841_v41 = vpop.f32.mrb[26].mxu1 }
 0x9ed   : > { %v15843_v2 = vpop.f32.mrb[27].mxu1 }
 0x9f0   : > { %v15845_v22 = vpop.f32.mrb[28].mxu1 }
 0x9f1   : > { %v15847_v61 = vpop.f32.mrb[29].mxu1 }
 0x9f2   : > { %17069 = vst [vmem:[#allocation34_spill] sm:$0xff] %v15847_v61 }
 0x9f4   : > { %v15849_v56 = vpop.f32.mrb[30].mxu1 }
 0x9f5   : > { %17070 = vst [vmem:[#allocation49_spill] sm:$0xff] %v15849_v56  ;;  %v15851_v59 = vpop.f32.mrb[31].mxu1 }
 0x9f6   : > { %17071 = vst [vmem:[#allocation37_spill] sm:$0xff] %v15851_v59 }
 0xa98   : > { %v15853_v39 = vpop.f32.mrb[32].mxu1 }
 0xa99   : > { %v8637_v9 = vand.u32 2147483647, %v15853_v39  ;;  %v8640_v50 = vand.u32 2139095040, %v15853_v39  ;;  %v15857_v34 = vpop.f32.mrb[33].mxu1 }
 0xa9a   : > { %v16862_v16 = vand.u32 2147483647, %v15857_v34  ;;  %v8744_v37 = vand.u32 2139095040, %v15857_v34 }
 0xa9b   : > { %v8641_v30 = vshrl.u32 %v8640_v50, 23  ;;  %v8644_v63 = vand.u32 8388607, %v8637_v9 }
 0xa9c   : > { %v8745_v31 = vshrl.u32 %v8744_v37, 23  ;;  %v8748_v54 = vand.u32 8388607, %v16862_v16  ;;  %v15865_v45 = vpop.f32.mrb[34].mxu1 }
 0xa9d   : > { %v10408_v14 = vadd.s32 4294967169, %v8641_v30  ;;  %v15867_v3 = vpop.f32.mrb[35].mxu1  ;;  %v8848_v42 = vand.u32 2139095040, %v15865_v45  ;;  %v8645_v36 = vor.u32 8388608, %v8644_v63 }
 0xa9e   : > { %v10412_v35 = vadd.s32 4294967169, %v8745_v31  ;;  %v8749_v51 = vor.u32 8388608, %v8748_v54 }
 0xa9f   : > { %v8647_v46 = vadd.s32 1, %v10408_v14  ;;  %v8849_v12 = vshrl.u32 %v8848_v42, 23  ;;  %v15874_v1 = vshll.u32 %v8645_v36, 8 }
 0xaa0   : > { %v8751_v23 = vadd.s32 1, %v10412_v35  ;;  %v15870_v40 = vpop.f32.mrb[36].mxu1  ;;  %v15878_v60 = vshll.u32 %v8749_v51, 8 }
 0xaa1   : > { %vm8648_vm0 = vcmp.gt.s32.totalorder %v8647_v46, 0  ;;  %v15872_v55 = vpop.f32.mrb[37].mxu1  ;;  %v10416_v5 = vadd.s32 4294967169, %v8849_v12 }
 0xaa2   : > { %v8649_v27 = vsel %vm8648_vm0, %v8647_v46, 0  ;;  %vm8752_vm6 = vcmp.gt.s32.totalorder %v8751_v23, 0 }
 0xaa3   : > { %v8650_v43 = vshrl.u32 %v8649_v27, 5  ;;  %v8651_v28 = vand.u32 31, %v8649_v27  ;;  %v8753_v13 = vsel %vm8752_vm6, %v8751_v23, 0  ;;  %v15883_v7 = vadd.s32 1, %v10416_v5 }
 0xaa4   : > { %v15876_v21 = vshrl.u32 %v8753_v13, 5  ;;  %v15880_v38 = vpop.f32.mrb[38].mxu1  ;;  %v8755_v11 = vand.u32 31, %v8753_v13 }
 0xaa5   : > { %v8652_v58 = vsub.s32 32, %v8651_v28  ;;  %v8654_v48 = vshll.u32 %v16914_v10, %v8651_v28  ;;  %v15885_v52 = vpop.f32.mrb[39].mxu1  ;;  %v8657_v29 = vshll.u32 %v16954_v57, %v8651_v28  ;;  %v8660_v8 = vshll.u32 %v16955_v44, %v8651_v28 }
 0xaa6   : > { %v8663_v26 = vshll.u32 %v16956_v15, %v8651_v28  ;;  %v8666_v4 = vshll.u32 %v16915_v53, %v8651_v28  ;;  %vm8669_vm4 = vcmp.lt.s32.totalorder %v8650_v43, 1  ;;  %vm8670_vm14 = vcmp.lt.s32.totalorder %v8650_v43, 2 }
 0xaa7   : > { %v8655_v33 = vshrl.u32 %v16954_v57, %v8652_v58  ;;  %v8658_v18 = vshrl.u32 %v16955_v44, %v8652_v58  ;;  %v8661_v0 = vshrl.u32 %v16956_v15, %v8652_v58  ;;  %v8653_v47 = vshrl.u32 %v16914_v10, %v8652_v58 }
 0xaa8   : > { %v8664_v20 = vshrl.u32 %v16915_v53, %v8652_v58  ;;  %v8667_v19 = vshrl.u32 %v16913_v25, %v8652_v58  ;;  %v8756_v50 = vsub.s32 32, %v8755_v11  ;;  %vm8671_vm11 = vcmp.lt.s32.totalorder %v8650_v43, 3 }
 0xaa9   : > { %v8656_v62 = vor.u32 %v8655_v33, %v8654_v48  ;;  %v8659_v6 = vor.u32 %v8658_v18, %v8657_v29  ;;  %v8662_v24 = vor.u32 %v8661_v0, %v8660_v8  ;;  %vm8672_vm2 = vcmp.lt.s32.totalorder %v8650_v43, 4 }
 0xaaa   : > { %v8665_v37 = vor.u32 %v8664_v20, %v8663_v26  ;;  %v8668_v30 = vor.u32 %v8667_v19, %v8666_v4  ;;  %v8758_v36 = vshll.u32 %v16914_v10, %v8755_v11  ;;  %v8759_v12 = vshrl.u32 %v16954_v57, %v8756_v50 }
 0xaab   : > { %v8673_v63 = vsel %vm8669_vm4, %v8653_v47, %v8656_v62  ;;  %v8674_v31 = vsel %vm8672_vm2, %v8662_v24, 2102212464  ;;  %v8677_v54 = vsel %vm8669_vm4, %v8656_v62, %v8659_v6  ;;  %v8681_v14 = vsel %vm8669_vm4, %v8659_v6, %v8662_v24 }
 0xaac   : > { %v8675_v35 = vsel %vm8671_vm11, %v8659_v6, %v8674_v31  ;;  %v8678_v42 = vsel %vm8672_vm2, %v8665_v37, 920167782  ;;  %v8682_v46 = vsel %vm8672_vm2, %v8668_v30, 1326507024  ;;  %v8761_v27 = vshll.u32 %v16954_v57, %v8755_v11 }
 0xaad   : > { %v8679_v51 = vsel %vm8671_vm11, %v8662_v24, %v8678_v42  ;;  %v8683_v23 = vsel %vm8671_vm11, %v8665_v37, %v8682_v46  ;;  %v8676_v5 = vsel %vm8670_vm14, %v8673_v63, %v8675_v35  ;;  %v8762_v58 = vshrl.u32 %v16955_v44, %v8756_v50 }
 0xaae   : > { %v8680_v28 = vsel %vm8670_vm14, %v8677_v54, %v8679_v51  ;;  %v8684_v13 = vsel %vm8670_vm14, %v8681_v14, %v8683_v23  ;;  %v8760_v4 = vor.u32 %v8759_v12, %v8758_v36  ;;  %v8764_v18 = vshll.u32 %v16955_v44, %v8755_v11 }
 0xaaf   : > { %v15908_v48 = vmul.u32.u64.low %v15874_v1, %v8684_v13  ;;  %v15909_v29 = vmul.u32.u64.high %v15874_v1, %v8684_v13, %v15908_v48  ;;  %v15912_v8 = vmul.u32.u64.low %v15874_v1, %v8680_v28  ;;  %v15913_v26 = vmul.u32.u64.high %v15874_v1, %v8680_v28, %v15912_v8 }
 0xab0   : > { %v8763_v33 = vor.u32 %v8762_v58, %v8761_v27  ;;  %v8765_v0 = vshrl.u32 %v16956_v15, %v8756_v50  ;;  %v8757_v43 = vshrl.u32 %v16914_v10, %v8756_v50  ;;  %v8767_v47 = vshll.u32 %v16956_v15, %v8755_v11 }
 0xab1   : > { %v8768_v20 = vshrl.u32 %v16915_v53, %v8756_v50  ;;  %v8771_v19 = vshrl.u32 %v16913_v25, %v8756_v50  ;;  %v8692_v62 = vmul.u32 %v15874_v1, %v8676_v5  ;;  %v8770_v24 = vshll.u32 %v16915_v53, %v8755_v11 }
 0xab2   : > { %v8766_v6 = vor.u32 %v8765_v0, %v8764_v18  ;;  %vm8773_vm9 = vcmp.lt.s32.totalorder %v15876_v21, 1  ;;  %vm8694_vm10 = vc.u32 %v15909_v29, %v15912_v8  ;;  %v8695_v37 = vadd.s32 1, %v15913_v26 }
 0xab3   : > { %v8769_v30 = vor.u32 %v8768_v20, %v8767_v47  ;;  %vm8774_vm12 = vcmp.lt.s32.totalorder %v15876_v21, 2  ;;  %v8772_v63 = vor.u32 %v8771_v19, %v8770_v24  ;;  %vm8775_vm7 = vcmp.lt.s32.totalorder %v15876_v21, 3 }
 0xab4   : > { %vm8776_vm8 = vcmp.lt.s32.totalorder %v15876_v21, 4  ;;  %v8781_v50 = vsel %vm8773_vm9, %v8760_v4, %v8763_v33  ;;  %v8696_v1 = vsel %vm8694_vm10, %v8695_v37, %v15913_v26  ;;  %v8785_v54 = vsel %vm8773_vm9, %v8763_v33, %v8766_v6  ;;  %v15947_v26 = vpop.f32.mrb[40].mxu1 }
 0xab5   : > { %v8778_v31 = vsel %vm8776_vm8, %v8766_v6, 2102212464  ;;  %v8782_v11 = vsel %vm8776_vm8, %v8769_v30, 920167782  ;;  %v8697_v14 = vadd.s32 %v8696_v1, %v8692_v62  ;;  %v8777_v35 = vsel %vm8773_vm9, %v8757_v43, %v8760_v4 }
 0xab6   : > { %v8783_v42 = vsel %vm8775_vm7, %v8766_v6, %v8782_v11  ;;  %v8786_v46 = vsel %vm8776_vm8, %v8772_v63, 1326507024  ;;  %v8779_v36 = vsel %vm8775_vm7, %v8763_v33, %v8778_v31  ;;  %vm8856_vm1 = vcmp.gt.s32.totalorder %v15883_v7, 0 }
 0xab7   : > { %v8784_v51 = vsel %vm8774_vm12, %v8781_v50, %v8783_v42  ;;  %v8787_v23 = vsel %vm8775_vm7, %v8769_v30, %v8786_v46  ;;  %v8698_v12 = vadd.s32 536870912, %v8697_v14  ;;  %v8857_v48 = vsel %vm8856_vm1, %v15883_v7, 0 }
 0xab8   : > { %v8788_v27 = vsel %vm8774_vm12, %v8785_v54, %v8787_v23  ;;  %v15938_v5 = vmul.u32.u64.low %v15878_v60, %v8784_v51  ;;  %v15939_v28 = vmul.u32.u64.high %v15878_v60, %v8784_v51, %v15938_v5  ;;  %v8780_v33 = vsel %vm8774_vm12, %v8777_v35, %v8779_v36 }
 0xab9   : > { %v15943_v13 = vmul.u32.u64.low %v15878_v60, %v8788_v27  ;;  %v15944_v58 = vmul.u32.u64.high %v15878_v60, %v8788_v27, %v15943_v13  ;;  %v15949_v4 = vshrl.u32 %v8698_v12, 30  ;;  %v8859_v18 = vand.u32 31, %v8857_v48 }
 0xaba   : > { %v8799_v43 = vadd.s32 1, %v15939_v28  ;;  %v8796_v47 = vmul.u32 %v15878_v60, %v8780_v33  ;;  %v16861_v62 = vand.u32 2147483647, %v15865_v45  ;;  %v8952_v1 = vand.u32 2139095040, %v15867_v3 }
 0xabb   : > { %v8700_v0 = vshll.u32 %v15949_v4, 30  ;;  %vm8798_vm13 = vc.u32 %v15944_v58, %v15938_v5  ;;  %v8860_v20 = vsub.s32 32, %v8859_v18  ;;  %v8862_v11 = vshll.u32 %v16914_v10, %v8859_v18 }
 0xabc   : > { %v8800_v7 = vsel %vm8798_vm13, %v8799_v43, %v15939_v28  ;;  %v8852_v63 = vand.u32 8388607, %v16861_v62  ;;  %v8865_v54 = vshll.u32 %v16954_v57, %v8859_v18  ;;  %v8858_v42 = vshrl.u32 %v8857_v48, 5 }
 0xabd   : > { %v15958_v19 = vsub.s32 %v8697_v14, %v8700_v0  ;;  %v8801_v6 = vadd.s32 %v8800_v7, %v8796_v47  ;;  %v8863_v37 = vshrl.u32 %v16954_v57, %v8860_v20  ;;  %v8866_v30 = vshrl.u32 %v16955_v44, %v8860_v20  ;;  %v15982_v7 = vpop.f32.mrb[41].mxu1 }
 0xabe   : > { %v8872_v50 = vshrl.u32 %v16915_v53, %v8860_v20  ;;  %v8869_v14 = vshrl.u32 %v16956_v15, %v8860_v20  ;;  %v8871_v46 = vshll.u32 %v16956_v15, %v8859_v18  ;;  %v8875_v36 = vshrl.u32 %v16913_v25, %v8860_v20 }
 0xabf   : > { %v8703_v21 = vsub.s32 0, %v15958_v19  ;;  %v8802_v24 = vadd.s32 536870912, %v8801_v6  ;;  %v8864_v23 = vor.u32 %v8863_v37, %v8862_v11  ;;  %v8867_v12 = vor.u32 %v8866_v30, %v8865_v54  ;;  %v15989_v54 = vpop.f32.mrb[42].mxu1 }
 0xac0   : > { %v8868_v27 = vshll.u32 %v16955_v44, %v8859_v18  ;;  %v8873_v13 = vor.u32 %v8872_v50, %v8871_v46  ;;  %v8874_v33 = vshll.u32 %v16915_v53, %v8859_v18  ;;  %v8853_v43 = vor.u32 8388608, %v8852_v63  ;;  %v15993_v46 = vpop.f32.mrb[43].mxu1 }
 0xac1   : > { %v10409_v60 = vmin.u32 %v8703_v21, %v15958_v19  ;;  %v15970_v31 = vshrl.u32 %v8802_v24, 30  ;;  %vm8877_vm15 = vcmp.lt.s32.totalorder %v8858_v42, 1  ;;  %v8953_v21 = vshrl.u32 %v8952_v1, 23 }
 0xac2   : > { %v8870_v47 = vor.u32 %v8869_v14, %v8868_v27  ;;  %v8876_v48 = vor.u32 %v8875_v36, %v8874_v33  ;;  %vm8880_vm0 = vcmp.lt.s32.totalorder %v8858_v42, 4  ;;  %v8885_v30 = vsel %vm8877_vm15, %v8864_v23, %v8867_v12 }
 0xac3   : > { %v8705_v35 = vclz %v10409_v60  ;;  %v8804_v51 = vshll.u32 %v15970_v31, 30  ;;  %v8861_v50 = vshrl.u32 %v16914_v10, %v8860_v20  ;;  %vm8879_vm6 = vcmp.lt.s32.totalorder %v8858_v42, 3 }
 0xac4   : > { %v8886_v18 = vsel %vm8880_vm0, %v8873_v13, 920167782  ;;  %vm8878_vm4 = vcmp.lt.s32.totalorder %v8858_v42, 2  ;;  %v8882_v63 = vsel %vm8880_vm0, %v8870_v47, 2102212464  ;;  %v8889_v14 = vsel %vm8877_vm15, %v8867_v12, %v8870_v47 }
 0xac5   : > { %v10410_v28 = vadd.s32 4294967294, %v8705_v35  ;;  %v15980_v0 = vsub.s32 %v8801_v6, %v8804_v51  ;;  %v8887_v11 = vsel %vm8879_vm6, %v8870_v47, %v8886_v18  ;;  %v8890_v35 = vsel %vm8880_vm0, %v8876_v48, 1326507024  ;;  %v16003_v47 = vpop.f32.mrb[44].mxu1 }
 0xac6   : > { %v8888_v1 = vsel %vm8878_vm4, %v8885_v30, %v8887_v11  ;;  %v8881_v20 = vsel %vm8877_vm15, %v8861_v50, %v8864_v23  ;;  %v8893_v51 = vshll.u32 %v8853_v43, 8  ;;  %v10420_v27 = vadd.s32 4294967169, %v8953_v21  ;;  %v16008_v23 = vpop.f32.mrb[45].mxu1 }
 0xac7   : > { %vm10411_vm5 = vcmp.lt.s32.totalorder %v10410_v28, 0  ;;  %v8807_v37 = vsub.s32 0, %v15980_v0  ;;  %v8891_v18 = vsel %vm8879_vm6, %v8873_v13, %v8890_v35  ;;  %v8693_v43 = vadd.s32 %v15912_v8, %v15909_v29 }
 0xac8   : > { %v8708_v24 = vsel %vm10411_vm5, 0, %v10410_v28  ;;  %v8892_v16 = vsel %vm8878_vm4, %v8889_v14, %v8891_v18  ;;  %v15999_v30 = vmul.u32.u64.low %v8893_v51, %v8888_v1  ;;  %v16000_v11 = vmul.u32.u64.high %v8893_v51, %v8888_v1, %v15999_v30  ;;  %v16017_v14 = vpop.f32.mrb[46].mxu1 }
 0xac9   : > { %v8713_v60 = vsub.s32 4294967266, %v8708_v24  ;;  %v10413_v6 = vmin.u32 %v8807_v37, %v15980_v0  ;;  %v8709_v28 = vsub.s32 32, %v8708_v24  ;;  %v8883_v37 = vsel %vm8879_vm6, %v8867_v12, %v8882_v63  ;;  %17072 = vst [vmem:[#allocation41_spill] sm:$0xff] %v16017_v14  ;;  %v16022_v29 = vpop.f32.mrb[47].mxu1 }
 0xaca   : > { %v8884_v12 = vsel %vm8878_vm4, %v8881_v20, %v8883_v37  ;;  %v8959_v13 = vadd.s32 1, %v10420_v27  ;;  %v8723_v63 = vsub.s32 4, %v15949_v4  ;;  %v8903_v1 = vadd.s32 1, %v16000_v11  ;;  %17073 = vst [vmem:[#allocation33_spill] sm:$0xff] %v16022_v29 }
 0xacb   : > { %v8809_v36 = vclz %v10413_v6  ;;  %v8714_v33 = vadd.s32 127, %v8713_v60  ;;  %v16005_v48 = vmul.u32.u64.low %v8893_v51, %v8892_v16  ;;  %v16006_v6 = vmul.u32.u64.high %v8893_v51, %v8892_v16, %v16005_v48 }
 0xacc   : > { %v8711_v60 = vshrl.u32 %v8693_v43, %v8709_v28  ;;  %v8900_v35 = vmul.u32 %v8893_v51, %v8884_v12  ;;  %vm8960_vm2 = vcmp.gt.s32.totalorder %v8959_v13, 0  ;;  %v8710_v8 = vshll.u32 %v15958_v19, %v8708_v24  ;;  %v7066_v19 = vpop.permute.xlu1 %7065 }
 0xacd   : > { %v10414_v62 = vadd.s32 4294967294, %v8809_v36  ;;  %v8715_v50 = vshll.u32 %v8714_v33, 23  ;;  %vm8902_vm11 = vc.u32 %v16006_v6, %v15999_v30  ;;  %v8961_v42 = vsel %vm8960_vm2, %v8959_v13, 0  ;;  %v7061_v33 = vpop.permute.xlu0 %7060 }
 0xace   : > { %vm8639_vm9 = vcmp.lt.s32.totalorder %v15853_v39, 0  ;;  %v8963_v20 = vand.u32 31, %v8961_v42  ;;  %v8712_v27 = vor.u32 %v8711_v60, %v8710_v8  ;;  %v16863_v28 = vand.u32 2147483647, %v15867_v3 }
 0xacf   : > { %vm10415_vm14 = vcmp.lt.s32.totalorder %v10414_v62, 0  ;;  %v8724_v51 = vsel %vm8639_vm9, %v8723_v63, %v15949_v4  ;;  %v8716_v37 = vor.u32 4788187, %v8715_v50  ;;  %v16032_v24 = vadd.f32 %v15837_v49, %v7061_v33 }
 0xad0   : > { %v16013_v21 = vsel %vm10415_vm14, 0, %v10414_v62  ;;  %v8904_v62 = vsel %vm8902_vm11, %v8903_v1, %v16000_v11  ;;  %v8964_v43 = vsub.s32 32, %v8963_v20  ;;  %v16035_v11 = vadd.f32 %v15839_v17, %v7061_v33 }
 0xad1   : > { %v8817_v16 = vsub.s32 4294967266, %v16013_v21  ;;  %v8905_v36 = vadd.s32 %v8904_v62, %v8900_v35  ;;  %v16038_v12 = vadd.f32 %v15841_v41, %v7066_v19  ;;  %vm16042_vm10 = vcmp.le.f32.partialorder %v8637_v9, 0.7853982 }
 0xad2   : > { %v8813_v13 = vsub.s32 32, %v16013_v21  ;;  %v8719_v50 = vcvt.s32.f32 %v8712_v27  ;;  %v8726_v49 = vsel %vm16042_vm10, 0, %v8724_v51  ;;  %v8797_v17 = vadd.s32 %v15938_v5, %v15944_v58 }
 0xad3   : > { %v8818_v18 = vadd.s32 127, %v8817_v16  ;;  %v8906_v48 = vadd.s32 536870912, %v8905_v36  ;;  %v8956_v41 = vand.u32 8388607, %v16863_v28  ;;  %v8717_v63 = vand.u32 2147483647, %v8716_v37 }
 0xad4   : > { %v8967_v16 = vshrl.u32 %v16954_v57, %v8964_v43  ;;  %v8970_v35 = vshrl.u32 %v16955_v44, %v8964_v43  ;;  %v8973_v8 = vshrl.u32 %v16956_v15, %v8964_v43  ;;  %v8975_v62 = vshll.u32 %v16956_v15, %v8963_v20 }
 0xad5   : > { %v16047_v60 = vshrl.u32 %v8906_v48, 30  ;;  %v8819_v1 = vshll.u32 %v8818_v18, 23  ;;  %v8976_v27 = vshrl.u32 %v16915_v53, %v8964_v43  ;;  %v8815_v51 = vshrl.u32 %v8797_v17, %v8813_v13 }
 0xad6   : > { %v8962_v5 = vshrl.u32 %v8961_v42, 5  ;;  %v8966_v58 = vshll.u32 %v16914_v10, %v8963_v20  ;;  %v8969_v37 = vshll.u32 %v16954_v57, %v8963_v20  ;;  %v8972_v18 = vshll.u32 %v16955_v44, %v8963_v20 }
 0xad7   : > { %v8908_v9 = vshll.u32 %v16047_v60, 30  ;;  %v8977_v48 = vor.u32 %v8976_v27, %v8975_v62  ;;  %v8979_v28 = vshrl.u32 %v16913_v25, %v8964_v43  ;;  %v8814_v32 = vshll.u32 %v15980_v0, %v16013_v21 }
 0xad8   : > { %v8820_v59 = vor.u32 4788187, %v8819_v1  ;;  %v9056_v13 = vand.u32 2139095040, %v15870_v40  ;;  %v8971_v17 = vor.u32 %v8970_v35, %v8969_v37  ;;  %v8974_v42 = vor.u32 %v8973_v8, %v8972_v18 }
 0xad9   : > { %v16061_v33 = vsub.s32 %v8905_v36, %v8908_v9  ;;  %v8968_v36 = vor.u32 %v8967_v16, %v8966_v58  ;;  %v8978_v9 = vshll.u32 %v16915_v53, %v8963_v20  ;;  %v8720_v56 = vmul.f32 %v8719_v50, %v8717_v63 }
 0xada   : > { %v8816_v14 = vor.u32 %v8815_v51, %v8814_v32  ;;  %vm8984_vm12 = vcmp.lt.s32.totalorder %v8962_v5, 4  ;;  %v16074_v62 = vadd.f32 %v15843_v2, %v7066_v19  ;;  %v8730_v27 = vadd.s32 3, %v8726_v49 }
 0xadb   : > { %v8911_v29 = vsub.s32 0, %v16061_v33  ;;  %v8980_v0 = vor.u32 %v8979_v28, %v8978_v9  ;;  %v8990_v21 = vsel %vm8984_vm12, %v8977_v48, 920167782  ;;  %vm8981_vm7 = vcmp.lt.s32.totalorder %v8962_v5, 1 }
 0xadc   : > { %vm8983_vm8 = vcmp.lt.s32.totalorder %v8962_v5, 3  ;;  %v9057_v16 = vshrl.u32 %v9056_v13, 23  ;;  %vm8743_vm1 = vcmp.lt.s32.totalorder %v15857_v34, 0  ;;  %v8821_v35 = vand.u32 2147483647, %v8820_v59 }
 0xadd   : > { %v10417_v61 = vmin.u32 %v8911_v29, %v16061_v33  ;;  %v8957_v20 = vor.u32 8388608, %v8956_v41  ;;  %v8989_v32 = vsel %vm8981_vm7, %v8968_v36, %v8971_v17  ;;  %v8991_v29 = vsel %vm8983_vm8, %v8974_v42, %v8990_v21 }
 0xade   : > { %v8721_v50 = vxor.u32 2147483648, %v8720_v56  ;;  %v8823_v63 = vcvt.s32.f32 %v8816_v14  ;;  %v8965_v19 = vshrl.u32 %v16914_v10, %v8964_v43  ;;  %vm8982_vm13 = vcmp.lt.s32.totalorder %v8962_v5, 2 }
 0xadf   : > { %v8913_v1 = vclz %v10417_v61  ;;  %v8986_v28 = vsel %vm8984_vm12, %v8974_v42, 2102212464  ;;  %v8993_v61 = vsel %vm8981_vm7, %v8971_v17, %v8974_v42  ;;  %v8994_v49 = vsel %vm8984_vm12, %v8980_v0, 1326507024 }
 0xae0   : > { %v8992_v59 = vsel %vm8982_vm13, %v8989_v32, %v8991_v29  ;;  %v8995_v41 = vsel %vm8983_vm8, %v8977_v48, %v8994_v49  ;;  %v10424_v8 = vadd.s32 4294967169, %v9057_v16  ;;  %v17076_v51 = vand.u32 2147483647, %v15857_v34 }
 0xae1   : > { %v10418_v2 = vadd.s32 4294967294, %v8913_v1  ;;  %v8824_v43 = vmul.f32 %v8823_v63, %v8821_v35  ;;  %v8996_v37 = vsel %vm8982_vm13, %v8993_v61, %v8995_v41  ;;  %v8997_v18 = vshll.u32 %v8957_v20, 8 }
 0xae2   : > { %vm16088_vm15 = vcmp.le.f32.partialorder %v17076_v51, 0.7853982  ;;  %v8827_v13 = vsub.s32 4, %v15970_v31  ;;  %v8985_v9 = vsel %vm8981_vm7, %v8965_v19, %v8968_v36  ;;  %v8987_v0 = vsel %vm8983_vm8, %v8971_v17, %v8986_v28 }
 0xae3   : > { %vm10419_vm5 = vcmp.lt.s32.totalorder %v10418_v2, 0  ;;  %v16096_v48 = vmul.u32.u64.low %v8997_v18, %v8996_v37  ;;  %v16097_v21 = vmul.u32.u64.high %v8997_v18, %v8996_v37, %v16096_v48  ;;  %v8722_v35 = vsel %vm8639_vm9, %v8721_v50, %v8720_v56 }
 0xae4   : > { %v8916_v58 = vsel %vm10419_vm5, 0, %v10418_v2  ;;  %v16099_v1 = vmul.u32.u64.low %v8997_v18, %v8992_v59  ;;  %v16100_v16 = vmul.u32.u64.high %v8997_v18, %v8992_v59, %v16099_v1  ;;  %v9063_v20 = vadd.s32 1, %v10424_v8 }
 0xae5   : > { %v8921_v42 = vsub.s32 4294967266, %v8916_v58  ;;  %v8917_v32 = vsub.s32 32, %v8916_v58  ;;  %v8825_v63 = vxor.u32 2147483648, %v8824_v43  ;;  %vm8847_vm0 = vcmp.lt.s32.totalorder %v15865_v45, 0 }
 0xae6   : > { %v8988_v36 = vsel %vm8982_vm13, %v8985_v9, %v8987_v0  ;;  %v16866_v17 = vand.u32 2147483647, %v15870_v40  ;;  %v8828_v2 = vsel %vm8743_vm1, %v8827_v13, %v15970_v31  ;;  %v8901_v19 = vadd.s32 %v15999_v30, %v16006_v6 }
 0xae7   : > { %v8922_v29 = vadd.s32 127, %v8921_v42  ;;  %vm9064_vm6 = vcmp.gt.s32.totalorder %v9063_v20, 0  ;;  %v8725_v56 = vsel %vm16042_vm10, %v15853_v39, %v8722_v35  ;;  %v8931_v50 = vsub.s32 4, %v16047_v60 }
 0xae8   : > { %vm9006_vm4 = vc.u32 %v16097_v21, %v16099_v1  ;;  %v9007_v5 = vadd.s32 1, %v16100_v16  ;;  %v16120_v61 = vand.u32 3, %v8730_v27  ;;  %v8919_v49 = vshrl.u32 %v8901_v19, %v8917_v32 }
 0xae9   : > { %v8923_v28 = vshll.u32 %v8922_v29, 23  ;;  %v9004_v31 = vmul.u32 %v8997_v18, %v8988_v36  ;;  %v9065_v59 = vsel %vm9064_vm6, %v9063_v20, 0  ;;  %v8826_v30 = vsel %vm8743_vm1, %v8825_v63, %v8824_v43 }
 0xaea   : > { %v17079_v6 = vand.u32 2147483647, %v15865_v45  ;;  %v9008_v8 = vsel %vm9006_vm4, %v9007_v5, %v16100_v16  ;;  %v9067_v51 = vand.u32 31, %v9065_v59  ;;  %11494 = vcosq.f32 %v8725_v56 }
 0xaeb   : > { %v8924_v41 = vor.u32 4788187, %v8923_v28  ;;  %v8830_v27 = vsel %vm16088_vm15, 0, %v8828_v2  ;;  %v8918_v37 = vshll.u32 %v16061_v33, %v8916_v58  ;;  %v9009_v18 = vadd.s32 %v9008_v8, %v9004_v31 }
 0xaec   : > { %vm16126_vm14 = vcmp.le.f32.partialorder %v17079_v6, 0.7853982  ;;  %11496 = vsinq.f32 %v8725_v56  ;;  %v16137_v43 = vsel %vm8847_vm0, %v8931_v50, %v16047_v60  ;;  %v9060_v13 = vand.u32 8388607, %v16866_v17 }
 0xaed   : > { %v9068_v42 = vsub.s32 32, %v9067_v51  ;;  %v8829_v9 = vsel %vm16088_vm15, %v15857_v34, %v8826_v30  ;;  %v8920_v0 = vor.u32 %v8919_v49, %v8918_v37  ;;  %v9010_v48 = vadd.s32 536870912, %v9009_v18 }
 0xaee   : > { %v16144_v16 = vshrl.u32 %v9065_v59, 5  ;;  %v8925_v33 = vand.u32 2147483647, %v8924_v41  ;;  %v9070_v29 = vshll.u32 %v16914_v10, %v9067_v51  ;;  %v9073_v20 = vshll.u32 %v16954_v57, %v9067_v51 }
 0xaef   : > { %v9071_v58 = vshrl.u32 %v16954_v57, %v9068_v42  ;;  %v9074_v35 = vshrl.u32 %v16955_v44, %v9068_v42  ;;  %v9077_v60 = vshrl.u32 %v16956_v15, %v9068_v42  ;;  %v16149_v32 = vshrl.u32 %v9010_v48, 30 }
 0xaf0   : > { %v9080_v14 = vshrl.u32 %v16915_v53, %v9068_v42  ;;  %v9076_v63 = vshll.u32 %v16955_v44, %v9067_v51  ;;  %v9079_v36 = vshll.u32 %v16956_v15, %v9067_v51  ;;  %v9082_v2 = vshll.u32 %v16915_v53, %v9067_v51 }
 0xaf1   : > { %v9083_v19 = vshrl.u32 %v16913_v25, %v9068_v42  ;;  %11498 = vcosq.f32 %v8829_v9  ;;  %v9012_v28 = vshll.u32 %v16149_v32, 30  ;;  %v9072_v56 = vor.u32 %v9071_v58, %v9070_v29 }
 0xaf2   : > { %v9075_v50 = vor.u32 %v9074_v35, %v9073_v20  ;;  %v8927_v5 = vcvt.s32.f32 %v8920_v0  ;;  %v9078_v49 = vor.u32 %v9077_v60, %v9076_v63  ;;  %v9081_v31 = vor.u32 %v9080_v14, %v9079_v36 }
 0xaf3   : > { %v9084_v59 = vor.u32 %v9083_v19, %v9082_v2  ;;  %11500 = vsinq.f32 %v8829_v9  ;;  %v8834_v30 = vadd.s32 3, %v8830_v27  ;;  %v8934_v6 = vsel %vm16126_vm14, 0, %v16137_v43 }
 0xaf4   : > { %v16162_v41 = vsub.s32 %v9009_v18, %v9012_v28  ;;  %v8928_v8 = vmul.f32 %v8927_v5, %v8925_v33  ;;  %v9061_v51 = vor.u32 8388608, %v9060_v13  ;;  %vm9085_vm11 = vcmp.lt.s32.totalorder %v16144_v16, 1  ;;  %v11495_v48 = vpop.eup %11494 }
 0xaf5   : > { %v9160_v37 = vand.u32 2139095040, %v15872_v55  ;;  %vm9087_vm2 = vcmp.lt.s32.totalorder %v16144_v16, 3  ;;  %vm9088_vm9 = vcmp.lt.s32.totalorder %v16144_v16, 4  ;;  %v9093_v27 = vsel %vm9085_vm11, %v9072_v56, %v9075_v50 }
 0xaf6   : > { %v9015_v0 = vsub.s32 0, %v16162_v41  ;;  %v11497_v9 = vpop.eup %11496  ;;  %v9069_v18 = vshrl.u32 %v16914_v10, %v9068_v42  ;;  %v9090_v43 = vsel %vm9088_vm9, %v9078_v49, 2102212464  ;;  %v9094_v33 = vsel %vm9088_vm9, %v9081_v31, 920167782 }
 0xaf7   : > { %v9098_v13 = vsel %vm9088_vm9, %v9084_v59, 1326507024  ;;  %vm9086_vm10 = vcmp.lt.s32.totalorder %v16144_v16, 2  ;;  %v9095_v35 = vsel %vm9087_vm2, %v9078_v49, %v9094_v33  ;;  %v9097_v60 = vsel %vm9085_vm11, %v9075_v50, %v9078_v49 }
 0xaf8   : > { %v10421_v58 = vmin.u32 %v9015_v0, %v16162_v41  ;;  %v9096_v29 = vsel %vm9086_vm10, %v9093_v27, %v9095_v35  ;;  %v9099_v20 = vsel %vm9087_vm2, %v9081_v31, %v9098_v13  ;;  %v9101_v42 = vshll.u32 %v9061_v51, 8  ;;  %v16194_v31 = vpop.permute.xlu0 %7070 }
 0xaf9   : > { %v9161_v14 = vshrl.u32 %v9160_v37, 23  ;;  %v8737_v63 = vxor.u32 2147483648, %v11495_v48  ;;  %v9089_v2 = vsel %vm9085_vm11, %v9069_v18, %v9072_v56  ;;  %v9091_v19 = vsel %vm9087_vm2, %v9075_v50, %v9090_v43  ;;  %17082 = vst [vmem:[#allocation42_spill] sm:$0xff] %v16194_v31 }
 0xafa   : > { %v9017_v36 = vclz %v10421_v58  ;;  %v9100_v28 = vsel %vm9086_vm10, %v9097_v60, %v9099_v20  ;;  %v16188_v5 = vmul.u32.u64.low %v9101_v42, %v9096_v29  ;;  %v16189_v49 = vmul.u32.u64.high %v9101_v42, %v9096_v29, %v16188_v5 }
 0xafb   : > { %v10428_v59 = vadd.s32 4294967169, %v9161_v14  ;;  %v16192_v0 = vpop.eup %11498  ;;  %v8929_v51 = vxor.u32 2147483648, %v8928_v8  ;;  %v16196_v27 = vmul.u32.u64.low %v9101_v42, %v9100_v28  ;;  %v16197_v33 = vmul.u32.u64.high %v9101_v42, %v9100_v28, %v16196_v27 }
 0xafc   : > { %v10422_v37 = vadd.s32 4294967294, %v9017_v36  ;;  %v16201_v56 = vadd.f32 %v15845_v22, %v16194_v31  ;;  %vm8732_vm12 = vcmp.lt.s32.totalorder %v16120_v61, 2  ;;  %v8734_v50 = vxor.u32 2147483648, %v11497_v9 }
 0xafd   : > { %v9167_v18 = vadd.s32 1, %v10428_v59  ;;  %v16204_v43 = vpop.eup %11500  ;;  %vm8736_vm7 = vcmp.eq.s32.totalorder %v16120_v61, 2  ;;  %v16207_v13 = vand.u32 3, %v8834_v30  ;;  %v9092_v58 = vsel %vm9086_vm10, %v9089_v2, %v9091_v19 }
 0xafe   : > { %17083 = vst [vmem:[#allocation45_spill] sm:$0xff] %v16201_v56  ;;  %vm10423_vm8 = vcmp.lt.s32.totalorder %v10422_v37, 0  ;;  %v8938_v35 = vadd.s32 3, %v8934_v6  ;;  %v9111_v29 = vadd.s32 1, %v16189_v49  ;;  %vm8733_vm13 = vcmp.eq.s32.totalorder %v16120_v61, 0 }
 0xaff   : > { %v9020_v60 = vsel %vm10423_vm8, 0, %v10422_v37  ;;  %vm9168_vm1 = vcmp.gt.s32.totalorder %v9167_v18, 0  ;;  %v8738_v22 = vsel %vm8736_vm7, %v8737_v63, %v11497_v9  ;;  %v8930_v20 = vsel %vm8847_vm0, %v8929_v51, %v8928_v8 }
 0xb00   : > { %v9025_v14 = vsub.s32 4294967266, %v9020_v60  ;;  %v8735_v36 = vsel %vm8733_vm13, %v11495_v48, %v8734_v50  ;;  %v9108_v28 = vmul.u32 %v9101_v42, %v9092_v58  ;;  %vm9110_vm5 = vc.u32 %v16197_v33, %v16188_v5 }
 0xb01   : > { %v9169_v30 = vsel %vm9168_vm1, %v9167_v18, 0  ;;  %v9021_v16 = vsub.s32 32, %v9020_v60  ;;  %v9112_v6 = vsel %vm9110_vm5, %v9111_v29, %v16189_v49  ;;  %v16865_v19 = vand.u32 2147483647, %v15872_v55 }
 0xb02   : > { %v9026_v2 = vadd.s32 127, %v9025_v14  ;;  %vm8837_vm15 = vcmp.eq.s32.totalorder %v16207_v13, 0  ;;  %vm8840_vm6 = vcmp.eq.s32.totalorder %v16207_v13, 2  ;;  %v8933_v8 = vsel %vm16126_vm14, %v15865_v45, %v8930_v20 }
 0xb03   : > { %v16224_v48 = vand.u32 3, %v8938_v35  ;;  %v9113_v9 = vadd.s32 %v9112_v6, %v9108_v28  ;;  %v9171_v42 = vand.u32 31, %v9169_v30  ;;  %v16228_v63 = vsel %vm8732_vm12, %v8735_v36, %v8738_v22 }
 0xb04   : > { %v8838_v49 = vxor.u32 2147483648, %v16204_v43  ;;  %v8841_v59 = vxor.u32 2147483648, %v16192_v0  ;;  %vm8951_vm0 = vcmp.lt.s32.totalorder %v15867_v3, 0  ;;  %v9005_v51 = vadd.s32 %v16099_v1, %v16097_v21 }
 0xb05   : > { %v9027_v37 = vshll.u32 %v9026_v2, 23  ;;  %v9035_v4 = vsub.s32 4, %v16149_v32  ;;  %v9114_v27 = vadd.s32 536870912, %v9113_v9  ;;  %v9172_v50 = vsub.s32 32, %v9171_v42 }
 0xb06   : > { %11502 = vcosq.f32 %v8933_v8  ;;  %v9022_v18 = vshll.u32 %v16162_v41, %v9020_v60  ;;  %v9023_v61 = vshrl.u32 %v9005_v51, %v9021_v16  ;;  %v9164_v58 = vand.u32 8388607, %v16865_v19 }
 0xb07   : > { %v16239_v35 = vshrl.u32 %v9114_v27, 30  ;;  %v16241_v29 = vshrl.u32 %v9169_v30, 5  ;;  %v9175_v22 = vshrl.u32 %v16954_v57, %v9172_v50  ;;  %v9178_v21 = vshrl.u32 %v16955_v44, %v9172_v50 }
 0xb08   : > { %v9174_v1 = vshll.u32 %v16914_v10, %v9171_v42  ;;  %v9181_v20 = vshrl.u32 %v16956_v15, %v9172_v50  ;;  %v9183_v14 = vshll.u32 %v16956_v15, %v9171_v42  ;;  %v9184_v41 = vshrl.u32 %v16915_v53, %v9172_v50 }
 0xb09   : > { %v9028_v60 = vor.u32 4788187, %v9027_v37  ;;  %v9116_v36 = vshll.u32 %v16239_v35, 30  ;;  %v9177_v28 = vshll.u32 %v16954_v57, %v9171_v42  ;;  %v9180_v30 = vshll.u32 %v16955_v44, %v9171_v42 }
 0xb0a   : > { %11504 = vsinq.f32 %v8933_v8  ;;  %v9024_v16 = vor.u32 %v9023_v61, %v9022_v18  ;;  %v9185_v2 = vor.u32 %v9184_v41, %v9183_v14  ;;  %v9187_v6 = vshrl.u32 %v16913_v25, %v9172_v50 }
 0xb0b   : > { %v17084_v51 = vand.u32 2147483647, %v15867_v3  ;;  %v16259_v19 = vsub.s32 %v9113_v9, %v9116_v36  ;;  %v9176_v37 = vor.u32 %v9175_v22, %v9174_v1  ;;  %v9179_v17 = vor.u32 %v9178_v21, %v9177_v28 }
 0xb0c   : > { %v9182_v56 = vor.u32 %v9181_v20, %v9180_v30  ;;  %v16264_v31 = vsel %vm8837_vm15, %v16192_v0, %v8838_v49  ;;  %v16269_v8 = vsel %vm8840_vm6, %v8841_v59, %v16204_v43  ;;  %v9165_v18 = vor.u32 8388608, %v9164_v58 }
 0xb0d   : > { %vm16255_vm4 = vcmp.le.f32.partialorder %v17084_v51, 0.7853982  ;;  %v9186_v61 = vshll.u32 %v16915_v53, %v9171_v42  ;;  %v9029_v14 = vand.u32 2147483647, %v9028_v60  ;;  %v16275_v9 = vsel %vm8951_vm0, %v9035_v4, %v16149_v32 }
 0xb0e   : > { %v9119_v22 = vsub.s32 0, %v16259_v19  ;;  %vm9192_vm14 = vcmp.lt.s32.totalorder %v16241_v29, 4  ;;  %v9031_v0 = vcvt.s32.f32 %v9024_v16  ;;  %vm9189_vm11 = vcmp.lt.s32.totalorder %v16241_v29, 1 }
 0xb0f   : > { %v9188_v49 = vor.u32 %v9187_v6, %v9186_v61  ;;  %v9198_v43 = vsel %vm9192_vm14, %v9185_v2, 920167782  ;;  %vm9191_vm2 = vcmp.lt.s32.totalorder %v16241_v29, 3  ;;  %v9194_v42 = vsel %vm9192_vm14, %v9182_v56, 2102212464 }
 0xb10   : > { %v10425_v59 = vmin.u32 %v9119_v22, %v16259_v19  ;;  %v9197_v32 = vsel %vm9189_vm11, %v9176_v37, %v9179_v17  ;;  %v16288_v4 = vpop.eup %11502  ;;  %v9173_v58 = vshrl.u32 %v16914_v10, %v9172_v50  ;;  %v9199_v21 = vsel %vm9191_vm2, %v9182_v56, %v9198_v43 }
 0xb11   : > { %v9205_v1 = vshll.u32 %v9165_v18, 8  ;;  %v9264_v20 = vand.u32 2139095040, %v15880_v38  ;;  %v9032_v41 = vmul.f32 %v9031_v0, %v9029_v14  ;;  %vm9055_vm9 = vcmp.lt.s32.totalorder %v15870_v40, 0 }
 0xb12   : > { %v9121_v60 = vclz %v10425_v59  ;;  %vm9190_vm10 = vcmp.lt.s32.totalorder %v16241_v29, 2  ;;  %v9201_v36 = vsel %vm9189_vm11, %v9179_v17, %v9182_v56  ;;  %v9193_v28 = vsel %vm9189_vm11, %v9173_v58, %v9176_v37 }
 0xb13   : > { %v9195_v50 = vsel %vm9191_vm2, %v9179_v17, %v9194_v42  ;;  %v9200_v30 = vsel %vm9190_vm10, %v9197_v32, %v9199_v21  ;;  %v9202_v16 = vsel %vm9192_vm14, %v9188_v49, 1326507024  ;;  %vm8729_vm12 = vweird.f32 %v15853_v39 }
 0xb14   : > { %vm8836_vm7 = vcmp.lt.s32.totalorder %v16207_v13, 2  ;;  %v10426_v6 = vadd.s32 4294967294, %v9121_v60  ;;  %v9203_v56 = vsel %vm9191_vm2, %v9185_v2, %v9202_v16  ;;  %v11505_v37 = vpop.eup %11504  ;;  %vm8941_vm8 = vcmp.eq.s32.totalorder %v16224_v48, 0 }
 0xb15   : > { %v16310_v51 = vmul.u32.u64.low %v9205_v1, %v9200_v30  ;;  %v16311_v18 = vmul.u32.u64.high %v9205_v1, %v9200_v30, %v16310_v51  ;;  %vm8944_vm1 = vcmp.eq.s32.totalorder %v16224_v48, 2  ;;  %v9038_v17 = vsel %vm16255_vm4, 0, %v16275_v9 }
 0xb16   : > { %v9204_v61 = vsel %vm9190_vm10, %v9201_v36, %v9203_v56  ;;  %v9261_v14 = vand.u32 2147483647, %v15880_v38  ;;  %v9265_v22 = vshrl.u32 %v9264_v20, 23  ;;  %v17087_v2 = vand.u32 2147483647, %v15870_v40 }
 0xb17   : > { %vm10427_vm5 = vcmp.lt.s32.totalorder %v10426_v6, 0  ;;  %v9196_v49 = vsel %vm9190_vm10, %v9193_v28, %v9195_v50  ;;  %v16330_v43 = vmul.u32.u64.low %v9205_v1, %v9204_v61  ;;  %v16331_v59 = vmul.u32.u64.high %v9205_v1, %v9204_v61, %v16330_v43 }
 0xb18   : > { %vm16324_vm13 = vcmp.le.f32.partialorder %v17087_v2, 0.7853982  ;;  %v9033_v9 = vxor.u32 2147483648, %v9032_v41  ;;  %v9124_v42 = vsel %vm10427_vm5, 0, %v10426_v6  ;;  %v9139_v32 = vsub.s32 4, %v16239_v35 }
 0xb19   : > { %v10432_v58 = vadd.s32 4294967169, %v9265_v22  ;;  %vm8833_vm15 = vweird.f32 %v15857_v34  ;;  %vm8940_vm6 = vcmp.lt.s32.totalorder %v16224_v48, 2  ;;  %v9109_v21 = vadd.s32 %v16188_v5, %v16197_v33 }
 0xb1a   : > { %v9125_v20 = vsub.s32 32, %v9124_v42  ;;  %v9129_v60 = vsub.s32 4294967266, %v9124_v42  ;;  %v9215_v29 = vadd.s32 1, %v16311_v18  ;;  %v8942_v36 = vxor.u32 2147483648, %v11505_v37 }
 0xb1b   : > { %v8945_v28 = vxor.u32 2147483648, %v16288_v4  ;;  %v9212_v50 = vmul.u32 %v9205_v1, %v9196_v49  ;;  %v9271_v30 = vadd.s32 1, %v10432_v58  ;;  %v9126_v16 = vshll.u32 %v16259_v19, %v9124_v42 }
 0xb1c   : > { %v9127_v6 = vshrl.u32 %v9109_v21, %v9125_v20  ;;  %v9130_v56 = vadd.s32 127, %v9129_v60  ;;  %vm9214_vm14 = vc.u32 %v16331_v59, %v16310_v51  ;;  %v9034_v61 = vsel %vm8951_vm0, %v9033_v9, %v9032_v41 }
 0xb1d   : > { %v9140_v5 = vsel %vm9055_vm9, %v9139_v32, %v16239_v35  ;;  %v9216_v33 = vsel %vm9214_vm14, %v9215_v29, %v16311_v18  ;;  %vm9272_vm11 = vcmp.gt.s32.totalorder %v9271_v30, 0  ;;  %v9368_v19 = vand.u32 2139095040, %v15885_v52 }
 0xb1e   : > { %v9128_v22 = vor.u32 %v9127_v6, %v9126_v16  ;;  %v9131_v1 = vshll.u32 %v9130_v56, 23  ;;  %v9217_v2 = vadd.s32 %v9216_v33, %v9212_v50  ;;  %v16353_v49 = vsel %vm8729_vm12, nan, %v16228_v63 }
 0xb1f   : > { %v8843_v41 = vsel %vm8836_vm7, %v16264_v31, %v16269_v8  ;;  %v9042_v43 = vadd.s32 3, %v9038_v17  ;;  %v9273_v35 = vsel %vm9272_vm11, %v9271_v30, 0  ;;  %v8943_v18 = vsel %vm8941_vm8, %v16288_v4, %v8942_v36 }
 0xb20   : > { %v8946_v9 = vsel %vm8944_vm1, %v8945_v28, %v11505_v37  ;;  %v9132_v42 = vor.u32 4788187, %v9131_v1  ;;  %v9218_v32 = vadd.s32 536870912, %v9217_v2  ;;  %v9037_v39 = vsel %vm16255_vm4, %v15867_v3, %v9034_v61 }
 0xb21   : > { %v9142_v63 = vsel %vm16324_vm13, 0, %v9140_v5  ;;  %v9268_v31 = vand.u32 8388607, %v9261_v14  ;;  %v9275_v13 = vand.u32 31, %v9273_v35  ;;  %v9135_v17 = vcvt.s32.f32 %v9128_v22 }
 0xb22   : > { %v9133_v8 = vand.u32 2147483647, %v9132_v42  ;;  %v16371_v58 = vshrl.u32 %v9218_v32, 30  ;;  %v9369_v4 = vshrl.u32 %v9368_v19, 23  ;;  %v16375_v37 = vsel %vm8833_vm15, nan, %v8843_v41 }
 0xb23   : > { %v16379_v27 = vsel %vm8940_vm6, %v8943_v18, %v8946_v9  ;;  %v16381_v21 = vand.u32 3, %v9042_v43  ;;  %v9276_v20 = vsub.s32 32, %v9275_v13  ;;  %11506 = vcosq.f32 %v9037_v39 }
 0xb24   : > { %v9136_v60 = vmul.f32 %v9135_v17, %v9133_v8  ;;  %v16383_v29 = vadd.s32 3, %v9142_v63  ;;  %v9220_v36 = vshll.u32 %v16371_v58, 30  ;;  %11508 = vsinq.f32 %v9037_v39 }
 0xb25   : > { %v9279_v28 = vshrl.u32 %v16954_v57, %v9276_v20  ;;  %v9282_v34 = vshrl.u32 %v16955_v44, %v9276_v20  ;;  %v9285_v50 = vshrl.u32 %v16956_v15, %v9276_v20  ;;  %v9269_v48 = vor.u32 8388608, %v9268_v31 }
 0xb26   : > { %v16389_v30 = vsub.s32 %v9217_v2, %v9220_v36  ;;  %v9278_v16 = vshll.u32 %v16914_v10, %v9275_v13  ;;  %v10436_v6 = vadd.s32 4294967169, %v9369_v4  ;;  %v9137_v56 = vxor.u32 2147483648, %v9136_v60 }
 0xb27   : > { %v9274_v61 = vshrl.u32 %v9273_v35, 5  ;;  %v9281_v5 = vshll.u32 %v16954_v57, %v9275_v13  ;;  %v9284_v33 = vshll.u32 %v16955_v44, %v9275_v13  ;;  %v9287_v19 = vshll.u32 %v16956_v15, %v9275_v13 }
 0xb28   : > { %v9223_v22 = vsub.s32 0, %v16389_v30  ;;  %v9280_v1 = vor.u32 %v9279_v28, %v9278_v16  ;;  %v9288_v41 = vshrl.u32 %v16915_v53, %v9276_v20  ;;  %v9290_v18 = vshll.u32 %v16915_v53, %v9275_v13 }
 0xb29   : > { %v9283_v43 = vor.u32 %v9282_v34, %v9281_v5  ;;  %v9286_v2 = vor.u32 %v9285_v50, %v9284_v33  ;;  %v9291_v9 = vshrl.u32 %v16913_v25, %v9276_v20  ;;  %v9365_v32 = vand.u32 2147483647, %v15885_v52 }
 0xb2a   : > { %v10429_v42 = vmin.u32 %v9223_v22, %v16389_v30  ;;  %v9289_v35 = vor.u32 %v9288_v41, %v9287_v19  ;;  %v9375_v39 = vadd.s32 1, %v10436_v6  ;;  %v9213_v63 = vadd.s32 %v16310_v51, %v16331_v59 }
 0xb2b   : > { %v9277_v31 = vshrl.u32 %v16914_v10, %v9276_v20  ;;  %v9292_v8 = vor.u32 %v9291_v9, %v9290_v18  ;;  %v9309_v17 = vshll.u32 %v9269_v48, 8  ;;  %vm8937_vm0 = vweird.f32 %v15865_v45 }
 0xb2c   : > { %v9138_v13 = vsel %vm9055_vm9, %v9137_v56, %v9136_v60  ;;  %v9225_v4 = vclz %v10429_v42  ;;  %vm9293_vm4 = vcmp.lt.s32.totalorder %v9274_v61, 1  ;;  %vm9294_vm2 = vcmp.lt.s32.totalorder %v9274_v61, 2 }
 0xb2d   : > { %vm9295_vm10 = vcmp.lt.s32.totalorder %v9274_v61, 3  ;;  %vm9296_vm12 = vcmp.lt.s32.totalorder %v9274_v61, 4  ;;  %v9301_v36 = vsel %vm9293_vm4, %v9280_v1, %v9283_v43  ;;  %v9305_v28 = vsel %vm9293_vm4, %v9283_v43, %v9286_v2  ;;  %v16407_v34 = vpop.eup %11506 }
 0xb2e   : > { %v10430_v50 = vadd.s32 4294967294, %v9225_v4  ;;  %v9298_v51 = vsel %vm9296_vm12, %v9286_v2, 2102212464  ;;  %v9302_v59 = vsel %vm9296_vm12, %v9289_v35, 920167782  ;;  %vm9376_vm7 = vcmp.gt.s32.totalorder %v9375_v39, 0  ;;  %v16409_v20 = vpop.eup %11508 }
 0xb2f   : > { %vm9159_vm8 = vcmp.lt.s32.totalorder %v15872_v55, 0  ;;  %v9297_v48 = vsel %vm9293_vm4, %v9277_v31, %v9280_v1  ;;  %v9299_v60 = vsel %vm9295_vm10, %v9283_v43, %v9298_v51  ;;  %v9303_v16 = vsel %vm9295_vm10, %v9286_v2, %v9302_v59 }
 0xb30   : > { %v9306_v6 = vsel %vm9296_vm12, %v9292_v8, 1326507024  ;;  %vm10431_vm9 = vcmp.lt.s32.totalorder %v10430_v50, 0  ;;  %v9304_v56 = vsel %vm9294_vm2, %v9301_v36, %v9303_v16  ;;  %v9377_v33 = vsel %vm9376_vm7, %v9375_v39, 0 }
 0xb31   : > { %v9307_v5 = vsel %vm9295_vm10, %v9289_v35, %v9306_v6  ;;  %v9228_v22 = vsel %vm10431_vm9, 0, %v10430_v50  ;;  %v16417_v41 = vmul.u32.u64.low %v9309_v17, %v9304_v56  ;;  %v16418_v18 = vmul.u32.u64.high %v9309_v17, %v9304_v56, %v16417_v41 }
 0xb32   : > { %v9308_v19 = vsel %vm9294_vm2, %v9305_v28, %v9307_v5  ;;  %v9229_v9 = vsub.s32 32, %v9228_v22  ;;  %v9233_v1 = vsub.s32 4294967266, %v9228_v22  ;;  %v9243_v43 = vsub.s32 4, %v16371_v58 }
 0xb33   : > { %v9372_v2 = vand.u32 8388607, %v9365_v32  ;;  %v9141_v42 = vsel %vm16324_vm13, %v15870_v40, %v9138_v13  ;;  %v16427_v35 = vmul.u32.u64.low %v9309_v17, %v9308_v19  ;;  %v16428_v39 = vmul.u32.u64.high %v9309_v17, %v9308_v19, %v16427_v35 }
 0xb34   : > { %v9379_v31 = vand.u32 31, %v9377_v33  ;;  %vm9048_vm1 = vcmp.eq.s32.totalorder %v16381_v21, 2  ;;  %v17090_v8 = vand.u32 2147483647, %v15872_v55  ;;  %v9230_v36 = vshll.u32 %v16389_v30, %v9228_v22 }
 0xb35   : > { %v9231_v28 = vshrl.u32 %v9213_v63, %v9229_v9  ;;  %v9234_v50 = vadd.s32 127, %v9233_v1  ;;  %v9300_v51 = vsel %vm9294_vm2, %v9297_v48, %v9299_v60  ;;  %v16442_v0 = vsel %vm8937_vm0, nan, %v16379_v27 }
 0xb36   : > { %vm16433_vm5 = vcmp.le.f32.partialorder %v17090_v8, 0.7853982  ;;  %v16445_v13 = vand.u32 3, %v16383_v29  ;;  %v9319_v59 = vadd.s32 1, %v16418_v18  ;;  %v16448_v16 = vsub.s32 32, %v9379_v31 }
 0xb37   : > { %v9046_v6 = vxor.u32 2147483648, %v16409_v20  ;;  %v9049_v30 = vxor.u32 2147483648, %v16407_v34  ;;  %v9232_v63 = vor.u32 %v9231_v28, %v9230_v36  ;;  %v9235_v56 = vshll.u32 %v9234_v50, 23 }
 0xb38   : > { %11510 = vcosq.f32 %v9141_v42  ;;  %v9316_v61 = vmul.u32 %v9309_v17, %v9300_v51  ;;  %vm9318_vm13 = vc.u32 %v16428_v39, %v16417_v41  ;;  %v9373_v45 = vor.u32 8388608, %v9372_v2 }
 0xb39   : > { %11512 = vsinq.f32 %v9141_v42  ;;  %v9236_v27 = vor.u32 4788187, %v9235_v56  ;;  %v9244_v29 = vsel %vm9159_vm8, %v9243_v43, %v16371_v58  ;;  %v9320_v48 = vsel %vm9318_vm13, %v9319_v59, %v16418_v18 }
 0xb3a   : > { %v9321_v60 = vadd.s32 %v9320_v48, %v9316_v61  ;;  %v9382_v5 = vshll.u32 %v16914_v10, %v9379_v31  ;;  %v9383_v22 = vshrl.u32 %v16954_v57, %v16448_v16  ;;  %v9386_v17 = vshrl.u32 %v16955_v44, %v16448_v16 }
 0xb3b   : > { %v9237_v19 = vand.u32 2147483647, %v9236_v27  ;;  %v9239_v9 = vcvt.s32.f32 %v9232_v63  ;;  %v9385_v1 = vshll.u32 %v16954_v57, %v9379_v31  ;;  %v9389_v2 = vshrl.u32 %v16956_v15, %v16448_v16 }
 0xb3c   : > { %v9322_v42 = vadd.s32 536870912, %v9321_v60  ;;  %v16466_v58 = vshrl.u32 %v9377_v33, 5  ;;  %v9384_v18 = vor.u32 %v9383_v22, %v9382_v5  ;;  %v9388_v43 = vshll.u32 %v16955_v44, %v9379_v31 }
 0xb3d   : > { %v9240_v35 = vmul.f32 %v9239_v9, %v9237_v19  ;;  %v9387_v8 = vor.u32 %v9386_v17, %v9385_v1  ;;  %v9391_v36 = vshll.u32 %v16956_v15, %v9379_v31  ;;  %v9392_v28 = vshrl.u32 %v16915_v53, %v16448_v16 }
 0xb3e   : > { %v16475_v57 = vsel %vm9048_vm1, %v9049_v30, %v16409_v20  ;;  %v9246_v50 = vsel %vm16433_vm5, 0, %v9244_v29  ;;  %v16479_v33 = vshrl.u32 %v9322_v42, 30  ;;  %v9395_v44 = vshrl.u32 %v16913_v25, %v16448_v16 }
 0xb3f   : > { %v9241_v51 = vxor.u32 2147483648, %v9240_v35  ;;  %v9390_v59 = vor.u32 %v9389_v2, %v9388_v43  ;;  %v9393_v63 = vor.u32 %v9392_v28, %v9391_v36  ;;  %v9394_v15 = vshll.u32 %v16915_v53, %v9379_v31 }
 0xb40   : > { %vm9045_vm15 = vcmp.eq.s32.totalorder %v16381_v21, 0  ;;  %v9324_v56 = vshll.u32 %v16479_v33, 30  ;;  %vm9397_vm6 = vcmp.lt.s32.totalorder %v16466_v58, 1  ;;  %vm9400_vm14 = vcmp.lt.s32.totalorder %v16466_v58, 4 }
 0xb41   : > { %v16488_v30 = vshll.u32 %v9373_v45, 8  ;;  %v9242_v61 = vsel %vm9159_vm8, %v9241_v51, %v9240_v35  ;;  %v9396_v27 = vor.u32 %v9395_v44, %v9394_v15  ;;  %v9405_v25 = vsel %vm9397_vm6, %v9384_v18, %v9387_v8 }
 0xb42   : > { %v9406_v53 = vsel %vm9400_vm14, %v9393_v63, 920167782  ;;  %v11511_v31 = vpop.eup %11510  ;;  %vm9152_vm11 = vcmp.eq.s32.totalorder %v16445_v13, 2  ;;  %v9245_v29 = vsel %vm16433_vm5, %v15872_v55, %v9242_v61  ;;  %v9250_v48 = vadd.s32 3, %v9246_v50 }
 0xb43   : > { %v16500_v45 = vsub.s32 %v9321_v60, %v9324_v56  ;;  %vm9399_vm0 = vcmp.lt.s32.totalorder %v16466_v58, 3  ;;  %v11513_v5 = vpop.eup %11512  ;;  %vm9149_vm4 = vcmp.eq.s32.totalorder %v16445_v13, 0  ;;  %11514 = vcosq.f32 %v9245_v29 }
 0xb44   : > { %vm9398_vm2 = vcmp.lt.s32.totalorder %v16466_v58, 2  ;;  %v9407_v22 = vsel %vm9399_vm0, %v9390_v59, %v9406_v53  ;;  %v8621_v17 = vmul.f32 1.442695, %v15947_v26  ;;  %11516 = vsinq.f32 %v9245_v29 }
 0xb45   : > { %v9327_v4 = vsub.s32 0, %v16500_v45  ;;  %v9402_v60 = vsel %vm9400_vm14, %v9390_v59, 2102212464  ;;  %v9408_v19 = vsel %vm9398_vm2, %v9405_v25, %v9407_v22  ;;  %v9409_v9 = vsel %vm9397_vm6, %v9387_v8, %v9390_v59 }
 0xb46   : > { %v9410_v1 = vsel %vm9400_vm14, %v9396_v27, 1326507024  ;;  %v16518_v2 = vmul.u32.u64.low %v16488_v30, %v9408_v19  ;;  %v16519_v42 = vmul.u32.u64.high %v16488_v30, %v9408_v19, %v16518_v2  ;;  %vm9044_vm10 = vcmp.lt.s32.totalorder %v16381_v21, 2 }
 0xb47   : > { %v9153_v26 = vxor.u32 2147483648, %v11511_v31  ;;  %v10433_v43 = vmin.u32 %v9327_v4, %v16500_v45  ;;  %v9381_v35 = vshrl.u32 %v16914_v10, %v16448_v16  ;;  %v9411_v36 = vsel %vm9399_vm0, %v9393_v63, %v9410_v1 }
 0xb48   : > { %v9150_v28 = vxor.u32 2147483648, %v11513_v5  ;;  %v9412_v50 = vsel %vm9398_vm2, %v9409_v9, %v9411_v36  ;;  %v8623_v44 = vmul.f32 1.442695, %v15982_v7  ;;  %v8625_v51 = vmul.f32 1.442695, %v15989_v54 }
 0xb49   : > { %vm9148_vm12 = vcmp.lt.s32.totalorder %v16445_v13, 2  ;;  %v9329_v59 = vclz %v10433_v43  ;;  %v9401_v15 = vsel %vm9397_vm6, %v9381_v35, %v9384_v18  ;;  %v9403_v10 = vsel %vm9399_vm0, %v9387_v8, %v9402_v60 }
 0xb4a   : > { %11518 = vpow2.f32 %v8621_v17  ;;  %v9047_v16 = vsel %vm9045_vm15, %v16407_v34, %v9046_v6  ;;  %v16543_v7 = vmul.u32.u64.low %v16488_v30, %v9412_v50  ;;  %v16544_v63 = vmul.u32.u64.high %v16488_v30, %v9412_v50, %v16543_v7 }
 0xb4b   : > { %11520 = vpow2.f32 %v8623_v44  ;;  %vm9041_vm7 = vweird.f32 %v15867_v3  ;;  %v10434_v54 = vadd.s32 4294967294, %v9329_v59  ;;  %v8627_v18 = vmul.f32 1.442695, %v15993_v46 }
 0xb4c   : > { %11522 = vpow2.f32 %v8625_v51  ;;  %v8629_v8 = vmul.f32 1.442695, %v16003_v47  ;;  %v9154_v20 = vsel %vm9152_vm11, %v9153_v26, %v11513_v5  ;;  %v9251_v56 = vand.u32 3, %v9250_v48 }
 0xb4d   : > { %v9404_v34 = vsel %vm9398_vm2, %v9401_v15, %v9403_v10  ;;  %v9423_v6 = vadd.s32 1, %v16519_v42  ;;  %vm9145_vm8 = vweird.f32 %v15870_v40  ;;  %v9151_v61 = vsel %vm9149_vm4, %v11511_v31, %v9150_v28  ;;  %v11515_v46 = vpop.eup %11514 }
 0xb4e   : > { %v9317_v27 = vadd.s32 %v16417_v41, %v16428_v39  ;;  %vm10435_vm9 = vcmp.lt.s32.totalorder %v10434_v54, 0  ;;  %11524 = vpow2.f32 %v8627_v18  ;;  %vm9422_vm1 = vc.u32 %v16544_v63, %v16518_v2  ;;  %v11517_v25 = vpop.eup %11516 }
 0xb4f   : > { %v9332_v47 = vsel %vm10435_vm9, 0, %v10434_v54  ;;  %11526 = vpow2.f32 %v8629_v8  ;;  %v8631_v58 = vmul.f32 1.442695, %v16008_v23  ;;  %v9257_v53 = vxor.u32 2147483648, %v11515_v46 }
 0xb50   : > { %v9333_v29 = vsub.s32 32, %v9332_v47  ;;  %v9337_v48 = vsub.s32 4294967266, %v9332_v47  ;;  %v9420_v5 = vmul.u32 %v16488_v30, %v9404_v34  ;;  %v9051_v41 = vsel %vm9044_vm10, %v9047_v16, %v16475_v57 }
 0xb51   : > { %v9254_v39 = vxor.u32 2147483648, %v11517_v25  ;;  %vm9256_vm5 = vcmp.eq.s32.totalorder %v9251_v56, 2  ;;  %v9424_v31 = vsel %vm9422_vm1, %v9423_v6, %v16519_v42  ;;  %vm9249_vm13 = vweird.f32 %v15872_v55  ;;  %v17095_v6 = vld [vmem:[#allocation42_spill] sm:$0xff] }
 0xb52   : > { %v9334_v22 = vshll.u32 %v16500_v45, %v9332_v47  ;;  %v9335_v17 = vshrl.u32 %v9317_v27, %v9333_v29  ;;  %v9338_v23 = vadd.s32 127, %v9337_v48  ;;  %v9425_v4 = vadd.s32 %v9424_v31, %v9420_v5 }
 0xb53   : > { %v9155_v60 = vsel %vm9148_vm12, %v9151_v61, %v9154_v20  ;;  %vm9253_vm15 = vcmp.eq.s32.totalorder %v9251_v56, 0  ;;  %v9258_v30 = vsel %vm9256_vm5, %v9257_v53, %v11517_v25  ;;  %11528 = vpow2.f32 %v8631_v58  ;;  %v17096_v61 = vld [vmem:[#allocation34_spill] sm:$0xff] }
 0xb54   : > { %v11519_v19 = vpop.eup %11518  ;;  %v9255_v21 = vsel %vm9253_vm15, %v11515_v46, %v9254_v39  ;;  %v9336_v57 = vor.u32 %v9335_v17, %v9334_v22  ;;  %v9339_v9 = vshll.u32 %v9338_v23, 23  ;;  %v9426_v1 = vadd.s32 536870912, %v9425_v4  ;;  %v17097_v22 = vld [vmem:[#allocation45_spill] sm:$0xff] }
 0xb55   : > { %v11521_v26 = vpop.eup %11520  ;;  %v9052_v42 = vsel %vm9041_vm7, nan, %v9051_v41  ;;  %vm9263_vm6 = vcmp.lt.s32.totalorder %v15880_v38, 0  ;;  %v9347_v45 = vsub.s32 4, %v16479_v33  ;;  %v9469_v43 = vmul.f32 %v11519_v19, %v16353_v49 }
 0xb56   : > { %v11523_v13 = vpop.eup %11522  ;;  %vm9252_vm14 = vcmp.lt.s32.totalorder %v9251_v56, 2  ;;  %v9340_v35 = vor.u32 4788187, %v9339_v9  ;;  %v16576_v36 = vshrl.u32 %v9426_v1, 30  ;;  %v9470_v28 = vmul.f32 %v11521_v26, %v16375_v37 }
 0xb57   : > { %v9156_v50 = vsel %vm9145_vm8, nan, %v9155_v60  ;;  %v9259_v44 = vsel %vm9252_vm14, %v9255_v21, %v9258_v30  ;;  %v9471_v3 = vmul.f32 %v11523_v13, %v16442_v0  ;;  %v9477_v51 = vmul.f32 %v16032_v24, %v9469_v43  ;;  %v17098_v60 = vld [vmem:[#allocation41_spill] sm:$0xff] }
 0xb58   : > { %v11525_v59 = vpop.eup %11524  ;;  %v9341_v15 = vand.u32 2147483647, %v9340_v35  ;;  %v9343_v10 = vcvt.s32.f32 %v9336_v57  ;;  %v9428_v49 = vshll.u32 %v16576_v36, 30  ;;  %v9478_v16 = vmul.f32 %v16035_v11, %v9470_v28 }
 0xb59   : > { %v11527_v7 = vpop.eup %11526  ;;  %v9348_v37 = vsel %vm9263_vm6, %v9347_v45, %v16479_v33  ;;  %v9472_v54 = vmul.f32 %v11525_v59, %v9052_v42  ;;  %v9479_v40 = vmul.f32 %v16038_v12, %v9471_v3  ;;  %v9497_v18 = vand.u32 4294901760, %v9477_v51 }
 0xb5a   : > { %vm16591_vm11 = vcmp.le.f32.partialorder %v9261_v14, 0.7853982  ;;  %v9344_v0 = vmul.f32 %v9343_v10, %v9341_v15  ;;  %v9429_v8 = vsub.s32 %v9425_v4, %v9428_v49  ;;  %v9473_v20 = vmul.f32 %v11527_v7, %v9156_v50 }
 0xb5b   : > { %v9260_v11 = vsel %vm9249_vm13, nan, %v9259_v44  ;;  %v9480_v56 = vmul.f32 %v16074_v62, %v9472_v54  ;;  %v9495_v34 = vand.u32 4294901760, %v9478_v16  ;;  %v9501_v33 = vand.u32 4294901760, %v9479_v40 }
 0xb5c   : > { %v10677_v12 = vadd.f32 %v17096_v61, %v17095_v6  ;;  %v9345_v27 = vxor.u32 2147483648, %v9344_v0  ;;  %v9350_v14 = vsel %vm16591_vm11, 0, %v9348_v37  ;;  %v9431_v46 = vsub.s32 0, %v9429_v8 }
 0xb5d   : > { %v11529_v47 = vpop.eup %11528  ;;  %v9499_v58 = vand.u32 4294901760, %v9480_v56  ;;  %v16602_v25 = vsub.f32 %v9478_v16, %v9495_v34  ;;  %v16604_v53 = vpack.c.bf16 %v9501_v33, %v9497_v18  ;;  %v16606_v55 = vsub.f32 %v9477_v51, %v9497_v18 }
 0xb5e   : > { %v9346_v62 = vsel %vm9263_vm6, %v9345_v27, %v9344_v0  ;;  %v10437_v29 = vmin.u32 %v9431_v46, %v9429_v8  ;;  %v16610_v48 = vsub.f32 %v9479_v40, %v9501_v33  ;;  %v9474_v5 = vmul.f32 %v11529_v47, %v9260_v11  ;;  %v7076_v47 = vpop.permute.xlu1 %7075 }
 0xb5f   : > { %v9349_v41 = vsel %vm16591_vm11, %v15880_v38, %v9346_v62  ;;  %v16615_v39 = vpack.c.bf16 %v9499_v58, %v9495_v34  ;;  %v16617_v31 = vsub.f32 %v9480_v56, %v9499_v58  ;;  %v16620_v17 = vmul.f32 %v17097_v22, %v9473_v20 }
 0xb60   : > { %11530 = vcosq.f32 %v9349_v41  ;;  %v9433_v23 = vclz %v10437_v29  ;;  %v9354_v4 = vadd.s32 3, %v9350_v14  ;;  %v8633_v30 = vmul.f32 1.442695, %v17098_v60 }
 0xb61   : > { %11532 = vsinq.f32 %v9349_v41  ;;  %10593 = vmatprep.subr.bf16.mxu0 %v16615_v39  ;;  %v16624_v19 = vmul.f32 %v10677_v12, %v9474_v5  ;;  %v9581_v57 = vand.u32 4294901760, %v16602_v25  ;;  %v9593_v9 = vand.u32 4294901760, %v16617_v31  ;;  %v17099_v5 = vld [vmem:[#allocation49_spill] sm:$0xff] }
 0xb62   : > { %v10438_v21 = vadd.s32 4294967294, %v9433_v23  ;;  %10595 = vmatpush1.bf16.msra.mxu0 %v16604_v53  ;;  %v9587_v1 = vand.u32 4294901760, %v16606_v55  ;;  %v9599_v26 = vand.u32 4294901760, %v16610_v48  ;;  %v10608_v42 = vpack.c.bf16 %v16617_v31, %v16602_v25 }
 0xb63   : > { %v9582_v45 = vsub.f32 %v16602_v25, %v9581_v57  ;;  %v9594_v43 = vsub.f32 %v16617_v31, %v9593_v9  ;;  %v9355_v35 = vand.u32 3, %v9354_v4  ;;  %v9421_v44 = vadd.s32 %v16518_v2, %v16544_v63  ;;  %v9490_v25 = vpop.permute.xlu0 %9489 }
 0xb64   : > { %vm10439_vm0 = vcmp.lt.s32.totalorder %v10438_v21, 0  ;;  %v9588_v13 = vsub.f32 %v16606_v55, %v9587_v1  ;;  %v9600_v50 = vsub.f32 %v16610_v48, %v9599_v26  ;;  %11534 = vpow2.f32 %v8633_v30 }
 0xb65   : > { %v9436_v28 = vsel %vm10439_vm0, 0, %v10438_v21  ;;  %v9583_v59 = vand.u32 4294901760, %v9582_v45  ;;  %v9595_v15 = vand.u32 4294901760, %v9594_v43  ;;  %v10610_v54 = vpack.c.bf16 %v16610_v48, %v16606_v55  ;;  %v17102_v45 = vld [vmem:[#allocation33_spill] sm:$0xff] }
 0xb66   : > { %v9437_v3 = vsub.s32 32, %v9436_v28  ;;  %v9441_v51 = vsub.s32 4294967266, %v9436_v28  ;;  %v9589_v10 = vand.u32 4294901760, %v9588_v13  ;;  %v9601_v49 = vand.u32 4294901760, %v9600_v50  ;;  %v9485_v13 = vld [vmem:[%s12188_s21] sm:$0xff] }
 0xb67   : > { %v9438_v16 = vshll.u32 %v9429_v8, %v9436_v28  ;;  %v16641_v40 = vpack.c.bf16 %v9595_v15, %v9583_v59  ;;  %v16645_v24 = vpack.c.bf16 %v9593_v9, %v9581_v57  ;;  %v16647_v20 = vpack.c.bf16 %v9599_v26, %v9587_v1 }
 0xb68   : > { %v9439_v7 = vshrl.u32 %v9421_v44, %v9437_v3  ;;  %v9442_v37 = vadd.s32 127, %v9441_v51  ;;  %v16643_v18 = vpack.c.bf16 %v9601_v49, %v9589_v10  ;;  %vm9360_vm4 = vcmp.eq.s32.totalorder %v9355_v35, 2 }
 0xb69   : > { %vm9357_vm2 = vcmp.eq.s32.totalorder %v9355_v35, 0  ;;  %v9505_v6 = vand.u32 4294901760, %v16620_v17  ;;  %vm9356_vm10 = vcmp.lt.s32.totalorder %v9355_v35, 2  ;;  %vm9353_vm12 = vweird.f32 %v15880_v38 }
 0xb6a   : > { %v11531_v2 = vpop.eup %11530  ;;  %v9440_v63 = vor.u32 %v9439_v7, %v9438_v16  ;;  %v9443_v0 = vshll.u32 %v9442_v37, 23  ;;  %v9451_v29 = vsub.s32 4, %v16576_v36  ;;  %v10678_v41 = vadd.f32 %v17099_v5, %v7076_v47 }
 0xb6b   : > { %v11533_v11 = vpop.eup %11532  ;;  %v9361_v56 = vxor.u32 2147483648, %v11531_v2  ;;  %v16654_v23 = vsub.f32 %v16620_v17, %v9505_v6  ;;  %vm9367_vm7 = vcmp.lt.s32.totalorder %v15885_v52, 0  ;;  %vm16659_vm8 = vcmp.le.f32.partialorder %v9365_v32, 0.7853982 }
 0xb6c   : > { %v9358_v34 = vxor.u32 2147483648, %v11533_v11  ;;  %v9444_v8 = vor.u32 4788187, %v9443_v0  ;;  %v9447_v27 = vcvt.s32.f32 %v9440_v63  ;;  %v9452_v21 = vsel %vm9367_vm7, %v9451_v29, %v16576_v36 }
 0xb6d   : > { %v9362_v33 = vsel %vm9360_vm4, %v9361_v56, %v11533_v11  ;;  %v9611_v9 = vand.u32 4294901760, %v16654_v23  ;;  %v9454_v1 = vsel %vm16659_vm8, 0, %v9452_v21  ;;  %v8635_v43 = vmul.f32 1.442695, %v17102_v45 }
 0xb6e   : > { %v9359_v61 = vsel %vm9357_vm2, %v11531_v2, %v9358_v34  ;;  %v9445_v12 = vand.u32 2147483647, %v9444_v8  ;;  %v11535_v46 = vpop.eup %11534  ;;  %v9458_v50 = vadd.s32 3, %v9454_v1  ;;  %v9493_v51 = vsel %vm2203_vm3, %v9485_v13, 0 }
 0xb6f   : > { %v9363_v14 = vsel %vm9356_vm10, %v9359_v61, %v9362_v33  ;;  %v9612_v36 = vsub.f32 %v16654_v23, %v9611_v9  ;;  %v16684_v49 = vand.u32 4294901760, %v9493_v51  ;;  %v9503_v11 = vand.u32 4294901760, %v16624_v19  ;;  %v17103_v61 = vld [vmem:[#allocation37_spill] sm:$0xff] }
 0xb70   : > { %v9364_v58 = vsel %vm9353_vm12, nan, %v9363_v14  ;;  %v9448_v62 = vmul.f32 %v9447_v27, %v9445_v12  ;;  %v9459_v10 = vand.u32 3, %v9458_v50  ;;  %vm9457_vm3 = vweird.f32 %v15885_v52 }
 0xb71   : > { %v9475_v22 = vmul.f32 %v11535_v46, %v9364_v58  ;;  %v9613_v59 = vand.u32 4294901760, %v9612_v36  ;;  %v9569_v56 = vsub.f32 %v9493_v51, %v16684_v49  ;;  %v10679_v12 = vadd.f32 %v17103_v61, %v7076_v47 }
 0xb72   : > { %v9449_v4 = vxor.u32 2147483648, %v9448_v62  ;;  %vm9464_vm9 = vcmp.eq.s32.totalorder %v9459_v10, 2  ;;  %vm9461_vm1 = vcmp.eq.s32.totalorder %v9459_v10, 0  ;;  %vm9460_vm5 = vcmp.lt.s32.totalorder %v9459_v10, 2 }
 0xb73   : > { %v9483_v60 = vmul.f32 %v10678_v41, %v9475_v22  ;;  %v9604_v14 = vsub.f32 %v16624_v19, %v9503_v11  ;;  %v9570_v46 = vand.u32 4294901760, %v9569_v56  ;;  %v17104_v21 = vmov 0.0  }
 0xb74   : > { %v9450_v30 = vsel %vm9367_vm7, %v9449_v4, %v9448_v62 }
 0xb75   : > { %v9453_v57 = vsel %vm16659_vm8, %v15885_v52, %v9450_v30  ;;  %v9509_v17 = vand.u32 4294901760, %v9483_v60  ;;  %v9571_v29 = vsub.f32 %v9569_v56, %v9570_v46  ;;  %v9605_v5 = vand.u32 4294901760, %v9604_v14 }
 0xb76   : > { %11536 = vcosq.f32 %v9453_v57 }
 0xb77   : > { %11538 = vsinq.f32 %v9453_v57  ;;  %v16670_v26 = vpack.c.bf16 %v9509_v17, %v9505_v6  ;;  %v16672_v32 = vsub.f32 %v9483_v60, %v9509_v17  ;;  %v9606_v4 = vsub.f32 %v9604_v14, %v9605_v5 }
 0xb78   : > { %11540 = vpow2.f32 %v8635_v43 }
 0xb79   : > { %v9623_v35 = vand.u32 4294901760, %v16672_v32  ;;  %v10614_v28 = vpack.c.bf16 %v16672_v32, %v16654_v23  ;;  %v9572_v23 = vand.u32 4294901760, %v9571_v29  ;;  %v9607_v19 = vand.u32 4294901760, %v9606_v4 }
 0xb7b   : > { %v9624_v44 = vsub.f32 %v16672_v32, %v9623_v35  ;;  %v16681_v3 = vpack.c.bf16 %v9623_v35, %v9611_v9 }
 0xb7d   : > { %v9625_v15 = vand.u32 4294901760, %v9624_v44 }
 0xb7f   : > { %v10606_v16 = vpack.c.bf16 %v9625_v15, %v9613_v59 }
 0xb80   : > { %v11537_v7 = vpop.eup %11536 }
 0xb81   : > { %v11539_v37 = vpop.eup %11538  ;;  %v9465_v2 = vxor.u32 2147483648, %v11537_v7 }
 0xb82   : > { %v9462_v63 = vxor.u32 2147483648, %v11539_v37  ;;  %v11541_v33 = vpop.eup %11540 }
 0xb83   : > { %v9466_v0 = vsel %vm9464_vm9, %v9465_v2, %v11539_v37 }
 0xb84   : > { %v9463_v34 = vsel %vm9461_vm1, %v11537_v7, %v9462_v63 }
 0xb85   : > { %v9467_v8 = vsel %vm9460_vm5, %v9463_v34, %v9466_v0 }
 0xb86   : > { %v9468_v6 = vsel %vm9457_vm3, nan, %v9467_v8 }
 0xb87   : > { %v9476_v27 = vmul.f32 %v11541_v33, %v9468_v6 }
 0xb89   : > { %v9484_v58 = vmul.f32 %v10679_v12, %v9476_v27 }
 0xb8b   : > { %v9507_v62 = vand.u32 4294901760, %v9484_v58 }
 0xb8d   : > { %v10596_v41 = vpack.c.bf16 %v9507_v62, %v9503_v11  ;;  %v9616_v22 = vsub.f32 %v9484_v58, %v9507_v62 }
 0xb8f   : > { %10597 = vmatprep.subr.bf16.mxu0 %v10596_v41  ;;  %v9617_v60 = vand.u32 4294901760, %v9616_v22  ;;  %v10612_v52 = vpack.c.bf16 %v9616_v22, %v9604_v14 }
 0xb90   : > { %10599 = vmatpush1.bf16.msra.mxu0 %v16670_v26 }
 0xb91   : > { %10601 = vmatprep.subr.bf16.mxu0 %v16641_v40  ;;  %v9618_v47 = vsub.f32 %v9616_v22, %v9617_v60  ;;  %v10628_v38 = vpack.c.bf16 %v9617_v60, %v9605_v5 }
 0xb93   : > { %9573 = vmatmul.mubr.f32.vlgmr.msra.gmra.mrb[54].mxu0 %v9572_v23  ;;  %v9619_v30 = vand.u32 4294901760, %v9618_v47 }
 0xb94   : > { %10603 = vmatpush1.bf16.msra.mxu0 %v16643_v18  ;;  %9683 = vmatprep.mubr.f32.mxu0 %v17104_v21 }
 0xb95   : > { %v10604_v57 = vpack.c.bf16 %v9619_v30, %v9607_v19 }
 0xb97   : > { %10605 = vmatprep.subr.bf16.mxu0 %v10604_v57 }
 0xb98   : > { %10607 = vmatpush1.bf16.msra.mxu0 %v10606_v16 }
 0xb99   : > { %10609 = vmatprep.subr.bf16.mxu0 %v10608_v42 }
 0xb9b   : > { %9685 = vmatmul.mubr.f32.vlgmr.msra.gmra.mrb[54].mxu0 %v16684_v49 }
 0xb9c   : > { %10611 = vmatpush1.bf16.msra.mxu0 %v10610_v54  ;;  %9771 = vmatprep.mubr.f32.mxu0 %v17104_v21 }
 0xb9d   : > { %10613 = vmatprep.subr.bf16.mxu0 %v10612_v52 }
 0xba0   : > { %10615 = vmatpush1.bf16.msra.mxu0 %v10614_v28 }
 0xba1   : > { %10617 = vmatprep.subr.bf16.mxu0 %v16615_v39 }
 0xba3   : > { %9774 = vmatmul.mubr.f32.vlgmr.msra.gmra.mrb[54].mxu0 %v9569_v56 }
 0xba4   : > { %10619 = vmatpush1.bf16.msra.mxu0 %v16604_v53  ;;  %9852 = vmatprep.mubr.f32.mxu0 %v17104_v21 }
 0xba5   : > { %10621 = vmatprep.subr.bf16.mxu0 %v10596_v41 }
 0xba8   : > { %10623 = vmatpush1.bf16.msra.mxu0 %v16670_v26 }
 0xba9   : > { %10625 = vmatprep.subr.bf16.mxu0 %v16645_v24 }
 0xbab   : > { %9856 = vmatmul.mubr.f32.vlgmr.msra.gmra.mrb[54].mxu0 %v9570_v46 }
 0xbac   : > { %10627 = vmatpush1.bf16.msra.mxu0 %v16647_v20  ;;  %9950 = vmatprep.mubr.f32.mxu0 %v17104_v21 }
 0xbad   : > { %10629 = vmatprep.subr.bf16.mxu0 %v10628_v38 }
 0xbb0   : > { %10631 = vmatpush1.bf16.msra.mxu0 %v16681_v3 }
 0xbb1   : > { %10633 = vmatprep.subr.bf16.mxu0 %v16615_v39 }
 0xbb3   : > { %9952 = vmatmul.mubr.f32.vlgmr.msra.gmra.mrb[54].mxu0 %v16684_v49 }
 0xbb4   : > { %10635 = vmatpush1.bf16.msra.mxu0 %v16604_v53  ;;  %10030 = vmatprep.mubr.f32.mxu0 %v17104_v21 }
 0xbb5   : > { %10637 = vmatprep.subr.bf16.mxu0 %v10596_v41 }
 0xbb8   : > { %10639 = vmatpush1.bf16.msra.mxu0 %v16670_v26 }
 0xbbb   : > { %10032 = vmatmul.mubr.f32.vlgmr.msra.gmra.mrb[54].mxu0 %v16684_v49 }
 0xc8e   : > { %v10033_v55 = vpop.f32.mrb[54].mxu0 }
 0xc8f   : > { %v10680_v48 = vadd.f32 %v10033_v55, %v9490_v25  ;;  %v10035_v39 = vpop.f32.mrb[55].mxu0 }
 0xc90   : > { %v10681_v31 = vadd.f32 %v10035_v39, %v9490_v25 }
 0xc91   : > { %10038 = vst [vmem:[%s473_s17] sm:$0xff] %v10680_v48 }
 0xc92   : > { %10039 = vst [vmem:[%s473_s17 + $0x8] sm:$0xff] %v10681_v31 }
 0xc93   : > { %11735 = shalt.err (!%p11732_p10)
}
 0xc94   : > { %s11736_s29 = scalar_lea.hbm %s16723_s14, 256  ;;  %s11740_s11 = scalar_lea.hbm %s16778_s6, 512 }
 0xc95   : > { %p11737_p5 = scmp.ne.s32.totalorder %s16723_s14, %s11736_s29  ;;  %p11741_p7 = scmp.lt.u32.totalorder %s16723_s14, %s16778_s6 }
 0xc96   : > { %p11742_p11 = scmp.lt.u32.totalorder %s11740_s11, %s11736_s29  ;;  %p11744_p13 = scmp.lt.u32.totalorder %s11736_s29, %s16723_s14 }
 0xc97   : > { %p11738_p4 = pnand %p11737_p5, %p17105_p0 }
 0xc98   : > { %p11743_p2 = por %p11742_p11, %p11741_p7 }
 0xc99   : > { %p11739_p3 = pneg %p11738_p4 }
 0xc9a   : > { %p11745_p1 = por %p11744_p13, %p11743_p2 }
 0xc9c   : > { %p11746_p8 = pnand %p11745_p1, %p11739_p3 }
 0xc9e   : > { %11749 = shalt.err (!%p11746_p8)
}
 0xc9f   : > { %11263 = dma.vmem_to_hbm [thread:$0]  (%p17105_p0), %s16725_s13, 256, %s16723_s14, %s10041_s24  }
 0xca0 PF: > { %s17106_s8 = sld [smem:[#allocation19_spill]]  ;;  %s17107_s15 = sld [smem:[#allocation24_spill]] }
 0xca1   : > { %s17108_s27 = sld [smem:[#allocation21_spill]] }
 0xca6   : > { %s10069_s21 = sand.u32 1, %s17106_s8   ;;  %p17109_p9 = scmp.ne.s32.totalorder %s17107_s15, 0 }
 0xca7   : > { %p17110_p6 = scmp.ge.s32.totalorder %s17108_s27, 2  ;;  %s10070_s30 = scalar_lea.sflag [#allocation4], %s10069_s21 }
 0xca9   : > { %p11285_p12 = pnand %p17110_p6, %p17109_p9 }
 0xcab   : > { %11791 = dma.done.wait (!%p11285_p12), %s10070_s30, 256  }
 0xcac   : > { %11793 = vsyncadd (!%p11285_p12), %s10070_s30, 4294967040  ;;  %s31_s26 = sadd.s32 1, %s17108_s27   ;;  %s17111_s1 = sld [smem:[#allocation20_spill]] }
 0xcad   : > { %p28_p10 = scmp.ge.s32.totalorder %s31_s26, 4   ;;  %s17112_s23 = sld [smem:[#allocation23_spill]] }
 0xcae   : > { %s17113_s10 = sld [smem:[#allocation22_spill]]  ;;  %s17114_s21 = smov %s11800_s22 }
 0xcaf   : > { %s17116_s24 = smov %s11812_s25  ;;  %30 = sbr.rel (!%p28_p10) target bundleno = 15 (0xf), region = 157 }
 0xcb2   : > { %s17115_s22 = smov %s17111_s1 }
 0xcb4   : > { %s17117_s25 = smov %s17113_s10 }
 0xcb6   :  { %10075 = vsyncpa [#allocation3], 1 }
 0xcb7   :  { %10077 = vsyncpa [#allocation3 + $0x1], 1 }
 0xcb8   :  { %10078 = vsyncpa [#allocation6], 1 }
 0xcb9   :  { %10080 = vsyncpa [#allocation6 + $0x1], 1 }
 0xcba   :  { %10081 = vsyncpa [#allocation9], 1 }
 0xcbb   :  { %10083 = vsyncpa [#allocation9 + $0x1], 1 }
 0xcbc   :  { %10084 = vsyncpa [#allocation12], 1 }
 0xcbd   :  { %10086 = vsyncpa [#allocation12 + $0x1], 1 }
 0xcbe   :  { %10087 = vsyncpa [#allocation4], 1 }
 0xcbf   :  { %10089 = vsyncpa [#allocation4 + $0x1], 1 }

</bundles_post_ra>
